<compile_context>
chip_gen: v7x
topology: tpu7x:2x2x1
jax: 0.10.0
libtpu: 0.0.40
codegen_flags: <defaults>
</compile_context>

<pallas_src>
import jax
import jax.numpy as jnp
from jax.experimental import pallas as pl
from jax.experimental.pallas import tpu as pltpu

LRELU_SLOPE = 0.2
BN_EPS = 1e-5                      # PyTorch BatchNorm3d default eps
VMEM_LIMIT = 32 * 1024 * 1024      # safe on v5e/v6e (128 MiB) and v7x (64 MiB phys)


# ---------------------------------------------------------------------------
# Shared epilogue: training-mode BatchNorm (batch stats, biased var) + LeakyReLU
# ---------------------------------------------------------------------------
def _bn_lrelu(y, gamma, beta):
    # y: (M, Cout) f32.  Single-pass variance (perf review); conv bias is omitted
    # by the callers since batch-stat BN cancels it exactly.
    mean = jnp.mean(y, axis=0, keepdims=True)
    var = jnp.mean(y * y, axis=0, keepdims=True) - mean * mean
    inv_std = jax.lax.rsqrt(var + BN_EPS)            # EUP slot, ~free
    scale = gamma * inv_std
    shift = beta - mean * scale
    z = y * scale + shift
    return jnp.where(z > 0, z, LRELU_SLOPE * z)


# ---------------------------------------------------------------------------
# Kernel 1 (layers 1-3): conv-as-matmul + BN + LeakyReLU, bf16 output.
# Full-array VMEM blocks, no grid (everything is tiny at these shapes).
# ---------------------------------------------------------------------------
def _conv_bn_lrelu_kernel(col_ref, w_ref, gamma_ref, beta_ref, o_ref):
    # col: (M, K) bf16, w: (K, Cout) bf16, gamma/beta: (1, Cout) f32 -> (M, Cout) bf16
    y = jnp.dot(col_ref[...], w_ref[...], preferred_element_type=jnp.float32)
    o_ref[...] = _bn_lrelu(y, gamma_ref[...], beta_ref[...]).astype(o_ref.dtype)


def fused_conv_bn_lrelu(col, w, gamma, beta):
    m = col.shape[0]
    cout = w.shape[1]
    return pl.pallas_call(
        _conv_bn_lrelu_kernel,
        out_shape=jax.ShapeDtypeStruct((m, cout), jnp.bfloat16),
        compiler_params=pltpu.CompilerParams(vmem_limit_bytes=VMEM_LIMIT),
    )(col, w, gamma, beta)


# ---------------------------------------------------------------------------
# Kernel 2 ("head"): layer 4 + layer 5 + classifier + global pool + sigmoid.
# After zero-tap elimination all three convs are plain matmuls with M = batch.
# ---------------------------------------------------------------------------
def _head_kernel(x_ref, w4_ref, g4_ref, b4_ref,
                 w5_ref, g5_ref, b5_ref, wc_ref, bc_ref, o_ref):
    # x: (N, 8*128) bf16; w4: (1024, 256); w5: (256, 512); wc: (512, 1) bf16.
    h = _bn_lrelu(jnp.dot(x_ref[...], w4_ref[...],
                          preferred_element_type=jnp.float32),
                  g4_ref[...], b4_ref[...])
    h = _bn_lrelu(jnp.dot(h.astype(jnp.bfloat16), w5_ref[...],
                          preferred_element_type=jnp.float32),
                  g5_ref[...], b5_ref[...])
    logit = jnp.dot(h.astype(jnp.bfloat16), wc_ref[...],
                    preferred_element_type=jnp.float32) + bc_ref[...]
    # adaptive_avg_pool3d((1,1,1)) over a 1x1x1 map is the identity; flatten + sigmoid.
    o_ref[...] = 1.0 / (1.0 + jnp.exp(-logit))


def fused_head(x_flat, p4, p5, pc):
    n = x_flat.shape[0]
    return pl.pallas_call(
        _head_kernel,
        out_shape=jax.ShapeDtypeStruct((n, 1), jnp.float32),
        compiler_params=pltpu.CompilerParams(vmem_limit_bytes=VMEM_LIMIT),
    )(x_flat, p4["w"], p4["gamma"], p4["beta"],
      p5["w"], p5["gamma"], p5["beta"], pc["w"], pc["b"])


# ---------------------------------------------------------------------------
# im2col for 3x3x3 conv, padding=1, channels-last activations (N, D, H, W, C).
# K ordering: (kd, kh, kw) outer, Cin inner (matches _flatten_weight below).
# ---------------------------------------------------------------------------
def im2col_3d_cl(x, stride):
    # TODO(synk): pull this strided 5-D patch extraction into the Pallas kernel
    # (27 shifted tap matmuls over a padded VMEM copy) once Mosaic lowering of
    # multi-dim strided in-kernel slices is verified; kept in XLA for robustness.
    n, d, h, w, c = x.shape
    xp = jnp.pad(x, ((0, 0), (1, 1), (1, 1), (1, 1), (0, 0)))
    do = (d + 2 - 3) // stride + 1
    ho = (h + 2 - 3) // stride + 1
    wo = (w + 2 - 3) // stride + 1
    patches = []
    for kd in range(3):
        for kh in range(3):
            for kw in range(3):
                patches.append(
                    xp[:,
                       kd:kd + stride * do:stride,
                       kh:kh + stride * ho:stride,
                       kw:kw + stride * wo:stride,
                       :]
                )
    col = jnp.stack(patches, axis=4)                 # (N, Do, Ho, Wo, taps, C)
    col = col.reshape(n * do * ho * wo, 27 * c)      # (M, K)
    return col, (do, ho, wo)


def _flatten_weight(w_oidhw, sd=slice(0, 3), sh=slice(0, 3), sw=slice(0, 3)):
    # PyTorch (Cout, Cin, kd, kh, kw) -> (taps*Cin, Cout); taps (kd,kh,kw)-major,
    # Cin inner — matches the im2col K ordering and the row-major flatten used
    # for the tap-eliminated layers.
    cout = w_oidhw.shape[0]
    w = w_oidhw[:, :, sd, sh, sw]
    return jnp.transpose(w, (2, 3, 4, 1, 0)).reshape(-1, cout)


# ---------------------------------------------------------------------------
# Parameters
# ---------------------------------------------------------------------------
def init_params(key, in_channels=1, features=(32, 64, 128, 256, 512)):
    layers = []
    prev = in_channels
    for f in features:
        key, k1, k2, k3, k4 = jax.random.split(key, 5)
        layers.append(dict(
            w=jax.random.normal(k1, (f, prev, 3, 3, 3), jnp.float32) * 0.1,
            # conv bias exists in the PyTorch module but is exactly cancelled by
            # batch-stat BN -> dropped at prep time (numerically identical).
            b=jax.random.normal(k2, (f,), jnp.float32) * 0.1,
            gamma=1.0 + 0.1 * jax.random.normal(k3, (f,), jnp.float32),
            beta=0.1 * jax.random.normal(k4, (f,), jnp.float32),
        ))
        prev = f
    key, k1, k2 = jax.random.split(key, 3)
    clf = dict(
        w=jax.random.normal(k1, (1, prev, 3, 3, 3), jnp.float32) * 0.1,
        b=jax.random.normal(k2, (1,), jnp.float32) * 0.1,
    )
    return layers, clf


def prepare_params(layers, clf):
    """One-time weight flatten + bf16 cast (NOT per forward, per perf review).

    Zero-tap elimination (valid for 16^3 inputs, spatial path 16->8->4->2->1->1):
      layers 1-3 : all 27 taps contribute            -> (27*Cin, Cout)
      layer 4    : 2^3 -> 1^3, 8 real-data taps      -> (8*Cin,  Cout)
      layer 5/clf: 1^3 -> 1^3, centre tap only       -> (Cin,    Cout)
    """
    assert len(layers) == 5
    prepped = []
    for i, p in enumerate(layers):
        if i < 3:
            sl = (slice(0, 3), slice(0, 3), slice(0, 3))
        elif i == 3:
            sl = (slice(1, 3), slice(1, 3), slice(1, 3))
        else:
            sl = (slice(1, 2), slice(1, 2), slice(1, 2))
        prepped.append(dict(
            w=_flatten_weight(p["w"], *sl).astype(jnp.bfloat16),
            gamma=p["gamma"].reshape(1, -1).astype(jnp.float32),
            beta=p["beta"].reshape(1, -1).astype(jnp.float32),
        ))
    pc = dict(
        w=_flatten_weight(clf["w"], slice(1, 2), slice(1, 2), slice(1, 2))
            .astype(jnp.bfloat16),
        b=clf["b"].reshape(1, 1).astype(jnp.float32),
    )
    return prepped, pc


# ---------------------------------------------------------------------------
# Forward
# ---------------------------------------------------------------------------
@jax.jit
def discriminator_forward(x, p_layers, p_clf):
    # x: (N, C, D, H, W) like PyTorch; convert once to channels-last bf16 and stay there.
    x = jnp.transpose(x, (0, 2, 3, 4, 1)).astype(jnp.bfloat16)
    n = x.shape[0]

    # Layers 1-3: stride-2 conv via im2col + one fused matmul/BN/LeakyReLU kernel each.
    for p in p_layers[:3]:
        col, (do, ho, wo) = im2col_3d_cl(x, stride=2)
        y = fused_conv_bn_lrelu(col, p["w"], p["gamma"], p["beta"])
        x = y.reshape(n, do, ho, wo, p["w"].shape[1])   # channels-last, no transpose

    # Layers 4-5 + classifier + pool + sigmoid: one fused head kernel.
    # Layer 4's 8 surviving taps over its 2x2x2xC input are exactly the row-major
    # flatten of that block, so no im2col is needed anywhere in the head.
    assert x.shape[1:4] == (2, 2, 2), "head fusion assumes a 16^3 input"
    x_flat = x.reshape(n, -1)                           # (N, 8*128) bf16
    return fused_head(x_flat, p_layers[3], p_layers[4], p_clf)   # (N, 1) f32


if __name__ == "__main__":
    key = jax.random.PRNGKey(0)
    key, pkey, xkey = jax.random.split(key, 3)
    layers, clf = init_params(pkey, in_channels=1)
    p_layers, p_clf = prepare_params(layers, clf)       # one-time flatten + bf16 cast
    x = jax.random.normal(xkey, (2, 1, 16, 16, 16), jnp.float32)  # (N, C, D, H, W)
    out = discriminator_forward(x, p_layers, p_clf)
    jax.block_until_ready(out)
    assert out.shape == (2, 1)
    assert bool(jnp.all(jnp.isfinite(out)))
    print("KERNEL_OK")
</pallas_src>

<mosaic_0001>
module attributes {stable_mosaic.version = 11 : i64} {
  func.func @_conv_bn_lrelu_kernel(%arg0: memref<1024x27xbf16, #tpu.memory_space<vmem>>, %arg1: memref<27x32xbf16, #tpu.memory_space<vmem>>, %arg2: memref<1x32xf32, #tpu.memory_space<vmem>>, %arg3: memref<1x32xf32, #tpu.memory_space<vmem>>, %arg4: memref<1024x32xbf16, #tpu.memory_space<vmem>>) attributes {dimension_semantics = [], scalar_prefetch = 0 : i64, scratch_operands = 0 : i64, tpu.core_type = #tpu.core_type<tc>} {
    %c0 = arith.constant 0 : index
    %c0_0 = arith.constant 0 : index
    %0 = vector.load %arg0[%c0, %c0_0] : memref<1024x27xbf16, #tpu.memory_space<vmem>>, vector<1024x27xbf16>
    %c0_1 = arith.constant 0 : index
    %c0_2 = arith.constant 0 : index
    %1 = vector.load %arg1[%c0_1, %c0_2] : memref<27x32xbf16, #tpu.memory_space<vmem>>, vector<27x32xbf16>
    %cst = arith.constant dense<0.000000e+00> : vector<1024x32xf32>
    %2 = tpu.matmul %0, %1, %cst {dimension_numbers = #tpu.dot_dimension_numbers<[1], [0], [0], [1], [0, 0, 1, 1], [], []>} : vector<1024x27xbf16>, vector<27x32xbf16>, vector<1024x32xf32> -> vector<1024x32xf32>
    %c0_3 = arith.constant 0 : index
    %c0_4 = arith.constant 0 : index
    %3 = vector.load %arg2[%c0_3, %c0_4] : memref<1x32xf32, #tpu.memory_space<vmem>>, vector<1x32xf32>
    %c0_5 = arith.constant 0 : index
    %c0_6 = arith.constant 0 : index
    %4 = vector.load %arg3[%c0_5, %c0_6] : memref<1x32xf32, #tpu.memory_space<vmem>>, vector<1x32xf32>
    %cst_7 = arith.constant dense<0.000000e+00> : vector<32xf32>
    %5 = vector.multi_reduction <add>, %2, %cst_7 [0] : vector<1024x32xf32> to vector<32xf32>
    %6 = vector.shape_cast %5 : vector<32xf32> to vector<1x32xf32>
    %cst_8 = arith.constant 1.024000e+03 : f32
    %7 = vector.broadcast %cst_8 : f32 to vector<1x32xf32>
    %8 = arith.divf %6, %7 : vector<1x32xf32>
    %9 = arith.mulf %2, %2 : vector<1024x32xf32>
    %cst_9 = arith.constant dense<0.000000e+00> : vector<32xf32>
    %10 = vector.multi_reduction <add>, %9, %cst_9 [0] : vector<1024x32xf32> to vector<32xf32>
    %11 = vector.shape_cast %10 : vector<32xf32> to vector<1x32xf32>
    %cst_10 = arith.constant 1.024000e+03 : f32
    %12 = vector.broadcast %cst_10 : f32 to vector<1x32xf32>
    %13 = arith.divf %11, %12 : vector<1x32xf32>
    %14 = arith.mulf %8, %8 : vector<1x32xf32>
    %15 = arith.subf %13, %14 : vector<1x32xf32>
    %cst_11 = arith.constant 9.99999974E-6 : f32
    %16 = vector.broadcast %cst_11 : f32 to vector<1x32xf32>
    %17 = arith.addf %15, %16 : vector<1x32xf32>
    %18 = math.rsqrt %17 : vector<1x32xf32>
    %19 = arith.mulf %3, %18 : vector<1x32xf32>
    %20 = arith.mulf %8, %19 : vector<1x32xf32>
    %21 = arith.subf %4, %20 : vector<1x32xf32>
    %22 = vector.broadcast %19 : vector<1x32xf32> to vector<1024x32xf32>
    %23 = arith.mulf %2, %22 : vector<1024x32xf32>
    %24 = vector.broadcast %21 : vector<1x32xf32> to vector<1024x32xf32>
    %25 = arith.addf %23, %24 : vector<1024x32xf32>
    %cst_12 = arith.constant 0.000000e+00 : f32
    %26 = vector.broadcast %cst_12 : f32 to vector<1024x32xf32>
    %27 = arith.cmpf ogt, %25, %26 : vector<1024x32xf32>
    %cst_13 = arith.constant 2.000000e-01 : f32
    %28 = vector.broadcast %cst_13 : f32 to vector<1024x32xf32>
    %29 = arith.mulf %28, %25 : vector<1024x32xf32>
    %30 = arith.select %27, %25, %29 : vector<1024x32xi1>, vector<1024x32xf32>
    %31 = arith.truncf %30 : vector<1024x32xf32> to vector<1024x32xbf16>
    %c0_14 = arith.constant 0 : index
    %c0_15 = arith.constant 0 : index
    %32 = vector.load %arg4[%c0_14, %c0_15] : memref<1024x32xbf16, #tpu.memory_space<vmem>>, vector<1024x32xbf16>
    tpu.vector_store %arg4[%c0_14, %c0_15], %31 {strides = array<i32>} : memref<1024x32xbf16, #tpu.memory_space<vmem>>, vector<1024x32xbf16>,
    return
  }
}

module attributes {stable_mosaic.version = 11 : i64} {
  func.func @_conv_bn_lrelu_kernel(%arg0: memref<128x864xbf16, #tpu.memory_space<vmem>>, %arg1: memref<864x64xbf16, #tpu.memory_space<vmem>>, %arg2: memref<1x64xf32, #tpu.memory_space<vmem>>, %arg3: memref<1x64xf32, #tpu.memory_space<vmem>>, %arg4: memref<128x64xbf16, #tpu.memory_space<vmem>>) attributes {dimension_semantics = [], scalar_prefetch = 0 : i64, scratch_operands = 0 : i64, tpu.core_type = #tpu.core_type<tc>} {
    %c0 = arith.constant 0 : index
    %c0_0 = arith.constant 0 : index
    %0 = vector.load %arg0[%c0, %c0_0] : memref<128x864xbf16, #tpu.memory_space<vmem>>, vector<128x864xbf16>
    %c0_1 = arith.constant 0 : index
    %c0_2 = arith.constant 0 : index
    %1 = vector.load %arg1[%c0_1, %c0_2] : memref<864x64xbf16, #tpu.memory_space<vmem>>, vector<864x64xbf16>
    %cst = arith.constant dense<0.000000e+00> : vector<128x64xf32>
    %2 = tpu.matmul %0, %1, %cst {dimension_numbers = #tpu.dot_dimension_numbers<[1], [0], [0], [1], [0, 0, 1, 1], [], []>} : vector<128x864xbf16>, vector<864x64xbf16>, vector<128x64xf32> -> vector<128x64xf32>
    %c0_3 = arith.constant 0 : index
    %c0_4 = arith.constant 0 : index
    %3 = vector.load %arg2[%c0_3, %c0_4] : memref<1x64xf32, #tpu.memory_space<vmem>>, vector<1x64xf32>
    %c0_5 = arith.constant 0 : index
    %c0_6 = arith.constant 0 : index
    %4 = vector.load %arg3[%c0_5, %c0_6] : memref<1x64xf32, #tpu.memory_space<vmem>>, vector<1x64xf32>
    %cst_7 = arith.constant dense<0.000000e+00> : vector<64xf32>
    %5 = vector.multi_reduction <add>, %2, %cst_7 [0] : vector<128x64xf32> to vector<64xf32>
    %6 = vector.shape_cast %5 : vector<64xf32> to vector<1x64xf32>
    %cst_8 = arith.constant 1.280000e+02 : f32
    %7 = vector.broadcast %cst_8 : f32 to vector<1x64xf32>
    %8 = arith.divf %6, %7 : vector<1x64xf32>
    %9 = arith.mulf %2, %2 : vector<128x64xf32>
    %cst_9 = arith.constant dense<0.000000e+00> : vector<64xf32>
    %10 = vector.multi_reduction <add>, %9, %cst_9 [0] : vector<128x64xf32> to vector<64xf32>
    %11 = vector.shape_cast %10 : vector<64xf32> to vector<1x64xf32>
    %cst_10 = arith.constant 1.280000e+02 : f32
    %12 = vector.broadcast %cst_10 : f32 to vector<1x64xf32>
    %13 = arith.divf %11, %12 : vector<1x64xf32>
    %14 = arith.mulf %8, %8 : vector<1x64xf32>
    %15 = arith.subf %13, %14 : vector<1x64xf32>
    %cst_11 = arith.constant 9.99999974E-6 : f32
    %16 = vector.broadcast %cst_11 : f32 to vector<1x64xf32>
    %17 = arith.addf %15, %16 : vector<1x64xf32>
    %18 = math.rsqrt %17 : vector<1x64xf32>
    %19 = arith.mulf %3, %18 : vector<1x64xf32>
    %20 = arith.mulf %8, %19 : vector<1x64xf32>
    %21 = arith.subf %4, %20 : vector<1x64xf32>
    %22 = vector.broadcast %19 : vector<1x64xf32> to vector<128x64xf32>
    %23 = arith.mulf %2, %22 : vector<128x64xf32>
    %24 = vector.broadcast %21 : vector<1x64xf32> to vector<128x64xf32>
    %25 = arith.addf %23, %24 : vector<128x64xf32>
    %cst_12 = arith.constant 0.000000e+00 : f32
    %26 = vector.broadcast %cst_12 : f32 to vector<128x64xf32>
    %27 = arith.cmpf ogt, %25, %26 : vector<128x64xf32>
    %cst_13 = arith.constant 2.000000e-01 : f32
    %28 = vector.broadcast %cst_13 : f32 to vector<128x64xf32>
    %29 = arith.mulf %28, %25 : vector<128x64xf32>
    %30 = arith.select %27, %25, %29 : vector<128x64xi1>, vector<128x64xf32>
    %31 = arith.truncf %30 : vector<128x64xf32> to vector<128x64xbf16>
    %c0_14 = arith.constant 0 : index
    %c0_15 = arith.constant 0 : index
    %32 = vector.load %arg4[%c0_14, %c0_15] : memref<128x64xbf16, #tpu.memory_space<vmem>>, vector<128x64xbf16>
    tpu.vector_store %arg4[%c0_14, %c0_15], %31 {strides = array<i32>} : memref<128x64xbf16, #tpu.memory_space<vmem>>, vector<128x64xbf16>,
    return
  }
}

module attributes {stable_mosaic.version = 11 : i64} {
  func.func @_conv_bn_lrelu_kernel(%arg0: memref<16x1728xbf16, #tpu.memory_space<vmem>>, %arg1: memref<1728x128xbf16, #tpu.memory_space<vmem>>, %arg2: memref<1x128xf32, #tpu.memory_space<vmem>>, %arg3: memref<1x128xf32, #tpu.memory_space<vmem>>, %arg4: memref<16x128xbf16, #tpu.memory_space<vmem>>) attributes {dimension_semantics = [], scalar_prefetch = 0 : i64, scratch_operands = 0 : i64, tpu.core_type = #tpu.core_type<tc>} {
    %c0 = arith.constant 0 : index
    %c0_0 = arith.constant 0 : index
    %0 = vector.load %arg0[%c0, %c0_0] : memref<16x1728xbf16, #tpu.memory_space<vmem>>, vector<16x1728xbf16>
    %c0_1 = arith.constant 0 : index
    %c0_2 = arith.constant 0 : index
    %1 = vector.load %arg1[%c0_1, %c0_2] : memref<1728x128xbf16, #tpu.memory_space<vmem>>, vector<1728x128xbf16>
    %cst = arith.constant dense<0.000000e+00> : vector<16x128xf32>
    %2 = tpu.matmul %0, %1, %cst {dimension_numbers = #tpu.dot_dimension_numbers<[1], [0], [0], [1], [0, 0, 1, 1], [], []>} : vector<16x1728xbf16>, vector<1728x128xbf16>, vector<16x128xf32> -> vector<16x128xf32>
    %c0_3 = arith.constant 0 : index
    %c0_4 = arith.constant 0 : index
    %3 = vector.load %arg2[%c0_3, %c0_4] : memref<1x128xf32, #tpu.memory_space<vmem>>, vector<1x128xf32>
    %c0_5 = arith.constant 0 : index
    %c0_6 = arith.constant 0 : index
    %4 = vector.load %arg3[%c0_5, %c0_6] : memref<1x128xf32, #tpu.memory_space<vmem>>, vector<1x128xf32>
    %cst_7 = arith.constant dense<0.000000e+00> : vector<128xf32>
    %5 = vector.multi_reduction <add>, %2, %cst_7 [0] : vector<16x128xf32> to vector<128xf32>
    %6 = vector.shape_cast %5 : vector<128xf32> to vector<1x128xf32>
    %cst_8 = arith.constant 1.600000e+01 : f32
    %7 = vector.broadcast %cst_8 : f32 to vector<1x128xf32>
    %8 = arith.divf %6, %7 : vector<1x128xf32>
    %9 = arith.mulf %2, %2 : vector<16x128xf32>
    %cst_9 = arith.constant dense<0.000000e+00> : vector<128xf32>
    %10 = vector.multi_reduction <add>, %9, %cst_9 [0] : vector<16x128xf32> to vector<128xf32>
    %11 = vector.shape_cast %10 : vector<128xf32> to vector<1x128xf32>
    %cst_10 = arith.constant 1.600000e+01 : f32
    %12 = vector.broadcast %cst_10 : f32 to vector<1x128xf32>
    %13 = arith.divf %11, %12 : vector<1x128xf32>
    %14 = arith.mulf %8, %8 : vector<1x128xf32>
    %15 = arith.subf %13, %14 : vector<1x128xf32>
    %cst_11 = arith.constant 9.99999974E-6 : f32
    %16 = vector.broadcast %cst_11 : f32 to vector<1x128xf32>
    %17 = arith.addf %15, %16 : vector<1x128xf32>
    %18 = math.rsqrt %17 : vector<1x128xf32>
    %19 = arith.mulf %3, %18 : vector<1x128xf32>
    %20 = arith.mulf %8, %19 : vector<1x128xf32>
    %21 = arith.subf %4, %20 : vector<1x128xf32>
    %22 = vector.broadcast %19 : vector<1x128xf32> to vector<16x128xf32>
    %23 = arith.mulf %2, %22 : vector<16x128xf32>
    %24 = vector.broadcast %21 : vector<1x128xf32> to vector<16x128xf32>
    %25 = arith.addf %23, %24 : vector<16x128xf32>
    %cst_12 = arith.constant 0.000000e+00 : f32
    %26 = vector.broadcast %cst_12 : f32 to vector<16x128xf32>
    %27 = arith.cmpf ogt, %25, %26 : vector<16x128xf32>
    %cst_13 = arith.constant 2.000000e-01 : f32
    %28 = vector.broadcast %cst_13 : f32 to vector<16x128xf32>
    %29 = arith.mulf %28, %25 : vector<16x128xf32>
    %30 = arith.select %27, %25, %29 : vector<16x128xi1>, vector<16x128xf32>
    %31 = arith.truncf %30 : vector<16x128xf32> to vector<16x128xbf16>
    %c0_14 = arith.constant 0 : index
    %c0_15 = arith.constant 0 : index
    %32 = vector.load %arg4[%c0_14, %c0_15] : memref<16x128xbf16, #tpu.memory_space<vmem>>, vector<16x128xbf16>
    tpu.vector_store %arg4[%c0_14, %c0_15], %31 {strides = array<i32>} : memref<16x128xbf16, #tpu.memory_space<vmem>>, vector<16x128xbf16>,
    return
  }
}

module attributes {stable_mosaic.version = 11 : i64} {
  func.func @_head_kernel(%arg0: memref<2x1024xbf16, #tpu.memory_space<vmem>>, %arg1: memref<1024x256xbf16, #tpu.memory_space<vmem>>, %arg2: memref<1x256xf32, #tpu.memory_space<vmem>>, %arg3: memref<1x256xf32, #tpu.memory_space<vmem>>, %arg4: memref<256x512xbf16, #tpu.memory_space<vmem>>, %arg5: memref<1x512xf32, #tpu.memory_space<vmem>>, %arg6: memref<1x512xf32, #tpu.memory_space<vmem>>, %arg7: memref<512x1xbf16, #tpu.memory_space<vmem>>, %arg8: memref<1x1xf32, #tpu.memory_space<vmem>>, %arg9: memref<2x1xf32, #tpu.memory_space<vmem>>) attributes {dimension_semantics = [], scalar_prefetch = 0 : i64, scratch_operands = 0 : i64, tpu.core_type = #tpu.core_type<tc>} {
    %c0 = arith.constant 0 : index
    %c0_0 = arith.constant 0 : index
    %0 = vector.load %arg0[%c0, %c0_0] : memref<2x1024xbf16, #tpu.memory_space<vmem>>, vector<2x1024xbf16>
    %c0_1 = arith.constant 0 : index
    %c0_2 = arith.constant 0 : index
    %1 = vector.load %arg1[%c0_1, %c0_2] : memref<1024x256xbf16, #tpu.memory_space<vmem>>, vector<1024x256xbf16>
    %cst = arith.constant dense<0.000000e+00> : vector<2x256xf32>
    %2 = tpu.matmul %0, %1, %cst {dimension_numbers = #tpu.dot_dimension_numbers<[1], [0], [0], [1], [0, 0, 1, 1], [], []>} : vector<2x1024xbf16>, vector<1024x256xbf16>, vector<2x256xf32> -> vector<2x256xf32>
    %c0_3 = arith.constant 0 : index
    %c0_4 = arith.constant 0 : index
    %3 = vector.load %arg2[%c0_3, %c0_4] : memref<1x256xf32, #tpu.memory_space<vmem>>, vector<1x256xf32>
    %c0_5 = arith.constant 0 : index
    %c0_6 = arith.constant 0 : index
    %4 = vector.load %arg3[%c0_5, %c0_6] : memref<1x256xf32, #tpu.memory_space<vmem>>, vector<1x256xf32>
    %cst_7 = arith.constant dense<0.000000e+00> : vector<256xf32>
    %5 = vector.multi_reduction <add>, %2, %cst_7 [0] : vector<2x256xf32> to vector<256xf32>
    %6 = vector.shape_cast %5 : vector<256xf32> to vector<1x256xf32>
    %cst_8 = arith.constant 2.000000e+00 : f32
    %7 = vector.broadcast %cst_8 : f32 to vector<1x256xf32>
    %8 = arith.divf %6, %7 : vector<1x256xf32>
    %9 = arith.mulf %2, %2 : vector<2x256xf32>
    %cst_9 = arith.constant dense<0.000000e+00> : vector<256xf32>
    %10 = vector.multi_reduction <add>, %9, %cst_9 [0] : vector<2x256xf32> to vector<256xf32>
    %11 = vector.shape_cast %10 : vector<256xf32> to vector<1x256xf32>
    %cst_10 = arith.constant 2.000000e+00 : f32
    %12 = vector.broadcast %cst_10 : f32 to vector<1x256xf32>
    %13 = arith.divf %11, %12 : vector<1x256xf32>
    %14 = arith.mulf %8, %8 : vector<1x256xf32>
    %15 = arith.subf %13, %14 : vector<1x256xf32>
    %cst_11 = arith.constant 9.99999974E-6 : f32
    %16 = vector.broadcast %cst_11 : f32 to vector<1x256xf32>
    %17 = arith.addf %15, %16 : vector<1x256xf32>
    %18 = math.rsqrt %17 : vector<1x256xf32>
    %19 = arith.mulf %3, %18 : vector<1x256xf32>
    %20 = arith.mulf %8, %19 : vector<1x256xf32>
    %21 = arith.subf %4, %20 : vector<1x256xf32>
    %22 = vector.broadcast %19 : vector<1x256xf32> to vector<2x256xf32>
    %23 = arith.mulf %2, %22 : vector<2x256xf32>
    %24 = vector.broadcast %21 : vector<1x256xf32> to vector<2x256xf32>
    %25 = arith.addf %23, %24 : vector<2x256xf32>
    %cst_12 = arith.constant 0.000000e+00 : f32
    %26 = vector.broadcast %cst_12 : f32 to vector<2x256xf32>
    %27 = arith.cmpf ogt, %25, %26 : vector<2x256xf32>
    %cst_13 = arith.constant 2.000000e-01 : f32
    %28 = vector.broadcast %cst_13 : f32 to vector<2x256xf32>
    %29 = arith.mulf %28, %25 : vector<2x256xf32>
    %30 = arith.select %27, %25, %29 : vector<2x256xi1>, vector<2x256xf32>
    %31 = arith.truncf %30 : vector<2x256xf32> to vector<2x256xbf16>
    %c0_14 = arith.constant 0 : index
    %c0_15 = arith.constant 0 : index
    %32 = vector.load %arg4[%c0_14, %c0_15] : memref<256x512xbf16, #tpu.memory_space<vmem>>, vector<256x512xbf16>
    %cst_16 = arith.constant dense<0.000000e+00> : vector<2x512xf32>
    %33 = tpu.matmul %31, %32, %cst_16 {dimension_numbers = #tpu.dot_dimension_numbers<[1], [0], [0], [1], [0, 0, 1, 1], [], []>} : vector<2x256xbf16>, vector<256x512xbf16>, vector<2x512xf32> -> vector<2x512xf32>
    %c0_17 = arith.constant 0 : index
    %c0_18 = arith.constant 0 : index
    %34 = vector.load %arg5[%c0_17, %c0_18] : memref<1x512xf32, #tpu.memory_space<vmem>>, vector<1x512xf32>
    %c0_19 = arith.constant 0 : index
    %c0_20 = arith.constant 0 : index
    %35 = vector.load %arg6[%c0_19, %c0_20] : memref<1x512xf32, #tpu.memory_space<vmem>>, vector<1x512xf32>
    %cst_21 = arith.constant dense<0.000000e+00> : vector<512xf32>
    %36 = vector.multi_reduction <add>, %33, %cst_21 [0] : vector<2x512xf32> to vector<512xf32>
    %37 = vector.shape_cast %36 : vector<512xf32> to vector<1x512xf32>
    %cst_22 = arith.constant 2.000000e+00 : f32
    %38 = vector.broadcast %cst_22 : f32 to vector<1x512xf32>
    %39 = arith.divf %37, %38 : vector<1x512xf32>
    %40 = arith.mulf %33, %33 : vector<2x512xf32>
    %cst_23 = arith.constant dense<0.000000e+00> : vector<512xf32>
    %41 = vector.multi_reduction <add>, %40, %cst_23 [0] : vector<2x512xf32> to vector<512xf32>
    %42 = vector.shape_cast %41 : vector<512xf32> to vector<1x512xf32>
    %cst_24 = arith.constant 2.000000e+00 : f32
    %43 = vector.broadcast %cst_24 : f32 to vector<1x512xf32>
    %44 = arith.divf %42, %43 : vector<1x512xf32>
    %45 = arith.mulf %39, %39 : vector<1x512xf32>
    %46 = arith.subf %44, %45 : vector<1x512xf32>
    %cst_25 = arith.constant 9.99999974E-6 : f32
    %47 = vector.broadcast %cst_25 : f32 to vector<1x512xf32>
    %48 = arith.addf %46, %47 : vector<1x512xf32>
    %49 = math.rsqrt %48 : vector<1x512xf32>
    %50 = arith.mulf %34, %49 : vector<1x512xf32>
    %51 = arith.mulf %39, %50 : vector<1x512xf32>
    %52 = arith.subf %35, %51 : vector<1x512xf32>
    %53 = vector.broadcast %50 : vector<1x512xf32> to vector<2x512xf32>
    %54 = arith.mulf %33, %53 : vector<2x512xf32>
    %55 = vector.broadcast %52 : vector<1x512xf32> to vector<2x512xf32>
    %56 = arith.addf %54, %55 : vector<2x512xf32>
    %cst_26 = arith.constant 0.000000e+00 : f32
    %57 = vector.broadcast %cst_26 : f32 to vector<2x512xf32>
    %58 = arith.cmpf ogt, %56, %57 : vector<2x512xf32>
    %cst_27 = arith.constant 2.000000e-01 : f32
    %59 = vector.broadcast %cst_27 : f32 to vector<2x512xf32>
    %60 = arith.mulf %59, %56 : vector<2x512xf32>
    %61 = arith.select %58, %56, %60 : vector<2x512xi1>, vector<2x512xf32>
    %62 = arith.truncf %61 : vector<2x512xf32> to vector<2x512xbf16>
    %c0_28 = arith.constant 0 : index
    %c0_29 = arith.constant 0 : index
    %63 = vector.load %arg7[%c0_28, %c0_29] : memref<512x1xbf16, #tpu.memory_space<vmem>>, vector<512x1xbf16>
    %cst_30 = arith.constant dense<0.000000e+00> : vector<2x1xf32>
    %64 = tpu.matmul %62, %63, %cst_30 {dimension_numbers = #tpu.dot_dimension_numbers<[1], [0], [0], [1], [0, 0, 1, 1], [], []>} : vector<2x512xbf16>, vector<512x1xbf16>, vector<2x1xf32> -> vector<2x1xf32>
    %c0_31 = arith.constant 0 : index
    %c0_32 = arith.constant 0 : index
    %65 = vector.load %arg8[%c0_31, %c0_32] : memref<1x1xf32, #tpu.memory_space<vmem>>, vector<1x1xf32>
    %66 = vector.broadcast %65 : vector<1x1xf32> to vector<2x1xf32>
    %67 = arith.addf %64, %66 : vector<2x1xf32>
    %cst_33 = arith.constant 0.000000e+00 : f32
    %68 = vector.broadcast %cst_33 : f32 to vector<2x1xf32>
    %69 = arith.subf %68, %67 : vector<2x1xf32>
    %70 = math.exp %69 : vector<2x1xf32>
    %cst_34 = arith.constant 1.000000e+00 : f32
    %71 = vector.broadcast %cst_34 : f32 to vector<2x1xf32>
    %72 = arith.addf %71, %70 : vector<2x1xf32>
    %cst_35 = arith.constant 1.000000e+00 : f32
    %73 = vector.broadcast %cst_35 : f32 to vector<2x1xf32>
    %74 = arith.divf %73, %72 : vector<2x1xf32>
    %c0_36 = arith.constant 0 : index
    %c0_37 = arith.constant 0 : index
    %75 = vector.load %arg9[%c0_36, %c0_37] : memref<2x1xf32, #tpu.memory_space<vmem>>, vector<2x1xf32>
    tpu.vector_store %arg9[%c0_36, %c0_37], %74 {strides = array<i32>} : memref<2x1xf32, #tpu.memory_space<vmem>>, vector<2x1xf32>,
    return
  }
}

</mosaic_0001>

<bundles_post_ra>
// kernel: discriminator_forward.4
= control target key start
LH: loop header
LB: loop body
LE: loop exit
PB: predicated region body
PF: predicated region fallthrough
CT: control target
= control target key end

     0   :  { %vm674_vm0 = vcmask 1044480   ;;  %vm675_vm1 = vcmask 1045504   ;;  %vm481_vm2 = vcmask 220160   ;;  %v3843_v1 = vmov 65535   ;;  %s8464_s1 = inlined_call_operand.vmem [shape: bf16[27,32], index: 1, kind: input, shape index: {}]   ;;  %s8465_s0 = inlined_call_operand.vmem [shape: bf16[1024,27], index: 0, kind: input, shape index: {}]   ;;  %s8466_s2 = inlined_call_operand.vmem [shape: f32[1,32], index: 2, kind: input, shape index: {}]   ;;  %s8467_s3 = inlined_call_operand.vmem [shape: f32[1,32], index: 3, kind: input, shape index: {}]   ;;  %s8468_s4 = inlined_call_operand.vmem [shape: bf16[1024,32], index: 4, kind: output, shape index: {}]  }
   0x1   :  { %v3775_v0 = vld [vmem:[%s8464_s1] sm:$0xff]   ;;  %v676_v2 = vsel %vm674_vm0, 4294967295, %v3843_v1  ;;  %v3776_v3 = vld [vmem:[%s8464_s1 + $0x8] sm:$0x3f]   ;;  %v3779_v8 = vld [vmem:[%s8465_s0 + $0x10] sm:$0xff]   ;;  %vm1228_vm3 = vcmask 261120  }
   0x2   :  { %3638 = vmatprep.subr.bf16.mxu0 %v3775_v0  ;;  %v677_v4 = vsel %vm675_vm1, %v676_v2, 0  ;;  %v3777_v5 = vld [vmem:[%s8465_s0] sm:$0xff]   ;;  %3770 = vmatprep.subr.bf16.mxu1 %v3775_v0  ;;  %v3778_v7 = vld [vmem:[%s8465_s0 + $0x8] sm:$0xff]   ;;  %v3780_v9 = vld [vmem:[%s8465_s0 + $0x18] sm:$0xff]  }
   0x3   :  { %3639 = vmatpush3.bf16.msra.mxu0 %v3775_v0  ;;  %v679_v6 = vand.u32 %v3776_v3, %v677_v4  ;;  %3772 = vmatpush3.bf16.msra.mxu1 %v3775_v0  ;;  %v3781_v10 = vld [vmem:[%s8465_s0 + $0x20] sm:$0xff]   ;;  %v3782_v11 = vld [vmem:[%s8465_s0 + $0x28] sm:$0xff]   ;;  %v3783_v12 = vld [vmem:[%s8465_s0 + $0x30] sm:$0xff]  }
   0x4   :  { %3642 = vmatprep.mubr.msk.bf16.mxu0 %vm481_vm2, %v3777_v5  ;;  %v3784_v13 = vld [vmem:[%s8465_s0 + $0x38] sm:$0xff]   ;;  %v3785_v14 = vld [vmem:[%s8465_s0 + $0x40] sm:$0xff]   ;;  %v3810_v16 = vld [vmem:[%s8465_s0 + $0x108] sm:$0xff]  }
   0x5   :  { %3640 = vmatprep.subr.bf16.mxu0 %v679_v6  ;;  %3771 = vmatprep.subr.bf16.mxu1 %v679_v6  ;;  %v3809_v15 = vld [vmem:[%s8465_s0 + $0x100] sm:$0xff]   ;;  %v3811_v17 = vld [vmem:[%s8465_s0 + $0x110] sm:$0xff]   ;;  %v3786_v18 = vld [vmem:[%s8465_s0 + $0x48] sm:$0xff]  }
   0x6   :  { %3706 = vmatprep.mubr.msk.bf16.mxu1 %vm481_vm2, %v3809_v15  ;;  %v3787_v19 = vld [vmem:[%s8465_s0 + $0x50] sm:$0xff]   ;;  %v3812_v20 = vld [vmem:[%s8465_s0 + $0x118] sm:$0xff]   ;;  %v3813_v21 = vld [vmem:[%s8465_s0 + $0x120] sm:$0xff]  }
   0x7   :  { %3641 = vmatpush3.bf16.msra.mxu0 %v679_v6  ;;  %3773 = vmatpush3.bf16.msra.mxu1 %v679_v6  ;;  %v3788_v22 = vld [vmem:[%s8465_s0 + $0x58] sm:$0xff]   ;;  %v3789_v23 = vld [vmem:[%s8465_s0 + $0x60] sm:$0xff]   ;;  %v3814_v24 = vld [vmem:[%s8465_s0 + $0x128] sm:$0xff]  }
   0x8   :  { %v3815_v25 = vld [vmem:[%s8465_s0 + $0x130] sm:$0xff]   ;;  %v3790_v26 = vld [vmem:[%s8465_s0 + $0x68] sm:$0xff]   ;;  %v3816_v28 = vld [vmem:[%s8465_s0 + $0x138] sm:$0xff]  }
   0x9   :  { %v3791_v27 = vld [vmem:[%s8465_s0 + $0x70] sm:$0xff]   ;;  %v3817_v29 = vld [vmem:[%s8465_s0 + $0x140] sm:$0xff]   ;;  %v3792_v30 = vld [vmem:[%s8465_s0 + $0x78] sm:$0xff]  }
   0xa   :  { %3643 = vmatmul.mubr.msk.bf16.vlgmr.msra.gmra.mrb[0].mxu0 %vm481_vm2, %v3778_v7  ;;  %3707 = vmatmul.mubr.msk.bf16.vlgmr.msra.gmra.mrb[0].mxu1 %vm481_vm2, %v3810_v16  ;;  %v3793_v31 = vld [vmem:[%s8465_s0 + $0x80] sm:$0xff]   ;;  %v3818_v32 = vld [vmem:[%s8465_s0 + $0x148] sm:$0xff]   ;;  %v3819_v33 = vld [vmem:[%s8465_s0 + $0x150] sm:$0xff]  }
   0xb   :  { %3646 = vmatprep.mubr.msk.bf16.mxu0 %vm481_vm2, %v3779_v8  ;;  %3710 = vmatprep.mubr.msk.bf16.mxu1 %vm481_vm2, %v3811_v17  ;;  %v3794_v34 = vld [vmem:[%s8465_s0 + $0x88] sm:$0xff]   ;;  %v3795_v35 = vld [vmem:[%s8465_s0 + $0x90] sm:$0xff]   ;;  %v3820_v36 = vld [vmem:[%s8465_s0 + $0x158] sm:$0xff]  }
   0xc   :  { %v3821_v37 = vld [vmem:[%s8465_s0 + $0x160] sm:$0xff]   ;;  %v3796_v38 = vld [vmem:[%s8465_s0 + $0x98] sm:$0xff]   ;;  %v3822_v40 = vld [vmem:[%s8465_s0 + $0x168] sm:$0xff]  }
   0xd   :  { %v3797_v39 = vld [vmem:[%s8465_s0 + $0xa0] sm:$0xff]   ;;  %v3823_v41 = vld [vmem:[%s8465_s0 + $0x170] sm:$0xff]   ;;  %v3798_v42 = vld [vmem:[%s8465_s0 + $0xa8] sm:$0xff]  }
   0xe   :  { %v3799_v43 = vld [vmem:[%s8465_s0 + $0xb0] sm:$0xff]   ;;  %v3824_v44 = vld [vmem:[%s8465_s0 + $0x178] sm:$0xff]   ;;  %v3825_v45 = vld [vmem:[%s8465_s0 + $0x180] sm:$0xff]  }
   0xf   :  { %v3800_v46 = vld [vmem:[%s8465_s0 + $0xb8] sm:$0xff]   ;;  %v3801_v47 = vld [vmem:[%s8465_s0 + $0xc0] sm:$0xff]   ;;  %v3826_v48 = vld [vmem:[%s8465_s0 + $0x188] sm:$0xff]  }
  0x10   :  { %v3827_v49 = vld [vmem:[%s8465_s0 + $0x190] sm:$0xff]   ;;  %v3802_v50 = vld [vmem:[%s8465_s0 + $0xc8] sm:$0xff]   ;;  %v3828_v52 = vld [vmem:[%s8465_s0 + $0x198] sm:$0xff]  }
  0x11   :  { %v3803_v51 = vld [vmem:[%s8465_s0 + $0xd0] sm:$0xff]   ;;  %v3829_v53 = vld [vmem:[%s8465_s0 + $0x1a0] sm:$0xff]   ;;  %v3804_v54 = vld [vmem:[%s8465_s0 + $0xd8] sm:$0xff]  }
  0x12   :  { %3647 = vmatmul.mubr.msk.bf16.gmra.mrb[4].mxu0 %vm481_vm2, %v3780_v9  ;;  %3711 = vmatmul.mubr.msk.bf16.gmra.mrb[4].mxu1 %vm481_vm2, %v3812_v20  ;;  %v3805_v55 = vld [vmem:[%s8465_s0 + $0xe0] sm:$0xff]   ;;  %v3830_v56 = vld [vmem:[%s8465_s0 + $0x1a8] sm:$0xff]   ;;  %v3831_v57 = vld [vmem:[%s8465_s0 + $0x1b0] sm:$0xff]  }
  0x13   :  { %3650 = vmatprep.mubr.msk.bf16.mxu0 %vm481_vm2, %v3781_v10  ;;  %3714 = vmatprep.mubr.msk.bf16.mxu1 %vm481_vm2, %v3813_v21  ;;  %v3806_v58 = vld [vmem:[%s8465_s0 + $0xe8] sm:$0xff]   ;;  %v3807_v59 = vld [vmem:[%s8465_s0 + $0xf0] sm:$0xff]   ;;  %v3832_v60 = vld [vmem:[%s8465_s0 + $0x1b8] sm:$0xff]  }
  0x14   :  { %v3833_v61 = vld [vmem:[%s8465_s0 + $0x1c0] sm:$0xff]   ;;  %v3808_v62 = vld [vmem:[%s8465_s0 + $0xf8] sm:$0xff]   ;;  %v3834_v63 = vld [vmem:[%s8465_s0 + $0x1c8] sm:$0xff]  }
  0x15   :  { %v3835_v0 = vld [vmem:[%s8465_s0 + $0x1d0] sm:$0xff]   ;;  %v3836_v1 = vld [vmem:[%s8465_s0 + $0x1d8] sm:$0xff]   ;;  %v3837_v2 = vld [vmem:[%s8465_s0 + $0x1e0] sm:$0xff]  }
  0x16   :  { %v3838_v3 = vld [vmem:[%s8465_s0 + $0x1e8] sm:$0xff]   ;;  %v3839_v4 = vld [vmem:[%s8465_s0 + $0x1f0] sm:$0xff]   ;;  %v3840_v5 = vld [vmem:[%s8465_s0 + $0x1f8] sm:$0xff]  }
  0x1a   :  { %3651 = vmatmul.mubr.msk.bf16.gmra.mrb[8].mxu0 %vm481_vm2, %v3782_v11  ;;  %3715 = vmatmul.mubr.msk.bf16.gmra.mrb[8].mxu1 %vm481_vm2, %v3814_v24 }
  0x1b   :  { %3654 = vmatprep.mubr.msk.bf16.mxu0 %vm481_vm2, %v3783_v12  ;;  %3718 = vmatprep.mubr.msk.bf16.mxu1 %vm481_vm2, %v3815_v25 }
  0x22   :  { %3655 = vmatmul.mubr.msk.bf16.gmra.mrb[12].mxu0 %vm481_vm2, %v3784_v13  ;;  %3719 = vmatmul.mubr.msk.bf16.gmra.mrb[12].mxu1 %vm481_vm2, %v3816_v28 }
  0x23   :  { %3658 = vmatprep.mubr.msk.bf16.mxu0 %vm481_vm2, %v3785_v14  ;;  %3722 = vmatprep.mubr.msk.bf16.mxu1 %vm481_vm2, %v3817_v29 }
  0x2a   :  { %3659 = vmatmul.mubr.msk.bf16.gmra.mrb[16].mxu0 %vm481_vm2, %v3786_v18  ;;  %3723 = vmatmul.mubr.msk.bf16.gmra.mrb[16].mxu1 %vm481_vm2, %v3818_v32 }
  0x2b   :  { %3662 = vmatprep.mubr.msk.bf16.mxu0 %vm481_vm2, %v3787_v19  ;;  %3726 = vmatprep.mubr.msk.bf16.mxu1 %vm481_vm2, %v3819_v33 }
  0x32   :  { %3663 = vmatmul.mubr.msk.bf16.gmra.mrb[20].mxu0 %vm481_vm2, %v3788_v22  ;;  %3727 = vmatmul.mubr.msk.bf16.gmra.mrb[20].mxu1 %vm481_vm2, %v3820_v36 }
  0x33   :  { %3666 = vmatprep.mubr.msk.bf16.mxu0 %vm481_vm2, %v3789_v23  ;;  %3730 = vmatprep.mubr.msk.bf16.mxu1 %vm481_vm2, %v3821_v37 }
  0x3a   :  { %3667 = vmatmul.mubr.msk.bf16.gmra.mrb[24].mxu0 %vm481_vm2, %v3790_v26  ;;  %3731 = vmatmul.mubr.msk.bf16.gmra.mrb[24].mxu1 %vm481_vm2, %v3822_v40 }
  0x3b   :  { %3670 = vmatprep.mubr.msk.bf16.mxu0 %vm481_vm2, %v3791_v27  ;;  %3734 = vmatprep.mubr.msk.bf16.mxu1 %vm481_vm2, %v3823_v41 }
  0x42   :  { %3671 = vmatmul.mubr.msk.bf16.gmra.mrb[28].mxu0 %vm481_vm2, %v3792_v30  ;;  %3735 = vmatmul.mubr.msk.bf16.gmra.mrb[28].mxu1 %vm481_vm2, %v3824_v44 }
  0x43   :  { %3674 = vmatprep.mubr.msk.bf16.mxu0 %vm481_vm2, %v3793_v31  ;;  %3738 = vmatprep.mubr.msk.bf16.mxu1 %vm481_vm2, %v3825_v45 }
  0x4a   :  { %3675 = vmatmul.mubr.msk.bf16.gmra.mrb[32].mxu0 %vm481_vm2, %v3794_v34  ;;  %3739 = vmatmul.mubr.msk.bf16.gmra.mrb[32].mxu1 %vm481_vm2, %v3826_v48 }
  0x4b   :  { %3678 = vmatprep.mubr.msk.bf16.mxu0 %vm481_vm2, %v3795_v35  ;;  %3742 = vmatprep.mubr.msk.bf16.mxu1 %vm481_vm2, %v3827_v49 }
  0x52   :  { %3679 = vmatmul.mubr.msk.bf16.gmra.mrb[36].mxu0 %vm481_vm2, %v3796_v38  ;;  %3743 = vmatmul.mubr.msk.bf16.gmra.mrb[36].mxu1 %vm481_vm2, %v3828_v52 }
  0x53   :  { %3682 = vmatprep.mubr.msk.bf16.mxu0 %vm481_vm2, %v3797_v39  ;;  %3746 = vmatprep.mubr.msk.bf16.mxu1 %vm481_vm2, %v3829_v53 }
  0x5a   :  { %3683 = vmatmul.mubr.msk.bf16.gmra.mrb[40].mxu0 %vm481_vm2, %v3798_v42  ;;  %3747 = vmatmul.mubr.msk.bf16.gmra.mrb[40].mxu1 %vm481_vm2, %v3830_v56 }
  0x5b   :  { %3686 = vmatprep.mubr.msk.bf16.mxu0 %vm481_vm2, %v3799_v43  ;;  %3750 = vmatprep.mubr.msk.bf16.mxu1 %vm481_vm2, %v3831_v57 }
  0x62   :  { %3687 = vmatmul.mubr.msk.bf16.gmra.mrb[44].mxu0 %vm481_vm2, %v3800_v46  ;;  %3751 = vmatmul.mubr.msk.bf16.gmra.mrb[44].mxu1 %vm481_vm2, %v3832_v60 }
  0x63   :  { %3690 = vmatprep.mubr.msk.bf16.mxu0 %vm481_vm2, %v3801_v47  ;;  %3754 = vmatprep.mubr.msk.bf16.mxu1 %vm481_vm2, %v3833_v61 }
  0x6a   :  { %3691 = vmatmul.mubr.msk.bf16.gmra.mrb[48].mxu0 %vm481_vm2, %v3802_v50  ;;  %3755 = vmatmul.mubr.msk.bf16.gmra.mrb[48].mxu1 %vm481_vm2, %v3834_v63 }
  0x6b   :  { %3694 = vmatprep.mubr.msk.bf16.mxu0 %vm481_vm2, %v3803_v51  ;;  %3758 = vmatprep.mubr.msk.bf16.mxu1 %vm481_vm2, %v3835_v0 }
  0x72   :  { %3695 = vmatmul.mubr.msk.bf16.gmra.mrb[52].mxu0 %vm481_vm2, %v3804_v54  ;;  %3759 = vmatmul.mubr.msk.bf16.gmra.mrb[52].mxu1 %vm481_vm2, %v3836_v1 }
  0x73   :  { %3698 = vmatprep.mubr.msk.bf16.mxu0 %vm481_vm2, %v3805_v55  ;;  %3762 = vmatprep.mubr.msk.bf16.mxu1 %vm481_vm2, %v3837_v2 }
  0x7a   :  { %3699 = vmatmul.mubr.msk.bf16.gmra.mrb[56].mxu0 %vm481_vm2, %v3806_v58  ;;  %3763 = vmatmul.mubr.msk.bf16.gmra.mrb[56].mxu1 %vm481_vm2, %v3838_v3 }
  0x7b   :  { %3702 = vmatprep.mubr.msk.bf16.mxu0 %vm481_vm2, %v3807_v59  ;;  %3766 = vmatprep.mubr.msk.bf16.mxu1 %vm481_vm2, %v3839_v4 }
  0x82   :  { %3703 = vmatmul.mubr.msk.bf16.gmra.mrb[60].mxu0 %vm481_vm2, %v3808_v62  ;;  %3767 = vmatmul.mubr.msk.bf16.gmra.mrb[60].mxu1 %vm481_vm2, %v3840_v5 }
  0xdd   :  { %v4131_v6 = vpop.f32.mrb[0].mxu0 }
  0xde   :  { %8770 = vst [vmem:[#allocation2_spill] sm:$0xff] %v4131_v6  ;;  %v4133_v7 = vpop.f32.mrb[1].mxu0  ;;  %v1494_v11 = vmul.f32 %v4131_v6, %v4131_v6  ;;  %v1232_v16 = vsel %vm1228_vm3, %v4131_v6, 0.0 }
  0xdf   :  { %8771 = vst [vmem:[#allocation3_spill] sm:$0xff] %v4133_v7  ;;  %v1492_v8 = vmul.f32 %v4133_v7, %v4133_v7  ;;  %v4137_v9 = vpop.f32.mrb[2].mxu0  ;;  %v1229_v12 = vsel %vm1228_vm3, %v4133_v7, 0.0 }
  0xe0   :  { %8772 = vst [vmem:[#allocation4_spill] sm:$0xff] %v4137_v9  ;;  %v4139_v10 = vpop.f32.mrb[3].mxu0  ;;  %v1495_v18 = vmul.f32 %v4137_v9, %v4137_v9  ;;  %v1623_v22 = vsel %vm1228_vm3, %v1494_v11, 0.0  ;;  %v1234_v23 = vsel %vm1228_vm3, %v4137_v9, 0.0 }
  0xe1   :  { %8773 = vst [vmem:[#allocation5_spill] sm:$0xff] %v4139_v10  ;;  %v1230_v13 = vsel %vm1228_vm3, %v4139_v10, 0.0  ;;  %v1493_v14 = vmul.f32 %v4139_v10, %v4139_v10  ;;  %v1620_v17 = vsel %vm1228_vm3, %v1492_v8, 0.0 }
  0xe2   :  { %v1231_v15 = vadd.f32 %v1230_v13, %v1229_v12  ;;  %v1625_v28 = vsel %vm1228_vm3, %v1495_v18, 0.0 }
  0xe3   :  { %v1621_v19 = vsel %vm1228_vm3, %v1493_v14, 0.0 }
  0xe4   :  { %v1233_v20 = vadd.f32 %v1232_v16, %v1231_v15  ;;  %v1622_v21 = vadd.f32 %v1621_v19, %v1620_v17 }
  0xe5   :  { %v4158_v24 = vpop.f32.mrb[4].mxu0 }
  0xe6   :  { %8774 = vst [vmem:[#allocation6_spill] sm:$0xff] %v4158_v24  ;;  %v1235_v25 = vadd.f32 %v1234_v23, %v1233_v20  ;;  %v1624_v26 = vadd.f32 %v1623_v22, %v1622_v21  ;;  %v4160_v27 = vpop.f32.mrb[5].mxu0  ;;  %v1498_v35 = vmul.f32 %v4158_v24, %v4158_v24  ;;  %v1240_v41 = vsel %vm1228_vm3, %v4158_v24, 0.0  ;;  %v4227_v23 = vpop.f32.mrb[0].mxu1 }
  0xe7   :  { %8775 = vst [vmem:[#allocation7_spill] sm:$0xff] %v4160_v27  ;;  %v1236_v29 = vsel %vm1228_vm3, %v4160_v27, 0.0  ;;  %v1496_v30 = vmul.f32 %v4160_v27, %v4160_v27  ;;  %v4167_v31 = vpop.f32.mrb[6].mxu0  ;;  %8786 = vst [vmem:[#allocation18_spill] sm:$0xff] %v4227_v23 }
  0xe8   :  { %8776 = vst [vmem:[#allocation8_spill] sm:$0xff] %v4167_v31  ;;  %v1626_v32 = vadd.f32 %v1625_v28, %v1624_v26  ;;  %v1237_v33 = vadd.f32 %v1236_v29, %v1235_v25  ;;  %v4169_v34 = vpop.f32.mrb[7].mxu0  ;;  %v1499_v42 = vmul.f32 %v4167_v31, %v4167_v31  ;;  %v1631_v46 = vsel %vm1228_vm3, %v1498_v35, 0.0 }
  0xe9   :  { %8777 = vst [vmem:[#allocation9_spill] sm:$0xff] %v4169_v34  ;;  %v1627_v36 = vsel %vm1228_vm3, %v1496_v30, 0.0  ;;  %v1238_v37 = vsel %vm1228_vm3, %v4169_v34, 0.0  ;;  %v1497_v38 = vmul.f32 %v4169_v34, %v4169_v34  ;;  %v1242_v47 = vsel %vm1228_vm3, %v4167_v31, 0.0  ;;  %v4236_v30 = vpop.f32.mrb[1].mxu1 }
  0xea   :  { %v1628_v39 = vadd.f32 %v1627_v36, %v1626_v32  ;;  %v1239_v40 = vadd.f32 %v1238_v37, %v1237_v33  ;;  %v1633_v52 = vsel %vm1228_vm3, %v1499_v42, 0.0  ;;  %8787 = vst [vmem:[#allocation19_spill] sm:$0xff] %v4236_v30  ;;  %v4238_v35 = vpop.f32.mrb[2].mxu1 }
  0xeb   :  { %v1629_v43 = vsel %vm1228_vm3, %v1497_v38, 0.0  ;;  %8788 = vst [vmem:[#allocation20_spill] sm:$0xff] %v4238_v35 }
  0xec   :  { %v1241_v44 = vadd.f32 %v1240_v41, %v1239_v40  ;;  %v1630_v45 = vadd.f32 %v1629_v43, %v1628_v39  ;;  %v4245_v39 = vpop.f32.mrb[3].mxu1 }
  0xed   :  { %v4186_v48 = vpop.f32.mrb[8].mxu0  ;;  %8789 = vst [vmem:[#allocation21_spill] sm:$0xff] %v4245_v39 }
  0xee   :  { %8778 = vst [vmem:[#allocation10_spill] sm:$0xff] %v4186_v48  ;;  %v1632_v49 = vadd.f32 %v1631_v46, %v1630_v45  ;;  %v4188_v50 = vpop.f32.mrb[9].mxu0  ;;  %v1243_v51 = vadd.f32 %v1242_v47, %v1241_v44  ;;  %v1502_v59 = vmul.f32 %v4186_v48, %v4186_v48  ;;  %v1248_v1 = vsel %vm1228_vm3, %v4186_v48, 0.0 }
  0xef   :  { %8779 = vst [vmem:[#allocation11_spill] sm:$0xff] %v4188_v50  ;;  %v1244_v53 = vsel %vm1228_vm3, %v4188_v50, 0.0  ;;  %v1500_v54 = vmul.f32 %v4188_v50, %v4188_v50  ;;  %v4195_v55 = vpop.f32.mrb[10].mxu0 }
  0xf0   :  { %8780 = vst [vmem:[#allocation12_spill] sm:$0xff] %v4195_v55  ;;  %v1245_v56 = vadd.f32 %v1244_v53, %v1243_v51  ;;  %v1634_v57 = vadd.f32 %v1633_v52, %v1632_v49  ;;  %v4197_v58 = vpop.f32.mrb[11].mxu0  ;;  %v1503_v2 = vmul.f32 %v4195_v55, %v4195_v55  ;;  %v1639_v8 = vsel %vm1228_vm3, %v1502_v59, 0.0  ;;  %v4263_v59 = vpop.f32.mrb[4].mxu1 }
  0xf1   :  { %8781 = vst [vmem:[#allocation13_spill] sm:$0xff] %v4197_v58  ;;  %v1635_v60 = vsel %vm1228_vm3, %v1500_v54, 0.0  ;;  %v1246_v61 = vsel %vm1228_vm3, %v4197_v58, 0.0  ;;  %v1501_v62 = vmul.f32 %v4197_v58, %v4197_v58  ;;  %v1250_v11 = vsel %vm1228_vm3, %v4195_v55, 0.0  ;;  %8794 = vst [vmem:[#allocation26_spill] sm:$0xff] %v4263_v59 }
  0xf2   :  { %v1636_v63 = vadd.f32 %v1635_v60, %v1634_v57  ;;  %v1247_v0 = vadd.f32 %v1246_v61, %v1245_v56  ;;  %v1641_v16 = vsel %vm1228_vm3, %v1503_v2, 0.0 }
  0xf3   :  { %v1637_v3 = vsel %vm1228_vm3, %v1501_v62, 0.0 }
  0xf4   :  { %v1249_v4 = vadd.f32 %v1248_v1, %v1247_v0  ;;  %v1638_v5 = vadd.f32 %v1637_v3, %v1636_v63  ;;  %v4272_v0 = vpop.f32.mrb[5].mxu1 }
  0xf5   :  { %v4214_v12 = vpop.f32.mrb[12].mxu0  ;;  %8795 = vst [vmem:[#allocation27_spill] sm:$0xff] %v4272_v0  ;;  %v4274_v3 = vpop.f32.mrb[6].mxu1 }
  0xf6   :  { %8782 = vst [vmem:[#allocation14_spill] sm:$0xff] %v4214_v12  ;;  %v1640_v13 = vadd.f32 %v1639_v8, %v1638_v5  ;;  %v4216_v14 = vpop.f32.mrb[13].mxu0  ;;  %v1251_v15 = vadd.f32 %v1250_v11, %v1249_v4  ;;  %v1506_v25 = vmul.f32 %v4214_v12, %v4214_v12  ;;  %v1256_v36 = vsel %vm1228_vm3, %v4214_v12, 0.0  ;;  %8796 = vst [vmem:[#allocation28_spill] sm:$0xff] %v4274_v3  ;;  %v4281_v11 = vpop.f32.mrb[7].mxu1 }
  0xf7   :  { %8783 = vst [vmem:[#allocation15_spill] sm:$0xff] %v4216_v14  ;;  %v1252_v17 = vsel %vm1228_vm3, %v4216_v14, 0.0  ;;  %v1504_v18 = vmul.f32 %v4216_v14, %v4216_v14  ;;  %v4223_v19 = vpop.f32.mrb[14].mxu0  ;;  %8797 = vst [vmem:[#allocation29_spill] sm:$0xff] %v4281_v11 }
  0xf8   :  { %8784 = vst [vmem:[#allocation16_spill] sm:$0xff] %v4223_v19  ;;  %v1253_v20 = vadd.f32 %v1252_v17, %v1251_v15  ;;  %v1642_v21 = vadd.f32 %v1641_v16, %v1640_v13  ;;  %v4225_v22 = vpop.f32.mrb[15].mxu0  ;;  %v1507_v37 = vmul.f32 %v4223_v19, %v4223_v19  ;;  %v1647_v42 = vsel %vm1228_vm3, %v1506_v25, 0.0 }
  0xf9   :  { %8785 = vst [vmem:[#allocation17_spill] sm:$0xff] %v4225_v22  ;;  %v1643_v26 = vsel %vm1228_vm3, %v1504_v18, 0.0  ;;  %v1254_v28 = vsel %vm1228_vm3, %v4225_v22, 0.0  ;;  %v1505_v29 = vmul.f32 %v4225_v22, %v4225_v22  ;;  %v1258_v43 = vsel %vm1228_vm3, %v4223_v19, 0.0 }
  0xfa   :  { %v1644_v32 = vadd.f32 %v1643_v26, %v1642_v21  ;;  %v1255_v33 = vadd.f32 %v1254_v28, %v1253_v20  ;;  %v1649_v49 = vsel %vm1228_vm3, %v1507_v37, 0.0 }
  0xfb   :  { %v1645_v38 = vsel %vm1228_vm3, %v1505_v29, 0.0 }
  0xfc   :  { %v1257_v40 = vadd.f32 %v1256_v36, %v1255_v33  ;;  %v1646_v41 = vadd.f32 %v1645_v38, %v1644_v32  ;;  %v4299_v38 = vpop.f32.mrb[8].mxu1 }
  0xfd   :  { %v4250_v44 = vpop.f32.mrb[16].mxu0  ;;  %8802 = vst [vmem:[#allocation34_spill] sm:$0xff] %v4299_v38 }
  0xfe   :  { %8790 = vst [vmem:[#allocation22_spill] sm:$0xff] %v4250_v44  ;;  %v1648_v45 = vadd.f32 %v1647_v42, %v1646_v41  ;;  %v4252_v46 = vpop.f32.mrb[17].mxu0  ;;  %v1259_v47 = vadd.f32 %v1258_v43, %v1257_v40  ;;  %v1510_v60 = vmul.f32 %v4250_v44, %v4250_v44  ;;  %v1264_v4 = vsel %vm1228_vm3, %v4250_v44, 0.0 }
  0xff   :  { %8791 = vst [vmem:[#allocation23_spill] sm:$0xff] %v4252_v46  ;;  %v1260_v51 = vsel %vm1228_vm3, %v4252_v46, 0.0  ;;  %v1508_v52 = vmul.f32 %v4252_v46, %v4252_v46  ;;  %v4259_v53 = vpop.f32.mrb[18].mxu0 }
 0x100   :  { %8792 = vst [vmem:[#allocation24_spill] sm:$0xff] %v4259_v53  ;;  %v1261_v54 = vadd.f32 %v1260_v51, %v1259_v47  ;;  %v1650_v56 = vadd.f32 %v1649_v49, %v1648_v45  ;;  %v4261_v57 = vpop.f32.mrb[19].mxu0  ;;  %v1511_v5 = vmul.f32 %v4259_v53, %v4259_v53  ;;  %v1655_v16 = vsel %vm1228_vm3, %v1510_v60, 0.0  ;;  %v4308_v45 = vpop.f32.mrb[9].mxu1 }
 0x101   :  { %8793 = vst [vmem:[#allocation25_spill] sm:$0xff] %v4261_v57  ;;  %v1651_v61 = vsel %vm1228_vm3, %v1508_v52, 0.0  ;;  %v1262_v62 = vsel %vm1228_vm3, %v4261_v57, 0.0  ;;  %v1509_v63 = vmul.f32 %v4261_v57, %v4261_v57  ;;  %v1266_v17 = vsel %vm1228_vm3, %v4259_v53, 0.0  ;;  %8803 = vst [vmem:[#allocation35_spill] sm:$0xff] %v4308_v45  ;;  %v4310_v51 = vpop.f32.mrb[10].mxu1 }
 0x102   :  { %v1652_v1 = vadd.f32 %v1651_v61, %v1650_v56  ;;  %v1263_v2 = vadd.f32 %v1262_v62, %v1261_v54  ;;  %v1657_v26 = vsel %vm1228_vm3, %v1511_v5, 0.0  ;;  %v4317_v60 = vpop.f32.mrb[11].mxu1 }
 0x103   :  { %v1653_v8 = vsel %vm1228_vm3, %v1509_v63, 0.0  ;;  %8804 = vst [vmem:[#allocation36_spill] sm:$0xff] %v4317_v60 }
 0x104   :  { %v1265_v13 = vadd.f32 %v1264_v4, %v1263_v2  ;;  %v1654_v15 = vadd.f32 %v1653_v8, %v1652_v1 }
 0x105   :  { %v4286_v18 = vpop.f32.mrb[20].mxu0 }
 0x106   :  { %8798 = vst [vmem:[#allocation30_spill] sm:$0xff] %v4286_v18  ;;  %v1656_v20 = vadd.f32 %v1655_v16, %v1654_v15  ;;  %v4288_v21 = vpop.f32.mrb[21].mxu0  ;;  %v1267_v25 = vadd.f32 %v1266_v17, %v1265_v13  ;;  %v1514_v40 = vmul.f32 %v4286_v18, %v4286_v18  ;;  %v1272_v52 = vsel %vm1228_vm3, %v4286_v18, 0.0 }
 0x107   :  { %8799 = vst [vmem:[#allocation31_spill] sm:$0xff] %v4288_v21  ;;  %v1268_v28 = vsel %vm1228_vm3, %v4288_v21, 0.0  ;;  %v1512_v29 = vmul.f32 %v4288_v21, %v4288_v21  ;;  %v4295_v32 = vpop.f32.mrb[22].mxu0 }
 0x108   :  { %8800 = vst [vmem:[#allocation32_spill] sm:$0xff] %v4295_v32  ;;  %v1269_v33 = vadd.f32 %v1268_v28, %v1267_v25  ;;  %v1658_v36 = vadd.f32 %v1657_v26, %v1656_v20  ;;  %v4297_v37 = vpop.f32.mrb[23].mxu0  ;;  %v1515_v54 = vmul.f32 %v4295_v32, %v4295_v32  ;;  %v1663_v63 = vsel %vm1228_vm3, %v1514_v40, 0.0  ;;  %v4335_v28 = vpop.f32.mrb[12].mxu1 }
 0x109   :  { %8801 = vst [vmem:[#allocation33_spill] sm:$0xff] %v4297_v37  ;;  %v1659_v41 = vsel %vm1228_vm3, %v1512_v29, 0.0  ;;  %v1270_v42 = vsel %vm1228_vm3, %v4297_v37, 0.0  ;;  %v1513_v43 = vmul.f32 %v4297_v37, %v4297_v37  ;;  %v1274_v1 = vsel %vm1228_vm3, %v4295_v32, 0.0 }
 0x10a   :  { %v1660_v47 = vadd.f32 %v1659_v41, %v1658_v36  ;;  %v1271_v49 = vadd.f32 %v1270_v42, %v1269_v33  ;;  %v1665_v13 = vsel %vm1228_vm3, %v1515_v54, 0.0  ;;  %v4344_v41 = vpop.f32.mrb[13].mxu1 }
 0x10b   :  { %v1661_v56 = vsel %vm1228_vm3, %v1513_v43, 0.0 }
 0x10c   :  { %v1273_v61 = vadd.f32 %v1272_v52, %v1271_v49  ;;  %v1662_v62 = vadd.f32 %v1661_v56, %v1660_v47  ;;  %v4346_v47 = vpop.f32.mrb[14].mxu1 }
 0x10d   :  { %v4322_v2 = vpop.f32.mrb[24].mxu0  ;;  %v4353_v56 = vpop.f32.mrb[15].mxu1 }
 0x10e   :  { %8805 = vst [vmem:[#allocation37_spill] sm:$0xff] %v4322_v2  ;;  %v1664_v4 = vadd.f32 %v1663_v63, %v1662_v62  ;;  %v4324_v5 = vpop.f32.mrb[25].mxu0  ;;  %v1275_v8 = vadd.f32 %v1274_v1, %v1273_v61  ;;  %v1518_v29 = vmul.f32 %v4322_v2, %v4322_v2  ;;  %v1280_v49 = vsel %vm1228_vm3, %v4322_v2, 0.0 }
 0x10f   :  { %8806 = vst [vmem:[#allocation38_spill] sm:$0xff] %v4324_v5  ;;  %v1276_v15 = vsel %vm1228_vm3, %v4324_v5, 0.0  ;;  %v1516_v16 = vmul.f32 %v4324_v5, %v4324_v5  ;;  %v4331_v17 = vpop.f32.mrb[26].mxu0 }
 0x110   :  { %8807 = vst [vmem:[#allocation39_spill] sm:$0xff] %v4331_v17  ;;  %v1277_v20 = vadd.f32 %v1276_v15, %v1275_v8  ;;  %v1666_v25 = vadd.f32 %v1665_v13, %v1664_v4  ;;  %v4333_v26 = vpop.f32.mrb[27].mxu0  ;;  %v1519_v52 = vmul.f32 %v4331_v17, %v4331_v17  ;;  %v1671_v63 = vsel %vm1228_vm3, %v1518_v29, 0.0 }
 0x111   :  { %8808 = vst [vmem:[#allocation40_spill] sm:$0xff] %v4333_v26  ;;  %v1667_v33 = vsel %vm1228_vm3, %v1516_v16, 0.0  ;;  %v1278_v36 = vsel %vm1228_vm3, %v4333_v26, 0.0  ;;  %v1517_v40 = vmul.f32 %v4333_v26, %v4333_v26  ;;  %v1282_v1 = vsel %vm1228_vm3, %v4331_v17, 0.0 }
 0x112   :  { %v1668_v42 = vadd.f32 %v1667_v33, %v1666_v25  ;;  %v1279_v43 = vadd.f32 %v1278_v36, %v1277_v20  ;;  %v1673_v16 = vsel %vm1228_vm3, %v1519_v52, 0.0 }
 0x113   :  { %v1669_v54 = vsel %vm1228_vm3, %v1517_v40, 0.0 }
 0x114   :  { %v1281_v61 = vadd.f32 %v1280_v49, %v1279_v43  ;;  %v1670_v62 = vadd.f32 %v1669_v54, %v1668_v42  ;;  %v4371_v42 = vpop.f32.mrb[16].mxu1 }
 0x115   :  { %v4358_v4 = vpop.f32.mrb[28].mxu0 }
 0x116   :  { %8809 = vst [vmem:[#allocation41_spill] sm:$0xff] %v4358_v4  ;;  %v1672_v8 = vadd.f32 %v1671_v63, %v1670_v62  ;;  %v4360_v13 = vpop.f32.mrb[29].mxu0  ;;  %v1283_v15 = vadd.f32 %v1282_v1, %v1281_v61  ;;  %v1522_v43 = vmul.f32 %v4358_v4, %v4358_v4  ;;  %v4380_v61 = vpop.f32.mrb[17].mxu1 }
 0x117   :  { %8810 = vst [vmem:[#allocation42_spill] sm:$0xff] %v4360_v13  ;;  %v1284_v20 = vsel %vm1228_vm3, %v4360_v13, 0.0  ;;  %v1520_v25 = vmul.f32 %v4360_v13, %v4360_v13  ;;  %v4367_v33 = vpop.f32.mrb[30].mxu0  ;;  %v4382_v1 = vpop.f32.mrb[18].mxu1 }
 0x118   :  { %8811 = vst [vmem:[#allocation43_spill] sm:$0xff] %v4367_v33  ;;  %v1285_v29 = vadd.f32 %v1284_v20, %v1283_v15  ;;  %v1674_v36 = vadd.f32 %v1673_v16, %v1672_v8  ;;  %v4369_v40 = vpop.f32.mrb[31].mxu0  ;;  %v1288_v8 = vsel %vm1228_vm3, %v4358_v4, 0.0  ;;  %v1523_v15 = vmul.f32 %v4367_v33, %v4367_v33  ;;  %v4389_v20 = vpop.f32.mrb[19].mxu1 }
 0x119   :  { %8812 = vst [vmem:[#allocation44_spill] sm:$0xff] %v4369_v40  ;;  %v1675_v49 = vsel %vm1228_vm3, %v1520_v25, 0.0  ;;  %v1286_v52 = vsel %vm1228_vm3, %v4369_v40, 0.0  ;;  %v1521_v54 = vmul.f32 %v4369_v40, %v4369_v40  ;;  %v1679_v40 = vsel %vm1228_vm3, %v1522_v43, 0.0 }
 0x11a   :  { %v1676_v62 = vadd.f32 %v1675_v49, %v1674_v36  ;;  %v1287_v63 = vadd.f32 %v1286_v52, %v1285_v29  ;;  %v1290_v36 = vsel %vm1228_vm3, %v4367_v33, 0.0  ;;  %v1681_v17 = vsel %vm1228_vm3, %v1523_v15, 0.0  ;;  %v4407_v33 = vpop.f32.mrb[20].mxu1 }
 0x11b   :  { %v1677_v16 = vsel %vm1228_vm3, %v1521_v54, 0.0 }
 0x11c   :  { %v1289_v25 = vadd.f32 %v1288_v8, %v1287_v63  ;;  %v1678_v13 = vadd.f32 %v1677_v16, %v1676_v62 }
 0x11d   :  { %v4394_v29 = vpop.f32.mrb[32].mxu0 }
 0x11e   :  { %8813 = vst [vmem:[#allocation45_spill] sm:$0xff] %v4394_v29  ;;  %v1680_v49 = vadd.f32 %v1679_v40, %v1678_v13  ;;  %v4396_v52 = vpop.f32.mrb[33].mxu0  ;;  %v1291_v4 = vadd.f32 %v1290_v36, %v1289_v25  ;;  %v1526_v13 = vmul.f32 %v4394_v29, %v4394_v29  ;;  %v4416_v36 = vpop.f32.mrb[21].mxu1 }
 0x11f   :  { %8814 = vst [vmem:[#allocation46_spill] sm:$0xff] %v4396_v52  ;;  %v1292_v54 = vsel %vm1228_vm3, %v4396_v52, 0.0  ;;  %v1524_v63 = vmul.f32 %v4396_v52, %v4396_v52  ;;  %v4403_v62 = vpop.f32.mrb[34].mxu0 }
 0x120   :  { %8815 = vst [vmem:[#allocation47_spill] sm:$0xff] %v4403_v62  ;;  %v1293_v43 = vadd.f32 %v1292_v54, %v1291_v4  ;;  %v1682_v8 = vadd.f32 %v1681_v17, %v1680_v49  ;;  %v4405_v16 = vpop.f32.mrb[35].mxu0  ;;  %v4418_v17 = vpop.f32.mrb[22].mxu1  ;;  %v1296_v49 = vsel %vm1228_vm3, %v4394_v29, 0.0  ;;  %v1527_v54 = vmul.f32 %v4403_v62, %v4403_v62 }
 0x121   :  { %8816 = vst [vmem:[#allocation48_spill] sm:$0xff] %v4405_v16  ;;  %v1683_v40 = vsel %vm1228_vm3, %v1524_v63, 0.0  ;;  %v1294_v15 = vsel %vm1228_vm3, %v4405_v16, 0.0  ;;  %v1525_v25 = vmul.f32 %v4405_v16, %v4405_v16  ;;  %v4425_v2 = vpop.f32.mrb[23].mxu1  ;;  %v1687_v16 = vsel %vm1228_vm3, %v1526_v13, 0.0 }
 0x122   :  { %v1684_v52 = vadd.f32 %v1683_v40, %v1682_v8  ;;  %v1295_v4 = vadd.f32 %v1294_v15, %v1293_v43  ;;  %v1298_v8 = vsel %vm1228_vm3, %v4403_v62, 0.0  ;;  %v1689_v32 = vsel %vm1228_vm3, %v1527_v54, 0.0  ;;  %v4443_v62 = vpop.f32.mrb[24].mxu1 }
 0x123   :  { %v1685_v63 = vsel %vm1228_vm3, %v1525_v25, 0.0 }
 0x124   :  { %v1297_v26 = vadd.f32 %v1296_v49, %v1295_v4  ;;  %v1686_v5 = vadd.f32 %v1685_v63, %v1684_v52 }
 0x125   :  { %v4430_v43 = vpop.f32.mrb[36].mxu0 }
 0x126   :  { %8817 = vst [vmem:[#allocation49_spill] sm:$0xff] %v4430_v43  ;;  %v1688_v40 = vadd.f32 %v1687_v16, %v1686_v5  ;;  %v4432_v15 = vpop.f32.mrb[37].mxu0  ;;  %v1299_v29 = vadd.f32 %v1298_v8, %v1297_v26  ;;  %v1530_v5 = vmul.f32 %v4430_v43, %v4430_v43  ;;  %v4452_v8 = vpop.f32.mrb[25].mxu1 }
 0x127   :  { %8818 = vst [vmem:[#allocation50_spill] sm:$0xff] %v4432_v15  ;;  %v1300_v25 = vsel %vm1228_vm3, %v4432_v15, 0.0  ;;  %v1528_v4 = vmul.f32 %v4432_v15, %v4432_v15  ;;  %v4439_v52 = vpop.f32.mrb[38].mxu0 }
 0x128   :  { %8819 = vst [vmem:[#allocation51_spill] sm:$0xff] %v4439_v52  ;;  %v1301_v13 = vadd.f32 %v1300_v25, %v1299_v29  ;;  %v1690_v49 = vadd.f32 %v1689_v32, %v1688_v40  ;;  %v4441_v63 = vpop.f32.mrb[39].mxu0  ;;  %v4454_v32 = vpop.f32.mrb[26].mxu1  ;;  %v1304_v40 = vsel %vm1228_vm3, %v4430_v43, 0.0  ;;  %v1531_v25 = vmul.f32 %v4439_v52, %v4439_v52 }
 0x129   :  { %8820 = vst [vmem:[#allocation52_spill] sm:$0xff] %v4441_v63  ;;  %v1691_v26 = vsel %vm1228_vm3, %v1528_v4, 0.0  ;;  %v1302_v16 = vsel %vm1228_vm3, %v4441_v63, 0.0  ;;  %v1529_v54 = vmul.f32 %v4441_v63, %v4441_v63  ;;  %v4461_v18 = vpop.f32.mrb[27].mxu1  ;;  %v1695_v63 = vsel %vm1228_vm3, %v1530_v5, 0.0 }
 0x12a   :  { %v1692_v15 = vadd.f32 %v1691_v26, %v1690_v49  ;;  %v1303_v29 = vadd.f32 %v1302_v16, %v1301_v13  ;;  %v1306_v49 = vsel %vm1228_vm3, %v4439_v52, 0.0  ;;  %v1697_v53 = vsel %vm1228_vm3, %v1531_v25, 0.0  ;;  %v4479_v52 = vpop.f32.mrb[28].mxu1 }
 0x12b   :  { %v1693_v4 = vsel %vm1228_vm3, %v1529_v54, 0.0 }
 0x12c   :  { %v1305_v37 = vadd.f32 %v1304_v40, %v1303_v29  ;;  %v1694_v21 = vadd.f32 %v1693_v4, %v1692_v15 }
 0x12d   :  { %v4466_v13 = vpop.f32.mrb[40].mxu0 }
 0x12e   :  { %8821 = vst [vmem:[#allocation53_spill] sm:$0xff] %v4466_v13  ;;  %v1696_v26 = vadd.f32 %v1695_v63, %v1694_v21  ;;  %v4468_v16 = vpop.f32.mrb[41].mxu0  ;;  %v1307_v43 = vadd.f32 %v1306_v49, %v1305_v37  ;;  %v1534_v21 = vmul.f32 %v4466_v13, %v4466_v13  ;;  %v4488_v49 = vpop.f32.mrb[29].mxu1 }
 0x12f   :  { %8822 = vst [vmem:[#allocation54_spill] sm:$0xff] %v4468_v16  ;;  %v1308_v54 = vsel %vm1228_vm3, %v4468_v16, 0.0  ;;  %v1532_v29 = vmul.f32 %v4468_v16, %v4468_v16  ;;  %v4475_v15 = vpop.f32.mrb[42].mxu0 }
 0x130   :  { %8823 = vst [vmem:[#allocation55_spill] sm:$0xff] %v4475_v15  ;;  %v1309_v5 = vadd.f32 %v1308_v54, %v1307_v43  ;;  %v1698_v40 = vadd.f32 %v1697_v53, %v1696_v26  ;;  %v4477_v4 = vpop.f32.mrb[43].mxu0  ;;  %v4490_v53 = vpop.f32.mrb[30].mxu1  ;;  %v1312_v26 = vsel %vm1228_vm3, %v4466_v13, 0.0  ;;  %v1535_v54 = vmul.f32 %v4475_v15, %v4475_v15 }
 0x131   :  { %8824 = vst [vmem:[#allocation56_spill] sm:$0xff] %v4477_v4  ;;  %v1699_v37 = vsel %vm1228_vm3, %v1532_v29, 0.0  ;;  %v1310_v63 = vsel %vm1228_vm3, %v4477_v4, 0.0  ;;  %v1533_v25 = vmul.f32 %v4477_v4, %v4477_v4  ;;  %v4497_v44 = vpop.f32.mrb[31].mxu1  ;;  %v1703_v4 = vsel %vm1228_vm3, %v1534_v21, 0.0 }
 0x132   :  { %v1700_v16 = vadd.f32 %v1699_v37, %v1698_v40  ;;  %v1311_v43 = vadd.f32 %v1310_v63, %v1309_v5  ;;  %v1314_v40 = vsel %vm1228_vm3, %v4475_v15, 0.0  ;;  %v1705_v19 = vsel %vm1228_vm3, %v1535_v54, 0.0  ;;  %v4515_v15 = vpop.f32.mrb[32].mxu1 }
 0x133   :  { %v1701_v29 = vsel %vm1228_vm3, %v1533_v25, 0.0 }
 0x134   :  { %v1313_v57 = vadd.f32 %v1312_v26, %v1311_v43  ;;  %v1702_v46 = vadd.f32 %v1701_v29, %v1700_v16 }
 0x135   :  { %v4502_v5 = vpop.f32.mrb[44].mxu0 }
 0x136   :  { %8825 = vst [vmem:[#allocation57_spill] sm:$0xff] %v4502_v5  ;;  %v1704_v37 = vadd.f32 %v1703_v4, %v1702_v46  ;;  %v4504_v63 = vpop.f32.mrb[45].mxu0  ;;  %v1315_v13 = vadd.f32 %v1314_v40, %v1313_v57  ;;  %v1538_v46 = vmul.f32 %v4502_v5, %v4502_v5  ;;  %v4524_v40 = vpop.f32.mrb[33].mxu1 }
 0x137   :  { %8826 = vst [vmem:[#allocation58_spill] sm:$0xff] %v4504_v63  ;;  %v1316_v25 = vsel %vm1228_vm3, %v4504_v63, 0.0  ;;  %v1536_v43 = vmul.f32 %v4504_v63, %v4504_v63  ;;  %v4511_v16 = vpop.f32.mrb[46].mxu0 }
 0x138   :  { %8827 = vst [vmem:[#allocation59_spill] sm:$0xff] %v4511_v16  ;;  %v1317_v21 = vadd.f32 %v1316_v25, %v1315_v13  ;;  %v1706_v26 = vadd.f32 %v1705_v19, %v1704_v37  ;;  %v4513_v29 = vpop.f32.mrb[47].mxu0  ;;  %v4526_v19 = vpop.f32.mrb[34].mxu1  ;;  %v1320_v37 = vsel %vm1228_vm3, %v4502_v5, 0.0  ;;  %v1539_v25 = vmul.f32 %v4511_v16, %v4511_v16 }
 0x139   :  { %8828 = vst [vmem:[#allocation60_spill] sm:$0xff] %v4513_v29  ;;  %v1707_v57 = vsel %vm1228_vm3, %v1536_v43, 0.0  ;;  %v1318_v4 = vsel %vm1228_vm3, %v4513_v29, 0.0  ;;  %v1537_v54 = vmul.f32 %v4513_v29, %v4513_v29  ;;  %v4533_v12 = vpop.f32.mrb[35].mxu1  ;;  %v1711_v29 = vsel %vm1228_vm3, %v1538_v46, 0.0 }
 0x13a   :  { %v1708_v63 = vadd.f32 %v1707_v57, %v1706_v26  ;;  %v1319_v13 = vadd.f32 %v1318_v4, %v1317_v21  ;;  %v1322_v26 = vsel %vm1228_vm3, %v4511_v16, 0.0  ;;  %v1713_v55 = vsel %vm1228_vm3, %v1539_v25, 0.0  ;;  %v4551_v16 = vpop.f32.mrb[36].mxu1 }
 0x13b   :  { %v1709_v43 = vsel %vm1228_vm3, %v1537_v54, 0.0 }
 0x13c   :  { %v1321_v22 = vadd.f32 %v1320_v37, %v1319_v13  ;;  %v1710_v14 = vadd.f32 %v1709_v43, %v1708_v63 }
 0x13d   :  { %v4538_v21 = vpop.f32.mrb[48].mxu0 }
 0x13e   :  { %8829 = vst [vmem:[#allocation61_spill] sm:$0xff] %v4538_v21  ;;  %v1712_v57 = vadd.f32 %v1711_v29, %v1710_v14  ;;  %v4540_v4 = vpop.f32.mrb[49].mxu0  ;;  %v1323_v5 = vadd.f32 %v1322_v26, %v1321_v22  ;;  %v1542_v14 = vmul.f32 %v4538_v21, %v4538_v21  ;;  %v4560_v26 = vpop.f32.mrb[37].mxu1 }
 0x13f   :  { %8830 = vst [vmem:[#allocation62_spill] sm:$0xff] %v4540_v4  ;;  %v1324_v54 = vsel %vm1228_vm3, %v4540_v4, 0.0  ;;  %v1540_v13 = vmul.f32 %v4540_v4, %v4540_v4  ;;  %v4547_v63 = vpop.f32.mrb[50].mxu0 }
 0x140   :  { %8831 = vst [vmem:[#allocation63_spill] sm:$0xff] %v4547_v63  ;;  %v1325_v46 = vadd.f32 %v1324_v54, %v1323_v5  ;;  %v1714_v37 = vadd.f32 %v1713_v55, %v1712_v57  ;;  %v4549_v43 = vpop.f32.mrb[51].mxu0  ;;  %v4562_v55 = vpop.f32.mrb[38].mxu1  ;;  %v1328_v57 = vsel %vm1228_vm3, %v4538_v21, 0.0  ;;  %v1543_v54 = vmul.f32 %v4547_v63, %v4547_v63 }
 0x141   :  { %8832 = vst [vmem:[#allocation64_spill] sm:$0xff] %v4549_v43  ;;  %v1715_v22 = vsel %vm1228_vm3, %v1540_v13, 0.0  ;;  %v1326_v29 = vsel %vm1228_vm3, %v4549_v43, 0.0  ;;  %v1541_v25 = vmul.f32 %v4549_v43, %v4549_v43  ;;  %v4569_v48 = vpop.f32.mrb[39].mxu1  ;;  %v1719_v43 = vsel %vm1228_vm3, %v1542_v14, 0.0 }
 0x142   :  { %v1716_v4 = vadd.f32 %v1715_v22, %v1714_v37  ;;  %v1327_v5 = vadd.f32 %v1326_v29, %v1325_v46  ;;  %v1330_v37 = vsel %vm1228_vm3, %v4547_v63, 0.0  ;;  %v1721_v31 = vsel %vm1228_vm3, %v1543_v54, 0.0  ;;  %v4587_v63 = vpop.f32.mrb[40].mxu1 }
 0x143   :  { %v1717_v13 = vsel %vm1228_vm3, %v1541_v25, 0.0  ;;  %8837 = vst [vmem:[#allocation69_spill] sm:$0xff] %v4587_v63 }
 0x144   :  { %v1329_v58 = vadd.f32 %v1328_v57, %v1327_v5  ;;  %v1718_v50 = vadd.f32 %v1717_v13, %v1716_v4 }
 0x145   :  { %v4574_v46 = vpop.f32.mrb[52].mxu0 }
 0x146   :  { %8833 = vst [vmem:[#allocation65_spill] sm:$0xff] %v4574_v46  ;;  %v1720_v22 = vadd.f32 %v1719_v43, %v1718_v50  ;;  %v4576_v29 = vpop.f32.mrb[53].mxu0  ;;  %v1331_v21 = vadd.f32 %v1330_v37, %v1329_v58  ;;  %v1546_v50 = vmul.f32 %v4574_v46, %v4574_v46  ;;  %v4596_v37 = vpop.f32.mrb[41].mxu1 }
 0x147   :  { %8834 = vst [vmem:[#allocation66_spill] sm:$0xff] %v4576_v29  ;;  %v1332_v25 = vsel %vm1228_vm3, %v4576_v29, 0.0  ;;  %v1544_v5 = vmul.f32 %v4576_v29, %v4576_v29  ;;  %v4583_v4 = vpop.f32.mrb[54].mxu0 }
 0x148   :  { %8835 = vst [vmem:[#allocation67_spill] sm:$0xff] %v4583_v4  ;;  %v1333_v14 = vadd.f32 %v1332_v25, %v1331_v21  ;;  %v1722_v57 = vadd.f32 %v1721_v31, %v1720_v22  ;;  %v4585_v13 = vpop.f32.mrb[55].mxu0  ;;  %v4598_v31 = vpop.f32.mrb[42].mxu1  ;;  %v1336_v22 = vsel %vm1228_vm3, %v4574_v46, 0.0  ;;  %v1547_v25 = vmul.f32 %v4583_v4, %v4583_v4 }
 0x149   :  { %8836 = vst [vmem:[#allocation68_spill] sm:$0xff] %v4585_v13  ;;  %v1723_v58 = vsel %vm1228_vm3, %v1544_v5, 0.0  ;;  %v1334_v43 = vsel %vm1228_vm3, %v4585_v13, 0.0  ;;  %v1545_v54 = vmul.f32 %v4585_v13, %v4585_v13  ;;  %8838 = vst [vmem:[#allocation70_spill] sm:$0xff] %v4598_v31  ;;  %v4605_v24 = vpop.f32.mrb[43].mxu1  ;;  %v1727_v13 = vsel %vm1228_vm3, %v1546_v50, 0.0 }
 0x14a   :  { %v1724_v29 = vadd.f32 %v1723_v58, %v1722_v57  ;;  %v1335_v21 = vadd.f32 %v1334_v43, %v1333_v14  ;;  %v1338_v57 = vsel %vm1228_vm3, %v4583_v4, 0.0  ;;  %v1729_v9 = vsel %vm1228_vm3, %v1547_v25, 0.0  ;;  %v4623_v4 = vpop.f32.mrb[44].mxu1 }
 0x14b   :  { %v1725_v5 = vsel %vm1228_vm3, %v1545_v54, 0.0  ;;  %8843 = vst [vmem:[#allocation75_spill] sm:$0xff] %v4623_v4 }
 0x14c   :  { %v1337_v34 = vadd.f32 %v1336_v22, %v1335_v21  ;;  %v1726_v27 = vadd.f32 %v1725_v5, %v1724_v29 }
 0x14d   :  { %v4610_v14 = vpop.f32.mrb[56].mxu0 }
 0x14e   :  { %8839 = vst [vmem:[#allocation71_spill] sm:$0xff] %v4610_v14  ;;  %v1728_v58 = vadd.f32 %v1727_v13, %v1726_v27  ;;  %v4612_v43 = vpop.f32.mrb[57].mxu0  ;;  %v1339_v46 = vadd.f32 %v1338_v57, %v1337_v34  ;;  %v1550_v27 = vmul.f32 %v4610_v14, %v4610_v14  ;;  %v4632_v57 = vpop.f32.mrb[45].mxu1 }
 0x14f   :  { %8840 = vst [vmem:[#allocation72_spill] sm:$0xff] %v4612_v43  ;;  %v1340_v54 = vsel %vm1228_vm3, %v4612_v43, 0.0  ;;  %v1548_v21 = vmul.f32 %v4612_v43, %v4612_v43  ;;  %v4619_v29 = vpop.f32.mrb[58].mxu0  ;;  %8844 = vst [vmem:[#allocation76_spill] sm:$0xff] %v4632_v57 }
 0x150   :  { %8841 = vst [vmem:[#allocation73_spill] sm:$0xff] %v4619_v29  ;;  %v1341_v50 = vadd.f32 %v1340_v54, %v1339_v46  ;;  %v1730_v22 = vadd.f32 %v1729_v9, %v1728_v58  ;;  %v4621_v5 = vpop.f32.mrb[59].mxu0  ;;  %v4634_v9 = vpop.f32.mrb[46].mxu1  ;;  %v1344_v58 = vsel %vm1228_vm3, %v4610_v14, 0.0  ;;  %v1551_v54 = vmul.f32 %v4619_v29, %v4619_v29 }
 0x151   :  { %8842 = vst [vmem:[#allocation74_spill] sm:$0xff] %v4621_v5  ;;  %v1731_v34 = vsel %vm1228_vm3, %v1548_v21, 0.0  ;;  %v1342_v13 = vsel %vm1228_vm3, %v4621_v5, 0.0  ;;  %v1549_v25 = vmul.f32 %v4621_v5, %v4621_v5  ;;  %8845 = vst [vmem:[#allocation77_spill] sm:$0xff] %v4634_v9  ;;  %v4641_v6 = vpop.f32.mrb[47].mxu1  ;;  %v1735_v5 = vsel %vm1228_vm3, %v1550_v27, 0.0 }
 0x152   :  { %v1732_v43 = vadd.f32 %v1731_v34, %v1730_v22  ;;  %v1343_v46 = vadd.f32 %v1342_v13, %v1341_v50  ;;  %8846 = vst [vmem:[#allocation78_spill] sm:$0xff] %v4641_v6  ;;  %v1346_v22 = vsel %vm1228_vm3, %v4619_v29, 0.0  ;;  %v1737_v9 = vsel %vm1228_vm3, %v1551_v54, 0.0  ;;  %v4659_v29 = vpop.f32.mrb[48].mxu1 }
 0x153   :  { %v1733_v21 = vsel %vm1228_vm3, %v1549_v25, 0.0  ;;  %8851 = vst [vmem:[#allocation83_spill] sm:$0xff] %v4659_v29  ;;  %v1556_v29 = vmul.f32 %v4236_v30, %v4236_v30 }
 0x154   :  { %v1345_v10 = vadd.f32 %v1344_v58, %v1343_v46  ;;  %v1734_v7 = vadd.f32 %v1733_v21, %v1732_v43 }
 0x155   :  { %v4646_v50 = vpop.f32.mrb[60].mxu0 }
 0x156   :  { %8847 = vst [vmem:[#allocation79_spill] sm:$0xff] %v4646_v50  ;;  %v1736_v34 = vadd.f32 %v1735_v5, %v1734_v7  ;;  %v4648_v13 = vpop.f32.mrb[61].mxu0  ;;  %v1347_v14 = vadd.f32 %v1346_v22, %v1345_v10  ;;  %v1554_v7 = vmul.f32 %v4646_v50, %v4646_v50  ;;  %v4668_v22 = vpop.f32.mrb[49].mxu1 }
 0x157   :  { %8848 = vst [vmem:[#allocation80_spill] sm:$0xff] %v4648_v13  ;;  %v1348_v25 = vsel %vm1228_vm3, %v4648_v13, 0.0  ;;  %v1552_v46 = vmul.f32 %v4648_v13, %v4648_v13  ;;  %v4655_v43 = vpop.f32.mrb[62].mxu0  ;;  %8852 = vst [vmem:[#allocation84_spill] sm:$0xff] %v4668_v22  ;;  %v1557_v22 = vmul.f32 %v4245_v39, %v4245_v39 }
 0x158   :  { %8849 = vst [vmem:[#allocation81_spill] sm:$0xff] %v4655_v43  ;;  %v1349_v27 = vadd.f32 %v1348_v25, %v1347_v14  ;;  %v1738_v58 = vadd.f32 %v1737_v9, %v1736_v34  ;;  %v4657_v21 = vpop.f32.mrb[63].mxu0  ;;  %v4670_v9 = vpop.f32.mrb[50].mxu1  ;;  %v1352_v34 = vsel %vm1228_vm3, %v4646_v50, 0.0  ;;  %v1555_v25 = vmul.f32 %v4655_v43, %v4655_v43 }
 0x159   :  { %8850 = vst [vmem:[#allocation82_spill] sm:$0xff] %v4657_v21  ;;  %v1739_v10 = vsel %vm1228_vm3, %v1552_v46, 0.0  ;;  %v1350_v5 = vsel %vm1228_vm3, %v4657_v21, 0.0  ;;  %v1553_v54 = vmul.f32 %v4657_v21, %v4657_v21  ;;  %8853 = vst [vmem:[#allocation85_spill] sm:$0xff] %v4670_v9  ;;  %v4679_v4 = vpop.f32.mrb[51].mxu1 }
 0x15a   :  { %v1740_v13 = vadd.f32 %v1739_v10, %v1738_v58  ;;  %v1351_v14 = vadd.f32 %v1350_v5, %v1349_v27  ;;  %8854 = vst [vmem:[#allocation86_spill] sm:$0xff] %v4679_v4  ;;  %v1743_v58 = vsel %vm1228_vm3, %v1554_v7, 0.0  ;;  %v1354_v27 = vsel %vm1228_vm3, %v4655_v43, 0.0 }
 0x15b   :  { %v1741_v46 = vsel %vm1228_vm3, %v1553_v54, 0.0  ;;  %v1356_v10 = vsel %vm1228_vm3, %v4236_v30, 0.0  ;;  %v1745_v9 = vsel %vm1228_vm3, %v1555_v25, 0.0  ;;  %v1747_v54 = vsel %vm1228_vm3, %v1556_v29, 0.0 }
 0x15c   :  { %v1353_v21 = vadd.f32 %v1352_v34, %v1351_v14  ;;  %v1742_v6 = vadd.f32 %v1741_v46, %v1740_v13  ;;  %v4690_v13 = vpop.f32.mrb[52].mxu1  ;;  %v1558_v7 = vmul.f32 %v4227_v23, %v4227_v23  ;;  %v1358_v34 = vsel %vm1228_vm3, %v4245_v39, 0.0 }
 0x15d   :  { %v4696_v46 = vpop.f32.mrb[53].mxu1  ;;  %v1360_v29 = vsel %vm1228_vm3, %v4227_v23, 0.0  ;;  %v1561_v30 = vmul.f32 %v4281_v11, %v4281_v11 }
 0x15e   :  { %v1355_v5 = vadd.f32 %v1354_v27, %v1353_v21  ;;  %v1744_v50 = vadd.f32 %v1743_v58, %v1742_v6  ;;  %v4698_v25 = vpop.f32.mrb[54].mxu1  ;;  %v1560_v58 = vmul.f32 %v4272_v0, %v4272_v0 }
 0x15f   :  { %v4707_v27 = vpop.f32.mrb[55].mxu1 }
 0x160   :  { %v1746_v4 = vadd.f32 %v1745_v9, %v1744_v50  ;;  %v1357_v14 = vadd.f32 %v1356_v10, %v1355_v5  ;;  %v1559_v50 = vmul.f32 %v4238_v35, %v4238_v35  ;;  %v1749_v9 = vsel %vm1228_vm3, %v1557_v22, 0.0 }
 0x161   :  { %v1755_v22 = vsel %vm1228_vm3, %v1560_v58, 0.0  ;;  %v1368_v58 = vsel %vm1228_vm3, %v4263_v59, 0.0 }
 0x162   :  { %v1748_v6 = vadd.f32 %v1747_v54, %v1746_v4  ;;  %v1359_v21 = vadd.f32 %v1358_v34, %v1357_v14  ;;  %v1751_v4 = vsel %vm1228_vm3, %v1558_v7, 0.0  ;;  %v1362_v54 = vsel %vm1228_vm3, %v4238_v35, 0.0 }
 0x163   :  { %v1364_v14 = vsel %vm1228_vm3, %v4272_v0, 0.0  ;;  %v1753_v39 = vsel %vm1228_vm3, %v1559_v50, 0.0  ;;  %v1562_v7 = vmul.f32 %v4263_v59, %v4263_v59  ;;  %v1565_v0 = vmul.f32 %v4317_v60, %v4317_v60 }
 0x164   :  { %v1361_v10 = vadd.f32 %v1360_v29, %v1359_v21  ;;  %v1750_v5 = vadd.f32 %v1749_v9, %v1748_v6  ;;  %v4718_v6 = vpop.f32.mrb[56].mxu1  ;;  %v1366_v29 = vsel %vm1228_vm3, %v4281_v11, 0.0 }
 0x165   :  { %8855 = vst [vmem:[#allocation87_spill] sm:$0xff] %v4718_v6  ;;  %v4724_v9 = vpop.f32.mrb[57].mxu1 }
 0x166   :  { %v1752_v34 = vadd.f32 %v1751_v4, %v1750_v5  ;;  %v1363_v23 = vadd.f32 %v1362_v54, %v1361_v10  ;;  %v4726_v50 = vpop.f32.mrb[58].mxu1  ;;  %v1564_v4 = vmul.f32 %v4308_v45, %v4308_v45 }
 0x167   :  { %8856 = vst [vmem:[#allocation88_spill] sm:$0xff] %v4726_v50  ;;  %v4735_v54 = vpop.f32.mrb[59].mxu1 }
 0x168   :  { %v1365_v43 = vadd.f32 %v1364_v14, %v1363_v23  ;;  %v1754_v21 = vadd.f32 %v1753_v39, %v1752_v34  ;;  %v1563_v23 = vmul.f32 %v4274_v3, %v4274_v3  ;;  %v1757_v39 = vsel %vm1228_vm3, %v1561_v30, 0.0 }
 0x169   :  { %v1763_v30 = vsel %vm1228_vm3, %v1564_v4, 0.0  ;;  %v1376_v4 = vsel %vm1228_vm3, %v4299_v38, 0.0 }
 0x16a   :  { %v1756_v10 = vadd.f32 %v1755_v22, %v1754_v21  ;;  %v1367_v5 = vadd.f32 %v1366_v29, %v1365_v43  ;;  %v1759_v22 = vsel %vm1228_vm3, %v1562_v7, 0.0  ;;  %v1370_v43 = vsel %vm1228_vm3, %v4274_v3, 0.0 }
 0x16b   :  { %v1372_v21 = vsel %vm1228_vm3, %v4308_v45, 0.0  ;;  %v1761_v11 = vsel %vm1228_vm3, %v1563_v23, 0.0  ;;  %v1566_v7 = vmul.f32 %v4299_v38, %v4299_v38  ;;  %v1569_v45 = vmul.f32 %v4353_v56, %v4353_v56 }
 0x16c   :  { %v1369_v14 = vadd.f32 %v1368_v58, %v1367_v5  ;;  %v1758_v34 = vadd.f32 %v1757_v39, %v1756_v10  ;;  %v4746_v10 = vpop.f32.mrb[60].mxu1  ;;  %v1374_v58 = vsel %vm1228_vm3, %v4317_v60, 0.0 }
 0x16d   :  { %8857 = vst [vmem:[#allocation89_spill] sm:$0xff] %v4746_v10  ;;  %v4752_v39 = vpop.f32.mrb[61].mxu1 }
 0x16e   :  { %v1760_v29 = vadd.f32 %v1759_v22, %v1758_v34  ;;  %v1371_v59 = vadd.f32 %v1370_v43, %v1369_v14  ;;  %8858 = vst [vmem:[#allocation90_spill] sm:$0xff] %v4752_v39  ;;  %v4754_v23 = vpop.f32.mrb[62].mxu1  ;;  %v1568_v22 = vmul.f32 %v4344_v41, %v4344_v41 }
 0x16f   :  { %8859 = vst [vmem:[#allocation91_spill] sm:$0xff] %v4754_v23  ;;  %v4763_v43 = vpop.f32.mrb[63].mxu1 }
 0x170   :  { %v1373_v35 = vadd.f32 %v1372_v21, %v1371_v59  ;;  %v1762_v5 = vadd.f32 %v1761_v11, %v1760_v29  ;;  %v1567_v59 = vmul.f32 %v4310_v51, %v4310_v51  ;;  %v1765_v11 = vsel %vm1228_vm3, %v1565_v0, 0.0  ;;  %8860 = vst [vmem:[#allocation92_spill] sm:$0xff] %v4763_v43 }
 0x171   :  { %v1771_v0 = vsel %vm1228_vm3, %v1568_v22, 0.0  ;;  %v1773_v22 = vsel %vm1228_vm3, %v1569_v45, 0.0  ;;  %v1573_v45 = vmul.f32 %v4389_v20, %v4389_v20 }
 0x172   :  { %v1764_v14 = vadd.f32 %v1763_v30, %v1762_v5  ;;  %v1375_v34 = vadd.f32 %v1374_v58, %v1373_v35  ;;  %v1767_v30 = vsel %vm1228_vm3, %v1566_v7, 0.0  ;;  %v1378_v35 = vsel %vm1228_vm3, %v4310_v51, 0.0 }
 0x173   :  { %v1380_v5 = vsel %vm1228_vm3, %v4344_v41, 0.0  ;;  %v1769_v60 = vsel %vm1228_vm3, %v1567_v59, 0.0  ;;  %v1570_v7 = vmul.f32 %v4335_v28, %v4335_v28  ;;  %v1571_v59 = vmul.f32 %v4346_v47, %v4346_v47 }
 0x174   :  { %v1377_v21 = vadd.f32 %v1376_v4, %v1375_v34  ;;  %v1766_v29 = vadd.f32 %v1765_v11, %v1764_v14  ;;  %v1382_v14 = vsel %vm1228_vm3, %v4353_v56, 0.0 }
 0x176   :  { %v1768_v58 = vadd.f32 %v1767_v30, %v1766_v29  ;;  %v1379_v38 = vadd.f32 %v1378_v35, %v1377_v21  ;;  %v1384_v21 = vsel %vm1228_vm3, %v4335_v28, 0.0  ;;  %v1775_v30 = vsel %vm1228_vm3, %v1570_v7, 0.0 }
 0x177   :  { %v1386_v35 = vsel %vm1228_vm3, %v4346_v47, 0.0  ;;  %v1574_v7 = vmul.f32 %v4371_v42, %v4371_v42 }
 0x178   :  { %v1381_v3 = vadd.f32 %v1380_v5, %v1379_v38  ;;  %v1770_v34 = vadd.f32 %v1769_v60, %v1768_v58  ;;  %v1572_v38 = vmul.f32 %v4380_v61, %v4380_v61 }
 0x17a   :  { %v1772_v4 = vadd.f32 %v1771_v0, %v1770_v34  ;;  %v1383_v11 = vadd.f32 %v1382_v14, %v1381_v3  ;;  %v1388_v3 = vsel %vm1228_vm3, %v4380_v61, 0.0  ;;  %v1777_v0 = vsel %vm1228_vm3, %v1571_v59, 0.0 }
 0x17b   :  { %v1779_v34 = vsel %vm1228_vm3, %v1572_v38, 0.0  ;;  %v1575_v59 = vmul.f32 %v4382_v1, %v4382_v1  ;;  %v1781_v38 = vsel %vm1228_vm3, %v1573_v45, 0.0  ;;  %v1577_v45 = vmul.f32 %v4425_v2, %v4425_v2 }
 0x17c   :  { %v1385_v60 = vadd.f32 %v1384_v21, %v1383_v11  ;;  %v1774_v29 = vadd.f32 %v1773_v22, %v1772_v4  ;;  %v1390_v4 = vsel %vm1228_vm3, %v4389_v20, 0.0 }
 0x17e   :  { %v1776_v5 = vadd.f32 %v1775_v30, %v1774_v29  ;;  %v1387_v58 = vadd.f32 %v1386_v35, %v1385_v60  ;;  %v1392_v60 = vsel %vm1228_vm3, %v4371_v42, 0.0  ;;  %v1576_v29 = vmul.f32 %v4416_v36, %v4416_v36 }
 0x180   :  { %v1389_v14 = vadd.f32 %v1388_v3, %v1387_v58  ;;  %v1778_v11 = vadd.f32 %v1777_v0, %v1776_v5  ;;  %v1783_v3 = vsel %vm1228_vm3, %v1574_v7, 0.0  ;;  %v1394_v5 = vsel %vm1228_vm3, %v4382_v1, 0.0 }
 0x181   :  { %v1396_v58 = vsel %vm1228_vm3, %v4416_v36, 0.0  ;;  %v1578_v7 = vmul.f32 %v4407_v33, %v4407_v33 }
 0x182   :  { %v1780_v21 = vadd.f32 %v1779_v34, %v1778_v11  ;;  %v1391_v22 = vadd.f32 %v1390_v4, %v1389_v14  ;;  %v1785_v14 = vsel %vm1228_vm3, %v1575_v59, 0.0  ;;  %v1787_v11 = vsel %vm1228_vm3, %v1576_v29, 0.0 }
 0x183   :  { %v1579_v59 = vmul.f32 %v4418_v17, %v4418_v17  ;;  %v1789_v29 = vsel %vm1228_vm3, %v1577_v45, 0.0  ;;  %v1581_v45 = vmul.f32 %v4461_v18, %v4461_v18 }
 0x184   :  { %v1393_v30 = vadd.f32 %v1392_v60, %v1391_v22  ;;  %v1782_v35 = vadd.f32 %v1781_v38, %v1780_v21  ;;  %v1398_v21 = vsel %vm1228_vm3, %v4425_v2, 0.0 }
 0x186   :  { %v1784_v0 = vadd.f32 %v1783_v3, %v1782_v35  ;;  %v1395_v34 = vadd.f32 %v1394_v5, %v1393_v30  ;;  %v1400_v30 = vsel %vm1228_vm3, %v4407_v33, 0.0  ;;  %v1580_v35 = vmul.f32 %v4452_v8, %v4452_v8 }
 0x188   :  { %v1397_v4 = vadd.f32 %v1396_v58, %v1395_v34  ;;  %v1786_v22 = vadd.f32 %v1785_v14, %v1784_v0  ;;  %v1791_v58 = vsel %vm1228_vm3, %v1578_v7, 0.0  ;;  %v1402_v0 = vsel %vm1228_vm3, %v4418_v17, 0.0 }
 0x189   :  { %v1404_v34 = vsel %vm1228_vm3, %v4452_v8, 0.0  ;;  %v1582_v7 = vmul.f32 %v4443_v62, %v4443_v62 }
 0x18a   :  { %v1788_v60 = vadd.f32 %v1787_v11, %v1786_v22  ;;  %v1399_v38 = vadd.f32 %v1398_v21, %v1397_v4  ;;  %v1793_v4 = vsel %vm1228_vm3, %v1579_v59, 0.0  ;;  %v1795_v22 = vsel %vm1228_vm3, %v1580_v35, 0.0 }
 0x18b   :  { %v1583_v59 = vmul.f32 %v4454_v32, %v4454_v32  ;;  %v1797_v35 = vsel %vm1228_vm3, %v1581_v45, 0.0  ;;  %v1585_v45 = vmul.f32 %v4497_v44, %v4497_v44 }
 0x18c   :  { %v1401_v3 = vadd.f32 %v1400_v30, %v1399_v38  ;;  %v1790_v5 = vadd.f32 %v1789_v29, %v1788_v60  ;;  %v1406_v60 = vsel %vm1228_vm3, %v4461_v18, 0.0 }
 0x18e   :  { %v1792_v14 = vadd.f32 %v1791_v58, %v1790_v5  ;;  %v1403_v11 = vadd.f32 %v1402_v0, %v1401_v3  ;;  %v1408_v3 = vsel %vm1228_vm3, %v4443_v62, 0.0  ;;  %v1584_v5 = vmul.f32 %v4488_v49, %v4488_v49 }
 0x190   :  { %v1405_v21 = vadd.f32 %v1404_v34, %v1403_v11  ;;  %v1794_v38 = vadd.f32 %v1793_v4, %v1792_v14  ;;  %v1799_v34 = vsel %vm1228_vm3, %v1582_v7, 0.0  ;;  %v1410_v14 = vsel %vm1228_vm3, %v4454_v32, 0.0 }
 0x191   :  { %v1412_v11 = vsel %vm1228_vm3, %v4488_v49, 0.0  ;;  %v1586_v7 = vmul.f32 %v4479_v52, %v4479_v52 }
 0x192   :  { %v1796_v30 = vadd.f32 %v1795_v22, %v1794_v38  ;;  %v1407_v29 = vadd.f32 %v1406_v60, %v1405_v21  ;;  %v1801_v21 = vsel %vm1228_vm3, %v1583_v59, 0.0  ;;  %v1803_v38 = vsel %vm1228_vm3, %v1584_v5, 0.0 }
 0x193   :  { %v1587_v59 = vmul.f32 %v4490_v53, %v4490_v53  ;;  %v1805_v5 = vsel %vm1228_vm3, %v1585_v45, 0.0  ;;  %v1589_v45 = vmul.f32 %v4533_v12, %v4533_v12 }
 0x194   :  { %v1409_v58 = vadd.f32 %v1408_v3, %v1407_v29  ;;  %v1798_v0 = vadd.f32 %v1797_v35, %v1796_v30  ;;  %v1414_v30 = vsel %vm1228_vm3, %v4497_v44, 0.0 }
 0x196   :  { %v1800_v4 = vadd.f32 %v1799_v34, %v1798_v0  ;;  %v1411_v22 = vadd.f32 %v1410_v14, %v1409_v58  ;;  %v1416_v58 = vsel %vm1228_vm3, %v4479_v52, 0.0  ;;  %v1588_v0 = vmul.f32 %v4524_v40, %v4524_v40 }
 0x198   :  { %v1413_v60 = vadd.f32 %v1412_v11, %v1411_v22  ;;  %v1802_v29 = vadd.f32 %v1801_v21, %v1800_v4  ;;  %v1807_v11 = vsel %vm1228_vm3, %v1586_v7, 0.0  ;;  %v1418_v4 = vsel %vm1228_vm3, %v4490_v53, 0.0 }
 0x199   :  { %v1420_v22 = vsel %vm1228_vm3, %v4524_v40, 0.0  ;;  %v1590_v7 = vmul.f32 %v4515_v15, %v4515_v15 }
 0x19a   :  { %v1804_v3 = vadd.f32 %v1803_v38, %v1802_v29  ;;  %v1415_v35 = vadd.f32 %v1414_v30, %v1413_v60  ;;  %v1809_v60 = vsel %vm1228_vm3, %v1587_v59, 0.0  ;;  %v1811_v29 = vsel %vm1228_vm3, %v1588_v0, 0.0 }
 0x19b   :  { %v1591_v59 = vmul.f32 %v4526_v19, %v4526_v19  ;;  %v1813_v0 = vsel %vm1228_vm3, %v1589_v45, 0.0  ;;  %v1593_v45 = vmul.f32 %v4569_v48, %v4569_v48 }
 0x19c   :  { %v1417_v34 = vadd.f32 %v1416_v58, %v1415_v35  ;;  %v1806_v14 = vadd.f32 %v1805_v5, %v1804_v3  ;;  %v1422_v3 = vsel %vm1228_vm3, %v4533_v12, 0.0 }
 0x19e   :  { %v1808_v21 = vadd.f32 %v1807_v11, %v1806_v14  ;;  %v1419_v38 = vadd.f32 %v1418_v4, %v1417_v34  ;;  %v1424_v34 = vsel %vm1228_vm3, %v4515_v15, 0.0  ;;  %v1592_v14 = vmul.f32 %v4560_v26, %v4560_v26 }
 0x1a0   :  { %v1421_v30 = vadd.f32 %v1420_v22, %v1419_v38  ;;  %v1810_v35 = vadd.f32 %v1809_v60, %v1808_v21  ;;  %v1815_v22 = vsel %vm1228_vm3, %v1590_v7, 0.0  ;;  %v1426_v21 = vsel %vm1228_vm3, %v4526_v19, 0.0 }
 0x1a1   :  { %v1428_v38 = vsel %vm1228_vm3, %v4560_v26, 0.0  ;;  %v1594_v7 = vmul.f32 %v4551_v16, %v4551_v16 }
 0x1a2   :  { %v1812_v58 = vadd.f32 %v1811_v29, %v1810_v35  ;;  %v1423_v5 = vadd.f32 %v1422_v3, %v1421_v30  ;;  %v1817_v30 = vsel %vm1228_vm3, %v1591_v59, 0.0  ;;  %v1819_v35 = vsel %vm1228_vm3, %v1592_v14, 0.0 }
 0x1a3   :  { %v1595_v59 = vmul.f32 %v4562_v55, %v4562_v55  ;;  %v1821_v14 = vsel %vm1228_vm3, %v1593_v45, 0.0  ;;  %v1597_v45 = vmul.f32 %v4605_v24, %v4605_v24 }
 0x1a4   :  { %v1425_v11 = vadd.f32 %v1424_v34, %v1423_v5  ;;  %v1814_v4 = vadd.f32 %v1813_v0, %v1812_v58  ;;  %v1430_v58 = vsel %vm1228_vm3, %v4569_v48, 0.0 }
 0x1a6   :  { %v1816_v60 = vadd.f32 %v1815_v22, %v1814_v4  ;;  %v1427_v29 = vadd.f32 %v1426_v21, %v1425_v11  ;;  %v1432_v11 = vsel %vm1228_vm3, %v4551_v16, 0.0  ;;  %v1596_v4 = vmul.f32 %v4596_v37, %v4596_v37 }
 0x1a8   :  { %v1429_v3 = vadd.f32 %v1428_v38, %v1427_v29  ;;  %v1818_v5 = vadd.f32 %v1817_v30, %v1816_v60  ;;  %v1823_v38 = vsel %vm1228_vm3, %v1594_v7, 0.0  ;;  %v1434_v60 = vsel %vm1228_vm3, %v4562_v55, 0.0 }
 0x1a9   :  { %v1436_v29 = vsel %vm1228_vm3, %v4596_v37, 0.0  ;;  %v1598_v7 = vmul.f32 %v4587_v63, %v4587_v63 }
 0x1aa   :  { %v1820_v34 = vadd.f32 %v1819_v35, %v1818_v5  ;;  %v1431_v0 = vadd.f32 %v1430_v58, %v1429_v3  ;;  %v1825_v3 = vsel %vm1228_vm3, %v1595_v59, 0.0  ;;  %v1827_v5 = vsel %vm1228_vm3, %v1596_v4, 0.0 }
 0x1ab   :  { %v1599_v59 = vmul.f32 %v4598_v31, %v4598_v31  ;;  %v1829_v4 = vsel %vm1228_vm3, %v1597_v45, 0.0  ;;  %v8861_v45 = vld [vmem:[#allocation78_spill] sm:$0xff] }
 0x1ac   :  { %v1433_v22 = vadd.f32 %v1432_v11, %v1431_v0  ;;  %v1822_v21 = vadd.f32 %v1821_v14, %v1820_v34  ;;  %v1438_v34 = vsel %vm1228_vm3, %v4605_v24, 0.0 }
 0x1ae   :  { %v1824_v30 = vadd.f32 %v1823_v38, %v1822_v21  ;;  %v1435_v35 = vadd.f32 %v1434_v60, %v1433_v22  ;;  %v1440_v22 = vsel %vm1228_vm3, %v4587_v63, 0.0  ;;  %v1600_v21 = vmul.f32 %v4632_v57, %v4632_v57 }
 0x1b0   :  { %v1437_v58 = vadd.f32 %v1436_v29, %v1435_v35  ;;  %v1826_v0 = vadd.f32 %v1825_v3, %v1824_v30  ;;  %v1831_v29 = vsel %vm1228_vm3, %v1598_v7, 0.0  ;;  %v1442_v30 = vsel %vm1228_vm3, %v4598_v31, 0.0 }
 0x1b1   :  { %v1444_v35 = vsel %vm1228_vm3, %v4632_v57, 0.0 }
 0x1b2   :  { %v1828_v11 = vadd.f32 %v1827_v5, %v1826_v0  ;;  %v1439_v14 = vadd.f32 %v1438_v34, %v1437_v58  ;;  %v1833_v58 = vsel %vm1228_vm3, %v1599_v59, 0.0  ;;  %v1835_v0 = vsel %vm1228_vm3, %v1600_v21, 0.0 }
 0x1b3   :  { %v1601_v34 = vmul.f32 %v8861_v45, %v8861_v45 }
 0x1b4   :  { %v1441_v38 = vadd.f32 %v1440_v22, %v1439_v14  ;;  %v1830_v60 = vadd.f32 %v1829_v4, %v1828_v11  ;;  %v8862_v11 = vld [vmem:[#allocation75_spill] sm:$0xff]  ;;  %v1446_v22 = vsel %vm1228_vm3, %v8861_v45, 0.0 }
 0x1b5   :  { %v1602_v7 = vmul.f32 %v8862_v11, %v8862_v11  ;;  %v1837_v21 = vsel %vm1228_vm3, %v1601_v34, 0.0  ;;  %v8865_v34 = vld [vmem:[#allocation86_spill] sm:$0xff] }
 0x1b6   :  { %v1832_v3 = vadd.f32 %v1831_v29, %v1830_v60  ;;  %v1443_v5 = vadd.f32 %v1442_v30, %v1441_v38  ;;  %v1448_v38 = vsel %vm1228_vm3, %v8862_v11, 0.0  ;;  %v8863_v60 = vld [vmem:[#allocation77_spill] sm:$0xff]  ;;  %v8864_v29 = vld [vmem:[#allocation84_spill] sm:$0xff]  ;;  %v1605_v45 = vmul.f32 %v8865_v34, %v8865_v34 }
 0x1b7   :  { %v1603_v59 = vmul.f32 %v8863_v60, %v8863_v60  ;;  %v1604_v30 = vmul.f32 %v8864_v29, %v8864_v29 }
 0x1b8   :  { %v1445_v63 = vadd.f32 %v1444_v35, %v1443_v5  ;;  %v1834_v14 = vadd.f32 %v1833_v58, %v1832_v3  ;;  %v1839_v5 = vsel %vm1228_vm3, %v1602_v7, 0.0  ;;  %v1450_v58 = vsel %vm1228_vm3, %v8863_v60, 0.0 }
 0x1b9   :  { %v1843_v11 = vsel %vm1228_vm3, %v1604_v30, 0.0  ;;  %v1845_v30 = vsel %vm1228_vm3, %v1605_v45, 0.0  ;;  %v1609_v45 = vmul.f32 %v4707_v27, %v4707_v27 }
 0x1ba   :  { %v1836_v4 = vadd.f32 %v1835_v0, %v1834_v14  ;;  %v1447_v31 = vadd.f32 %v1446_v22, %v1445_v63  ;;  %v1452_v63 = vsel %vm1228_vm3, %v8864_v29, 0.0  ;;  %v1841_v22 = vsel %vm1228_vm3, %v1603_v59, 0.0 }
 0x1bc   :  { %v1449_v35 = vadd.f32 %v1448_v38, %v1447_v31  ;;  %v1838_v3 = vadd.f32 %v1837_v21, %v1836_v4  ;;  %v8866_v4 = vld [vmem:[#allocation83_spill] sm:$0xff]  ;;  %v1454_v38 = vsel %vm1228_vm3, %v8865_v34, 0.0 }
 0x1bd   :  { %v1606_v7 = vmul.f32 %v8866_v4, %v8866_v4 }
 0x1be   :  { %v1840_v0 = vadd.f32 %v1839_v5, %v1838_v3  ;;  %v1451_v14 = vadd.f32 %v1450_v58, %v1449_v35  ;;  %v1456_v35 = vsel %vm1228_vm3, %v8866_v4, 0.0  ;;  %v8867_v3 = vld [vmem:[#allocation85_spill] sm:$0xff]  ;;  %v1608_v5 = vmul.f32 %v4696_v46, %v4696_v46 }
 0x1bf   :  { %v1607_v59 = vmul.f32 %v8867_v3, %v8867_v3 }
 0x1c0   :  { %v1453_v57 = vadd.f32 %v1452_v63, %v1451_v14  ;;  %v1842_v31 = vadd.f32 %v1841_v22, %v1840_v0  ;;  %v1847_v0 = vsel %vm1228_vm3, %v1606_v7, 0.0  ;;  %v1458_v14 = vsel %vm1228_vm3, %v8867_v3, 0.0 }
 0x1c1   :  { %v1610_v7 = vmul.f32 %v4690_v13, %v4690_v13 }
 0x1c2   :  { %v1844_v21 = vadd.f32 %v1843_v11, %v1842_v31  ;;  %v1455_v60 = vadd.f32 %v1454_v38, %v1453_v57  ;;  %v1460_v57 = vsel %vm1228_vm3, %v4696_v46, 0.0  ;;  %v1849_v31 = vsel %vm1228_vm3, %v1607_v59, 0.0 }
 0x1c3   :  { %v1851_v38 = vsel %vm1228_vm3, %v1608_v5, 0.0  ;;  %v1611_v59 = vmul.f32 %v4698_v25, %v4698_v25  ;;  %v1853_v5 = vsel %vm1228_vm3, %v1609_v45, 0.0  ;;  %v1613_v45 = vmul.f32 %v4735_v54, %v4735_v54 }
 0x1c4   :  { %v1457_v58 = vadd.f32 %v1456_v35, %v1455_v60  ;;  %v1846_v63 = vadd.f32 %v1845_v30, %v1844_v21  ;;  %v1462_v21 = vsel %vm1228_vm3, %v4707_v27, 0.0 }
 0x1c6   :  { %v1848_v11 = vadd.f32 %v1847_v0, %v1846_v63  ;;  %v1459_v22 = vadd.f32 %v1458_v14, %v1457_v58  ;;  %v1464_v58 = vsel %vm1228_vm3, %v4690_v13, 0.0  ;;  %v1612_v63 = vmul.f32 %v4724_v9, %v4724_v9 }
 0x1c8   :  { %v1461_v4 = vadd.f32 %v1460_v57, %v1459_v22  ;;  %v1850_v60 = vadd.f32 %v1849_v31, %v1848_v11  ;;  %v1855_v57 = vsel %vm1228_vm3, %v1610_v7, 0.0  ;;  %v1466_v11 = vsel %vm1228_vm3, %v4698_v25, 0.0 }
 0x1c9   :  { %v1614_v7 = vmul.f32 %v4718_v6, %v4718_v6 }
 0x1ca   :  { %v1852_v35 = vadd.f32 %v1851_v38, %v1850_v60  ;;  %v1463_v30 = vadd.f32 %v1462_v21, %v1461_v4  ;;  %v1468_v4 = vsel %vm1228_vm3, %v4724_v9, 0.0  ;;  %v1857_v38 = vsel %vm1228_vm3, %v1611_v59, 0.0 }
 0x1cb   :  { %v1859_v60 = vsel %vm1228_vm3, %v1612_v63, 0.0  ;;  %v1615_v59 = vmul.f32 %v4726_v50, %v4726_v50  ;;  %v1861_v63 = vsel %vm1228_vm3, %v1613_v45, 0.0  ;;  %v1617_v45 = vmul.f32 %v4763_v43, %v4763_v43 }
 0x1cc   :  { %v1465_v0 = vadd.f32 %v1464_v58, %v1463_v30  ;;  %v1854_v14 = vadd.f32 %v1853_v5, %v1852_v35  ;;  %v1470_v35 = vsel %vm1228_vm3, %v4735_v54, 0.0 }
 0x1ce   :  { %v1856_v22 = vadd.f32 %v1855_v57, %v1854_v14  ;;  %v1467_v31 = vadd.f32 %v1466_v11, %v1465_v0  ;;  %v1472_v0 = vsel %vm1228_vm3, %v4718_v6, 0.0  ;;  %v1616_v14 = vmul.f32 %v4752_v39, %v4752_v39 }
 0x1d0   :  { %v1469_v21 = vadd.f32 %v1468_v4, %v1467_v31  ;;  %v1858_v30 = vadd.f32 %v1857_v38, %v1856_v22  ;;  %v1863_v4 = vsel %vm1228_vm3, %v1614_v7, 0.0  ;;  %v1474_v22 = vsel %vm1228_vm3, %v4726_v50, 0.0 }
 0x1d1   :  { %v1476_v31 = vsel %vm1228_vm3, %v4752_v39, 0.0  ;;  %v1618_v7 = vmul.f32 %v4746_v10, %v4746_v10 }
 0x1d2   :  { %v1860_v58 = vadd.f32 %v1859_v60, %v1858_v30  ;;  %v1471_v5 = vadd.f32 %v1470_v35, %v1469_v21  ;;  %v1865_v21 = vsel %vm1228_vm3, %v1615_v59, 0.0  ;;  %v1867_v30 = vsel %vm1228_vm3, %v1616_v14, 0.0 }
 0x1d3   :  { %v1619_v59 = vmul.f32 %v4754_v23, %v4754_v23  ;;  %v1869_v14 = vsel %vm1228_vm3, %v1617_v45, 0.0 }
 0x1d4   :  { %v1473_v57 = vadd.f32 %v1472_v0, %v1471_v5  ;;  %v1862_v11 = vadd.f32 %v1861_v63, %v1860_v58  ;;  %v1478_v58 = vsel %vm1228_vm3, %v4763_v43, 0.0 }
 0x1d6   :  { %v1864_v38 = vadd.f32 %v1863_v4, %v1862_v11  ;;  %v1475_v60 = vadd.f32 %v1474_v22, %v1473_v57  ;;  %v1480_v57 = vsel %vm1228_vm3, %v4746_v10, 0.0  ;;  %v1871_v22 = vsel %vm1228_vm3, %v1618_v7, 0.0 }
 0x1d8   :  { %v1477_v35 = vadd.f32 %v1476_v31, %v1475_v60  ;;  %v1866_v5 = vadd.f32 %v1865_v21, %v1864_v38  ;;  %v1482_v31 = vsel %vm1228_vm3, %v4754_v23, 0.0  ;;  %v1873_v21 = vsel %vm1228_vm3, %v1619_v59, 0.0 }
 0x1d9   :  { %v1890_v59 = vlaneseq }
 0x1da   :  { %v1868_v0 = vadd.f32 %v1867_v30, %v1866_v5  ;;  %v1479_v63 = vadd.f32 %v1478_v58, %v1477_v35 }
 0x1dc   :  { %v1481_v11 = vadd.f32 %v1480_v57, %v1479_v63  ;;  %v1870_v4 = vadd.f32 %v1869_v14, %v1868_v0 }
 0x1de   :  { %v1483_v38 = vadd.f32 %v1482_v31, %v1481_v11  ;;  %v1872_v60 = vadd.f32 %v1871_v22, %v1870_v4  ;;  %v5027_v22 = vshrl.u32 %v1890_v59, 7  ;;  %v1226_v31 = vld [vmem:[%s8466_s2] sm:$0x1]  ;;  %v8875_v59 = vld [vmem:[#allocation8_spill] sm:$0xff] }
 0x1e0   :  { %v1484_v30 = vrot.slane %v1483_v38, 4  ;;  %v1874_v35 = vadd.f32 %v1873_v21, %v1872_v60  ;;  %v8868_v60 = vld [vmem:[#allocation3_spill] sm:$0xff] }
 0x1e2   :  { %v1485_v5 = vadd.f32 %v1484_v30, %v1483_v38  ;;  %v1875_v58 = vrot.slane %v1874_v35, 4  ;;  %v8869_v30 = vld [vmem:[#allocation5_spill] sm:$0xff] }
 0x1e4   :  { %v1486_v10 = vrot.slane %v1485_v5, 2  ;;  %v1876_v43 = vadd.f32 %v1875_v58, %v1874_v35 }
 0x1e6   :  { %v1487_v39 = vadd.f32 %v1486_v10, %v1485_v5  ;;  %v1877_v50 = vrot.slane %v1876_v43, 2  ;;  %v8564_v10 = vsub.s32 0, %v5027_v22  ;;  %v8870_v5 = vld [vmem:[#allocation2_spill] sm:$0xff] }
 0x1e8   :  { %v1488_v45 = vrot.slane %v1487_v39, 1  ;;  %v1878_v63 = vadd.f32 %v1877_v50, %v1876_v43 }
 0x1ea   :  { %v1489_v0 = vadd.f32 %v1488_v45, %v1487_v39  ;;  %v1879_v57 = vrot.slane %v1878_v63, 1  ;;  %v5036_v39 = vld [vmem:[%s8467_s3] sm:$0x1]  ;;  %v8871_v45 = vld [vmem:[#allocation4_spill] sm:$0xff] }
 0x1ec   :  { %v1491_v7 = vmul.f32 0.0009765625, %v1489_v0  ;;  %v1880_v14 = vadd.f32 %v1879_v57, %v1878_v63  ;;  %v8872_v0 = vld [vmem:[#allocation7_spill] sm:$0xff] }
 0x1ee   :  { %v1881_v6 = vmul.f32 0.0009765625, %v1880_v14  ;;  %v1882_v23 = vmul.f32 %v1491_v7, %v1491_v7 }
 0x1f0   :  { %v1883_v11 = vsub.f32 %v1881_v6, %v1882_v23  ;;  %v8885_v23 = vld [vmem:[#allocation17_spill] sm:$0xff] }
 0x1f2   :  { %v1884_v4 = vadd.f32 1e-05, %v1883_v11  ;;  %v8874_v11 = vld [vmem:[#allocation6_spill] sm:$0xff] }
 0x1f4   :  { %3841 = vrsqrt.f32 %v1884_v4 }
 0x1fe   :  { %v3842_v38 = vpop.eup %3841 }
 0x1ff   :  { %v1886_v50 = vmul.f32 %v3842_v38, %v1226_v31  ;;  %v8876_v38 = vld [vmem:[#allocation11_spill] sm:$0xff] }
 0x201   :  { %v5038_v43 = vmul.f32 %v1886_v50, %v1491_v7  ;;  %v5042_v6 = vrot.slane %v1886_v50, %v8564_v10  ;;  %v8873_v7 = vld [vmem:[#allocation9_spill] sm:$0xff]  ;;  %v8887_v10 = vld [vmem:[#allocation14_spill] sm:$0xff] }
 0x203   :  { %v5048_v21 = vmul.f32 %v5042_v6, %v8868_v60  ;;  %v5052_v35 = vmul.f32 %v5042_v6, %v8869_v30  ;;  %v5056_v58 = vmul.f32 %v8870_v5, %v5042_v6  ;;  %v5060_v63 = vmul.f32 %v8871_v45, %v5042_v6  ;;  %v8877_v60 = vld [vmem:[#allocation13_spill] sm:$0xff]  ;;  %v8879_v5 = vld [vmem:[#allocation10_spill] sm:$0xff] }
 0x204   :  { %v5064_v57 = vmul.f32 %v5042_v6, %v8872_v0  ;;  %v5068_v14 = vmul.f32 %v5042_v6, %v8873_v7  ;;  %v5072_v4 = vmul.f32 %v8874_v11, %v5042_v6  ;;  %v5076_v31 = vmul.f32 %v8875_v59, %v5042_v6  ;;  %v8881_v0 = vld [vmem:[#allocation12_spill] sm:$0xff]  ;;  %v8883_v11 = vld [vmem:[#allocation15_spill] sm:$0xff] }
 0x205   :  { %v5080_v50 = vmul.f32 %v5042_v6, %v8876_v38  ;;  %v5084_v30 = vmul.f32 %v5042_v6, %v8877_v60  ;;  %v5088_v45 = vmul.f32 %v8879_v5, %v5042_v6  ;;  %v5092_v7 = vmul.f32 %v8881_v0, %v5042_v6 }
 0x206   :  { %v5096_v59 = vmul.f32 %v5042_v6, %v8883_v11  ;;  %v5100_v38 = vmul.f32 %v5042_v6, %v8885_v23  ;;  %v5104_v60 = vmul.f32 %v8887_v10, %v5042_v6 }
 0x207   :  { %8878 = vst [vmem:[#allocation84_spill] sm:$0xff] %v5084_v30  ;;  %8880 = vst [vmem:[#allocation86_spill] sm:$0xff] %v5088_v45  ;;  %v8889_v30 = vld [vmem:[#allocation16_spill] sm:$0xff]  ;;  %v8891_v45 = vld [vmem:[#allocation23_spill] sm:$0xff] }
 0x208   :  { %8882 = vst [vmem:[#allocation85_spill] sm:$0xff] %v5092_v7  ;;  %8884 = vst [vmem:[#allocation3_spill] sm:$0xff] %v5096_v59  ;;  %v5108_v5 = vmul.f32 %v8889_v30, %v5042_v6  ;;  %v5112_v0 = vmul.f32 %v5042_v6, %v8891_v45  ;;  %v8893_v7 = vld [vmem:[#allocation25_spill] sm:$0xff]  ;;  %v8895_v59 = vld [vmem:[#allocation22_spill] sm:$0xff] }
 0x209   :  { %8886 = vst [vmem:[#allocation5_spill] sm:$0xff] %v5100_v38  ;;  %8888 = vst [vmem:[#allocation2_spill] sm:$0xff] %v5104_v60  ;;  %v5116_v11 = vmul.f32 %v5042_v6, %v8893_v7  ;;  %v5120_v23 = vmul.f32 %v8895_v59, %v5042_v6  ;;  %v8897_v38 = vld [vmem:[#allocation24_spill] sm:$0xff]  ;;  %v8899_v60 = vld [vmem:[#allocation31_spill] sm:$0xff] }
 0x20a   :  { %8890 = vst [vmem:[#allocation4_spill] sm:$0xff] %v5108_v5  ;;  %8892 = vst [vmem:[#allocation7_spill] sm:$0xff] %v5112_v0  ;;  %v5124_v10 = vmul.f32 %v8897_v38, %v5042_v6  ;;  %v5128_v30 = vmul.f32 %v5042_v6, %v8899_v60  ;;  %v8901_v5 = vld [vmem:[#allocation33_spill] sm:$0xff]  ;;  %v8903_v0 = vld [vmem:[#allocation30_spill] sm:$0xff] }
 0x20b   :  { %8894 = vst [vmem:[#allocation9_spill] sm:$0xff] %v5116_v11  ;;  %8896 = vst [vmem:[#allocation6_spill] sm:$0xff] %v5120_v23  ;;  %v5132_v45 = vmul.f32 %v5042_v6, %v8901_v5  ;;  %v5136_v7 = vmul.f32 %v8903_v0, %v5042_v6  ;;  %v8905_v11 = vld [vmem:[#allocation32_spill] sm:$0xff]  ;;  %v8907_v23 = vld [vmem:[#allocation38_spill] sm:$0xff] }
 0x20c   :  { %8898 = vst [vmem:[#allocation8_spill] sm:$0xff] %v5124_v10  ;;  %8900 = vst [vmem:[#allocation11_spill] sm:$0xff] %v5128_v30  ;;  %v5140_v59 = vmul.f32 %v8905_v11, %v5042_v6  ;;  %v5144_v38 = vmul.f32 %v5042_v6, %v8907_v23  ;;  %v8909_v10 = vld [vmem:[#allocation40_spill] sm:$0xff]  ;;  %v8911_v30 = vld [vmem:[#allocation37_spill] sm:$0xff] }
 0x20d   :  { %8902 = vst [vmem:[#allocation13_spill] sm:$0xff] %v5132_v45  ;;  %8904 = vst [vmem:[#allocation10_spill] sm:$0xff] %v5136_v7  ;;  %v5148_v60 = vmul.f32 %v5042_v6, %v8909_v10  ;;  %v5152_v5 = vmul.f32 %v8911_v30, %v5042_v6  ;;  %v8913_v45 = vld [vmem:[#allocation39_spill] sm:$0xff]  ;;  %v8915_v7 = vld [vmem:[#allocation42_spill] sm:$0xff] }
 0x20e   :  { %8906 = vst [vmem:[#allocation12_spill] sm:$0xff] %v5140_v59  ;;  %8908 = vst [vmem:[#allocation15_spill] sm:$0xff] %v5144_v38  ;;  %v5156_v0 = vmul.f32 %v8913_v45, %v5042_v6  ;;  %v5160_v11 = vmul.f32 %v5042_v6, %v8915_v7  ;;  %v8917_v59 = vld [vmem:[#allocation44_spill] sm:$0xff]  ;;  %v8919_v38 = vld [vmem:[#allocation41_spill] sm:$0xff] }
 0x20f   :  { %8910 = vst [vmem:[#allocation17_spill] sm:$0xff] %v5148_v60  ;;  %8912 = vst [vmem:[#allocation14_spill] sm:$0xff] %v5152_v5  ;;  %v5164_v23 = vmul.f32 %v5042_v6, %v8917_v59  ;;  %v5168_v10 = vmul.f32 %v8919_v38, %v5042_v6  ;;  %v8921_v60 = vld [vmem:[#allocation43_spill] sm:$0xff]  ;;  %v8923_v5 = vld [vmem:[#allocation46_spill] sm:$0xff] }
 0x210   :  { %8914 = vst [vmem:[#allocation16_spill] sm:$0xff] %v5156_v0  ;;  %8916 = vst [vmem:[#allocation23_spill] sm:$0xff] %v5160_v11  ;;  %v5172_v30 = vmul.f32 %v8921_v60, %v5042_v6  ;;  %v5176_v45 = vmul.f32 %v5042_v6, %v8923_v5  ;;  %v8925_v0 = vld [vmem:[#allocation48_spill] sm:$0xff]  ;;  %v8927_v11 = vld [vmem:[#allocation45_spill] sm:$0xff] }
 0x211   :  { %8918 = vst [vmem:[#allocation25_spill] sm:$0xff] %v5164_v23  ;;  %8920 = vst [vmem:[#allocation22_spill] sm:$0xff] %v5168_v10  ;;  %v5180_v7 = vmul.f32 %v5042_v6, %v8925_v0  ;;  %v5184_v59 = vmul.f32 %v8927_v11, %v5042_v6  ;;  %v8929_v23 = vld [vmem:[#allocation47_spill] sm:$0xff]  ;;  %v8931_v10 = vld [vmem:[#allocation50_spill] sm:$0xff] }
 0x212   :  { %8922 = vst [vmem:[#allocation24_spill] sm:$0xff] %v5172_v30  ;;  %8924 = vst [vmem:[#allocation31_spill] sm:$0xff] %v5176_v45  ;;  %v5188_v38 = vmul.f32 %v8929_v23, %v5042_v6  ;;  %v5192_v60 = vmul.f32 %v5042_v6, %v8931_v10  ;;  %v8933_v30 = vld [vmem:[#allocation52_spill] sm:$0xff]  ;;  %v8935_v45 = vld [vmem:[#allocation49_spill] sm:$0xff] }
 0x213   :  { %8926 = vst [vmem:[#allocation33_spill] sm:$0xff] %v5180_v7  ;;  %8928 = vst [vmem:[#allocation30_spill] sm:$0xff] %v5184_v59  ;;  %v5196_v5 = vmul.f32 %v5042_v6, %v8933_v30  ;;  %v5200_v0 = vmul.f32 %v8935_v45, %v5042_v6  ;;  %v8937_v7 = vld [vmem:[#allocation51_spill] sm:$0xff]  ;;  %v8939_v59 = vld [vmem:[#allocation54_spill] sm:$0xff] }
 0x214   :  { %8930 = vst [vmem:[#allocation32_spill] sm:$0xff] %v5188_v38  ;;  %8932 = vst [vmem:[#allocation38_spill] sm:$0xff] %v5192_v60  ;;  %v5204_v11 = vmul.f32 %v8937_v7, %v5042_v6  ;;  %v5208_v23 = vmul.f32 %v5042_v6, %v8939_v59  ;;  %v8941_v38 = vld [vmem:[#allocation56_spill] sm:$0xff]  ;;  %v8943_v60 = vld [vmem:[#allocation53_spill] sm:$0xff] }
 0x215   :  { %8934 = vst [vmem:[#allocation40_spill] sm:$0xff] %v5196_v5  ;;  %8936 = vst [vmem:[#allocation37_spill] sm:$0xff] %v5200_v0  ;;  %v5212_v10 = vmul.f32 %v5042_v6, %v8941_v38  ;;  %v5216_v30 = vmul.f32 %v8943_v60, %v5042_v6  ;;  %v8945_v5 = vld [vmem:[#allocation55_spill] sm:$0xff]  ;;  %v8947_v0 = vld [vmem:[#allocation58_spill] sm:$0xff] }
 0x216   :  { %8938 = vst [vmem:[#allocation39_spill] sm:$0xff] %v5204_v11  ;;  %8940 = vst [vmem:[#allocation42_spill] sm:$0xff] %v5208_v23  ;;  %v5220_v45 = vmul.f32 %v8945_v5, %v5042_v6  ;;  %v5224_v7 = vmul.f32 %v5042_v6, %v8947_v0  ;;  %v8949_v11 = vld [vmem:[#allocation60_spill] sm:$0xff]  ;;  %v8951_v23 = vld [vmem:[#allocation57_spill] sm:$0xff] }
 0x217   :  { %8942 = vst [vmem:[#allocation44_spill] sm:$0xff] %v5212_v10  ;;  %8944 = vst [vmem:[#allocation41_spill] sm:$0xff] %v5216_v30  ;;  %v5228_v59 = vmul.f32 %v5042_v6, %v8949_v11  ;;  %v5232_v38 = vmul.f32 %v8951_v23, %v5042_v6  ;;  %v8953_v10 = vld [vmem:[#allocation59_spill] sm:$0xff]  ;;  %v8955_v30 = vld [vmem:[#allocation62_spill] sm:$0xff] }
 0x218   :  { %8946 = vst [vmem:[#allocation43_spill] sm:$0xff] %v5220_v45  ;;  %8948 = vst [vmem:[#allocation46_spill] sm:$0xff] %v5224_v7  ;;  %v5236_v60 = vmul.f32 %v8953_v10, %v5042_v6  ;;  %v5240_v5 = vmul.f32 %v5042_v6, %v8955_v30  ;;  %v8957_v45 = vld [vmem:[#allocation64_spill] sm:$0xff]  ;;  %v8959_v7 = vld [vmem:[#allocation61_spill] sm:$0xff] }
 0x219   :  { %8950 = vst [vmem:[#allocation48_spill] sm:$0xff] %v5228_v59  ;;  %8952 = vst [vmem:[#allocation45_spill] sm:$0xff] %v5232_v38  ;;  %v5244_v0 = vmul.f32 %v5042_v6, %v8957_v45  ;;  %v5248_v11 = vmul.f32 %v8959_v7, %v5042_v6  ;;  %v8961_v59 = vld [vmem:[#allocation63_spill] sm:$0xff]  ;;  %v8963_v38 = vld [vmem:[#allocation66_spill] sm:$0xff] }
 0x21a   :  { %8954 = vst [vmem:[#allocation47_spill] sm:$0xff] %v5236_v60  ;;  %8956 = vst [vmem:[#allocation50_spill] sm:$0xff] %v5240_v5  ;;  %v5252_v23 = vmul.f32 %v8961_v59, %v5042_v6  ;;  %v5256_v10 = vmul.f32 %v5042_v6, %v8963_v38  ;;  %v8965_v60 = vld [vmem:[#allocation68_spill] sm:$0xff]  ;;  %v8967_v5 = vld [vmem:[#allocation65_spill] sm:$0xff] }
 0x21b   :  { %8958 = vst [vmem:[#allocation52_spill] sm:$0xff] %v5244_v0  ;;  %8960 = vst [vmem:[#allocation49_spill] sm:$0xff] %v5248_v11  ;;  %v5260_v30 = vmul.f32 %v5042_v6, %v8965_v60  ;;  %v5264_v45 = vmul.f32 %v8967_v5, %v5042_v6  ;;  %v8969_v0 = vld [vmem:[#allocation67_spill] sm:$0xff]  ;;  %v8971_v11 = vld [vmem:[#allocation72_spill] sm:$0xff] }
 0x21c   :  { %8962 = vst [vmem:[#allocation51_spill] sm:$0xff] %v5252_v23  ;;  %8964 = vst [vmem:[#allocation54_spill] sm:$0xff] %v5256_v10  ;;  %v5268_v7 = vmul.f32 %v8969_v0, %v5042_v6  ;;  %v5272_v59 = vmul.f32 %v5042_v6, %v8971_v11  ;;  %v8973_v23 = vld [vmem:[#allocation74_spill] sm:$0xff]  ;;  %v8975_v10 = vld [vmem:[#allocation71_spill] sm:$0xff] }
 0x21d   :  { %8966 = vst [vmem:[#allocation56_spill] sm:$0xff] %v5260_v30  ;;  %8968 = vst [vmem:[#allocation53_spill] sm:$0xff] %v5264_v45  ;;  %v5276_v38 = vmul.f32 %v5042_v6, %v8973_v23  ;;  %v5280_v60 = vmul.f32 %v8975_v10, %v5042_v6  ;;  %v8977_v30 = vld [vmem:[#allocation73_spill] sm:$0xff]  ;;  %v8979_v45 = vld [vmem:[#allocation80_spill] sm:$0xff] }
 0x21e   :  { %8970 = vst [vmem:[#allocation55_spill] sm:$0xff] %v5268_v7  ;;  %8972 = vst [vmem:[#allocation58_spill] sm:$0xff] %v5272_v59  ;;  %v5284_v5 = vmul.f32 %v8977_v30, %v5042_v6  ;;  %v5288_v0 = vmul.f32 %v5042_v6, %v8979_v45  ;;  %v8981_v7 = vld [vmem:[#allocation82_spill] sm:$0xff]  ;;  %v8983_v59 = vld [vmem:[#allocation79_spill] sm:$0xff] }
 0x21f   :  { %8974 = vst [vmem:[#allocation60_spill] sm:$0xff] %v5276_v38  ;;  %8976 = vst [vmem:[#allocation57_spill] sm:$0xff] %v5280_v60  ;;  %v5292_v11 = vmul.f32 %v5042_v6, %v8981_v7  ;;  %v5296_v23 = vmul.f32 %v8983_v59, %v5042_v6  ;;  %v8985_v38 = vld [vmem:[#allocation81_spill] sm:$0xff]  ;;  %v8987_v60 = vld [vmem:[#allocation19_spill] sm:$0xff] }
 0x220   :  { %8978 = vst [vmem:[#allocation59_spill] sm:$0xff] %v5284_v5  ;;  %8980 = vst [vmem:[#allocation62_spill] sm:$0xff] %v5288_v0  ;;  %v5300_v10 = vmul.f32 %v8985_v38, %v5042_v6  ;;  %v5304_v30 = vmul.f32 %v5042_v6, %v8987_v60  ;;  %v8989_v5 = vld [vmem:[#allocation21_spill] sm:$0xff]  ;;  %v8991_v0 = vld [vmem:[#allocation18_spill] sm:$0xff] }
 0x221   :  { %8982 = vst [vmem:[#allocation64_spill] sm:$0xff] %v5292_v11  ;;  %8984 = vst [vmem:[#allocation61_spill] sm:$0xff] %v5296_v23  ;;  %v5308_v45 = vmul.f32 %v5042_v6, %v8989_v5  ;;  %v5312_v7 = vmul.f32 %v8991_v0, %v5042_v6  ;;  %v8993_v11 = vld [vmem:[#allocation20_spill] sm:$0xff]  ;;  %v8995_v23 = vld [vmem:[#allocation27_spill] sm:$0xff] }
 0x222   :  { %8986 = vst [vmem:[#allocation63_spill] sm:$0xff] %v5300_v10  ;;  %8988 = vst [vmem:[#allocation66_spill] sm:$0xff] %v5304_v30  ;;  %v5316_v59 = vmul.f32 %v8993_v11, %v5042_v6  ;;  %v5320_v38 = vmul.f32 %v5042_v6, %v8995_v23  ;;  %v8997_v10 = vld [vmem:[#allocation29_spill] sm:$0xff]  ;;  %v8998_v30 = vld [vmem:[#allocation26_spill] sm:$0xff] }
 0x223   :  { %8990 = vst [vmem:[#allocation68_spill] sm:$0xff] %v5308_v45  ;;  %8992 = vst [vmem:[#allocation65_spill] sm:$0xff] %v5312_v7  ;;  %v5324_v60 = vmul.f32 %v5042_v6, %v8997_v10  ;;  %v5328_v5 = vmul.f32 %v8998_v30, %v5042_v6  ;;  %v8999_v45 = vld [vmem:[#allocation28_spill] sm:$0xff]  ;;  %v9000_v7 = vld [vmem:[#allocation35_spill] sm:$0xff]  ;;  %v5348_v30 = vmul.f32 %v4310_v51, %v5042_v6 }
 0x224   :  { %8994 = vst [vmem:[#allocation67_spill] sm:$0xff] %v5316_v59  ;;  %8996 = vst [vmem:[#allocation72_spill] sm:$0xff] %v5320_v38  ;;  %v5332_v0 = vmul.f32 %v8999_v45, %v5042_v6  ;;  %v5336_v11 = vmul.f32 %v5042_v6, %v9000_v7  ;;  %v9001_v59 = vld [vmem:[#allocation36_spill] sm:$0xff]  ;;  %v9002_v38 = vld [vmem:[#allocation34_spill] sm:$0xff]  ;;  %v5352_v45 = vmul.f32 %v5042_v6, %v4344_v41 }
 0x225   :  { %v5340_v23 = vmul.f32 %v5042_v6, %v9001_v59  ;;  %v5344_v10 = vmul.f32 %v9002_v38, %v5042_v6  ;;  %v5356_v7 = vmul.f32 %v5042_v6, %v4353_v56  ;;  %v5360_v59 = vmul.f32 %v4335_v28, %v5042_v6 }
 0x226   :  { %v5364_v38 = vmul.f32 %v4346_v47, %v5042_v6  ;;  %v5368_v51 = vmul.f32 %v5042_v6, %v4380_v61  ;;  %v5372_v41 = vmul.f32 %v5042_v6, %v4389_v20  ;;  %v5376_v56 = vmul.f32 %v4371_v42, %v5042_v6 }
 0x227   :  { %v5380_v28 = vmul.f32 %v4382_v1, %v5042_v6  ;;  %v5384_v47 = vmul.f32 %v5042_v6, %v4416_v36  ;;  %v5388_v61 = vmul.f32 %v5042_v6, %v4425_v2  ;;  %v5392_v20 = vmul.f32 %v4407_v33, %v5042_v6 }
 0x228   :  { %v5396_v42 = vmul.f32 %v4418_v17, %v5042_v6  ;;  %v5400_v1 = vmul.f32 %v5042_v6, %v4452_v8  ;;  %v5404_v36 = vmul.f32 %v5042_v6, %v4461_v18  ;;  %v5408_v2 = vmul.f32 %v4443_v62, %v5042_v6 }
 0x229   :  { %v5412_v33 = vmul.f32 %v4454_v32, %v5042_v6  ;;  %v5416_v17 = vmul.f32 %v5042_v6, %v4488_v49  ;;  %v5420_v8 = vmul.f32 %v5042_v6, %v4497_v44  ;;  %v5424_v18 = vmul.f32 %v4479_v52, %v5042_v6 }
 0x22a   :  { %v5428_v62 = vmul.f32 %v4490_v53, %v5042_v6  ;;  %v5432_v32 = vmul.f32 %v5042_v6, %v4524_v40  ;;  %v5436_v49 = vmul.f32 %v5042_v6, %v4533_v12  ;;  %v5440_v44 = vmul.f32 %v4515_v15, %v5042_v6 }
 0x22b   :  { %v5444_v52 = vmul.f32 %v4526_v19, %v5042_v6  ;;  %v5448_v53 = vmul.f32 %v5042_v6, %v4560_v26  ;;  %v5452_v40 = vmul.f32 %v5042_v6, %v4569_v48  ;;  %v5456_v12 = vmul.f32 %v4551_v16, %v5042_v6 }
 0x22c   :  { %v5460_v15 = vmul.f32 %v4562_v55, %v5042_v6  ;;  %v5464_v19 = vmul.f32 %v5042_v6, %v4596_v37  ;;  %v5468_v26 = vmul.f32 %v5042_v6, %v4605_v24 }
 0x22d   :  { %9003 = vst [vmem:[#allocation74_spill] sm:$0xff] %v5448_v53  ;;  %9004 = vst [vmem:[#allocation71_spill] sm:$0xff] %v5452_v40  ;;  %v9009_v53 = vld [vmem:[#allocation69_spill] sm:$0xff]  ;;  %v9010_v40 = vld [vmem:[#allocation70_spill] sm:$0xff] }
 0x22e   :  { %9005 = vst [vmem:[#allocation73_spill] sm:$0xff] %v5456_v12  ;;  %9006 = vst [vmem:[#allocation80_spill] sm:$0xff] %v5460_v15  ;;  %v5472_v48 = vmul.f32 %v9009_v53, %v5042_v6  ;;  %v5476_v16 = vmul.f32 %v9010_v40, %v5042_v6  ;;  %v9011_v12 = vld [vmem:[#allocation76_spill] sm:$0xff]  ;;  %v9013_v15 = vld [vmem:[#allocation78_spill] sm:$0xff]  ;;  %v5496_v40 = vmul.f32 %v5042_v6, %v8864_v29 }
 0x22f   :  { %9007 = vst [vmem:[#allocation82_spill] sm:$0xff] %v5464_v19  ;;  %9008 = vst [vmem:[#allocation79_spill] sm:$0xff] %v5468_v26  ;;  %v5480_v55 = vmul.f32 %v5042_v6, %v9011_v12  ;;  %v5484_v37 = vmul.f32 %v5042_v6, %v9013_v15  ;;  %v9014_v19 = vld [vmem:[#allocation75_spill] sm:$0xff]  ;;  %v9015_v26 = vld [vmem:[#allocation77_spill] sm:$0xff]  ;;  %v5500_v12 = vmul.f32 %v5042_v6, %v8865_v34 }
 0x230   :  { %v5488_v24 = vmul.f32 %v9014_v19, %v5042_v6  ;;  %v5492_v53 = vmul.f32 %v9015_v26, %v5042_v6  ;;  %v5508_v19 = vmul.f32 %v8867_v3, %v5042_v6  ;;  %v5512_v26 = vmul.f32 %v5042_v6, %v4696_v46 }
 0x231   :  { %9012 = vst [vmem:[#allocation81_spill] sm:$0xff] %v5480_v55  ;;  %v9016_v55 = vld [vmem:[#allocation83_spill] sm:$0xff]  ;;  %v5516_v29 = vmul.f32 %v5042_v6, %v4707_v27  ;;  %v5520_v34 = vmul.f32 %v4690_v13, %v5042_v6  ;;  %v5528_v3 = vmul.f32 %v5042_v6, %v4724_v9  ;;  %v5532_v46 = vmul.f32 %v5042_v6, %v4735_v54 }
 0x232   :  { %v5504_v15 = vmul.f32 %v9016_v55, %v5042_v6  ;;  %9017 = vst [vmem:[#allocation19_spill] sm:$0xff] %v5512_v26  ;;  %v5524_v55 = vmul.f32 %v4698_v25, %v5042_v6  ;;  %v9023_v26 = vld [vmem:[#allocation87_spill] sm:$0xff] }
 0x233   :  { %9018 = vst [vmem:[#allocation21_spill] sm:$0xff] %v5516_v29  ;;  %9019 = vst [vmem:[#allocation18_spill] sm:$0xff] %v5520_v34  ;;  %v5536_v27 = vmul.f32 %v9023_v26, %v5042_v6  ;;  %v9025_v29 = vld [vmem:[#allocation88_spill] sm:$0xff]  ;;  %v9027_v34 = vld [vmem:[#allocation90_spill] sm:$0xff] }
 0x234   :  { %9020 = vst [vmem:[#allocation20_spill] sm:$0xff] %v5524_v55  ;;  %9021 = vst [vmem:[#allocation27_spill] sm:$0xff] %v5528_v3  ;;  %v5540_v13 = vmul.f32 %v9025_v29, %v5042_v6  ;;  %v5544_v25 = vmul.f32 %v5042_v6, %v9027_v34  ;;  %v9028_v55 = vld [vmem:[#allocation92_spill] sm:$0xff]  ;;  %v9029_v3 = vld [vmem:[#allocation89_spill] sm:$0xff]  ;;  %v9032_v29 = vsub.f32 %v5036_v39, %v5038_v43 }
 0x235   :  { %9022 = vst [vmem:[#allocation29_spill] sm:$0xff] %v5532_v46  ;;  %9024 = vst [vmem:[#allocation26_spill] sm:$0xff] %v5536_v27  ;;  %v5548_v9 = vmul.f32 %v5042_v6, %v9028_v55  ;;  %v5552_v54 = vmul.f32 %v9029_v3, %v5042_v6  ;;  %v9030_v46 = vld [vmem:[#allocation91_spill] sm:$0xff]  ;;  %v9031_v27 = vsub.s32 0, %v5027_v22 }
 0x236   :  { %9026 = vst [vmem:[#allocation28_spill] sm:$0xff] %v5540_v13  ;;  %v5556_v26 = vmul.f32 %v9030_v46, %v5042_v6  ;;  %v9038_v46 = vld [vmem:[#allocation85_spill] sm:$0xff] }
 0x237   :  { %v5563_v13 = vrot.slane %v9032_v29, %v9031_v27  ;;  %v9040_v27 = vld [vmem:[#allocation3_spill] sm:$0xff]  ;;  %v9042_v29 = vld [vmem:[#allocation5_spill] sm:$0xff] }
 0x239   :  { %v5567_v34 = vadd.f32 %v5563_v13, %v5048_v21  ;;  %v5571_v55 = vadd.f32 %v5563_v13, %v5052_v35  ;;  %v5575_v3 = vadd.f32 %v5563_v13, %v5056_v58  ;;  %v5579_v22 = vadd.f32 %v5563_v13, %v5060_v63  ;;  %v9034_v58 = vld [vmem:[#allocation84_spill] sm:$0xff] }
 0x23a   :  { %v5583_v39 = vadd.f32 %v5563_v13, %v5064_v57  ;;  %v5587_v43 = vadd.f32 %v5563_v13, %v5068_v14  ;;  %v5591_v6 = vadd.f32 %v5563_v13, %v5072_v4  ;;  %v5595_v21 = vadd.f32 %v5563_v13, %v5076_v31  ;;  %v9036_v57 = vld [vmem:[#allocation86_spill] sm:$0xff] }
 0x23b   :  { %v5599_v35 = vadd.f32 %v5563_v13, %v5080_v50  ;;  %v5603_v63 = vadd.f32 %v5563_v13, %v9034_v58  ;;  %v5607_v14 = vadd.f32 %v5563_v13, %v9036_v57  ;;  %v5611_v4 = vadd.f32 %v5563_v13, %v9038_v46 }
 0x23c   :  { %v5615_v31 = vadd.f32 %v5563_v13, %v9040_v27  ;;  %v5619_v50 = vadd.f32 %v5563_v13, %v9042_v29  ;;  %vm2157_vm4 = vcmp.gt.f32.partialorder %v5567_v34, 0.0  ;;  %vm2158_vm5 = vcmp.gt.f32.partialorder %v5571_v55, 0.0 }
 0x23d   :  { %9033 = vst [vmem:[#allocation35_spill] sm:$0xff] %v5599_v35  ;;  %9035 = vst [vmem:[#allocation36_spill] sm:$0xff] %v5603_v63  ;;  %v9044_v35 = vld [vmem:[#allocation2_spill] sm:$0xff]  ;;  %v9046_v63 = vld [vmem:[#allocation4_spill] sm:$0xff]  ;;  %vm2159_vm6 = vcmp.gt.f32.partialorder %v5575_v3, 0.0  ;;  %vm2160_vm7 = vcmp.gt.f32.partialorder %v5579_v22, 0.0 }
 0x23e   :  { %9037 = vst [vmem:[#allocation34_spill] sm:$0xff] %v5607_v14  ;;  %9039 = vst [vmem:[#allocation69_spill] sm:$0xff] %v5611_v4  ;;  %v5623_v58 = vadd.f32 %v5563_v13, %v9044_v35  ;;  %v5627_v57 = vadd.f32 %v5563_v13, %v9046_v63  ;;  %v9048_v14 = vld [vmem:[#allocation7_spill] sm:$0xff]  ;;  %v9050_v4 = vld [vmem:[#allocation9_spill] sm:$0xff]  ;;  %vm2161_vm8 = vcmp.gt.f32.partialorder %v5583_v39, 0.0  ;;  %vm2162_vm9 = vcmp.gt.f32.partialorder %v5587_v43, 0.0 }
 0x23f   :  { %9041 = vst [vmem:[#allocation70_spill] sm:$0xff] %v5615_v31  ;;  %9043 = vst [vmem:[#allocation76_spill] sm:$0xff] %v5619_v50  ;;  %v5631_v46 = vadd.f32 %v5563_v13, %v9048_v14  ;;  %v5635_v27 = vadd.f32 %v5563_v13, %v9050_v4  ;;  %v9052_v31 = vld [vmem:[#allocation6_spill] sm:$0xff]  ;;  %v9054_v50 = vld [vmem:[#allocation8_spill] sm:$0xff]  ;;  %vm2163_vm10 = vcmp.gt.f32.partialorder %v5591_v6, 0.0  ;;  %vm2164_vm11 = vcmp.gt.f32.partialorder %v5595_v21, 0.0 }
 0x240   :  { %9045 = vst [vmem:[#allocation78_spill] sm:$0xff] %v5623_v58  ;;  %9047 = vst [vmem:[#allocation75_spill] sm:$0xff] %v5627_v57  ;;  %v5639_v29 = vadd.f32 %v5563_v13, %v9052_v31  ;;  %v5643_v35 = vadd.f32 %v5563_v13, %v9054_v50  ;;  %v9056_v58 = vld [vmem:[#allocation11_spill] sm:$0xff]  ;;  %v9058_v57 = vld [vmem:[#allocation13_spill] sm:$0xff] }
 0x241   :  { %9049 = vst [vmem:[#allocation77_spill] sm:$0xff] %v5631_v46  ;;  %9051 = vst [vmem:[#allocation83_spill] sm:$0xff] %v5635_v27  ;;  %v5647_v63 = vadd.f32 %v5563_v13, %v9056_v58  ;;  %v5651_v14 = vadd.f32 %v5563_v13, %v9058_v57  ;;  %v9060_v46 = vld [vmem:[#allocation10_spill] sm:$0xff]  ;;  %v9062_v27 = vld [vmem:[#allocation12_spill] sm:$0xff] }
 0x242   :  { %9053 = vst [vmem:[#allocation87_spill] sm:$0xff] %v5639_v29  ;;  %9055 = vst [vmem:[#allocation88_spill] sm:$0xff] %v5643_v35  ;;  %v5655_v4 = vadd.f32 %v5563_v13, %v9060_v46  ;;  %v5659_v31 = vadd.f32 %v5563_v13, %v9062_v27  ;;  %v9064_v29 = vld [vmem:[#allocation15_spill] sm:$0xff]  ;;  %v9066_v35 = vld [vmem:[#allocation17_spill] sm:$0xff] }
 0x243   :  { %9057 = vst [vmem:[#allocation90_spill] sm:$0xff] %v5647_v63  ;;  %9059 = vst [vmem:[#allocation92_spill] sm:$0xff] %v5651_v14  ;;  %v5663_v50 = vadd.f32 %v5563_v13, %v9064_v29  ;;  %v5667_v58 = vadd.f32 %v5563_v13, %v9066_v35  ;;  %v9068_v63 = vld [vmem:[#allocation14_spill] sm:$0xff]  ;;  %v9070_v14 = vld [vmem:[#allocation16_spill] sm:$0xff] }
 0x244   :  { %9061 = vst [vmem:[#allocation89_spill] sm:$0xff] %v5655_v4  ;;  %9063 = vst [vmem:[#allocation91_spill] sm:$0xff] %v5659_v31  ;;  %v5671_v57 = vadd.f32 %v5563_v13, %v9068_v63  ;;  %v5675_v46 = vadd.f32 %v5563_v13, %v9070_v14  ;;  %v9072_v4 = vld [vmem:[#allocation23_spill] sm:$0xff]  ;;  %v9074_v31 = vld [vmem:[#allocation25_spill] sm:$0xff] }
 0x245   :  { %9065 = vst [vmem:[#allocation84_spill] sm:$0xff] %v5663_v50  ;;  %9067 = vst [vmem:[#allocation86_spill] sm:$0xff] %v5667_v58  ;;  %v5679_v27 = vadd.f32 %v5563_v13, %v9072_v4  ;;  %v5683_v29 = vadd.f32 %v5563_v13, %v9074_v31  ;;  %v9076_v50 = vld [vmem:[#allocation22_spill] sm:$0xff]  ;;  %v9078_v58 = vld [vmem:[#allocation24_spill] sm:$0xff] }
 0x246   :  { %9069 = vst [vmem:[#allocation85_spill] sm:$0xff] %v5671_v57  ;;  %9071 = vst [vmem:[#allocation3_spill] sm:$0xff] %v5675_v46  ;;  %v5687_v35 = vadd.f32 %v5563_v13, %v9076_v50  ;;  %v5691_v63 = vadd.f32 %v5563_v13, %v9078_v58  ;;  %v9080_v57 = vld [vmem:[#allocation31_spill] sm:$0xff]  ;;  %v9082_v46 = vld [vmem:[#allocation33_spill] sm:$0xff] }
 0x247   :  { %9073 = vst [vmem:[#allocation5_spill] sm:$0xff] %v5679_v27  ;;  %9075 = vst [vmem:[#allocation2_spill] sm:$0xff] %v5683_v29  ;;  %v5695_v14 = vadd.f32 %v5563_v13, %v9080_v57  ;;  %v5699_v4 = vadd.f32 %v5563_v13, %v9082_v46  ;;  %v9084_v27 = vld [vmem:[#allocation30_spill] sm:$0xff]  ;;  %v9086_v29 = vld [vmem:[#allocation32_spill] sm:$0xff] }
 0x248   :  { %9077 = vst [vmem:[#allocation4_spill] sm:$0xff] %v5687_v35  ;;  %9079 = vst [vmem:[#allocation7_spill] sm:$0xff] %v5691_v63  ;;  %v5703_v31 = vadd.f32 %v5563_v13, %v9084_v27  ;;  %v5707_v50 = vadd.f32 %v5563_v13, %v9086_v29  ;;  %v9088_v35 = vld [vmem:[#allocation38_spill] sm:$0xff]  ;;  %v9090_v63 = vld [vmem:[#allocation40_spill] sm:$0xff] }
 0x249   :  { %9081 = vst [vmem:[#allocation9_spill] sm:$0xff] %v5695_v14  ;;  %9083 = vst [vmem:[#allocation6_spill] sm:$0xff] %v5699_v4  ;;  %v5711_v58 = vadd.f32 %v5563_v13, %v9088_v35  ;;  %v5715_v57 = vadd.f32 %v5563_v13, %v9090_v63  ;;  %v9092_v14 = vld [vmem:[#allocation37_spill] sm:$0xff]  ;;  %v9094_v4 = vld [vmem:[#allocation39_spill] sm:$0xff] }
 0x24a   :  { %9085 = vst [vmem:[#allocation8_spill] sm:$0xff] %v5703_v31  ;;  %9087 = vst [vmem:[#allocation11_spill] sm:$0xff] %v5707_v50  ;;  %v5719_v46 = vadd.f32 %v5563_v13, %v9092_v14  ;;  %v5723_v27 = vadd.f32 %v5563_v13, %v9094_v4  ;;  %v9096_v31 = vld [vmem:[#allocation42_spill] sm:$0xff]  ;;  %v9098_v50 = vld [vmem:[#allocation44_spill] sm:$0xff] }
 0x24b   :  { %9089 = vst [vmem:[#allocation13_spill] sm:$0xff] %v5711_v58  ;;  %9091 = vst [vmem:[#allocation10_spill] sm:$0xff] %v5715_v57  ;;  %v5727_v29 = vadd.f32 %v5563_v13, %v9096_v31  ;;  %v5731_v35 = vadd.f32 %v5563_v13, %v9098_v50  ;;  %v9100_v58 = vld [vmem:[#allocation41_spill] sm:$0xff]  ;;  %v9102_v57 = vld [vmem:[#allocation43_spill] sm:$0xff] }
 0x24c   :  { %9093 = vst [vmem:[#allocation12_spill] sm:$0xff] %v5719_v46  ;;  %9095 = vst [vmem:[#allocation15_spill] sm:$0xff] %v5723_v27  ;;  %v5735_v63 = vadd.f32 %v5563_v13, %v9100_v58  ;;  %v5739_v14 = vadd.f32 %v5563_v13, %v9102_v57  ;;  %v9104_v46 = vld [vmem:[#allocation46_spill] sm:$0xff]  ;;  %v9106_v27 = vld [vmem:[#allocation48_spill] sm:$0xff] }
 0x24d   :  { %9097 = vst [vmem:[#allocation17_spill] sm:$0xff] %v5727_v29  ;;  %9099 = vst [vmem:[#allocation14_spill] sm:$0xff] %v5731_v35  ;;  %v5743_v4 = vadd.f32 %v5563_v13, %v9104_v46  ;;  %v5747_v31 = vadd.f32 %v5563_v13, %v9106_v27  ;;  %v9108_v29 = vld [vmem:[#allocation45_spill] sm:$0xff]  ;;  %v9110_v35 = vld [vmem:[#allocation47_spill] sm:$0xff] }
 0x24e   :  { %9101 = vst [vmem:[#allocation16_spill] sm:$0xff] %v5735_v63  ;;  %9103 = vst [vmem:[#allocation23_spill] sm:$0xff] %v5739_v14  ;;  %v5751_v50 = vadd.f32 %v5563_v13, %v9108_v29  ;;  %v5755_v58 = vadd.f32 %v5563_v13, %v9110_v35  ;;  %v9112_v63 = vld [vmem:[#allocation50_spill] sm:$0xff]  ;;  %v9114_v14 = vld [vmem:[#allocation52_spill] sm:$0xff] }
 0x24f   :  { %9105 = vst [vmem:[#allocation25_spill] sm:$0xff] %v5743_v4  ;;  %9107 = vst [vmem:[#allocation22_spill] sm:$0xff] %v5747_v31  ;;  %v5759_v57 = vadd.f32 %v5563_v13, %v9112_v63  ;;  %v5763_v46 = vadd.f32 %v5563_v13, %v9114_v14  ;;  %v9116_v4 = vld [vmem:[#allocation49_spill] sm:$0xff]  ;;  %v9118_v31 = vld [vmem:[#allocation51_spill] sm:$0xff] }
 0x250   :  { %9109 = vst [vmem:[#allocation24_spill] sm:$0xff] %v5751_v50  ;;  %9111 = vst [vmem:[#allocation31_spill] sm:$0xff] %v5755_v58  ;;  %v5767_v27 = vadd.f32 %v5563_v13, %v9116_v4  ;;  %v5771_v29 = vadd.f32 %v5563_v13, %v9118_v31  ;;  %v9120_v50 = vld [vmem:[#allocation54_spill] sm:$0xff]  ;;  %v9122_v58 = vld [vmem:[#allocation56_spill] sm:$0xff] }
 0x251   :  { %9113 = vst [vmem:[#allocation33_spill] sm:$0xff] %v5759_v57  ;;  %9115 = vst [vmem:[#allocation30_spill] sm:$0xff] %v5763_v46  ;;  %v5775_v35 = vadd.f32 %v5563_v13, %v9120_v50  ;;  %v5779_v63 = vadd.f32 %v5563_v13, %v9122_v58  ;;  %v9124_v57 = vld [vmem:[#allocation53_spill] sm:$0xff]  ;;  %v9126_v46 = vld [vmem:[#allocation55_spill] sm:$0xff] }
 0x252   :  { %9117 = vst [vmem:[#allocation32_spill] sm:$0xff] %v5767_v27  ;;  %9119 = vst [vmem:[#allocation38_spill] sm:$0xff] %v5771_v29  ;;  %v5783_v14 = vadd.f32 %v5563_v13, %v9124_v57  ;;  %v5787_v4 = vadd.f32 %v5563_v13, %v9126_v46  ;;  %v9128_v27 = vld [vmem:[#allocation58_spill] sm:$0xff]  ;;  %v9130_v29 = vld [vmem:[#allocation60_spill] sm:$0xff] }
 0x253   :  { %9121 = vst [vmem:[#allocation40_spill] sm:$0xff] %v5775_v35  ;;  %9123 = vst [vmem:[#allocation37_spill] sm:$0xff] %v5779_v63  ;;  %v5791_v31 = vadd.f32 %v5563_v13, %v9128_v27  ;;  %v5795_v50 = vadd.f32 %v5563_v13, %v9130_v29  ;;  %v9132_v35 = vld [vmem:[#allocation57_spill] sm:$0xff]  ;;  %v9134_v63 = vld [vmem:[#allocation59_spill] sm:$0xff] }
 0x254   :  { %9125 = vst [vmem:[#allocation39_spill] sm:$0xff] %v5783_v14  ;;  %9127 = vst [vmem:[#allocation42_spill] sm:$0xff] %v5787_v4  ;;  %v5799_v58 = vadd.f32 %v5563_v13, %v9132_v35  ;;  %v5803_v57 = vadd.f32 %v5563_v13, %v9134_v63  ;;  %v9136_v14 = vld [vmem:[#allocation62_spill] sm:$0xff]  ;;  %v9138_v4 = vld [vmem:[#allocation64_spill] sm:$0xff] }
 0x255   :  { %9129 = vst [vmem:[#allocation44_spill] sm:$0xff] %v5791_v31  ;;  %9131 = vst [vmem:[#allocation41_spill] sm:$0xff] %v5795_v50  ;;  %v5807_v46 = vadd.f32 %v5563_v13, %v9136_v14  ;;  %v5811_v27 = vadd.f32 %v5563_v13, %v9138_v4  ;;  %v9140_v31 = vld [vmem:[#allocation61_spill] sm:$0xff]  ;;  %v9142_v50 = vld [vmem:[#allocation63_spill] sm:$0xff] }
 0x256   :  { %9133 = vst [vmem:[#allocation43_spill] sm:$0xff] %v5799_v58  ;;  %9135 = vst [vmem:[#allocation46_spill] sm:$0xff] %v5803_v57  ;;  %v5815_v29 = vadd.f32 %v5563_v13, %v9140_v31  ;;  %v5819_v35 = vadd.f32 %v5563_v13, %v9142_v50  ;;  %v9143_v58 = vld [vmem:[#allocation66_spill] sm:$0xff]  ;;  %v9144_v57 = vld [vmem:[#allocation68_spill] sm:$0xff] }
 0x257   :  { %9137 = vst [vmem:[#allocation48_spill] sm:$0xff] %v5807_v46  ;;  %9139 = vst [vmem:[#allocation45_spill] sm:$0xff] %v5811_v27  ;;  %v5823_v63 = vadd.f32 %v5563_v13, %v9143_v58  ;;  %v5827_v14 = vadd.f32 %v5563_v13, %v9144_v57  ;;  %v9145_v46 = vld [vmem:[#allocation65_spill] sm:$0xff]  ;;  %v9146_v27 = vld [vmem:[#allocation67_spill] sm:$0xff]  ;;  %v5843_v58 = vadd.f32 %v5563_v13, %v5324_v60 }
 0x258   :  { %9141 = vst [vmem:[#allocation47_spill] sm:$0xff] %v5815_v29  ;;  %v5831_v4 = vadd.f32 %v5563_v13, %v9145_v46  ;;  %v5835_v31 = vadd.f32 %v5563_v13, %v9146_v27  ;;  %v9147_v29 = vld [vmem:[#allocation72_spill] sm:$0xff]  ;;  %v5847_v57 = vadd.f32 %v5563_v13, %v5328_v5  ;;  %v5851_v46 = vadd.f32 %v5563_v13, %v5332_v0 }
 0x259   :  { %v5839_v50 = vadd.f32 %v5563_v13, %v9147_v29  ;;  %v5855_v27 = vadd.f32 %v5563_v13, %v5336_v11  ;;  %v5859_v29 = vadd.f32 %v5563_v13, %v5340_v23  ;;  %v5863_v60 = vadd.f32 %v5563_v13, %v5344_v10 }
 0x25a   :  { %v5867_v5 = vadd.f32 %v5563_v13, %v5348_v30  ;;  %v5871_v0 = vadd.f32 %v5563_v13, %v5352_v45  ;;  %v5875_v11 = vadd.f32 %v5563_v13, %v5356_v7  ;;  %v5879_v23 = vadd.f32 %v5563_v13, %v5360_v59 }
 0x25b   :  { %v5883_v10 = vadd.f32 %v5563_v13, %v5364_v38  ;;  %v5887_v30 = vadd.f32 %v5563_v13, %v5368_v51  ;;  %v5891_v45 = vadd.f32 %v5563_v13, %v5372_v41  ;;  %v5895_v7 = vadd.f32 %v5563_v13, %v5376_v56 }
 0x25c   :  { %9148 = vst [vmem:[#allocation50_spill] sm:$0xff] %v5875_v11  ;;  %9149 = vst [vmem:[#allocation52_spill] sm:$0xff] %v5879_v23  ;;  %v5899_v59 = vadd.f32 %v5563_v13, %v5380_v28  ;;  %v5903_v38 = vadd.f32 %v5563_v13, %v5384_v47  ;;  %v5907_v51 = vadd.f32 %v5563_v13, %v5388_v61 }
 0x25d   :  { %9150 = vst [vmem:[#allocation49_spill] sm:$0xff] %v5883_v10  ;;  %9151 = vst [vmem:[#allocation51_spill] sm:$0xff] %v5887_v30  ;;  %v5911_v41 = vadd.f32 %v5563_v13, %v5392_v20  ;;  %v5915_v56 = vadd.f32 %v5563_v13, %v5396_v42  ;;  %v5919_v28 = vadd.f32 %v5563_v13, %v5400_v1 }
 0x25e   :  { %9152 = vst [vmem:[#allocation54_spill] sm:$0xff] %v5891_v45  ;;  %9153 = vst [vmem:[#allocation56_spill] sm:$0xff] %v5895_v7  ;;  %v5923_v47 = vadd.f32 %v5563_v13, %v5404_v36  ;;  %v5927_v61 = vadd.f32 %v5563_v13, %v5408_v2  ;;  %v5931_v20 = vadd.f32 %v5563_v13, %v5412_v33 }
 0x25f   :  { %9154 = vst [vmem:[#allocation53_spill] sm:$0xff] %v5899_v59  ;;  %9155 = vst [vmem:[#allocation55_spill] sm:$0xff] %v5903_v38  ;;  %v5935_v42 = vadd.f32 %v5563_v13, %v5416_v17  ;;  %v5939_v1 = vadd.f32 %v5563_v13, %v5420_v8  ;;  %v5943_v36 = vadd.f32 %v5563_v13, %v5424_v18  ;;  %v9241_v59 = vld [vmem:[#allocation85_spill] sm:$0xff] }
 0x260   :  { %9156 = vst [vmem:[#allocation58_spill] sm:$0xff] %v5907_v51  ;;  %9157 = vst [vmem:[#allocation60_spill] sm:$0xff] %v5911_v41  ;;  %v5947_v2 = vadd.f32 %v5563_v13, %v5428_v62  ;;  %v5951_v33 = vadd.f32 %v5563_v13, %v5432_v32  ;;  %v5955_v17 = vadd.f32 %v5563_v13, %v5436_v49  ;;  %v6174_v7 = vmul.f32 0.2, %v9241_v59 }
 0x261   :  { %9158 = vst [vmem:[#allocation57_spill] sm:$0xff] %v5915_v56  ;;  %9159 = vst [vmem:[#allocation59_spill] sm:$0xff] %v5919_v28  ;;  %v5959_v8 = vadd.f32 %v5563_v13, %v5440_v44  ;;  %v5963_v18 = vadd.f32 %v5563_v13, %v5444_v52  ;;  %v9234_v56 = vld [vmem:[#allocation91_spill] sm:$0xff] }
 0x262   :  { %9160 = vst [vmem:[#allocation62_spill] sm:$0xff] %v5923_v47  ;;  %9161 = vst [vmem:[#allocation64_spill] sm:$0xff] %v5927_v61  ;;  %v6159_v41 = vmul.f32 0.2, %v9234_v56 }
 0x263   :  { %9162 = vst [vmem:[#allocation61_spill] sm:$0xff] %v5931_v20  ;;  %9163 = vst [vmem:[#allocation63_spill] sm:$0xff] %v5935_v42  ;;  %v9230_v20 = vld [vmem:[#allocation90_spill] sm:$0xff] }
 0x264   :  { %9164 = vst [vmem:[#allocation66_spill] sm:$0xff] %v5939_v1  ;;  %9165 = vst [vmem:[#allocation68_spill] sm:$0xff] %v5943_v36  ;;  %v9171_v36 = vld [vmem:[#allocation74_spill] sm:$0xff]  ;;  %v6144_v61 = vmul.f32 0.2, %v9230_v20 }
 0x265   :  { %9166 = vst [vmem:[#allocation65_spill] sm:$0xff] %v5947_v2  ;;  %9167 = vst [vmem:[#allocation67_spill] sm:$0xff] %v5951_v33  ;;  %v5967_v62 = vadd.f32 %v5563_v13, %v9171_v36  ;;  %v9173_v2 = vld [vmem:[#allocation71_spill] sm:$0xff]  ;;  %v9175_v33 = vld [vmem:[#allocation73_spill] sm:$0xff] }
 0x266   :  { %9168 = vst [vmem:[#allocation72_spill] sm:$0xff] %v5955_v17  ;;  %9169 = vst [vmem:[#allocation93_spill] sm:$0xff] %v5959_v8  ;;  %v5971_v32 = vadd.f32 %v5563_v13, %v9173_v2  ;;  %v5975_v49 = vadd.f32 %v5563_v13, %v9175_v33  ;;  %v9177_v17 = vld [vmem:[#allocation80_spill] sm:$0xff]  ;;  %v9179_v8 = vld [vmem:[#allocation82_spill] sm:$0xff]  ;;  %v5991_v2 = vadd.f32 %v5563_v13, %v5472_v48 }
 0x267   :  { %9170 = vst [vmem:[#allocation94_spill] sm:$0xff] %v5963_v18  ;;  %9172 = vst [vmem:[#allocation74_spill] sm:$0xff] %v5967_v62  ;;  %v5979_v44 = vadd.f32 %v5563_v13, %v9177_v17  ;;  %v5983_v52 = vadd.f32 %v5563_v13, %v9179_v8  ;;  %v9181_v18 = vld [vmem:[#allocation79_spill] sm:$0xff]  ;;  %v5995_v33 = vadd.f32 %v5563_v13, %v5476_v16 }
 0x268   :  { %9174 = vst [vmem:[#allocation71_spill] sm:$0xff] %v5971_v32  ;;  %9176 = vst [vmem:[#allocation73_spill] sm:$0xff] %v5975_v49  ;;  %v5987_v36 = vadd.f32 %v5563_v13, %v9181_v18  ;;  %v9185_v49 = vld [vmem:[#allocation81_spill] sm:$0xff]  ;;  %v6003_v8 = vadd.f32 %v5563_v13, %v5484_v37  ;;  %v6007_v18 = vadd.f32 %v5563_v13, %v5488_v24 }
 0x269   :  { %9178 = vst [vmem:[#allocation80_spill] sm:$0xff] %v5979_v44  ;;  %9180 = vst [vmem:[#allocation82_spill] sm:$0xff] %v5983_v52  ;;  %v5999_v17 = vadd.f32 %v5563_v13, %v9185_v49  ;;  %v6011_v48 = vadd.f32 %v5563_v13, %v5492_v53  ;;  %v6015_v16 = vadd.f32 %v5563_v13, %v5496_v40  ;;  %v9224_v44 = vld [vmem:[#allocation75_spill] sm:$0xff] }
 0x26a   :  { %9182 = vst [vmem:[#allocation79_spill] sm:$0xff] %v5987_v36  ;;  %9183 = vst [vmem:[#allocation95_spill] sm:$0xff] %v5991_v2  ;;  %v6019_v49 = vadd.f32 %v5563_v13, %v5500_v12  ;;  %v6023_v37 = vadd.f32 %v5563_v13, %v5504_v15  ;;  %v6027_v24 = vadd.f32 %v5563_v13, %v5508_v19  ;;  %v9221_v2 = vld [vmem:[#allocation76_spill] sm:$0xff]  ;;  %v6123_v32 = vmul.f32 0.2, %v9224_v44 }
 0x26b   :  { %9184 = vst [vmem:[#allocation96_spill] sm:$0xff] %v5995_v33  ;;  %9186 = vst [vmem:[#allocation81_spill] sm:$0xff] %v5999_v17  ;;  %vm2170_vm1 = vcmp.gt.f32.partialorder %v9221_v2, 0.0  ;;  %vm2172_vm3 = vcmp.gt.f32.partialorder %v9224_v44, 0.0 }
 0x26c   :  { %9187 = vst [vmem:[#allocation97_spill] sm:$0xff] %v6003_v8  ;;  %9188 = vst [vmem:[#allocation98_spill] sm:$0xff] %v6007_v18  ;;  %v9194_v18 = vld [vmem:[#allocation19_spill] sm:$0xff] }
 0x26d   :  { %9189 = vst [vmem:[#allocation99_spill] sm:$0xff] %v6011_v48  ;;  %9190 = vst [vmem:[#allocation100_spill] sm:$0xff] %v6015_v16  ;;  %v6031_v53 = vadd.f32 %v5563_v13, %v9194_v18  ;;  %v9196_v48 = vld [vmem:[#allocation21_spill] sm:$0xff]  ;;  %v9198_v16 = vld [vmem:[#allocation18_spill] sm:$0xff] }
 0x26e   :  { %9191 = vst [vmem:[#allocation101_spill] sm:$0xff] %v6019_v49  ;;  %9192 = vst [vmem:[#allocation102_spill] sm:$0xff] %v6023_v37  ;;  %v6035_v40 = vadd.f32 %v5563_v13, %v9196_v48  ;;  %v6039_v12 = vadd.f32 %v5563_v13, %v9198_v16  ;;  %v9200_v49 = vld [vmem:[#allocation20_spill] sm:$0xff]  ;;  %v9202_v37 = vld [vmem:[#allocation27_spill] sm:$0xff] }
 0x26f   :  { %9193 = vst [vmem:[#allocation103_spill] sm:$0xff] %v6027_v24  ;;  %9195 = vst [vmem:[#allocation19_spill] sm:$0xff] %v6031_v53  ;;  %v6043_v15 = vadd.f32 %v5563_v13, %v9200_v49  ;;  %v6047_v19 = vadd.f32 %v5563_v13, %v9202_v37  ;;  %v9204_v24 = vld [vmem:[#allocation29_spill] sm:$0xff]  ;;  %v9206_v53 = vld [vmem:[#allocation26_spill] sm:$0xff]  ;;  %v6063_v49 = vadd.f32 %v5563_v13, %v5544_v25 }
 0x270   :  { %9197 = vst [vmem:[#allocation21_spill] sm:$0xff] %v6035_v40  ;;  %9199 = vst [vmem:[#allocation18_spill] sm:$0xff] %v6039_v12  ;;  %v6051_v18 = vadd.f32 %v5563_v13, %v9204_v24  ;;  %v6055_v48 = vadd.f32 %v5563_v13, %v9206_v53  ;;  %v9208_v40 = vld [vmem:[#allocation28_spill] sm:$0xff]  ;;  %v6067_v37 = vadd.f32 %v5563_v13, %v5548_v9  ;;  %v9214_v25 = vld [vmem:[#allocation35_spill] sm:$0xff]  ;;  %v2285_v9 = vmul.f32 0.2, %v5567_v34 }
 0x271   :  { %9201 = vst [vmem:[#allocation20_spill] sm:$0xff] %v6043_v15  ;;  %9203 = vst [vmem:[#allocation27_spill] sm:$0xff] %v6047_v19  ;;  %v6059_v16 = vadd.f32 %v5563_v13, %v9208_v40  ;;  %v6071_v24 = vadd.f32 %v5563_v13, %v5552_v54  ;;  %v6075_v53 = vadd.f32 %v5563_v13, %v5556_v26  ;;  %vm2165_vm12 = vcmp.gt.f32.partialorder %v9214_v25, 0.0  ;;  %v9215_v13 = vld [vmem:[#allocation36_spill] sm:$0xff]  ;;  %v9216_v40 = vld [vmem:[#allocation34_spill] sm:$0xff] }
 0x272   :  { %9205 = vst [vmem:[#allocation29_spill] sm:$0xff] %v6051_v18  ;;  %9207 = vst [vmem:[#allocation26_spill] sm:$0xff] %v6055_v48  ;;  %vm2166_vm13 = vcmp.gt.f32.partialorder %v9215_v13, 0.0  ;;  %v2286_v54 = vmul.f32 0.2, %v5571_v55  ;;  %vm2167_vm14 = vcmp.gt.f32.partialorder %v9216_v40, 0.0  ;;  %v6101_v19 = vsel %vm2157_vm4, %v5567_v34, %v2285_v9 }
 0x273   :  { %9209 = vst [vmem:[#allocation28_spill] sm:$0xff] %v6059_v16  ;;  %9210 = vst [vmem:[#allocation104_spill] sm:$0xff] %v6063_v49  ;;  %v2287_v26 = vmul.f32 0.2, %v5575_v3  ;;  %v9217_v49 = vld [vmem:[#allocation69_spill] sm:$0xff]  ;;  %v9219_v15 = vld [vmem:[#allocation70_spill] sm:$0xff] }
 0x274   :  { %9211 = vst [vmem:[#allocation105_spill] sm:$0xff] %v6067_v37  ;;  %9212 = vst [vmem:[#allocation106_spill] sm:$0xff] %v6071_v24  ;;  %v2289_v24 = vmul.f32 0.2, %v5583_v39  ;;  %v2290_v37 = vmul.f32 0.2, %v5587_v43  ;;  %v6110_v33 = vsel %vm2158_vm5, %v5571_v55, %v2286_v54 }
 0x275   :  { %9213 = vst [vmem:[#allocation107_spill] sm:$0xff] %v6075_v53  ;;  %v2288_v53 = vmul.f32 0.2, %v5579_v22  ;;  %vm2168_vm15 = vcmp.gt.f32.partialorder %v9217_v49, 0.0  ;;  %v2291_v16 = vmul.f32 0.2, %v5591_v6  ;;  %v6119_v52 = vsel %vm2159_vm6, %v5575_v3, %v2287_v26 }
 0x276   :  { %v2292_v48 = vmul.f32 0.2, %v5595_v21  ;;  %v2293_v18 = vmul.f32 0.2, %v9214_v25  ;;  %9218 = vst [vmem:[#allocation35_spill] sm:$0xff] %v6101_v19  ;;  %vm2169_vm0 = vcmp.gt.f32.partialorder %v9219_v15, 0.0  ;;  %v6149_v47 = vsel %vm2161_vm8, %v5583_v39, %v2289_v24 }
 0x277   :  { %v2294_v12 = vmul.f32 0.2, %v9215_v13  ;;  %v2295_v8 = vmul.f32 0.2, %v9216_v40  ;;  %v2296_v17 = vmul.f32 0.2, %v9217_v49  ;;  %v6134_v1 = vsel %vm2160_vm7, %v5579_v22, %v2288_v53 }
 0x278   :  { %9220 = vst [vmem:[#allocation36_spill] sm:$0xff] %v6110_v33  ;;  %v2297_v36 = vmul.f32 0.2, %v9219_v15  ;;  %v2298_v34 = vmul.f32 0.2, %v9221_v2  ;;  %v9222_v9 = vld [vmem:[#allocation78_spill] sm:$0xff]  ;;  %v6164_v51 = vsel %vm2162_vm9, %v5587_v43, %v2290_v37  ;;  %v6179_v45 = vsel %vm2163_vm10, %v5591_v6, %v2291_v16 }
 0x279   :  { %v2299_v19 = vmul.f32 0.2, %v9222_v9  ;;  %9223 = vst [vmem:[#allocation34_spill] sm:$0xff] %v6119_v52  ;;  %vm2171_vm2 = vcmp.gt.f32.partialorder %v9222_v9, 0.0  ;;  %v9225_v55 = vld [vmem:[#allocation77_spill] sm:$0xff]  ;;  %v9226_v33 = vld [vmem:[#allocation83_spill] sm:$0xff] }
 0x27a   :  { %v6126_v54 = vmul.f32 0.2, %v9225_v55  ;;  %v6129_v62 = vmul.f32 0.2, %v9226_v33  ;;  %9227 = vst [vmem:[#allocation69_spill] sm:$0xff] %v6134_v1  ;;  %v9228_v3 = vld [vmem:[#allocation87_spill] sm:$0xff] }
 0x27b   :  { %v6138_v26 = vmul.f32 0.2, %v9228_v3  ;;  %v9229_v52 = vld [vmem:[#allocation88_spill] sm:$0xff]  ;;  %9231 = vst [vmem:[#allocation70_spill] sm:$0xff] %v6149_v47  ;;  %vm2173_vm4 = vcmp.gt.f32.partialorder %v9225_v55, 0.0  ;;  %v9233_v1 = vld [vmem:[#allocation89_spill] sm:$0xff] }
 0x27c   :  { %v6141_v42 = vmul.f32 0.2, %v9229_v52  ;;  %v9232_v22 = vld [vmem:[#allocation92_spill] sm:$0xff]  ;;  %v6156_v28 = vmul.f32 0.2, %v9233_v1  ;;  %9235 = vst [vmem:[#allocation76_spill] sm:$0xff] %v6159_v41 }
 0x27d   :  { %v6153_v53 = vmul.f32 0.2, %v9232_v22  ;;  %9236 = vst [vmem:[#allocation78_spill] sm:$0xff] %v6164_v51  ;;  %vm2174_vm5 = vcmp.gt.f32.partialorder %v9226_v33, 0.0  ;;  %v9237_v39 = vld [vmem:[#allocation84_spill] sm:$0xff]  ;;  %v9239_v47 = vld [vmem:[#allocation86_spill] sm:$0xff] }
 0x27e   :  { %v6168_v24 = vmul.f32 0.2, %v9237_v39  ;;  %v6171_v38 = vmul.f32 0.2, %v9239_v47  ;;  %9242 = vst [vmem:[#allocation83_spill] sm:$0xff] %v6174_v7  ;;  %9243 = vst [vmem:[#allocation87_spill] sm:$0xff] %v6179_v45  ;;  %v6194_v7 = vsel %vm2164_vm11, %v5595_v21, %v2292_v48 }
 0x27f   :  { %vm2175_vm6 = vcmp.gt.f32.partialorder %v9228_v3, 0.0  ;;  %v9244_v43 = vld [vmem:[#allocation3_spill] sm:$0xff]  ;;  %v9246_v51 = vld [vmem:[#allocation5_spill] sm:$0xff]  ;;  %9250 = vst [vmem:[#allocation89_spill] sm:$0xff] %v6194_v7  ;;  %vm2176_vm7 = vcmp.gt.f32.partialorder %v9229_v52, 0.0  ;;  %v9251_v6 = vld [vmem:[#allocation4_spill] sm:$0xff] }
 0x280   :  { %9238 = vst [vmem:[#allocation75_spill] sm:$0xff] %v6168_v24  ;;  %9240 = vst [vmem:[#allocation77_spill] sm:$0xff] %v6171_v38  ;;  %v6183_v37 = vmul.f32 0.2, %v9244_v43  ;;  %v6186_v30 = vmul.f32 0.2, %v9246_v51 }
 0x281   :  { %v9248_v24 = vld [vmem:[#allocation2_spill] sm:$0xff]  ;;  %v6198_v16 = vmul.f32 0.2, %v9251_v6  ;;  %v9253_v45 = vld [vmem:[#allocation7_spill] sm:$0xff]  ;;  %vm2177_vm8 = vcmp.gt.f32.partialorder %v9230_v20, 0.0  ;;  %v9260_v7 = vld [vmem:[#allocation8_spill] sm:$0xff] }
 0x282   :  { %9245 = vst [vmem:[#allocation88_spill] sm:$0xff] %v6183_v37  ;;  %9247 = vst [vmem:[#allocation90_spill] sm:$0xff] %v6186_v30  ;;  %v6189_v10 = vmul.f32 0.2, %v9248_v24  ;;  %v6201_v38 = vmul.f32 0.2, %v9253_v45 }
 0x283   :  { %9252 = vst [vmem:[#allocation91_spill] sm:$0xff] %v6198_v16  ;;  %v9255_v37 = vld [vmem:[#allocation9_spill] sm:$0xff]  ;;  %v9258_v21 = vld [vmem:[#allocation6_spill] sm:$0xff]  ;;  %v6216_v30 = vmul.f32 0.2, %v9260_v7  ;;  %v9262_v16 = vld [vmem:[#allocation11_spill] sm:$0xff] }
 0x284   :  { %9249 = vst [vmem:[#allocation92_spill] sm:$0xff] %v6189_v10  ;;  %9254 = vst [vmem:[#allocation84_spill] sm:$0xff] %v6201_v38  ;;  %v6204_v23 = vmul.f32 0.2, %v9255_v37  ;;  %v6209_v10 = vsel %vm2165_vm12, %v9214_v25, %v2293_v18  ;;  %v6213_v48 = vmul.f32 0.2, %v9258_v21 }
 0x285   :  { %9257 = vst [vmem:[#allocation85_spill] sm:$0xff] %v6209_v10  ;;  %9261 = vst [vmem:[#allocation5_spill] sm:$0xff] %v6216_v30  ;;  %v6219_v41 = vmul.f32 0.2, %v9262_v16  ;;  %vm2178_vm9 = vcmp.gt.f32.partialorder %v9232_v22, 0.0  ;;  %v9265_v18 = vld [vmem:[#allocation13_spill] sm:$0xff] }
 0x286   :  { %9256 = vst [vmem:[#allocation86_spill] sm:$0xff] %v6204_v23  ;;  %9259 = vst [vmem:[#allocation3_spill] sm:$0xff] %v6213_v48  ;;  %v6224_v23 = vsel %vm2166_vm13, %v9215_v13, %v2294_v12  ;;  %v6228_v25 = vmul.f32 0.2, %v9265_v18  ;;  %v9267_v10 = vld [vmem:[#allocation10_spill] sm:$0xff]  ;;  %v9269_v48 = vld [vmem:[#allocation12_spill] sm:$0xff] }
 0x287   :  { %9263 = vst [vmem:[#allocation2_spill] sm:$0xff] %v6219_v41  ;;  %9264 = vst [vmem:[#allocation4_spill] sm:$0xff] %v6224_v23  ;;  %v6231_v38 = vmul.f32 0.2, %v9267_v10  ;;  %v6234_v11 = vmul.f32 0.2, %v9269_v48  ;;  %v6239_v41 = vsel %vm2167_vm14, %v9216_v40, %v2295_v8 }
 0x288   :  { %9266 = vst [vmem:[#allocation7_spill] sm:$0xff] %v6228_v25  ;;  %9271 = vst [vmem:[#allocation8_spill] sm:$0xff] %v6239_v41  ;;  %vm2179_vm10 = vcmp.gt.f32.partialorder %v9233_v1, 0.0  ;;  %v9272_v12 = vld [vmem:[#allocation15_spill] sm:$0xff]  ;;  %v9274_v23 = vld [vmem:[#allocation17_spill] sm:$0xff]  ;;  %vm2180_vm11 = vcmp.gt.f32.partialorder %v9234_v56, 0.0 }
 0x289   :  { %9268 = vst [vmem:[#allocation9_spill] sm:$0xff] %v6231_v38  ;;  %9270 = vst [vmem:[#allocation6_spill] sm:$0xff] %v6234_v11  ;;  %v6243_v13 = vmul.f32 0.2, %v9272_v12  ;;  %v6246_v30 = vmul.f32 0.2, %v9274_v23  ;;  %v6254_v11 = vsel %vm2168_vm15, %v9217_v49, %v2296_v17 }
 0x28a   :  { %v9276_v25 = vld [vmem:[#allocation14_spill] sm:$0xff]  ;;  %9278 = vst [vmem:[#allocation17_spill] sm:$0xff] %v6254_v11  ;;  %v9279_v8 = vld [vmem:[#allocation16_spill] sm:$0xff]  ;;  %v9281_v41 = vld [vmem:[#allocation23_spill] sm:$0xff]  ;;  %vm2181_vm12 = vcmp.gt.f32.partialorder %v9237_v39, 0.0  ;;  %vm2182_vm13 = vcmp.gt.f32.partialorder %v9239_v47, 0.0 }
 0x28b   :  { %9273 = vst [vmem:[#allocation11_spill] sm:$0xff] %v6243_v13  ;;  %9275 = vst [vmem:[#allocation10_spill] sm:$0xff] %v6246_v30  ;;  %v6249_v18 = vmul.f32 0.2, %v9276_v25  ;;  %v6258_v40 = vmul.f32 0.2, %v9279_v8 }
 0x28c   :  { %v6261_v38 = vmul.f32 0.2, %v9281_v41  ;;  %v9283_v13 = vld [vmem:[#allocation25_spill] sm:$0xff]  ;;  %v9286_v17 = vld [vmem:[#allocation22_spill] sm:$0xff]  ;;  %v9288_v11 = vld [vmem:[#allocation24_spill] sm:$0xff]  ;;  %vm2183_vm14 = vcmp.gt.f32.partialorder %v9241_v59, 0.0 }
 0x28d   :  { %9277 = vst [vmem:[#allocation12_spill] sm:$0xff] %v6249_v18  ;;  %9280 = vst [vmem:[#allocation14_spill] sm:$0xff] %v6258_v40  ;;  %v6264_v12 = vmul.f32 0.2, %v9283_v13  ;;  %v6269_v18 = vsel %vm2169_vm0, %v9219_v15, %v2297_v36  ;;  %v6273_v49 = vmul.f32 0.2, %v9286_v17 }
 0x28e   :  { %9282 = vst [vmem:[#allocation23_spill] sm:$0xff] %v6261_v38  ;;  %9285 = vst [vmem:[#allocation108_spill] sm:$0xff] %v6269_v18  ;;  %v6276_v30 = vmul.f32 0.2, %v9288_v11  ;;  %v9290_v40 = vld [vmem:[#allocation31_spill] sm:$0xff]  ;;  %v9293_v36 = vld [vmem:[#allocation33_spill] sm:$0xff] }
 0x28f   :  { %9284 = vst [vmem:[#allocation25_spill] sm:$0xff] %v6264_v12  ;;  %9287 = vst [vmem:[#allocation109_spill] sm:$0xff] %v6273_v49  ;;  %v6279_v8 = vmul.f32 0.2, %v9290_v40  ;;  %v6284_v12 = vsel %vm2170_vm1, %v9221_v2, %v2298_v34  ;;  %v6288_v15 = vmul.f32 0.2, %v9293_v36 }
 0x290   :  { %9289 = vst [vmem:[#allocation24_spill] sm:$0xff] %v6276_v30  ;;  %9292 = vst [vmem:[#allocation110_spill] sm:$0xff] %v6284_v12  ;;  %v9295_v18 = vld [vmem:[#allocation30_spill] sm:$0xff]  ;;  %v9297_v49 = vld [vmem:[#allocation32_spill] sm:$0xff]  ;;  %vm2184_vm15 = vcmp.gt.f32.partialorder %v9244_v43, 0.0  ;;  %vm2185_vm0 = vcmp.gt.f32.partialorder %v9246_v51, 0.0 }
 0x291   :  { %9291 = vst [vmem:[#allocation31_spill] sm:$0xff] %v6279_v8  ;;  %9294 = vst [vmem:[#allocation111_spill] sm:$0xff] %v6288_v15  ;;  %v6291_v38 = vmul.f32 0.2, %v9295_v18  ;;  %v6294_v17 = vmul.f32 0.2, %v9297_v49  ;;  %v6299_v8 = vsel %vm2171_vm2, %v9222_v9, %v2299_v19 }
 0x292   :  { %9299 = vst [vmem:[#allocation112_spill] sm:$0xff] %v6299_v8  ;;  %v9300_v2 = vld [vmem:[#allocation38_spill] sm:$0xff]  ;;  %v9302_v12 = vld [vmem:[#allocation40_spill] sm:$0xff]  ;;  %v9304_v15 = vld [vmem:[#allocation37_spill] sm:$0xff]  ;;  %vm2186_vm1 = vcmp.gt.f32.partialorder %v9248_v24, 0.0  ;;  %vm2187_vm2 = vcmp.gt.f32.partialorder %v9251_v6, 0.0 }
 0x293   :  { %9296 = vst [vmem:[#allocation30_spill] sm:$0xff] %v6291_v38  ;;  %9298 = vst [vmem:[#allocation32_spill] sm:$0xff] %v6294_v17  ;;  %v6303_v34 = vmul.f32 0.2, %v9300_v2  ;;  %v6306_v30 = vmul.f32 0.2, %v9302_v12  ;;  %v6315_v17 = vsel %vm2172_vm3, %v9224_v44, %v6123_v32 }
 0x294   :  { %v6309_v36 = vmul.f32 0.2, %v9304_v15  ;;  %9306 = vst [vmem:[#allocation114_spill] sm:$0xff] %v6315_v17  ;;  %v9307_v19 = vld [vmem:[#allocation39_spill] sm:$0xff]  ;;  %v9309_v8 = vld [vmem:[#allocation42_spill] sm:$0xff]  ;;  %v9314_v32 = vld [vmem:[#allocation41_spill] sm:$0xff] }
 0x295   :  { %9301 = vst [vmem:[#allocation38_spill] sm:$0xff] %v6303_v34  ;;  %9303 = vst [vmem:[#allocation113_spill] sm:$0xff] %v6306_v30  ;;  %v6319_v9 = vmul.f32 0.2, %v9307_v19  ;;  %v6322_v38 = vmul.f32 0.2, %v9309_v8 }
 0x296   :  { %9305 = vst [vmem:[#allocation37_spill] sm:$0xff] %v6309_v36  ;;  %v9311_v34 = vld [vmem:[#allocation44_spill] sm:$0xff]  ;;  %v6331_v36 = vsel %vm2173_vm4, %v9225_v55, %v6126_v54  ;;  %v6335_v44 = vmul.f32 0.2, %v9314_v32  ;;  %v9316_v17 = vld [vmem:[#allocation43_spill] sm:$0xff]  ;;  %vm2188_vm3 = vcmp.gt.f32.partialorder %v9253_v45, 0.0 }
 0x297   :  { %9308 = vst [vmem:[#allocation39_spill] sm:$0xff] %v6319_v9  ;;  %9310 = vst [vmem:[#allocation115_spill] sm:$0xff] %v6322_v38  ;;  %v6325_v12 = vmul.f32 0.2, %v9311_v34  ;;  %v6338_v30 = vmul.f32 0.2, %v9316_v17 }
 0x298   :  { %9313 = vst [vmem:[#allocation116_spill] sm:$0xff] %v6331_v36  ;;  %9315 = vst [vmem:[#allocation41_spill] sm:$0xff] %v6335_v44  ;;  %v9318_v9 = vld [vmem:[#allocation46_spill] sm:$0xff]  ;;  %v9321_v55 = vld [vmem:[#allocation48_spill] sm:$0xff]  ;;  %vm2189_vm4 = vcmp.gt.f32.partialorder %v9255_v37, 0.0 }
 0x299   :  { %9312 = vst [vmem:[#allocation44_spill] sm:$0xff] %v6325_v12  ;;  %9317 = vst [vmem:[#allocation117_spill] sm:$0xff] %v6338_v30  ;;  %v6341_v8 = vmul.f32 0.2, %v9318_v9  ;;  %v6347_v12 = vsel %vm2174_vm5, %v9226_v33, %v6129_v62  ;;  %v6351_v54 = vmul.f32 0.2, %v9321_v55 }
 0x29a   :  { %9320 = vst [vmem:[#allocation118_spill] sm:$0xff] %v6347_v12  ;;  %v9323_v36 = vld [vmem:[#allocation45_spill] sm:$0xff]  ;;  %v9325_v44 = vld [vmem:[#allocation47_spill] sm:$0xff]  ;;  %v6367_v62 = vmul.f32 0.2, %v5819_v35  ;;  %vm2190_vm5 = vcmp.gt.f32.partialorder %v9258_v21, 0.0 }
 0x29b   :  { %9319 = vst [vmem:[#allocation46_spill] sm:$0xff] %v6341_v8  ;;  %9322 = vst [vmem:[#allocation48_spill] sm:$0xff] %v6351_v54  ;;  %v6354_v38 = vmul.f32 0.2, %v9323_v36  ;;  %v6357_v17 = vmul.f32 0.2, %v9325_v44  ;;  %v6363_v8 = vsel %vm2175_vm6, %v9228_v3, %v6138_v26 }
 0x29c   :  { %9327 = vst [vmem:[#allocation119_spill] sm:$0xff] %v6363_v8  ;;  %9328 = vst [vmem:[#allocation120_spill] sm:$0xff] %v6367_v62  ;;  %v6370_v33 = vmul.f32 0.2, %v5823_v63  ;;  %v6373_v12 = vmul.f32 0.2, %v5827_v14 }
 0x29d   :  { %9324 = vst [vmem:[#allocation45_spill] sm:$0xff] %v6354_v38  ;;  %9326 = vst [vmem:[#allocation47_spill] sm:$0xff] %v6357_v17  ;;  %v6379_v17 = vsel %vm2176_vm7, %v9229_v52, %v6141_v42  ;;  %v6383_v3 = vmul.f32 0.2, %v5831_v4  ;;  %v6386_v26 = vmul.f32 0.2, %v5835_v31 }
 0x29e   :  { %9329 = vst [vmem:[#allocation121_spill] sm:$0xff] %v6370_v33  ;;  %9330 = vst [vmem:[#allocation122_spill] sm:$0xff] %v6373_v12  ;;  %v6389_v8 = vmul.f32 0.2, %v5839_v50  ;;  %v6395_v12 = vsel %vm2177_vm8, %v9230_v20, %v6144_v61  ;;  %v6399_v42 = vmul.f32 0.2, %v5843_v58 }
 0x29f   :  { %9331 = vst [vmem:[#allocation123_spill] sm:$0xff] %v6379_v17  ;;  %9332 = vst [vmem:[#allocation124_spill] sm:$0xff] %v6383_v3  ;;  %v6402_v52 = vmul.f32 0.2, %v5847_v57  ;;  %v6405_v17 = vmul.f32 0.2, %v5851_v46 }
 0x2a0   :  { %9333 = vst [vmem:[#allocation125_spill] sm:$0xff] %v6386_v26  ;;  %9334 = vst [vmem:[#allocation126_spill] sm:$0xff] %v6389_v8  ;;  %v6411_v8 = vsel %vm2178_vm9, %v9232_v22, %v6153_v53  ;;  %v6415_v61 = vmul.f32 0.2, %v5855_v27  ;;  %v6418_v20 = vmul.f32 0.2, %v5859_v29 }
 0x2a1   :  { %9335 = vst [vmem:[#allocation127_spill] sm:$0xff] %v6395_v12  ;;  %9336 = vst [vmem:[#allocation128_spill] sm:$0xff] %v6399_v42  ;;  %v6421_v12 = vmul.f32 0.2, %v5863_v60  ;;  %vm2191_vm6 = vcmp.gt.f32.partialorder %v9260_v7, 0.0  ;;  %vm2192_vm7 = vcmp.gt.f32.partialorder %v9262_v16, 0.0 }
 0x2a2   :  { %9337 = vst [vmem:[#allocation129_spill] sm:$0xff] %v6402_v52  ;;  %9338 = vst [vmem:[#allocation130_spill] sm:$0xff] %v6405_v17  ;;  %v6427_v17 = vsel %vm2179_vm10, %v9233_v1, %v6156_v28  ;;  %v6431_v22 = vmul.f32 0.2, %v5867_v5  ;;  %v6434_v53 = vmul.f32 0.2, %v5871_v0 }
 0x2a3   :  { %9339 = vst [vmem:[#allocation131_spill] sm:$0xff] %v6411_v8  ;;  %9340 = vst [vmem:[#allocation132_spill] sm:$0xff] %v6415_v61  ;;  %v9346_v8 = vld [vmem:[#allocation50_spill] sm:$0xff]  ;;  %v9350_v28 = vld [vmem:[#allocation52_spill] sm:$0xff]  ;;  %vm2194_vm9 = vcmp.gt.f32.partialorder %v9267_v10, 0.0  ;;  %vm2195_vm10 = vcmp.gt.f32.partialorder %v9269_v48, 0.0 }
 0x2a4   :  { %9341 = vst [vmem:[#allocation133_spill] sm:$0xff] %v6418_v20  ;;  %9342 = vst [vmem:[#allocation134_spill] sm:$0xff] %v6421_v12  ;;  %v6437_v61 = vmul.f32 0.2, %v9346_v8  ;;  %v9348_v20 = vld [vmem:[#allocation76_spill] sm:$0xff]  ;;  %v9358_v26 = vld [vmem:[#allocation13_spill] sm:$0xff] }
 0x2a5   :  { %9343 = vst [vmem:[#allocation135_spill] sm:$0xff] %v6427_v17  ;;  %9344 = vst [vmem:[#allocation136_spill] sm:$0xff] %v6431_v22  ;;  %v6443_v12 = vsel %vm2180_vm11, %v9234_v56, %v9348_v20  ;;  %v6447_v1 = vmul.f32 0.2, %v9350_v28  ;;  %v9352_v17 = vld [vmem:[#allocation49_spill] sm:$0xff]  ;;  %v9354_v22 = vld [vmem:[#allocation51_spill] sm:$0xff] }
 0x2a6   :  { %9345 = vst [vmem:[#allocation137_spill] sm:$0xff] %v6434_v53  ;;  %9347 = vst [vmem:[#allocation138_spill] sm:$0xff] %v6437_v61  ;;  %v6450_v52 = vmul.f32 0.2, %v9352_v17  ;;  %v6453_v42 = vmul.f32 0.2, %v9354_v22 }
 0x2a7   :  { %9349 = vst [vmem:[#allocation76_spill] sm:$0xff] %v6443_v12  ;;  %9351 = vst [vmem:[#allocation52_spill] sm:$0xff] %v6447_v1  ;;  %v9356_v53 = vld [vmem:[#allocation75_spill] sm:$0xff]  ;;  %vm2193_vm8 = vcmp.gt.f32.partialorder %v9358_v26, 0.0  ;;  %v9359_v56 = vld [vmem:[#allocation54_spill] sm:$0xff] }
 0x2a8   :  { %9353 = vst [vmem:[#allocation49_spill] sm:$0xff] %v6450_v52  ;;  %9355 = vst [vmem:[#allocation51_spill] sm:$0xff] %v6453_v42  ;;  %v6459_v61 = vsel %vm2181_vm12, %v9237_v39, %v9356_v53  ;;  %v6463_v20 = vmul.f32 0.2, %v9359_v56  ;;  %v9361_v12 = vld [vmem:[#allocation56_spill] sm:$0xff]  ;;  %v9363_v1 = vld [vmem:[#allocation53_spill] sm:$0xff] }
 0x2a9   :  { %9357 = vst [vmem:[#allocation75_spill] sm:$0xff] %v6459_v61  ;;  %v6466_v3 = vmul.f32 0.2, %v9361_v12  ;;  %v6469_v33 = vmul.f32 0.2, %v9363_v1  ;;  %v9365_v52 = vld [vmem:[#allocation77_spill] sm:$0xff] }
 0x2aa   :  { %9360 = vst [vmem:[#allocation13_spill] sm:$0xff] %v6463_v20  ;;  %v6475_v42 = vsel %vm2182_vm13, %v9239_v47, %v9365_v52  ;;  %v9367_v39 = vld [vmem:[#allocation55_spill] sm:$0xff]  ;;  %v9369_v61 = vld [vmem:[#allocation58_spill] sm:$0xff]  ;;  %v9371_v20 = vld [vmem:[#allocation60_spill] sm:$0xff]  ;;  %vm2197_vm12 = vcmp.gt.f32.partialorder %v9274_v23, 0.0 }
 0x2ab   :  { %9362 = vst [vmem:[#allocation54_spill] sm:$0xff] %v6466_v3  ;;  %9364 = vst [vmem:[#allocation56_spill] sm:$0xff] %v6469_v33  ;;  %v6479_v53 = vmul.f32 0.2, %v9367_v39  ;;  %v6482_v62 = vmul.f32 0.2, %v9369_v61 }
 0x2ac   :  { %9366 = vst [vmem:[#allocation53_spill] sm:$0xff] %v6475_v42  ;;  %v6485_v38 = vmul.f32 0.2, %v9371_v20  ;;  %v9373_v3 = vld [vmem:[#allocation83_spill] sm:$0xff]  ;;  %v9375_v47 = vld [vmem:[#allocation57_spill] sm:$0xff]  ;;  %v9495_v39 = vld [vmem:[#allocation60_spill] sm:$0xff] }
 0x2ad   :  { %9368 = vst [vmem:[#allocation77_spill] sm:$0xff] %v6479_v53  ;;  %9370 = vst [vmem:[#allocation139_spill] sm:$0xff] %v6482_v62  ;;  %v6491_v33 = vsel %vm2183_vm14, %v9241_v59, %v9373_v3  ;;  %v6495_v52 = vmul.f32 0.2, %v9375_v47  ;;  %v9377_v42 = vld [vmem:[#allocation59_spill] sm:$0xff]  ;;  %v9379_v53 = vld [vmem:[#allocation62_spill] sm:$0xff] }
 0x2ae   :  { %9372 = vst [vmem:[#allocation140_spill] sm:$0xff] %v6485_v38  ;;  %9374 = vst [vmem:[#allocation83_spill] sm:$0xff] %v6491_v33  ;;  %v6498_v54 = vmul.f32 0.2, %v9377_v42  ;;  %v6501_v30 = vmul.f32 0.2, %v9379_v53 }
 0x2af   :  { %9376 = vst [vmem:[#allocation141_spill] sm:$0xff] %v6495_v52  ;;  %v9381_v62 = vld [vmem:[#allocation88_spill] sm:$0xff]  ;;  %v9383_v20 = vld [vmem:[#allocation15_spill] sm:$0xff]  ;;  %v9386_v33 = vld [vmem:[#allocation61_spill] sm:$0xff] }
 0x2b0   :  { %9378 = vst [vmem:[#allocation142_spill] sm:$0xff] %v6498_v54  ;;  %9380 = vst [vmem:[#allocation143_spill] sm:$0xff] %v6501_v30  ;;  %v6507_v38 = vsel %vm2184_vm15, %v9244_v43, %v9381_v62  ;;  %vm2196_vm11 = vcmp.gt.f32.partialorder %v9383_v20, 0.0  ;;  %v9384_v59 = vld [vmem:[#allocation64_spill] sm:$0xff]  ;;  %v6514_v47 = vmul.f32 0.2, %v9386_v33 }
 0x2b1   :  { %9382 = vst [vmem:[#allocation88_spill] sm:$0xff] %v6507_v38  ;;  %v6511_v3 = vmul.f32 0.2, %v9384_v59  ;;  %v9388_v52 = vld [vmem:[#allocation63_spill] sm:$0xff]  ;;  %v9390_v54 = vld [vmem:[#allocation90_spill] sm:$0xff]  ;;  %v9394_v38 = vld [vmem:[#allocation68_spill] sm:$0xff] }
 0x2b2   :  { %9387 = vst [vmem:[#allocation64_spill] sm:$0xff] %v6514_v47  ;;  %v6517_v42 = vmul.f32 0.2, %v9388_v52  ;;  %v6523_v30 = vsel %vm2185_vm0, %v9246_v51, %v9390_v54  ;;  %v9392_v43 = vld [vmem:[#allocation66_spill] sm:$0xff]  ;;  %v9396_v47 = vld [vmem:[#allocation65_spill] sm:$0xff]  ;;  %v9400_v51 = vld [vmem:[#allocation16_spill] sm:$0xff] }
 0x2b3   :  { %9385 = vst [vmem:[#allocation15_spill] sm:$0xff] %v6511_v3  ;;  %9391 = vst [vmem:[#allocation90_spill] sm:$0xff] %v6523_v30  ;;  %v6528_v62 = vmul.f32 0.2, %v9392_v43  ;;  %v6531_v3 = vmul.f32 0.2, %v9394_v38 }
 0x2b4   :  { %9389 = vst [vmem:[#allocation144_spill] sm:$0xff] %v6517_v42  ;;  %v6534_v33 = vmul.f32 0.2, %v9396_v47  ;;  %v9398_v42 = vld [vmem:[#allocation92_spill] sm:$0xff]  ;;  %vm2199_vm14 = vcmp.gt.f32.partialorder %v9400_v51, 0.0  ;;  %v9401_v54 = vld [vmem:[#allocation22_spill] sm:$0xff] }
 0x2b5   :  { %9393 = vst [vmem:[#allocation145_spill] sm:$0xff] %v6528_v62  ;;  %9395 = vst [vmem:[#allocation146_spill] sm:$0xff] %v6531_v3  ;;  %v6540_v52 = vsel %vm2186_vm1, %v9248_v24, %v9398_v42  ;;  %v9402_v30 = vld [vmem:[#allocation67_spill] sm:$0xff]  ;;  %v9404_v3 = vld [vmem:[#allocation72_spill] sm:$0xff]  ;;  %vm2203_vm1 = vcmp.gt.f32.partialorder %v9288_v11, 0.0  ;;  %vm2243_vm15 = vcmp.gt.f32.partialorder %v9495_v39, 0.0 }
 0x2b6   :  { %9397 = vst [vmem:[#allocation147_spill] sm:$0xff] %v6534_v33  ;;  %9399 = vst [vmem:[#allocation92_spill] sm:$0xff] %v6540_v52  ;;  %v6547_v62 = vmul.f32 0.2, %v9402_v30  ;;  %v6550_v47 = vmul.f32 0.2, %v9404_v3 }
 0x2b7   :  { %v9406_v33 = vld [vmem:[#allocation93_spill] sm:$0xff]  ;;  %v9408_v43 = vld [vmem:[#allocation91_spill] sm:$0xff]  ;;  %v9411_v52 = vld [vmem:[#allocation94_spill] sm:$0xff] }
 0x2b8   :  { %9403 = vst [vmem:[#allocation16_spill] sm:$0xff] %v6547_v62  ;;  %9405 = vst [vmem:[#allocation22_spill] sm:$0xff] %v6550_v47  ;;  %v6553_v38 = vmul.f32 0.2, %v9406_v33  ;;  %v6559_v24 = vsel %vm2187_vm2, %v9251_v6, %v9408_v43  ;;  %v9410_v42 = vld [vmem:[#allocation33_spill] sm:$0xff]  ;;  %v9413_v47 = vld [vmem:[#allocation74_spill] sm:$0xff] }
 0x2b9   :  { %9409 = vst [vmem:[#allocation91_spill] sm:$0xff] %v6559_v24  ;;  %v6566_v62 = vmul.f32 0.2, %v9411_v52  ;;  %v6569_v33 = vmul.f32 0.2, %v9413_v47  ;;  %v9417_v30 = vld [vmem:[#allocation84_spill] sm:$0xff] }
 0x2ba   :  { %9407 = vst [vmem:[#allocation148_spill] sm:$0xff] %v6553_v38  ;;  %v9415_v38 = vld [vmem:[#allocation71_spill] sm:$0xff]  ;;  %v6578_v6 = vsel %vm2188_vm3, %v9253_v45, %v9417_v30  ;;  %vm2207_vm2 = vcmp.gt.f32.partialorder %v9297_v49, 0.0  ;;  %v9419_v43 = vld [vmem:[#allocation40_spill] sm:$0xff]  ;;  %v9420_v24 = vld [vmem:[#allocation73_spill] sm:$0xff]  ;;  %vm2211_vm3 = vcmp.gt.f32.partialorder %v9307_v19, 0.0 }
 0x2bb   :  { %9412 = vst [vmem:[#allocation33_spill] sm:$0xff] %v6566_v62  ;;  %9414 = vst [vmem:[#allocation149_spill] sm:$0xff] %v6569_v33  ;;  %v6572_v3 = vmul.f32 0.2, %v9415_v38  ;;  %v6585_v62 = vmul.f32 0.2, %v9420_v24 }
 0x2bc   :  { %9418 = vst [vmem:[#allocation84_spill] sm:$0xff] %v6578_v6  ;;  %v9422_v33 = vld [vmem:[#allocation80_spill] sm:$0xff]  ;;  %v9426_v52 = vld [vmem:[#allocation86_spill] sm:$0xff]  ;;  %v9429_v6 = vld [vmem:[#allocation79_spill] sm:$0xff] }
 0x2bd   :  { %9416 = vst [vmem:[#allocation150_spill] sm:$0xff] %v6572_v3  ;;  %9421 = vst [vmem:[#allocation40_spill] sm:$0xff] %v6585_v62  ;;  %v6588_v38 = vmul.f32 0.2, %v9422_v33  ;;  %v9424_v3 = vld [vmem:[#allocation82_spill] sm:$0xff]  ;;  %v6597_v30 = vsel %vm2189_vm4, %v9255_v37, %v9426_v52  ;;  %v9435_v24 = vld [vmem:[#allocation3_spill] sm:$0xff] }
 0x2be   :  { %v6591_v47 = vmul.f32 0.2, %v9424_v3  ;;  %9427 = vst [vmem:[#allocation86_spill] sm:$0xff] %v6597_v30  ;;  %v9428_v45 = vld [vmem:[#allocation42_spill] sm:$0xff]  ;;  %v6604_v62 = vmul.f32 0.2, %v9429_v6  ;;  %v6616_v37 = vsel %vm2190_vm5, %v9258_v21, %v9435_v24 }
 0x2bf   :  { %9423 = vst [vmem:[#allocation151_spill] sm:$0xff] %v6588_v38  ;;  %v9431_v38 = vld [vmem:[#allocation95_spill] sm:$0xff]  ;;  %9436 = vst [vmem:[#allocation3_spill] sm:$0xff] %v6616_v37  ;;  %v9438_v30 = vld [vmem:[#allocation81_spill] sm:$0xff]  ;;  %vm2219_vm5 = vcmp.gt.f32.partialorder %v9325_v44, 0.0 }
 0x2c0   :  { %9425 = vst [vmem:[#allocation152_spill] sm:$0xff] %v6591_v47  ;;  %9430 = vst [vmem:[#allocation42_spill] sm:$0xff] %v6604_v62  ;;  %v6607_v3 = vmul.f32 0.2, %v9431_v38  ;;  %v9433_v47 = vld [vmem:[#allocation96_spill] sm:$0xff]  ;;  %v9437_v52 = vld [vmem:[#allocation43_spill] sm:$0xff] }
 0x2c1   :  { %v6610_v33 = vmul.f32 0.2, %v9433_v47  ;;  %vm2215_vm4 = vcmp.gt.f32.partialorder %v9437_v52, 0.0  ;;  %v6623_v62 = vmul.f32 0.2, %v9438_v30  ;;  %v9444_v6 = vld [vmem:[#allocation5_spill] sm:$0xff] }
 0x2c2   :  { %9432 = vst [vmem:[#allocation153_spill] sm:$0xff] %v6607_v3  ;;  %v9440_v3 = vld [vmem:[#allocation97_spill] sm:$0xff]  ;;  %v6635_v21 = vsel %vm2191_vm6, %v9260_v7, %v9444_v6  ;;  %v9446_v24 = vld [vmem:[#allocation99_spill] sm:$0xff]  ;;  %vm2223_vm6 = vcmp.gt.f32.partialorder %v5831_v4, 0.0  ;;  %v9454_v6 = vld [vmem:[#allocation102_spill] sm:$0xff] }
 0x2c3   :  { %9434 = vst [vmem:[#allocation154_spill] sm:$0xff] %v6610_v33  ;;  %9439 = vst [vmem:[#allocation43_spill] sm:$0xff] %v6623_v62  ;;  %v6626_v47 = vmul.f32 0.2, %v9440_v3  ;;  %v9442_v33 = vld [vmem:[#allocation98_spill] sm:$0xff]  ;;  %v9484_v8 = vld [vmem:[#allocation11_spill] sm:$0xff] }
 0x2c4   :  { %v6629_v38 = vmul.f32 0.2, %v9442_v33  ;;  %9445 = vst [vmem:[#allocation5_spill] sm:$0xff] %v6635_v21  ;;  %v6642_v37 = vmul.f32 0.2, %v9446_v24  ;;  %v9452_v3 = vld [vmem:[#allocation2_spill] sm:$0xff] }
 0x2c5   :  { %9441 = vst [vmem:[#allocation81_spill] sm:$0xff] %v6626_v47  ;;  %v9448_v47 = vld [vmem:[#allocation100_spill] sm:$0xff]  ;;  %v6654_v7 = vsel %vm2192_vm7, %v9262_v16, %v9452_v3  ;;  %v6661_v21 = vmul.f32 0.2, %v9454_v6  ;;  %vm2227_vm7 = vcmp.gt.f32.partialorder %v5847_v57, 0.0  ;;  %v9462_v3 = vld [vmem:[#allocation21_spill] sm:$0xff] }
 0x2c6   :  { %9443 = vst [vmem:[#allocation155_spill] sm:$0xff] %v6629_v38  ;;  %9447 = vst [vmem:[#allocation99_spill] sm:$0xff] %v6642_v37  ;;  %v6645_v62 = vmul.f32 0.2, %v9448_v47  ;;  %v9450_v38 = vld [vmem:[#allocation101_spill] sm:$0xff]  ;;  %v9460_v47 = vld [vmem:[#allocation7_spill] sm:$0xff] }
 0x2c7   :  { %v6648_v33 = vmul.f32 0.2, %v9450_v38  ;;  %9453 = vst [vmem:[#allocation2_spill] sm:$0xff] %v6654_v7  ;;  %9455 = vst [vmem:[#allocation102_spill] sm:$0xff] %v6661_v21  ;;  %v6673_v16 = vsel %vm2193_vm8, %v9358_v26, %v9460_v47  ;;  %v6680_v7 = vmul.f32 0.2, %v9462_v3 }
 0x2c8   :  { %9449 = vst [vmem:[#allocation156_spill] sm:$0xff] %v6645_v62  ;;  %v9456_v62 = vld [vmem:[#allocation103_spill] sm:$0xff]  ;;  %9461 = vst [vmem:[#allocation7_spill] sm:$0xff] %v6673_v16  ;;  %vm2231_vm8 = vcmp.gt.f32.partialorder %v5863_v60, 0.0  ;;  %v9496_v61 = vld [vmem:[#allocation57_spill] sm:$0xff] }
 0x2c9   :  { %9451 = vst [vmem:[#allocation157_spill] sm:$0xff] %v6648_v33  ;;  %v6664_v37 = vmul.f32 0.2, %v9456_v62  ;;  %v9458_v33 = vld [vmem:[#allocation19_spill] sm:$0xff]  ;;  %9463 = vst [vmem:[#allocation21_spill] sm:$0xff] %v6680_v7  ;;  %v9468_v62 = vld [vmem:[#allocation9_spill] sm:$0xff] }
 0x2ca   :  { %v6667_v38 = vmul.f32 0.2, %v9458_v33  ;;  %v6692_v26 = vsel %vm2194_vm9, %v9267_v10, %v9468_v62  ;;  %v9470_v47 = vld [vmem:[#allocation27_spill] sm:$0xff]  ;;  %vm2235_vm9 = vcmp.gt.f32.partialorder %v9350_v28, 0.0  ;;  %v9478_v62 = vld [vmem:[#allocation28_spill] sm:$0xff] }
 0x2cb   :  { %9457 = vst [vmem:[#allocation158_spill] sm:$0xff] %v6664_v37  ;;  %v9464_v37 = vld [vmem:[#allocation18_spill] sm:$0xff]  ;;  %9469 = vst [vmem:[#allocation9_spill] sm:$0xff] %v6692_v26  ;;  %v6699_v16 = vmul.f32 0.2, %v9470_v47  ;;  %vm2280_vm0 = vcmp.gt.f32.partialorder %v9478_v62, 0.0 }
 0x2cc   :  { %9459 = vst [vmem:[#allocation159_spill] sm:$0xff] %v6667_v38  ;;  %v6683_v21 = vmul.f32 0.2, %v9464_v37  ;;  %v9466_v38 = vld [vmem:[#allocation20_spill] sm:$0xff]  ;;  %v9476_v37 = vld [vmem:[#allocation6_spill] sm:$0xff] }
 0x2cd   :  { %v6686_v33 = vmul.f32 0.2, %v9466_v38  ;;  %9471 = vst [vmem:[#allocation27_spill] sm:$0xff] %v6699_v16  ;;  %v6711_v10 = vsel %vm2195_vm10, %v9269_v48, %v9476_v37  ;;  %v6718_v26 = vmul.f32 0.2, %v9478_v62  ;;  %v6730_v48 = vsel %vm2196_vm11, %v9383_v20, %v9484_v8  ;;  %v9486_v37 = vld [vmem:[#allocation106_spill] sm:$0xff] }
 0x2ce   :  { %9465 = vst [vmem:[#allocation160_spill] sm:$0xff] %v6683_v21  ;;  %v9472_v21 = vld [vmem:[#allocation29_spill] sm:$0xff]  ;;  %9477 = vst [vmem:[#allocation6_spill] sm:$0xff] %v6711_v10  ;;  %v6737_v10 = vmul.f32 0.2, %v9486_v37  ;;  %v9492_v20 = vld [vmem:[#allocation12_spill] sm:$0xff] }
 0x2cf   :  { %9467 = vst [vmem:[#allocation161_spill] sm:$0xff] %v6686_v33  ;;  %v6702_v7 = vmul.f32 0.2, %v9472_v21  ;;  %v9474_v33 = vld [vmem:[#allocation26_spill] sm:$0xff]  ;;  %9479 = vst [vmem:[#allocation28_spill] sm:$0xff] %v6718_v26  ;;  %vm9493_vm11 = vcmp.gt.f32.partialorder %v9276_v25, 0.0 }
 0x2d0   :  { %v6705_v38 = vmul.f32 0.2, %v9474_v33  ;;  %9485 = vst [vmem:[#allocation11_spill] sm:$0xff] %v6730_v48  ;;  %9487 = vst [vmem:[#allocation106_spill] sm:$0xff] %v6737_v10  ;;  %v6752_v48 = vsel %vm9493_vm11, %v9276_v25, %v9492_v20  ;;  %v9497_v10 = vld [vmem:[#allocation59_spill] sm:$0xff]  ;;  %v9503_v20 = vld [vmem:[#allocation25_spill] sm:$0xff] }
 0x2d1   :  { %9473 = vst [vmem:[#allocation29_spill] sm:$0xff] %v6702_v7  ;;  %v9480_v7 = vld [vmem:[#allocation104_spill] sm:$0xff]  ;;  %9494 = vst [vmem:[#allocation12_spill] sm:$0xff] %v6752_v48  ;;  %vm9504_vm11 = vcmp.gt.f32.partialorder %v9283_v13, 0.0  ;;  %vm9507_vm10 = vcmp.gt.f32.partialorder %v9401_v54, 0.0 }
 0x2d2   :  { %9475 = vst [vmem:[#allocation162_spill] sm:$0xff] %v6705_v38  ;;  %v6721_v16 = vmul.f32 0.2, %v9480_v7  ;;  %v9482_v38 = vld [vmem:[#allocation105_spill] sm:$0xff]  ;;  %v6774_v48 = vsel %vm9504_vm11, %v9283_v13, %v9503_v20  ;;  %v9514_v20 = vld [vmem:[#allocation31_spill] sm:$0xff]  ;;  %vm9515_vm11 = vcmp.gt.f32.partialorder %v9290_v40, 0.0 }
 0x2d3   :  { %v6724_v33 = vmul.f32 0.2, %v9482_v38  ;;  %9505 = vst [vmem:[#allocation59_spill] sm:$0xff] %v6774_v48  ;;  %v9520_v48 = vld [vmem:[#allocation30_spill] sm:$0xff] }
 0x2d4   :  { %9481 = vst [vmem:[#allocation104_spill] sm:$0xff] %v6721_v16  ;;  %v9488_v16 = vld [vmem:[#allocation107_spill] sm:$0xff] }
 0x2d5   :  { %9483 = vst [vmem:[#allocation105_spill] sm:$0xff] %v6724_v33  ;;  %v6740_v26 = vmul.f32 0.2, %v9488_v16  ;;  %v9490_v33 = vld [vmem:[#allocation10_spill] sm:$0xff] }
 0x2d6   :  { %v6746_v8 = vsel %vm2197_vm12, %v9274_v23, %v9490_v33  ;;  %v9500_v33 = vld [vmem:[#allocation23_spill] sm:$0xff]  ;;  %vm9501_vm12 = vcmp.gt.f32.partialorder %v9281_v41, 0.0 }
 0x2d7   :  { %9489 = vst [vmem:[#allocation107_spill] sm:$0xff] %v6740_v26  ;;  %9491 = vst [vmem:[#allocation10_spill] sm:$0xff] %v6746_v8  ;;  %v9498_v26 = vld [vmem:[#allocation14_spill] sm:$0xff]  ;;  %v6768_v25 = vsel %vm9501_vm12, %v9281_v41, %v9500_v33  ;;  %v9506_v8 = vld [vmem:[#allocation109_spill] sm:$0xff]  ;;  %vm9521_vm12 = vcmp.gt.f32.partialorder %v9295_v18, 0.0 }
 0x2d8   :  { %v6762_v23 = vsel %vm2199_vm14, %v9400_v51, %v9498_v26  ;;  %9502 = vst [vmem:[#allocation57_spill] sm:$0xff] %v6768_v25  ;;  %v6780_v53 = vsel %vm9507_vm10, %v9401_v54, %v9506_v8  ;;  %vm2247_vm14 = vcmp.gt.f32.partialorder %v9384_v59, 0.0  ;;  %v9509_v51 = vld [vmem:[#allocation61_spill] sm:$0xff]  ;;  %v9510_v26 = vld [vmem:[#allocation63_spill] sm:$0xff]  ;;  %v9511_v41 = vld [vmem:[#allocation66_spill] sm:$0xff]  ;;  %v6796_v54 = vsel %vm9515_vm11, %v9290_v40, %v9514_v20 }
 0x2d9   :  { %9499 = vst [vmem:[#allocation60_spill] sm:$0xff] %v6762_v23  ;;  %9508 = vst [vmem:[#allocation14_spill] sm:$0xff] %v6780_v53  ;;  %v9512_v33 = vld [vmem:[#allocation24_spill] sm:$0xff]  ;;  %v9517_v8 = vld [vmem:[#allocation111_spill] sm:$0xff]  ;;  %vm9518_vm10 = vcmp.gt.f32.partialorder %v9410_v42, 0.0  ;;  %v6808_v25 = vsel %vm9521_vm12, %v9295_v18, %v9520_v48  ;;  %vm9533_vm12 = vcmp.gt.f32.partialorder %v9419_v43, 0.0 }
 0x2da   :  { %v6790_v13 = vsel %vm2203_vm1, %v9288_v11, %v9512_v33  ;;  %9516 = vst [vmem:[#allocation25_spill] sm:$0xff] %v6796_v54  ;;  %v6802_v53 = vsel %vm9518_vm10, %v9410_v42, %v9517_v8  ;;  %9522 = vst [vmem:[#allocation61_spill] sm:$0xff] %v6808_v25  ;;  %v9523_v11 = vld [vmem:[#allocation68_spill] sm:$0xff]  ;;  %v9524_v33 = vld [vmem:[#allocation65_spill] sm:$0xff]  ;;  %vm9530_vm10 = vcmp.gt.f32.partialorder %v9300_v2, 0.0  ;;  %vm9536_vm11 = vcmp.gt.f32.partialorder %v9304_v15, 0.0 }
 0x2db   :  { %9513 = vst [vmem:[#allocation23_spill] sm:$0xff] %v6790_v13  ;;  %9519 = vst [vmem:[#allocation109_spill] sm:$0xff] %v6802_v53  ;;  %vm2251_vm1 = vcmp.gt.f32.partialorder %v9523_v11, 0.0  ;;  %v9525_v13 = vld [vmem:[#allocation67_spill] sm:$0xff]  ;;  %v9526_v40 = vld [vmem:[#allocation72_spill] sm:$0xff] }
 0x2dc   :  { %v9527_v20 = vld [vmem:[#allocation32_spill] sm:$0xff]  ;;  %v9529_v8 = vld [vmem:[#allocation38_spill] sm:$0xff]  ;;  %v9532_v48 = vld [vmem:[#allocation113_spill] sm:$0xff] }
 0x2dd   :  { %v6818_v42 = vsel %vm2207_vm2, %v9297_v49, %v9527_v20  ;;  %v6824_v18 = vsel %vm9530_vm10, %v9300_v2, %v9529_v8  ;;  %v6830_v25 = vsel %vm9533_vm12, %v9419_v43, %v9532_v48  ;;  %v9535_v53 = vld [vmem:[#allocation37_spill] sm:$0xff]  ;;  %v9539_v20 = vld [vmem:[#allocation94_spill] sm:$0xff]  ;;  %v9541_v2 = vld [vmem:[#allocation71_spill] sm:$0xff]  ;;  %vm9545_vm12 = vcmp.gt.f32.partialorder %v9428_v45, 0.0 }
 0x2de   :  { %9528 = vst [vmem:[#allocation63_spill] sm:$0xff] %v6818_v42  ;;  %9531 = vst [vmem:[#allocation66_spill] sm:$0xff] %v6824_v18  ;;  %v6836_v54 = vsel %vm9536_vm11, %v9304_v15, %v9535_v53  ;;  %v9538_v49 = vld [vmem:[#allocation93_spill] sm:$0xff]  ;;  %v9540_v42 = vld [vmem:[#allocation74_spill] sm:$0xff]  ;;  %vm9548_vm11 = vcmp.gt.f32.partialorder %v9311_v34, 0.0  ;;  %vm9551_vm10 = vcmp.gt.f32.partialorder %v9314_v32, 0.0 }
 0x2df   :  { %9534 = vst [vmem:[#allocation24_spill] sm:$0xff] %v6830_v25  ;;  %9537 = vst [vmem:[#allocation31_spill] sm:$0xff] %v6836_v54  ;;  %vm2255_vm2 = vcmp.gt.f32.partialorder %v9538_v49, 0.0  ;;  %v9542_v8 = vld [vmem:[#allocation39_spill] sm:$0xff]  ;;  %v9547_v53 = vld [vmem:[#allocation44_spill] sm:$0xff] }
 0x2e0   :  { %v6846_v43 = vsel %vm2211_vm3, %v9307_v19, %v9542_v8  ;;  %v9544_v48 = vld [vmem:[#allocation115_spill] sm:$0xff]  ;;  %v6858_v54 = vsel %vm9548_vm11, %v9311_v34, %v9547_v53  ;;  %v9550_v25 = vld [vmem:[#allocation41_spill] sm:$0xff]  ;;  %v9554_v8 = vld [vmem:[#allocation80_spill] sm:$0xff]  ;;  %vm9559_vm11 = vcmp.gt.f32.partialorder %v9318_v9, 0.0 }
 0x2e1   :  { %9543 = vst [vmem:[#allocation111_spill] sm:$0xff] %v6846_v43  ;;  %v6852_v15 = vsel %vm9545_vm12, %v9428_v45, %v9544_v48  ;;  %9549 = vst [vmem:[#allocation68_spill] sm:$0xff] %v6858_v54  ;;  %v6864_v18 = vsel %vm9551_vm10, %v9314_v32, %v9550_v25  ;;  %v9553_v19 = vld [vmem:[#allocation73_spill] sm:$0xff]  ;;  %v9555_v43 = vld [vmem:[#allocation82_spill] sm:$0xff]  ;;  %vm9562_vm10 = vcmp.gt.f32.partialorder %v9321_v55, 0.0  ;;  %vm9565_vm12 = vcmp.gt.f32.partialorder %v9323_v36, 0.0 }
 0x2e2   :  { %9546 = vst [vmem:[#allocation30_spill] sm:$0xff] %v6852_v15  ;;  %9552 = vst [vmem:[#allocation65_spill] sm:$0xff] %v6864_v18  ;;  %vm2259_vm3 = vcmp.gt.f32.partialorder %v9553_v19, 0.0  ;;  %v9556_v45 = vld [vmem:[#allocation79_spill] sm:$0xff]  ;;  %v9557_v48 = vld [vmem:[#allocation117_spill] sm:$0xff] }
 0x2e3   :  { %v6874_v34 = vsel %vm2215_vm4, %v9437_v52, %v9557_v48  ;;  %v9558_v53 = vld [vmem:[#allocation46_spill] sm:$0xff]  ;;  %v9561_v25 = vld [vmem:[#allocation48_spill] sm:$0xff]  ;;  %v9564_v54 = vld [vmem:[#allocation45_spill] sm:$0xff] }
 0x2e4   :  { %v6880_v32 = vsel %vm9559_vm11, %v9318_v9, %v9558_v53  ;;  %v6886_v18 = vsel %vm9562_vm10, %v9321_v55, %v9561_v25  ;;  %v6892_v15 = vsel %vm9565_vm12, %v9323_v36, %v9564_v54  ;;  %v9567_v52 = vld [vmem:[#allocation95_spill] sm:$0xff]  ;;  %v9568_v48 = vld [vmem:[#allocation96_spill] sm:$0xff]  ;;  %v9569_v9 = vld [vmem:[#allocation97_spill] sm:$0xff]  ;;  %vm9572_vm10 = vcmp.gt.f32.partialorder %v5819_v35, 0.0 }
 0x2e5   :  { %9560 = vst [vmem:[#allocation67_spill] sm:$0xff] %v6880_v32  ;;  %9563 = vst [vmem:[#allocation72_spill] sm:$0xff] %v6886_v18  ;;  %vm2263_vm4 = vcmp.gt.f32.partialorder %v9567_v52, 0.0  ;;  %v9570_v53 = vld [vmem:[#allocation47_spill] sm:$0xff]  ;;  %v9571_v25 = vld [vmem:[#allocation120_spill] sm:$0xff]  ;;  %vm9575_vm12 = vcmp.gt.f32.partialorder %v5823_v63, 0.0 }
 0x2e6   :  { %9566 = vst [vmem:[#allocation32_spill] sm:$0xff] %v6892_v15  ;;  %v6902_v55 = vsel %vm2219_vm5, %v9325_v44, %v9570_v53  ;;  %v6908_v36 = vsel %vm9572_vm10, %v5819_v35, %v9571_v25  ;;  %v9574_v54 = vld [vmem:[#allocation121_spill] sm:$0xff]  ;;  %v9577_v18 = vld [vmem:[#allocation122_spill] sm:$0xff]  ;;  %vm9578_vm11 = vcmp.gt.f32.partialorder %v5827_v14, 0.0  ;;  %v9581_v53 = vld [vmem:[#allocation100_spill] sm:$0xff]  ;;  %vm9590_vm10 = vcmp.gt.f32.partialorder %v5843_v58, 0.0 }
 0x2e7   :  { %9573 = vst [vmem:[#allocation38_spill] sm:$0xff] %v6908_v36  ;;  %v6914_v15 = vsel %vm9575_vm12, %v5823_v63, %v9574_v54  ;;  %v6920_v32 = vsel %vm9578_vm11, %v5827_v14, %v9577_v18  ;;  %v9580_v44 = vld [vmem:[#allocation98_spill] sm:$0xff]  ;;  %v9582_v35 = vld [vmem:[#allocation101_spill] sm:$0xff]  ;;  %v9583_v25 = vld [vmem:[#allocation124_spill] sm:$0xff]  ;;  %vm9585_vm12 = vcmp.gt.f32.partialorder %v5835_v31, 0.0  ;;  %vm9587_vm11 = vcmp.gt.f32.partialorder %v5839_v50, 0.0 }
 0x2e8   :  { %9576 = vst [vmem:[#allocation113_spill] sm:$0xff] %v6914_v15  ;;  %9579 = vst [vmem:[#allocation37_spill] sm:$0xff] %v6920_v32  ;;  %vm2267_vm5 = vcmp.gt.f32.partialorder %v9580_v44, 0.0  ;;  %v6930_v63 = vsel %vm2223_vm6, %v5831_v4, %v9583_v25  ;;  %v9584_v54 = vld [vmem:[#allocation125_spill] sm:$0xff]  ;;  %v9586_v18 = vld [vmem:[#allocation126_spill] sm:$0xff]  ;;  %vm2271_vm6 = vcmp.gt.f32.partialorder %v9454_v6, 0.0 }
 0x2e9   :  { %v6936_v14 = vsel %vm9585_vm12, %v5835_v31, %v9584_v54  ;;  %v6942_v32 = vsel %vm9587_vm11, %v5839_v50, %v9586_v18  ;;  %v9589_v15 = vld [vmem:[#allocation128_spill] sm:$0xff]  ;;  %v9592_v4 = vld [vmem:[#allocation103_spill] sm:$0xff]  ;;  %v9594_v31 = vld [vmem:[#allocation129_spill] sm:$0xff]  ;;  %vm9596_vm11 = vcmp.gt.f32.partialorder %v5851_v46, 0.0  ;;  %vm9602_vm12 = vcmp.gt.f32.partialorder %v5859_v29, 0.0 }
 0x2ea   :  { %9588 = vst [vmem:[#allocation93_spill] sm:$0xff] %v6942_v32  ;;  %v6948_v36 = vsel %vm9590_vm10, %v5843_v58, %v9589_v15  ;;  %v9593_v25 = vld [vmem:[#allocation19_spill] sm:$0xff]  ;;  %v6958_v50 = vsel %vm2227_vm7, %v5847_v57, %v9594_v31  ;;  %v9595_v54 = vld [vmem:[#allocation130_spill] sm:$0xff]  ;;  %v9598_v15 = vld [vmem:[#allocation132_spill] sm:$0xff]  ;;  %vm9599_vm10 = vcmp.gt.f32.partialorder %v5855_v27, 0.0 }
 0x2eb   :  { %9591 = vst [vmem:[#allocation94_spill] sm:$0xff] %v6948_v36  ;;  %v6964_v58 = vsel %vm9596_vm11, %v5851_v46, %v9595_v54  ;;  %v6970_v18 = vsel %vm9599_vm10, %v5855_v27, %v9598_v15  ;;  %v9601_v36 = vld [vmem:[#allocation133_spill] sm:$0xff]  ;;  %v9604_v57 = vld [vmem:[#allocation18_spill] sm:$0xff]  ;;  %v9605_v31 = vld [vmem:[#allocation20_spill] sm:$0xff]  ;;  %vm9608_vm10 = vcmp.gt.f32.partialorder %v5867_v5, 0.0 }
 0x2ec   :  { %9597 = vst [vmem:[#allocation74_spill] sm:$0xff] %v6964_v58  ;;  %9600 = vst [vmem:[#allocation71_spill] sm:$0xff] %v6970_v18  ;;  %v6976_v32 = vsel %vm9602_vm12, %v5859_v29, %v9601_v36  ;;  %vm2275_vm7 = vcmp.gt.f32.partialorder %v9604_v57, 0.0  ;;  %v9606_v46 = vld [vmem:[#allocation134_spill] sm:$0xff]  ;;  %v9607_v54 = vld [vmem:[#allocation136_spill] sm:$0xff]  ;;  %vm9610_vm12 = vcmp.gt.f32.partialorder %v5871_v0, 0.0 }
 0x2ed   :  { %9603 = vst [vmem:[#allocation39_spill] sm:$0xff] %v6976_v32  ;;  %v6986_v27 = vsel %vm2231_vm8, %v5863_v60, %v9606_v46  ;;  %v6992_v29 = vsel %vm9608_vm10, %v5867_v5, %v9607_v54  ;;  %v9609_v36 = vld [vmem:[#allocation137_spill] sm:$0xff]  ;;  %v9611_v32 = vld [vmem:[#allocation138_spill] sm:$0xff]  ;;  %v9616_v5 = vld [vmem:[#allocation52_spill] sm:$0xff]  ;;  %vm9623_vm10 = vcmp.gt.f32.partialorder %v9359_v56, 0.0 }
 0x2ee   :  { %v6998_v15 = vsel %vm9610_vm12, %v5871_v0, %v9609_v36  ;;  %v9612_v18 = vld [vmem:[#allocation50_spill] sm:$0xff]  ;;  %v7014_v0 = vsel %vm2235_vm9, %v9350_v28, %v9616_v5  ;;  %v9617_v46 = vld [vmem:[#allocation49_spill] sm:$0xff]  ;;  %vm9618_vm12 = vcmp.gt.f32.partialorder %v9352_v17, 0.0  ;;  %vm2283_vm9 = vcmp.gt.f32.partialorder %v9486_v37, 0.0  ;;  %v9627_v5 = vld [vmem:[#allocation56_spill] sm:$0xff] }
 0x2ef   :  { %vm9613_vm11 = vcmp.gt.f32.partialorder %v9612_v18, 0.0  ;;  %v9615_v60 = vld [vmem:[#allocation26_spill] sm:$0xff]  ;;  %v9622_v36 = vld [vmem:[#allocation13_spill] sm:$0xff]  ;;  %v9772_v23 = vld [vmem:[#allocation63_spill] sm:$0xff] }
 0x2f0   :  { %v7004_v58 = vsel %vm9613_vm11, %v9612_v18, %v9611_v32  ;;  %vm2279_vm8 = vcmp.gt.f32.partialorder %v9615_v60, 0.0  ;;  %v7020_v32 = vsel %vm9618_vm12, %v9352_v17, %v9617_v46  ;;  %v9619_v18 = vld [vmem:[#allocation51_spill] sm:$0xff]  ;;  %vm9620_vm11 = vcmp.gt.f32.partialorder %v9354_v22, 0.0  ;;  %v9625_v28 = vld [vmem:[#allocation54_spill] sm:$0xff]  ;;  %v9629_v46 = vld [vmem:[#allocation77_spill] sm:$0xff] }
 0x2f1   :  { %9614 = vst [vmem:[#allocation115_spill] sm:$0xff] %v7004_v58  ;;  %v7026_v54 = vsel %vm9620_vm11, %v9354_v22, %v9619_v18  ;;  %v7032_v58 = vsel %vm9623_vm10, %v9359_v56, %v9622_v36  ;;  %vm9626_vm12 = vcmp.gt.f32.partialorder %v9361_v12, 0.0  ;;  %vm9628_vm11 = vcmp.gt.f32.partialorder %v9363_v1, 0.0  ;;  %v9630_v18 = vld [vmem:[#allocation55_spill] sm:$0xff] }
 0x2f2   :  { %9621 = vst [vmem:[#allocation44_spill] sm:$0xff] %v7026_v54  ;;  %9624 = vst [vmem:[#allocation41_spill] sm:$0xff] %v7032_v58  ;;  %v7040_v17 = vsel %vm9626_vm12, %v9361_v12, %v9625_v28  ;;  %v7046_v22 = vsel %vm9628_vm11, %v9363_v1, %v9627_v5  ;;  %vm9631_vm10 = vcmp.gt.f32.partialorder %v9630_v18, 0.0  ;;  %v9632_v36 = vld [vmem:[#allocation139_spill] sm:$0xff]  ;;  %v9633_v58 = vld [vmem:[#allocation58_spill] sm:$0xff]  ;;  %vm9638_vm12 = vcmp.gt.f32.partialorder %v9496_v61, 0.0 }
 0x2f3   :  { %v7052_v56 = vsel %vm9631_vm10, %v9630_v18, %v9629_v46  ;;  %vm9634_vm13 = vcmp.gt.f32.partialorder %v9633_v58, 0.0  ;;  %v9636_v12 = vld [vmem:[#allocation140_spill] sm:$0xff]  ;;  %v9637_v1 = vld [vmem:[#allocation141_spill] sm:$0xff]  ;;  %v9639_v46 = vld [vmem:[#allocation142_spill] sm:$0xff]  ;;  %vm9640_vm11 = vcmp.gt.f32.partialorder %v9497_v10, 0.0  ;;  %vm9648_vm10 = vcmp.gt.f32.partialorder %v9510_v26, 0.0 }
 0x2f4   :  { %v7058_v54 = vsel %vm9634_vm13, %v9633_v58, %v9632_v36  ;;  %v7064_v28 = vsel %vm2243_vm15, %v9495_v39, %v9636_v12  ;;  %v7070_v5 = vsel %vm9638_vm12, %v9496_v61, %v9637_v1  ;;  %v7076_v18 = vsel %vm9640_vm11, %v9497_v10, %v9639_v46  ;;  %v9641_v58 = vld [vmem:[#allocation143_spill] sm:$0xff]  ;;  %v9642_v36 = vld [vmem:[#allocation62_spill] sm:$0xff]  ;;  %v9645_v61 = vld [vmem:[#allocation64_spill] sm:$0xff] }
 0x2f5   :  { %9635 = vst [vmem:[#allocation73_spill] sm:$0xff] %v7058_v54  ;;  %vm9643_vm13 = vcmp.gt.f32.partialorder %v9642_v36, 0.0  ;;  %v9644_v39 = vld [vmem:[#allocation15_spill] sm:$0xff]  ;;  %vm9646_vm15 = vcmp.gt.f32.partialorder %v9509_v51, 0.0  ;;  %v9647_v10 = vld [vmem:[#allocation144_spill] sm:$0xff]  ;;  %vm9650_vm12 = vcmp.gt.f32.partialorder %v9511_v41, 0.0 }
 0x2f6   :  { %v7082_v54 = vsel %vm9643_vm13, %v9642_v36, %v9641_v58  ;;  %v7088_v12 = vsel %vm2247_vm14, %v9384_v59, %v9644_v39  ;;  %v7094_v1 = vsel %vm9646_vm15, %v9509_v51, %v9645_v61  ;;  %v7100_v46 = vsel %vm9648_vm10, %v9510_v26, %v9647_v10  ;;  %v9649_v58 = vld [vmem:[#allocation145_spill] sm:$0xff]  ;;  %v9651_v59 = vld [vmem:[#allocation146_spill] sm:$0xff]  ;;  %v9652_v51 = vld [vmem:[#allocation147_spill] sm:$0xff] }
 0x2f7   :  { %v7106_v36 = vsel %vm9650_vm12, %v9511_v41, %v9649_v58  ;;  %v7112_v39 = vsel %vm2251_vm1, %v9523_v11, %v9651_v59  ;;  %vm9653_vm14 = vcmp.gt.f32.partialorder %v9524_v33, 0.0  ;;  %v9654_v26 = vld [vmem:[#allocation16_spill] sm:$0xff]  ;;  %vm9655_vm11 = vcmp.gt.f32.partialorder %v9525_v13, 0.0  ;;  %v9656_v41 = vld [vmem:[#allocation22_spill] sm:$0xff] }
 0x2f8   :  { %v7118_v61 = vsel %vm9653_vm14, %v9524_v33, %v9652_v51  ;;  %v7124_v10 = vsel %vm9655_vm11, %v9525_v13, %v9654_v26  ;;  %vm9657_vm13 = vcmp.gt.f32.partialorder %v9526_v40, 0.0  ;;  %v9658_v11 = vld [vmem:[#allocation148_spill] sm:$0xff]  ;;  %v9659_v33 = vld [vmem:[#allocation33_spill] sm:$0xff]  ;;  %vm9660_vm1 = vcmp.gt.f32.partialorder %v9539_v20, 0.0 }
 0x2f9   :  { %v7130_v58 = vsel %vm9657_vm13, %v9526_v40, %v9656_v41  ;;  %v7136_v59 = vsel %vm2255_vm2, %v9538_v49, %v9658_v11  ;;  %v7142_v51 = vsel %vm9660_vm1, %v9539_v20, %v9659_v33  ;;  %v9661_v13 = vld [vmem:[#allocation149_spill] sm:$0xff]  ;;  %vm9662_vm15 = vcmp.gt.f32.partialorder %v9540_v42, 0.0  ;;  %v9663_v40 = vld [vmem:[#allocation150_spill] sm:$0xff]  ;;  %v9665_v49 = vld [vmem:[#allocation40_spill] sm:$0xff] }
 0x2fa   :  { %v7148_v26 = vsel %vm9662_vm15, %v9540_v42, %v9661_v13  ;;  %vm9664_vm10 = vcmp.gt.f32.partialorder %v9541_v2, 0.0  ;;  %v7160_v11 = vsel %vm2259_vm3, %v9553_v19, %v9665_v49  ;;  %v9666_v20 = vld [vmem:[#allocation151_spill] sm:$0xff]  ;;  %vm9667_vm2 = vcmp.gt.f32.partialorder %v9554_v8, 0.0  ;;  %v9668_v42 = vld [vmem:[#allocation152_spill] sm:$0xff]  ;;  %v9672_v19 = vld [vmem:[#allocation153_spill] sm:$0xff] }
 0x2fb   :  { %v7154_v41 = vsel %vm9664_vm10, %v9541_v2, %v9663_v40  ;;  %v7166_v33 = vsel %vm9667_vm2, %v9554_v8, %v9666_v20  ;;  %vm9669_vm12 = vcmp.gt.f32.partialorder %v9555_v43, 0.0  ;;  %v9670_v2 = vld [vmem:[#allocation42_spill] sm:$0xff]  ;;  %vm9671_vm14 = vcmp.gt.f32.partialorder %v9556_v45, 0.0 }
 0x2fc   :  { %v7172_v13 = vsel %vm9669_vm12, %v9555_v43, %v9668_v42  ;;  %v7178_v40 = vsel %vm9671_vm14, %v9556_v45, %v9670_v2  ;;  %v7184_v49 = vsel %vm2263_vm4, %v9567_v52, %v9672_v19  ;;  %v9673_v8 = vld [vmem:[#allocation154_spill] sm:$0xff]  ;;  %vm9674_vm3 = vcmp.gt.f32.partialorder %v9568_v48, 0.0  ;;  %v9675_v43 = vld [vmem:[#allocation43_spill] sm:$0xff]  ;;  %v9677_v45 = vld [vmem:[#allocation81_spill] sm:$0xff] }
 0x2fd   :  { %v7190_v20 = vsel %vm9674_vm3, %v9568_v48, %v9673_v8  ;;  %vm9676_vm11 = vcmp.gt.f32.partialorder %v9438_v30, 0.0  ;;  %vm9678_vm13 = vcmp.gt.f32.partialorder %v9569_v9, 0.0  ;;  %v9679_v52 = vld [vmem:[#allocation155_spill] sm:$0xff]  ;;  %vm9681_vm4 = vcmp.gt.f32.partialorder %v9446_v24, 0.0 }
 0x2fe   :  { %v7196_v42 = vsel %vm9676_vm11, %v9438_v30, %v9675_v43  ;;  %v7202_v2 = vsel %vm9678_vm13, %v9569_v9, %v9677_v45  ;;  %v7208_v19 = vsel %vm2267_vm5, %v9580_v44, %v9679_v52  ;;  %v9680_v48 = vld [vmem:[#allocation99_spill] sm:$0xff]  ;;  %v9682_v30 = vld [vmem:[#allocation156_spill] sm:$0xff]  ;;  %vm9683_vm1 = vcmp.gt.f32.partialorder %v9581_v53, 0.0  ;;  %v9684_v9 = vld [vmem:[#allocation157_spill] sm:$0xff] }
 0x2ff   :  { %v7214_v8 = vsel %vm9681_vm4, %v9446_v24, %v9680_v48  ;;  %v7220_v43 = vsel %vm9683_vm1, %v9581_v53, %v9682_v30  ;;  %vm9685_vm15 = vcmp.gt.f32.partialorder %v9582_v35, 0.0  ;;  %v9687_v44 = vld [vmem:[#allocation102_spill] sm:$0xff]  ;;  %vm9690_vm5 = vcmp.gt.f32.partialorder %v9592_v4, 0.0  ;;  %v9692_v53 = vld [vmem:[#allocation159_spill] sm:$0xff] }
 0x300   :  { %v7226_v45 = vsel %vm9685_vm15, %v9582_v35, %v9684_v9  ;;  %v7232_v52 = vsel %vm2271_vm6, %v9454_v6, %v9687_v44  ;;  %v9689_v24 = vld [vmem:[#allocation158_spill] sm:$0xff]  ;;  %vm9693_vm10 = vcmp.gt.f32.partialorder %v9593_v25, 0.0  ;;  %v9695_v35 = vld [vmem:[#allocation21_spill] sm:$0xff]  ;;  %vm9696_vm2 = vcmp.gt.f32.partialorder %v9462_v3, 0.0  ;;  %v9698_v6 = vld [vmem:[#allocation160_spill] sm:$0xff] }
 0x301   :  { %9686 = vst [vmem:[#allocation80_spill] sm:$0xff] %v7226_v45  ;;  %9688 = vst [vmem:[#allocation82_spill] sm:$0xff] %v7232_v52  ;;  %v7238_v48 = vsel %vm9690_vm5, %v9592_v4, %v9689_v24  ;;  %v7244_v30 = vsel %vm9693_vm10, %v9593_v25, %v9692_v53  ;;  %v7250_v9 = vsel %vm9696_vm2, %v9462_v3, %v9695_v35  ;;  %v9700_v4 = vld [vmem:[#allocation161_spill] sm:$0xff]  ;;  %vm9701_vm6 = vcmp.gt.f32.partialorder %v9605_v31, 0.0  ;;  %v9703_v25 = vld [vmem:[#allocation27_spill] sm:$0xff] }
 0x302   :  { %9691 = vst [vmem:[#allocation79_spill] sm:$0xff] %v7238_v48  ;;  %9694 = vst [vmem:[#allocation117_spill] sm:$0xff] %v7244_v30  ;;  %v7256_v44 = vsel %vm2275_vm7, %v9604_v57, %v9698_v6  ;;  %v7262_v24 = vsel %vm9701_vm6, %v9605_v31, %v9700_v4  ;;  %vm9704_vm12 = vcmp.gt.f32.partialorder %v9470_v47, 0.0  ;;  %v9705_v3 = vld [vmem:[#allocation29_spill] sm:$0xff]  ;;  %vm9706_vm14 = vcmp.gt.f32.partialorder %v9472_v21, 0.0  ;;  %v9708_v57 = vld [vmem:[#allocation162_spill] sm:$0xff] }
 0x303   :  { %9697 = vst [vmem:[#allocation46_spill] sm:$0xff] %v7250_v9  ;;  %9699 = vst [vmem:[#allocation48_spill] sm:$0xff] %v7256_v44  ;;  %v7268_v53 = vsel %vm9704_vm12, %v9470_v47, %v9703_v25  ;;  %v7274_v35 = vsel %vm9706_vm14, %v9472_v21, %v9705_v3  ;;  %v7280_v6 = vsel %vm2279_vm8, %v9615_v60, %v9708_v57  ;;  %v9710_v31 = vld [vmem:[#allocation28_spill] sm:$0xff]  ;;  %vm9713_vm7 = vcmp.gt.f32.partialorder %v9480_v7, 0.0  ;;  %v9715_v21 = vld [vmem:[#allocation105_spill] sm:$0xff] }
 0x304   :  { %9702 = vst [vmem:[#allocation45_spill] sm:$0xff] %v7262_v24  ;;  %9707 = vst [vmem:[#allocation95_spill] sm:$0xff] %v7274_v35  ;;  %v7286_v4 = vsel %vm2280_vm0, %v9478_v62, %v9710_v31  ;;  %v9712_v47 = vld [vmem:[#allocation104_spill] sm:$0xff]  ;;  %vm9716_vm3 = vcmp.gt.f32.partialorder %v9482_v38, 0.0  ;;  %v9718_v60 = vld [vmem:[#allocation106_spill] sm:$0xff]  ;;  %vm9721_vm0 = vcmp.gt.f32.partialorder %v9488_v16, 0.0  ;;  %v9796_v52 = vmov %v7280_v6 }
 0x305   :  { %9709 = vst [vmem:[#allocation96_spill] sm:$0xff] %v7280_v6  ;;  %9711 = vst [vmem:[#allocation97_spill] sm:$0xff] %v7286_v4  ;;  %v7292_v25 = vsel %vm9713_vm7, %v9480_v7, %v9712_v47  ;;  %v7298_v3 = vsel %vm9716_vm3, %v9482_v38, %v9715_v21  ;;  %v7304_v57 = vsel %vm2283_vm9, %v9486_v37, %v9718_v60  ;;  %v9720_v62 = vld [vmem:[#allocation107_spill] sm:$0xff]  ;;  %v9757_v38 = vld [vmem:[#allocation5_spill] sm:$0xff]  ;;  %v9797_v48 = vmov %v7286_v4 }
 0x306   :  { %9714 = vst [vmem:[#allocation47_spill] sm:$0xff] %v7292_v25  ;;  %9717 = vst [vmem:[#allocation120_spill] sm:$0xff] %v7298_v3  ;;  %v7310_v31 = vsel %vm9721_vm0, %v9488_v16, %v9720_v62  ;;  %v9776_v16 = vld [vmem:[#allocation111_spill] sm:$0xff]  ;;  %v9786_v37 = vld [vmem:[#allocation93_spill] sm:$0xff]  ;;  %v3566_v6 = vpack.c.bf16 %v9796_v52, %v9796_v52  ;;  %vm3053_vm8 = vcmask 257024  }
 0x307   :  { %9719 = vst [vmem:[#allocation121_spill] sm:$0xff] %v7304_v57  ;;  %9722 = vst [vmem:[#allocation122_spill] sm:$0xff] %v7310_v31  ;;  %v9780_v3 = vld [vmem:[#allocation67_spill] sm:$0xff]  ;;  %v9788_v31 = vld [vmem:[#allocation74_spill] sm:$0xff] }
 0x308   :  { %v9792_v7 = vld [vmem:[#allocation44_spill] sm:$0xff]  ;;  %v9793_v25 = vld [vmem:[#allocation41_spill] sm:$0xff]  ;;  %v9802_v21 = vld [vmem:[#allocation35_spill] sm:$0xff]  ;;  %3176 = vst.msk [vmem:[%s8468_s4 + $0x1e8] sm:$0xf] %vm3053_vm8, %v3566_v6 }
 0x309   :  { %v9794_v57 = vld [vmem:[#allocation73_spill] sm:$0xff]  ;;  %v9803_v45 = vpack.c.bf16 %v9802_v21, %v9802_v21  ;;  %v9804_v60 = vld [vmem:[#allocation36_spill] sm:$0xff]  ;;  %v9806_v47 = vld [vmem:[#allocation34_spill] sm:$0xff] }
 0x30a   :  { %v9805_v35 = vpack.c.bf16 %v9804_v60, %v9804_v60  ;;  %v9807_v4 = vpack.c.bf16 %v9806_v47, %v9806_v47  ;;  %v9808_v21 = vld [vmem:[#allocation69_spill] sm:$0xff] }
 0x30b   :  { %3054 = vst.msk [vmem:[%s8468_s4] sm:$0xf] %vm3053_vm8, %v9803_v45  ;;  %v9809_v62 = vpack.c.bf16 %v9808_v21, %v9808_v21  ;;  %v9810_v45 = vld [vmem:[#allocation70_spill] sm:$0xff] }
 0x30c   :  { %3055 = vst.msk [vmem:[%s8468_s4 + $0x4] sm:$0xf] %vm3053_vm8, %v9805_v35  ;;  %3056 = vst.msk [vmem:[%s8468_s4 + $0x8] sm:$0xf] %vm3053_vm8, %v9807_v4  ;;  %v9811_v60 = vpack.c.bf16 %v9810_v45, %v9810_v45  ;;  %v9812_v35 = vld [vmem:[#allocation78_spill] sm:$0xff]  ;;  %v9814_v4 = vld [vmem:[#allocation87_spill] sm:$0xff] }
 0x30d   :  { %v9798_v30 = vld [vmem:[#allocation47_spill] sm:$0xff]  ;;  %v9799_v9 = vld [vmem:[#allocation120_spill] sm:$0xff]  ;;  %3057 = vst.msk [vmem:[%s8468_s4 + $0xc] sm:$0xf] %vm3053_vm8, %v9809_v62  ;;  %v9813_v47 = vpack.c.bf16 %v9812_v35, %v9812_v35  ;;  %v9815_v21 = vpack.c.bf16 %v9814_v4, %v9814_v4  ;;  %v9816_v62 = vld [vmem:[#allocation89_spill] sm:$0xff] }
 0x30e   :  { %v9800_v44 = vld [vmem:[#allocation121_spill] sm:$0xff]  ;;  %v9801_v24 = vld [vmem:[#allocation122_spill] sm:$0xff]  ;;  %3058 = vst.msk [vmem:[%s8468_s4 + $0x10] sm:$0xf] %vm3053_vm8, %v9811_v60  ;;  %v9817_v45 = vpack.c.bf16 %v9816_v62, %v9816_v62  ;;  %v9998_v52 = vpack.c.bf16 %v9799_v9, %v9799_v9 }
 0x30f   :  { %3059 = vst.msk [vmem:[%s8468_s4 + $0x14] sm:$0xf] %vm3053_vm8, %v9813_v47  ;;  %3060 = vst.msk [vmem:[%s8468_s4 + $0x18] sm:$0xf] %vm3053_vm8, %v9815_v21  ;;  %v9818_v60 = vld [vmem:[#allocation85_spill] sm:$0xff]  ;;  %v9820_v47 = vld [vmem:[#allocation4_spill] sm:$0xff] }
 0x310   :  { %3061 = vst.msk [vmem:[%s8468_s4 + $0x1c] sm:$0xf] %vm3053_vm8, %v9817_v45  ;;  %v9819_v35 = vpack.c.bf16 %v9818_v60, %v9818_v60  ;;  %v9821_v4 = vpack.c.bf16 %v9820_v47, %v9820_v47  ;;  %v9822_v21 = vld [vmem:[#allocation8_spill] sm:$0xff]  ;;  %v9824_v45 = vld [vmem:[#allocation17_spill] sm:$0xff]  ;;  %3179 = vst.msk [vmem:[%s8468_s4 + $0x1f4] sm:$0xf] %vm3053_vm8, %v9998_v52 }
 0x311   :  { %v9823_v62 = vpack.c.bf16 %v9822_v21, %v9822_v21  ;;  %v9825_v60 = vpack.c.bf16 %v9824_v45, %v9824_v45 }
 0x312   :  { %3062 = vst.msk [vmem:[%s8468_s4 + $0x20] sm:$0xf] %vm3053_vm8, %v9819_v35  ;;  %3063 = vst.msk [vmem:[%s8468_s4 + $0x24] sm:$0xf] %vm3053_vm8, %v9821_v4  ;;  %v9826_v35 = vld [vmem:[#allocation108_spill] sm:$0xff]  ;;  %v9828_v4 = vld [vmem:[#allocation110_spill] sm:$0xff] }
 0x313   :  { %3064 = vst.msk [vmem:[%s8468_s4 + $0x28] sm:$0xf] %vm3053_vm8, %v9823_v62  ;;  %3065 = vst.msk [vmem:[%s8468_s4 + $0x2c] sm:$0xf] %vm3053_vm8, %v9825_v60  ;;  %v9827_v47 = vpack.c.bf16 %v9826_v35, %v9826_v35  ;;  %v9829_v21 = vpack.c.bf16 %v9828_v4, %v9828_v4  ;;  %v9830_v62 = vld [vmem:[#allocation112_spill] sm:$0xff]  ;;  %v9832_v60 = vld [vmem:[#allocation114_spill] sm:$0xff] }
 0x314   :  { %v9831_v45 = vpack.c.bf16 %v9830_v62, %v9830_v62  ;;  %v9833_v35 = vpack.c.bf16 %v9832_v60, %v9832_v60 }
 0x315   :  { %3066 = vst.msk [vmem:[%s8468_s4 + $0x30] sm:$0xf] %vm3053_vm8, %v9827_v47  ;;  %3067 = vst.msk [vmem:[%s8468_s4 + $0x34] sm:$0xf] %vm3053_vm8, %v9829_v21  ;;  %v9834_v47 = vld [vmem:[#allocation116_spill] sm:$0xff]  ;;  %v9836_v21 = vld [vmem:[#allocation118_spill] sm:$0xff] }
 0x316   :  { %3068 = vst.msk [vmem:[%s8468_s4 + $0x38] sm:$0xf] %vm3053_vm8, %v9831_v45  ;;  %3069 = vst.msk [vmem:[%s8468_s4 + $0x3c] sm:$0xf] %vm3053_vm8, %v9833_v35  ;;  %v9835_v4 = vpack.c.bf16 %v9834_v47, %v9834_v47  ;;  %v9837_v62 = vpack.c.bf16 %v9836_v21, %v9836_v21  ;;  %v9838_v45 = vld [vmem:[#allocation119_spill] sm:$0xff] }
 0x317   :  { %v9839_v60 = vpack.c.bf16 %v9838_v45, %v9838_v45  ;;  %v9840_v35 = vld [vmem:[#allocation123_spill] sm:$0xff] }
 0x318   :  { %3070 = vst.msk [vmem:[%s8468_s4 + $0x40] sm:$0xf] %vm3053_vm8, %v9835_v4  ;;  %3071 = vst.msk [vmem:[%s8468_s4 + $0x44] sm:$0xf] %vm3053_vm8, %v9837_v62  ;;  %v9841_v47 = vpack.c.bf16 %v9840_v35, %v9840_v35  ;;  %v9842_v4 = vld [vmem:[#allocation127_spill] sm:$0xff] }
 0x319   :  { %3072 = vst.msk [vmem:[%s8468_s4 + $0x48] sm:$0xf] %vm3053_vm8, %v9839_v60  ;;  %v9843_v21 = vpack.c.bf16 %v9842_v4, %v9842_v4  ;;  %v9844_v62 = vld [vmem:[#allocation131_spill] sm:$0xff] }
 0x31a   :  { %3073 = vst.msk [vmem:[%s8468_s4 + $0x4c] sm:$0xf] %vm3053_vm8, %v9841_v47  ;;  %v9845_v45 = vpack.c.bf16 %v9844_v62, %v9844_v62  ;;  %v9846_v60 = vld [vmem:[#allocation135_spill] sm:$0xff]  ;;  %v9848_v47 = vld [vmem:[#allocation76_spill] sm:$0xff] }
 0x31b   :  { %3074 = vst.msk [vmem:[%s8468_s4 + $0x50] sm:$0xf] %vm3053_vm8, %v9843_v21  ;;  %v9847_v35 = vpack.c.bf16 %v9846_v60, %v9846_v60  ;;  %v9849_v4 = vpack.c.bf16 %v9848_v47, %v9848_v47  ;;  %v9850_v21 = vld [vmem:[#allocation75_spill] sm:$0xff] }
 0x31c   :  { %3075 = vst.msk [vmem:[%s8468_s4 + $0x54] sm:$0xf] %vm3053_vm8, %v9845_v45  ;;  %v9851_v62 = vpack.c.bf16 %v9850_v21, %v9850_v21  ;;  %v9852_v45 = vld [vmem:[#allocation53_spill] sm:$0xff] }
 0x31d   :  { %3076 = vst.msk [vmem:[%s8468_s4 + $0x58] sm:$0xf] %vm3053_vm8, %v9847_v35  ;;  %3077 = vst.msk [vmem:[%s8468_s4 + $0x5c] sm:$0xf] %vm3053_vm8, %v9849_v4  ;;  %v9853_v60 = vpack.c.bf16 %v9852_v45, %v9852_v45  ;;  %v9854_v35 = vld [vmem:[#allocation83_spill] sm:$0xff]  ;;  %v9856_v4 = vld [vmem:[#allocation88_spill] sm:$0xff] }
 0x31e   :  { %3078 = vst.msk [vmem:[%s8468_s4 + $0x60] sm:$0xf] %vm3053_vm8, %v9851_v62  ;;  %v9855_v47 = vpack.c.bf16 %v9854_v35, %v9854_v35  ;;  %v9857_v21 = vpack.c.bf16 %v9856_v4, %v9856_v4  ;;  %v9858_v62 = vld [vmem:[#allocation90_spill] sm:$0xff] }
 0x31f   :  { %3079 = vst.msk [vmem:[%s8468_s4 + $0x64] sm:$0xf] %vm3053_vm8, %v9853_v60  ;;  %v9859_v45 = vpack.c.bf16 %v9858_v62, %v9858_v62  ;;  %v9860_v60 = vld [vmem:[#allocation92_spill] sm:$0xff] }
 0x320   :  { %3080 = vst.msk [vmem:[%s8468_s4 + $0x68] sm:$0xf] %vm3053_vm8, %v9855_v47  ;;  %3081 = vst.msk [vmem:[%s8468_s4 + $0x6c] sm:$0xf] %vm3053_vm8, %v9857_v21  ;;  %v9861_v35 = vpack.c.bf16 %v9860_v60, %v9860_v60  ;;  %v9862_v47 = vld [vmem:[#allocation91_spill] sm:$0xff]  ;;  %v9864_v21 = vld [vmem:[#allocation84_spill] sm:$0xff] }
 0x321   :  { %3082 = vst.msk [vmem:[%s8468_s4 + $0x70] sm:$0xf] %vm3053_vm8, %v9859_v45  ;;  %v9863_v4 = vpack.c.bf16 %v9862_v47, %v9862_v47  ;;  %v9865_v62 = vpack.c.bf16 %v9864_v21, %v9864_v21  ;;  %v9866_v45 = vld [vmem:[#allocation86_spill] sm:$0xff] }
 0x322   :  { %3083 = vst.msk [vmem:[%s8468_s4 + $0x74] sm:$0xf] %vm3053_vm8, %v9861_v35  ;;  %v9867_v60 = vpack.c.bf16 %v9866_v45, %v9866_v45  ;;  %v9868_v35 = vld [vmem:[#allocation3_spill] sm:$0xff]  ;;  %v9871_v21 = vld [vmem:[#allocation2_spill] sm:$0xff] }
 0x323   :  { %3084 = vst.msk [vmem:[%s8468_s4 + $0x78] sm:$0xf] %vm3053_vm8, %v9863_v4  ;;  %3085 = vst.msk [vmem:[%s8468_s4 + $0x7c] sm:$0xf] %vm3053_vm8, %v9865_v62  ;;  %v9869_v47 = vpack.c.bf16 %v9868_v35, %v9868_v35  ;;  %v9870_v4 = vpack.c.bf16 %v9757_v38, %v9757_v38  ;;  %v9872_v62 = vpack.c.bf16 %v9871_v21, %v9871_v21  ;;  %v9873_v45 = vld [vmem:[#allocation7_spill] sm:$0xff]  ;;  %v9875_v38 = vld [vmem:[#allocation9_spill] sm:$0xff] }
 0x324   :  { %3086 = vst.msk [vmem:[%s8468_s4 + $0x80] sm:$0xf] %vm3053_vm8, %v9867_v60  ;;  %v9874_v60 = vpack.c.bf16 %v9873_v45, %v9873_v45  ;;  %v9876_v35 = vpack.c.bf16 %v9875_v38, %v9875_v38  ;;  %v9879_v21 = vld [vmem:[#allocation11_spill] sm:$0xff]  ;;  %v9881_v45 = vld [vmem:[#allocation10_spill] sm:$0xff]  ;;  %v9883_v38 = vld [vmem:[#allocation12_spill] sm:$0xff] }
 0x325   :  { %3087 = vst.msk [vmem:[%s8468_s4 + $0x84] sm:$0xf] %vm3053_vm8, %v9869_v47  ;;  %3088 = vst.msk [vmem:[%s8468_s4 + $0x88] sm:$0xf] %vm3053_vm8, %v9870_v4  ;;  %v9877_v47 = vld [vmem:[#allocation6_spill] sm:$0xff] }
 0x326   :  { %3089 = vst.msk [vmem:[%s8468_s4 + $0x8c] sm:$0xf] %vm3053_vm8, %v9872_v62  ;;  %3090 = vst.msk [vmem:[%s8468_s4 + $0x90] sm:$0xf] %vm3053_vm8, %v9874_v60  ;;  %v9878_v4 = vpack.c.bf16 %v9877_v47, %v9877_v47  ;;  %v9880_v62 = vpack.c.bf16 %v9879_v21, %v9879_v21  ;;  %v9882_v60 = vpack.c.bf16 %v9881_v45, %v9881_v45  ;;  %v9885_v47 = vld [vmem:[#allocation60_spill] sm:$0xff]  ;;  %v9887_v21 = vld [vmem:[#allocation57_spill] sm:$0xff] }
 0x327   :  { %3091 = vst.msk [vmem:[%s8468_s4 + $0x94] sm:$0xf] %vm3053_vm8, %v9876_v35  ;;  %v9884_v35 = vpack.c.bf16 %v9883_v38, %v9883_v38  ;;  %v9889_v45 = vld [vmem:[#allocation59_spill] sm:$0xff]  ;;  %v9891_v38 = vld [vmem:[#allocation14_spill] sm:$0xff] }
 0x328   :  { %3092 = vst.msk [vmem:[%s8468_s4 + $0x98] sm:$0xf] %vm3053_vm8, %v9878_v4  ;;  %3093 = vst.msk [vmem:[%s8468_s4 + $0x9c] sm:$0xf] %vm3053_vm8, %v9880_v62  ;;  %v9886_v4 = vpack.c.bf16 %v9885_v47, %v9885_v47  ;;  %v9888_v62 = vpack.c.bf16 %v9887_v21, %v9887_v21  ;;  %v9893_v47 = vld [vmem:[#allocation23_spill] sm:$0xff]  ;;  %v9895_v21 = vld [vmem:[#allocation25_spill] sm:$0xff] }
 0x329   :  { %3094 = vst.msk [vmem:[%s8468_s4 + $0xa0] sm:$0xf] %vm3053_vm8, %v9882_v60  ;;  %3095 = vst.msk [vmem:[%s8468_s4 + $0xa4] sm:$0xf] %vm3053_vm8, %v9884_v35  ;;  %v9890_v60 = vpack.c.bf16 %v9889_v45, %v9889_v45  ;;  %v9892_v35 = vpack.c.bf16 %v9891_v38, %v9891_v38  ;;  %v9897_v45 = vld [vmem:[#allocation109_spill] sm:$0xff] }
 0x32a   :  { %3096 = vst.msk [vmem:[%s8468_s4 + $0xa8] sm:$0xf] %vm3053_vm8, %v9886_v4  ;;  %3097 = vst.msk [vmem:[%s8468_s4 + $0xac] sm:$0xf] %vm3053_vm8, %v9888_v62  ;;  %v9894_v4 = vpack.c.bf16 %v9893_v47, %v9893_v47  ;;  %v9896_v62 = vpack.c.bf16 %v9895_v21, %v9895_v21  ;;  %v9899_v38 = vld [vmem:[#allocation61_spill] sm:$0xff]  ;;  %v9901_v47 = vpack.c.bf16 %v9772_v23, %v9772_v23  ;;  %v9906_v23 = vld [vmem:[#allocation31_spill] sm:$0xff] }
 0x32b   :  { %3098 = vst.msk [vmem:[%s8468_s4 + $0xb0] sm:$0xf] %vm3053_vm8, %v9890_v60  ;;  %3099 = vst.msk [vmem:[%s8468_s4 + $0xb4] sm:$0xf] %vm3053_vm8, %v9892_v35  ;;  %v9898_v60 = vpack.c.bf16 %v9897_v45, %v9897_v45  ;;  %v9900_v35 = vpack.c.bf16 %v9899_v38, %v9899_v38  ;;  %v9908_v38 = vpack.c.bf16 %v9776_v16, %v9776_v16  ;;  %v9913_v16 = vld [vmem:[#allocation65_spill] sm:$0xff] }
 0x32c   :  { %3100 = vst.msk [vmem:[%s8468_s4 + $0xb8] sm:$0xf] %vm3053_vm8, %v9894_v4  ;;  %3101 = vst.msk [vmem:[%s8468_s4 + $0xbc] sm:$0xf] %vm3053_vm8, %v9896_v62  ;;  %v9902_v4 = vld [vmem:[#allocation66_spill] sm:$0xff]  ;;  %v9904_v62 = vld [vmem:[#allocation24_spill] sm:$0xff] }
 0x32d   :  { %3102 = vst.msk [vmem:[%s8468_s4 + $0xc0] sm:$0xf] %vm3053_vm8, %v9898_v60  ;;  %3103 = vst.msk [vmem:[%s8468_s4 + $0xc4] sm:$0xf] %vm3053_vm8, %v9900_v35  ;;  %v9903_v21 = vpack.c.bf16 %v9902_v4, %v9902_v4  ;;  %v9905_v45 = vpack.c.bf16 %v9904_v62, %v9904_v62  ;;  %v9907_v60 = vpack.c.bf16 %v9906_v23, %v9906_v23  ;;  %v9909_v35 = vld [vmem:[#allocation30_spill] sm:$0xff]  ;;  %v9911_v4 = vld [vmem:[#allocation68_spill] sm:$0xff] }
 0x32e   :  { %3104 = vst.msk [vmem:[%s8468_s4 + $0xc8] sm:$0xf] %vm3053_vm8, %v9901_v47  ;;  %3108 = vst.msk [vmem:[%s8468_s4 + $0xd8] sm:$0xf] %vm3053_vm8, %v9908_v38  ;;  %v9910_v47 = vpack.c.bf16 %v9909_v35, %v9909_v35  ;;  %v9914_v62 = vpack.c.bf16 %v9913_v16, %v9913_v16  ;;  %v9916_v23 = vpack.c.bf16 %v9780_v3, %v9780_v3 }
 0x32f   :  { %3105 = vst.msk [vmem:[%s8468_s4 + $0xcc] sm:$0xf] %vm3053_vm8, %v9903_v21  ;;  %3106 = vst.msk [vmem:[%s8468_s4 + $0xd0] sm:$0xf] %vm3053_vm8, %v9905_v45  ;;  %v9912_v21 = vpack.c.bf16 %v9911_v4, %v9911_v4  ;;  %v9915_v45 = vpack.c.bf16 %v6874_v34, %v6874_v34  ;;  %v9919_v34 = vld [vmem:[#allocation32_spill] sm:$0xff]  ;;  %v9921_v3 = vpack.c.bf16 %v6902_v55, %v6902_v55  ;;  %v9926_v55 = vld [vmem:[#allocation37_spill] sm:$0xff] }
 0x330   :  { %3107 = vst.msk [vmem:[%s8468_s4 + $0xd4] sm:$0xf] %vm3053_vm8, %v9907_v60  ;;  %3109 = vst.msk [vmem:[%s8468_s4 + $0xdc] sm:$0xf] %vm3053_vm8, %v9910_v47  ;;  %v9917_v60 = vld [vmem:[#allocation72_spill] sm:$0xff]  ;;  %v9920_v35 = vpack.c.bf16 %v9919_v34, %v9919_v34  ;;  %v9922_v47 = vld [vmem:[#allocation38_spill] sm:$0xff] }
 0x331   :  { %3110 = vst.msk [vmem:[%s8468_s4 + $0xe0] sm:$0xf] %vm3053_vm8, %v9912_v21  ;;  %3111 = vst.msk [vmem:[%s8468_s4 + $0xe4] sm:$0xf] %vm3053_vm8, %v9914_v62  ;;  %v9918_v38 = vpack.c.bf16 %v9917_v60, %v9917_v60  ;;  %v9923_v4 = vpack.c.bf16 %v9922_v47, %v9922_v47  ;;  %v9924_v21 = vld [vmem:[#allocation113_spill] sm:$0xff]  ;;  %v9927_v62 = vpack.c.bf16 %v9926_v55, %v9926_v55  ;;  %v9935_v34 = vld [vmem:[#allocation71_spill] sm:$0xff] }
 0x332   :  { %3112 = vst.msk [vmem:[%s8468_s4 + $0xe8] sm:$0xf] %vm3053_vm8, %v9915_v45  ;;  %3113 = vst.msk [vmem:[%s8468_s4 + $0xec] sm:$0xf] %vm3053_vm8, %v9916_v23  ;;  %v9925_v16 = vpack.c.bf16 %v9924_v21, %v9924_v21  ;;  %v9928_v45 = vpack.c.bf16 %v6930_v63, %v6930_v63  ;;  %v9929_v23 = vpack.c.bf16 %v6936_v14, %v6936_v14  ;;  %v9931_v63 = vld [vmem:[#allocation94_spill] sm:$0xff] }
 0x333   :  { %3114 = vst.msk [vmem:[%s8468_s4 + $0xf0] sm:$0xf] %vm3053_vm8, %v9918_v38  ;;  %3115 = vst.msk [vmem:[%s8468_s4 + $0xf4] sm:$0xf] %vm3053_vm8, %v9920_v35  ;;  %v9930_v60 = vpack.c.bf16 %v9786_v37, %v9786_v37  ;;  %v9932_v38 = vpack.c.bf16 %v9931_v63, %v9931_v63  ;;  %v9933_v14 = vpack.c.bf16 %v6958_v50, %v6958_v50  ;;  %v9937_v50 = vld [vmem:[#allocation39_spill] sm:$0xff]  ;;  %v9987_v63 = vld [vmem:[#allocation46_spill] sm:$0xff] }
 0x334   :  { %3116 = vst.msk [vmem:[%s8468_s4 + $0xf8] sm:$0xf] %vm3053_vm8, %v9921_v3  ;;  %3117 = vst.msk [vmem:[%s8468_s4 + $0xfc] sm:$0xf] %vm3053_vm8, %v9923_v4  ;;  %v9934_v37 = vpack.c.bf16 %v9788_v31, %v9788_v31  ;;  %v9936_v35 = vpack.c.bf16 %v9935_v34, %v9935_v34  ;;  %v9938_v3 = vpack.c.bf16 %v9937_v50, %v9937_v50  ;;  %v9991_v34 = vld [vmem:[#allocation45_spill] sm:$0xff] }
 0x335   :  { %3118 = vst.msk [vmem:[%s8468_s4 + $0x100] sm:$0xf] %vm3053_vm8, %v9925_v16  ;;  %3119 = vst.msk [vmem:[%s8468_s4 + $0x104] sm:$0xf] %vm3053_vm8, %v9927_v62  ;;  %v9939_v31 = vpack.c.bf16 %v6986_v27, %v6986_v27  ;;  %v9940_v47 = vpack.c.bf16 %v6992_v29, %v6992_v29  ;;  %v9941_v4 = vpack.c.bf16 %v6998_v15, %v6998_v15  ;;  %v9942_v27 = vld [vmem:[#allocation115_spill] sm:$0xff] }
 0x336   :  { %3120 = vst.msk [vmem:[%s8468_s4 + $0x108] sm:$0xf] %vm3053_vm8, %v9928_v45  ;;  %3121 = vst.msk [vmem:[%s8468_s4 + $0x10c] sm:$0xf] %vm3053_vm8, %v9929_v23  ;;  %v9943_v21 = vpack.c.bf16 %v9942_v27, %v9942_v27  ;;  %v9944_v29 = vpack.c.bf16 %v7014_v0, %v7014_v0  ;;  %v9945_v15 = vpack.c.bf16 %v7020_v32, %v7020_v32  ;;  %v9985_v23 = vld [vmem:[#allocation117_spill] sm:$0xff] }
 0x337   :  { %3122 = vst.msk [vmem:[%s8468_s4 + $0x110] sm:$0xf] %vm3053_vm8, %v9930_v60  ;;  %3123 = vst.msk [vmem:[%s8468_s4 + $0x114] sm:$0xf] %vm3053_vm8, %v9932_v38  ;;  %v9946_v16 = vpack.c.bf16 %v9792_v7, %v9792_v7  ;;  %v9947_v0 = vpack.c.bf16 %v9793_v25, %v9793_v25  ;;  %v9948_v32 = vpack.c.bf16 %v7040_v17, %v7040_v17 }
 0x338   :  { %3124 = vst.msk [vmem:[%s8468_s4 + $0x118] sm:$0xf] %vm3053_vm8, %v9933_v14  ;;  %3125 = vst.msk [vmem:[%s8468_s4 + $0x11c] sm:$0xf] %vm3053_vm8, %v9934_v37  ;;  %v9949_v7 = vpack.c.bf16 %v7046_v22, %v7046_v22  ;;  %v9950_v25 = vpack.c.bf16 %v7052_v56, %v7052_v56  ;;  %v9951_v17 = vpack.c.bf16 %v9794_v57, %v9794_v57  ;;  %v9989_v14 = vld [vmem:[#allocation48_spill] sm:$0xff] }
 0x339   :  { %3126 = vst.msk [vmem:[%s8468_s4 + $0x120] sm:$0xf] %vm3053_vm8, %v9936_v35  ;;  %3127 = vst.msk [vmem:[%s8468_s4 + $0x124] sm:$0xf] %vm3053_vm8, %v9938_v3  ;;  %v9952_v22 = vpack.c.bf16 %v7064_v28, %v7064_v28  ;;  %v9953_v56 = vpack.c.bf16 %v7070_v5, %v7070_v5  ;;  %v9954_v57 = vpack.c.bf16 %v7076_v18, %v7076_v18  ;;  %v9994_v3 = vld [vmem:[#allocation95_spill] sm:$0xff] }
 0x33a   :  { %3128 = vst.msk [vmem:[%s8468_s4 + $0x128] sm:$0xf] %vm3053_vm8, %v9939_v31  ;;  %3129 = vst.msk [vmem:[%s8468_s4 + $0x12c] sm:$0xf] %vm3053_vm8, %v9940_v47  ;;  %v9955_v28 = vpack.c.bf16 %v7082_v54, %v7082_v54  ;;  %v9956_v5 = vpack.c.bf16 %v7088_v12, %v7088_v12  ;;  %v9957_v18 = vpack.c.bf16 %v7094_v1, %v7094_v1 }
 0x33b   :  { %3130 = vst.msk [vmem:[%s8468_s4 + $0x130] sm:$0xf] %vm3053_vm8, %v9941_v4  ;;  %3131 = vst.msk [vmem:[%s8468_s4 + $0x134] sm:$0xf] %vm3053_vm8, %v9943_v21  ;;  %v9958_v54 = vpack.c.bf16 %v7100_v46, %v7100_v46  ;;  %v9959_v12 = vpack.c.bf16 %v7106_v36, %v7106_v36  ;;  %v9960_v1 = vpack.c.bf16 %v7112_v39, %v7112_v39 }
 0x33c   :  { %3132 = vst.msk [vmem:[%s8468_s4 + $0x138] sm:$0xf] %vm3053_vm8, %v9944_v29  ;;  %3133 = vst.msk [vmem:[%s8468_s4 + $0x13c] sm:$0xf] %vm3053_vm8, %v9945_v15  ;;  %v9961_v46 = vpack.c.bf16 %v7118_v61, %v7118_v61  ;;  %v9962_v36 = vpack.c.bf16 %v7124_v10, %v7124_v10  ;;  %v9963_v39 = vpack.c.bf16 %v7130_v58, %v7130_v58 }
 0x33d   :  { %3134 = vst.msk [vmem:[%s8468_s4 + $0x140] sm:$0xf] %vm3053_vm8, %v9946_v16  ;;  %3135 = vst.msk [vmem:[%s8468_s4 + $0x144] sm:$0xf] %vm3053_vm8, %v9947_v0  ;;  %v9964_v61 = vpack.c.bf16 %v7136_v59, %v7136_v59  ;;  %v9965_v10 = vpack.c.bf16 %v7142_v51, %v7142_v51  ;;  %v9966_v58 = vpack.c.bf16 %v7148_v26, %v7148_v26 }
 0x33e   :  { %3136 = vst.msk [vmem:[%s8468_s4 + $0x148] sm:$0xf] %vm3053_vm8, %v9948_v32  ;;  %3137 = vst.msk [vmem:[%s8468_s4 + $0x14c] sm:$0xf] %vm3053_vm8, %v9949_v7  ;;  %v9967_v59 = vpack.c.bf16 %v7154_v41, %v7154_v41  ;;  %v9968_v51 = vpack.c.bf16 %v7160_v11, %v7160_v11  ;;  %v9969_v26 = vpack.c.bf16 %v7166_v33, %v7166_v33 }
 0x33f   :  { %3138 = vst.msk [vmem:[%s8468_s4 + $0x150] sm:$0xf] %vm3053_vm8, %v9950_v25  ;;  %3139 = vst.msk [vmem:[%s8468_s4 + $0x154] sm:$0xf] %vm3053_vm8, %v9951_v17  ;;  %v9970_v41 = vpack.c.bf16 %v7172_v13, %v7172_v13  ;;  %v9971_v11 = vpack.c.bf16 %v7178_v40, %v7178_v40  ;;  %v9972_v33 = vpack.c.bf16 %v7184_v49, %v7184_v49 }
 0x340   :  { %3140 = vst.msk [vmem:[%s8468_s4 + $0x158] sm:$0xf] %vm3053_vm8, %v9952_v22  ;;  %3141 = vst.msk [vmem:[%s8468_s4 + $0x15c] sm:$0xf] %vm3053_vm8, %v9953_v56  ;;  %v9973_v13 = vpack.c.bf16 %v7190_v20, %v7190_v20  ;;  %v9974_v40 = vpack.c.bf16 %v7196_v42, %v7196_v42  ;;  %v9975_v49 = vpack.c.bf16 %v7202_v2, %v7202_v2 }
 0x341   :  { %3142 = vst.msk [vmem:[%s8468_s4 + $0x160] sm:$0xf] %vm3053_vm8, %v9954_v57  ;;  %3143 = vst.msk [vmem:[%s8468_s4 + $0x164] sm:$0xf] %vm3053_vm8, %v9955_v28  ;;  %v9976_v20 = vpack.c.bf16 %v7208_v19, %v7208_v19  ;;  %v9977_v42 = vpack.c.bf16 %v7214_v8, %v7214_v8  ;;  %v9978_v2 = vpack.c.bf16 %v7220_v43, %v7220_v43  ;;  %v9979_v19 = vld [vmem:[#allocation80_spill] sm:$0xff]  ;;  %v9981_v8 = vld [vmem:[#allocation82_spill] sm:$0xff] }
 0x342   :  { %3144 = vst.msk [vmem:[%s8468_s4 + $0x168] sm:$0xf] %vm3053_vm8, %v9956_v5  ;;  %3145 = vst.msk [vmem:[%s8468_s4 + $0x16c] sm:$0xf] %vm3053_vm8, %v9957_v18  ;;  %v9980_v55 = vpack.c.bf16 %v9979_v19, %v9979_v19  ;;  %v9982_v62 = vpack.c.bf16 %v9981_v8, %v9981_v8  ;;  %v9983_v43 = vld [vmem:[#allocation79_spill] sm:$0xff]  ;;  %v9986_v60 = vpack.c.bf16 %v9985_v23, %v9985_v23 }
 0x343   :  { %3146 = vst.msk [vmem:[%s8468_s4 + $0x170] sm:$0xf] %vm3053_vm8, %v9958_v54  ;;  %3147 = vst.msk [vmem:[%s8468_s4 + $0x174] sm:$0xf] %vm3053_vm8, %v9959_v12  ;;  %v9984_v45 = vpack.c.bf16 %v9983_v43, %v9983_v43  ;;  %v9988_v38 = vpack.c.bf16 %v9987_v63, %v9987_v63  ;;  %v9990_v37 = vpack.c.bf16 %v9989_v14, %v9989_v14 }
 0x344   :  { %3148 = vst.msk [vmem:[%s8468_s4 + $0x178] sm:$0xf] %vm3053_vm8, %v9960_v1  ;;  %3149 = vst.msk [vmem:[%s8468_s4 + $0x17c] sm:$0xf] %vm3053_vm8, %v9961_v46  ;;  %v9992_v35 = vpack.c.bf16 %v9991_v34, %v9991_v34  ;;  %v9993_v50 = vpack.c.bf16 %v7268_v53, %v7268_v53  ;;  %v9995_v31 = vpack.c.bf16 %v9994_v3, %v9994_v3 }
 0x345   :  { %3150 = vst.msk [vmem:[%s8468_s4 + $0x180] sm:$0xf] %vm3053_vm8, %v9962_v36  ;;  %3151 = vst.msk [vmem:[%s8468_s4 + $0x184] sm:$0xf] %vm3053_vm8, %v9963_v39  ;;  %v9996_v53 = vpack.c.bf16 %v9797_v48, %v9797_v48  ;;  %v9997_v47 = vpack.c.bf16 %v9798_v30, %v9798_v30  ;;  %v9999_v48 = vpack.c.bf16 %v9800_v44, %v9800_v44 }
 0x346   :  { %3152 = vst.msk [vmem:[%s8468_s4 + $0x188] sm:$0xf] %vm3053_vm8, %v9964_v61  ;;  %3153 = vst.msk [vmem:[%s8468_s4 + $0x18c] sm:$0xf] %vm3053_vm8, %v9965_v10  ;;  %v10000_v30 = vpack.c.bf16 %v9801_v24, %v9801_v24 }
 0x347   :  { %3154 = vst.msk [vmem:[%s8468_s4 + $0x190] sm:$0xf] %vm3053_vm8, %v9966_v58  ;;  %3155 = vst.msk [vmem:[%s8468_s4 + $0x194] sm:$0xf] %vm3053_vm8, %v9967_v59 }
 0x348   :  { %3156 = vst.msk [vmem:[%s8468_s4 + $0x198] sm:$0xf] %vm3053_vm8, %v9968_v51  ;;  %3157 = vst.msk [vmem:[%s8468_s4 + $0x19c] sm:$0xf] %vm3053_vm8, %v9969_v26 }
 0x349   :  { %3158 = vst.msk [vmem:[%s8468_s4 + $0x1a0] sm:$0xf] %vm3053_vm8, %v9970_v41  ;;  %3159 = vst.msk [vmem:[%s8468_s4 + $0x1a4] sm:$0xf] %vm3053_vm8, %v9971_v11 }
 0x34a   :  { %3160 = vst.msk [vmem:[%s8468_s4 + $0x1a8] sm:$0xf] %vm3053_vm8, %v9972_v33  ;;  %3161 = vst.msk [vmem:[%s8468_s4 + $0x1ac] sm:$0xf] %vm3053_vm8, %v9973_v13 }
 0x34b   :  { %3162 = vst.msk [vmem:[%s8468_s4 + $0x1b0] sm:$0xf] %vm3053_vm8, %v9974_v40  ;;  %3163 = vst.msk [vmem:[%s8468_s4 + $0x1b4] sm:$0xf] %vm3053_vm8, %v9975_v49 }
 0x34c   :  { %3164 = vst.msk [vmem:[%s8468_s4 + $0x1b8] sm:$0xf] %vm3053_vm8, %v9976_v20  ;;  %3165 = vst.msk [vmem:[%s8468_s4 + $0x1bc] sm:$0xf] %vm3053_vm8, %v9977_v42 }
 0x34d   :  { %3166 = vst.msk [vmem:[%s8468_s4 + $0x1c0] sm:$0xf] %vm3053_vm8, %v9978_v2  ;;  %3167 = vst.msk [vmem:[%s8468_s4 + $0x1c4] sm:$0xf] %vm3053_vm8, %v9980_v55 }
 0x34e   :  { %3168 = vst.msk [vmem:[%s8468_s4 + $0x1c8] sm:$0xf] %vm3053_vm8, %v9982_v62  ;;  %3169 = vst.msk [vmem:[%s8468_s4 + $0x1cc] sm:$0xf] %vm3053_vm8, %v9984_v45 }
 0x34f   :  { %3170 = vst.msk [vmem:[%s8468_s4 + $0x1d0] sm:$0xf] %vm3053_vm8, %v9986_v60  ;;  %3171 = vst.msk [vmem:[%s8468_s4 + $0x1d4] sm:$0xf] %vm3053_vm8, %v9988_v38 }
 0x350   :  { %3172 = vst.msk [vmem:[%s8468_s4 + $0x1d8] sm:$0xf] %vm3053_vm8, %v9990_v37  ;;  %3173 = vst.msk [vmem:[%s8468_s4 + $0x1dc] sm:$0xf] %vm3053_vm8, %v9992_v35 }
 0x351   :  { %3174 = vst.msk [vmem:[%s8468_s4 + $0x1e0] sm:$0xf] %vm3053_vm8, %v9993_v50  ;;  %3175 = vst.msk [vmem:[%s8468_s4 + $0x1e4] sm:$0xf] %vm3053_vm8, %v9995_v31 }
 0x352   :  { %3177 = vst.msk [vmem:[%s8468_s4 + $0x1ec] sm:$0xf] %vm3053_vm8, %v9996_v53  ;;  %3178 = vst.msk [vmem:[%s8468_s4 + $0x1f0] sm:$0xf] %vm3053_vm8, %v9997_v47 }
 0x353   :  { %3180 = vst.msk [vmem:[%s8468_s4 + $0x1f8] sm:$0xf] %vm3053_vm8, %v9999_v48  ;;  %3181 = vst.msk [vmem:[%s8468_s4 + $0x1fc] sm:$0xf] %vm3053_vm8, %v10000_v30 }

// kernel: discriminator_forward.5
= control target key start
LH: loop header
LB: loop body
LE: loop exit
PB: predicated region body
PF: predicated region fallthrough
CT: control target
= control target key end

     0   :  { %vm794_vm0 = vcmask 785408   ;;  %vm1209_vm1 = vcmask 523264   ;;  %s2644_s1 = inlined_call_operand.vmem [shape: bf16[864,64], index: 1, kind: input, shape index: {}]   ;;  %s2645_s0 = inlined_call_operand.vmem [shape: bf16[128,864], index: 0, kind: input, shape index: {}]   ;;  %s2646_s2 = inlined_call_operand.vmem [shape: f32[1,64], index: 2, kind: input, shape index: {}]   ;;  %s2647_s3 = inlined_call_operand.vmem [shape: f32[1,64], index: 3, kind: input, shape index: {}]   ;;  %s2648_s4 = inlined_call_operand.vmem [shape: bf16[128,64], index: 4, kind: output, shape index: {}]  }
   0x1   :  { %v1871_v0 = vld [vmem:[%s2644_s1 + $0x40] sm:$0xff]   ;;  %v1875_v4 = vld [vmem:[%s2644_s1 + $0x48] sm:$0xff]   ;;  %v1879_v8 = vld [vmem:[%s2644_s1 + $0x50] sm:$0xff]  }
   0x2   :  { %v1872_v1 = vld [vmem:[%s2644_s1 + $0xc0] sm:$0xff]   ;;  %1637 = vmatprep.subr.bf16.mxu0 %v1871_v0  ;;  %v1876_v5 = vld [vmem:[%s2644_s1 + $0xc8] sm:$0xff]   ;;  %v1880_v9 = vld [vmem:[%s2644_s1 + $0xd0] sm:$0xff]  }
   0x3   :  { %v1873_v2 = vld [vmem:[%s2644_s1] sm:$0xff]   ;;  %1701 = vmatprep.subr.bf16.mxu1 %v1872_v1  ;;  %v1877_v6 = vld [vmem:[%s2644_s1 + $0x8] sm:$0xff]   ;;  %v1881_v10 = vld [vmem:[%s2644_s1 + $0x10] sm:$0xff]  }
   0x4   :  { %v1874_v3 = vld [vmem:[%s2644_s1 + $0x80] sm:$0xff]   ;;  %1638 = vmatpush3.bf16.msra.mxu0 %v1873_v2  ;;  %v1878_v7 = vld [vmem:[%s2644_s1 + $0x88] sm:$0xff]   ;;  %v1882_v11 = vld [vmem:[%s2644_s1 + $0x90] sm:$0xff]  }
   0x5   :  { %1702 = vmatpush3.bf16.msra.mxu1 %v1874_v3  ;;  %1639 = vmatprep.subr.bf16.mxu0 %v1875_v4  ;;  %v1883_v12 = vld [vmem:[%s2644_s1 + $0x58] sm:$0xff]   ;;  %v1887_v16 = vld [vmem:[%s2644_s1 + $0x60] sm:$0xff]   ;;  %v1891_v20 = vld [vmem:[%s2644_s1 + $0x68] sm:$0xff]  }
   0x6   :  { %1703 = vmatprep.subr.bf16.mxu1 %v1876_v5  ;;  %v1884_v13 = vld [vmem:[%s2644_s1 + $0xd8] sm:$0xff]   ;;  %v1888_v17 = vld [vmem:[%s2644_s1 + $0xe0] sm:$0xff]   ;;  %v1892_v21 = vld [vmem:[%s2644_s1 + $0xe8] sm:$0xff]  }
   0x7   :  { %v1885_v14 = vld [vmem:[%s2644_s1 + $0x18] sm:$0xff]   ;;  %v1889_v18 = vld [vmem:[%s2644_s1 + $0x20] sm:$0xff]   ;;  %v1893_v22 = vld [vmem:[%s2644_s1 + $0x28] sm:$0xff]  }
   0x8   :  { %1640 = vmatpush3.bf16.msra.mxu0 %v1877_v6  ;;  %v1886_v15 = vld [vmem:[%s2644_s1 + $0x98] sm:$0xff]   ;;  %v1890_v19 = vld [vmem:[%s2644_s1 + $0xa0] sm:$0xff]   ;;  %v1894_v23 = vld [vmem:[%s2644_s1 + $0xa8] sm:$0xff]  }
   0x9   :  { %1704 = vmatpush3.bf16.msra.mxu1 %v1878_v7  ;;  %1641 = vmatprep.subr.bf16.mxu0 %v1879_v8  ;;  %v1895_v24 = vld [vmem:[%s2644_s1 + $0x70] sm:$0xff]   ;;  %v1899_v28 = vld [vmem:[%s2644_s1 + $0x78] sm:$0xff]   ;;  %v1905_v33 = vld [vmem:[%s2645_s0 + $0x4] ss:$28 sps:$4 sm:$0xff]  }
   0xa   :  { %1705 = vmatprep.subr.bf16.mxu1 %v1880_v9  ;;  %v1896_v25 = vld [vmem:[%s2644_s1 + $0xf0] sm:$0xff]   ;;  %v1900_v29 = vld [vmem:[%s2644_s1 + $0xf8] sm:$0xff]   ;;  %v1906_v34 = vld [vmem:[%s2645_s0 + $0x8] ss:$28 sps:$4 sm:$0xff]   ;;  %851 = vmatprep.mubr.bf16.mxu0 %v1905_v33 }
   0xb   :  { %v1897_v26 = vld [vmem:[%s2644_s1 + $0x30] sm:$0xff]   ;;  %v1901_v30 = vld [vmem:[%s2644_s1 + $0x38] sm:$0xff]   ;;  %v1908_v35 = vld [vmem:[%s2645_s0 + $0xc] ss:$28 sps:$4 sm:$0xff]  }
   0xc   :  { %1642 = vmatpush3.bf16.msra.mxu0 %v1881_v10  ;;  %v1898_v27 = vld [vmem:[%s2644_s1 + $0xb0] sm:$0xff]   ;;  %v1902_v31 = vld [vmem:[%s2644_s1 + $0xb8] sm:$0xff]   ;;  %v1909_v36 = vld [vmem:[%s2644_s1 + $0x140] sm:$0xff]   ;;  %948 = vmatprep.mubr.bf16.mxu1 %v1908_v35 }
   0xd   :  { %1706 = vmatpush3.bf16.msra.mxu1 %v1882_v11  ;;  %1643 = vmatprep.subr.bf16.mxu0 %v1883_v12  ;;  %v1903_v32 = vld [vmem:[%s2645_s0] ss:$28 sps:$4 sm:$0xff]   ;;  %v1915_v40 = vld [vmem:[%s2645_s0 + $0x38] ss:$28 sps:$4 sm:$0xff]   ;;  %v1917_v42 = vld [vmem:[%s2644_s1 + $0x148] sm:$0xff]  }
   0xe   :  { %1707 = vmatprep.subr.bf16.mxu1 %v1884_v13  ;;  %v1910_v37 = vld [vmem:[%s2644_s1 + $0x100] sm:$0xff]   ;;  %v1911_v38 = vld [vmem:[%s2645_s0 + $0x3c] ss:$28 sps:$4 sm:$0xff]   ;;  %v1918_v43 = vld [vmem:[%s2644_s1 + $0x108] sm:$0xff]  }
   0xf   :  { %v1913_v39 = vld [vmem:[%s2645_s0 + $0x44] ss:$28 sps:$4 sm:$0xff]   ;;  %v1919_v44 = vld [vmem:[%s2645_s0 + $0x74] ss:$28 sps:$4 sm:$0xff]   ;;  %v1921_v45 = vld [vmem:[%s2645_s0 + $0x7c] ss:$28 sps:$4 sm:$0xff]  }
  0x10   :  { %1644 = vmatpush3.bf16.msra.mxu0 %v1885_v14  ;;  %v1916_v41 = vld [vmem:[%s2645_s0 + $0x40] ss:$28 sps:$4 sm:$0xff]   ;;  %v1925_v46 = vld [vmem:[%s2644_s1 + $0x150] sm:$0xff]   ;;  %v1927_v50 = vld [vmem:[%s2645_s0 + $0xac] ss:$28 sps:$4 sm:$0xff]  }
  0x11   :  { %1708 = vmatpush3.bf16.msra.mxu1 %v1886_v15  ;;  %1645 = vmatprep.subr.bf16.mxu0 %v1887_v16  ;;  %v1926_v47 = vld [vmem:[%s2644_s1 + $0x110] sm:$0xff]   ;;  %v1933_v52 = vld [vmem:[%s2644_s1 + $0x158] sm:$0xff]   ;;  %v1931_v54 = vld [vmem:[%s2645_s0 + $0xa8] ss:$28 sps:$4 sm:$0xff]  }
  0x12   :  { %1709 = vmatprep.subr.bf16.mxu1 %v1888_v17  ;;  %v1923_v48 = vld [vmem:[%s2645_s0 + $0x70] ss:$28 sps:$4 sm:$0xff]   ;;  %v1924_v49 = vld [vmem:[%s2645_s0 + $0x78] ss:$28 sps:$4 sm:$0xff]   ;;  %v1941_v55 = vld [vmem:[%s2644_s1 + $0x160] sm:$0xff]  }
  0x13   :  { %v1929_v51 = vld [vmem:[%s2645_s0 + $0xb4] ss:$28 sps:$4 sm:$0xff]   ;;  %v1934_v53 = vld [vmem:[%s2644_s1 + $0x118] sm:$0xff]   ;;  %v1942_v57 = vld [vmem:[%s2644_s1 + $0x180] sm:$0xff]  }
  0x14   :  { %1646 = vmatpush3.bf16.msra.mxu0 %v1889_v18  ;;  %v1932_v56 = vld [vmem:[%s2645_s0 + $0xb0] ss:$28 sps:$4 sm:$0xff]   ;;  %v1943_v58 = vld [vmem:[%s2644_s1 + $0x120] sm:$0xff]   ;;  %v1944_v2 = vld [vmem:[%s2645_s0 + $0x11c] ss:$28 sps:$4 sm:$0xff]  }
  0x15   :  { %1710 = vmatpush3.bf16.msra.mxu1 %v1890_v19  ;;  %1647 = vmatprep.subr.bf16.mxu0 %v1891_v20  ;;  %v1935_v59 = vld [vmem:[%s2645_s0 + $0xe4] ss:$28 sps:$4 sm:$0xff]   ;;  %v1937_v60 = vld [vmem:[%s2645_s0 + $0xec] ss:$28 sps:$4 sm:$0xff]   ;;  %v1959_v4 = vld [vmem:[%s2644_s1 + $0x170] sm:$0xff]  }
  0x16   :  { %1711 = vmatprep.subr.bf16.mxu1 %v1892_v21  ;;  %v1950_v61 = vld [vmem:[%s2644_s1 + $0x168] sm:$0xff]   ;;  %v1939_v0 = vld [vmem:[%s2645_s0 + $0xe0] ss:$28 sps:$4 sm:$0xff]   ;;  %v1960_v5 = vld [vmem:[%s2644_s1 + $0x130] sm:$0xff]  }
  0x17   :  { %v1951_v62 = vld [vmem:[%s2644_s1 + $0x128] sm:$0xff]   ;;  %v1946_v3 = vld [vmem:[%s2645_s0 + $0x124] ss:$28 sps:$4 sm:$0xff]   ;;  %v1961_v6 = vld [vmem:[%s2644_s1 + $0x190] sm:$0xff]  }
  0x18   :  { %1648 = vmatpush3.bf16.msra.mxu0 %v1893_v22  ;;  %v1952_v63 = vld [vmem:[%s2644_s1 + $0x188] sm:$0xff]   ;;  %v1948_v7 = vld [vmem:[%s2645_s0 + $0x118] ss:$28 sps:$4 sm:$0xff]   ;;  %v1949_v8 = vld [vmem:[%s2645_s0 + $0x120] ss:$28 sps:$4 sm:$0xff]  }
  0x19   :  { %1712 = vmatpush3.bf16.msra.mxu1 %v1894_v23  ;;  %1649 = vmatprep.subr.bf16.mxu0 %v1895_v24  ;;  %v1940_v1 = vld [vmem:[%s2645_s0 + $0xe8] ss:$28 sps:$4 sm:$0xff]   ;;  %v1953_v9 = vld [vmem:[%s2645_s0 + $0x154] ss:$28 sps:$4 sm:$0xff]   ;;  %v1968_v10 = vld [vmem:[%s2644_s1 + $0x178] sm:$0xff]  }
  0x1a   :  { %1713 = vmatprep.subr.bf16.mxu1 %v1896_v25  ;;  %v1955_v11 = vld [vmem:[%s2645_s0 + $0x15c] ss:$28 sps:$4 sm:$0xff]   ;;  %v1971_v14 = vld [vmem:[%s2644_s1 + $0x1a0] sm:$0xff]   ;;  %v1975_v15 = vld [vmem:[%s2644_s1 + $0x1a8] sm:$0xff]  }
  0x1b   :  { %v1969_v12 = vld [vmem:[%s2644_s1 + $0x198] sm:$0xff]   ;;  %v1957_v16 = vld [vmem:[%s2645_s0 + $0x150] ss:$28 sps:$4 sm:$0xff]   ;;  %v1966_v20 = vld [vmem:[%s2645_s0 + $0x188] ss:$28 sps:$4 sm:$0xff]  }
  0x1c   :  { %1650 = vmatpush3.bf16.msra.mxu0 %v1897_v26  ;;  %v1970_v13 = vld [vmem:[%s2644_s1 + $0x138] sm:$0xff]   ;;  %v1962_v18 = vld [vmem:[%s2645_s0 + $0x18c] ss:$28 sps:$4 sm:$0xff]   ;;  %v1964_v19 = vld [vmem:[%s2645_s0 + $0x194] ss:$28 sps:$4 sm:$0xff]  }
  0x1d   :  { %1714 = vmatpush3.bf16.msra.mxu1 %v1898_v27  ;;  %1651 = vmatprep.subr.bf16.mxu0 %v1899_v28  ;;  %v1958_v17 = vld [vmem:[%s2645_s0 + $0x158] ss:$28 sps:$4 sm:$0xff]   ;;  %v1967_v21 = vld [vmem:[%s2645_s0 + $0x190] ss:$28 sps:$4 sm:$0xff]   ;;  %v1984_v27 = vld [vmem:[%s2645_s0 + $0x88] ss:$28 sps:$4 sm:$0xff]  }
  0x1e   :  { %1715 = vmatprep.subr.bf16.mxu1 %v1900_v29  ;;  %v1974_v22 = vld [vmem:[%s2645_s0 + $0x14] ss:$28 sps:$4 sm:$0xff]   ;;  %v1978_v26 = vld [vmem:[%s2645_s0 + $0x4c] ss:$28 sps:$4 sm:$0xff]   ;;  %v1981_v29 = vld [vmem:[%s2645_s0 + $0x84] ss:$28 sps:$4 sm:$0xff]  }
  0x1f   :  { %v1976_v23 = vld [vmem:[%s2645_s0 + $0x18] ss:$28 sps:$4 sm:$0xff]   ;;  %v1972_v24 = vld [vmem:[%s2645_s0 + $0x10] ss:$28 sps:$4 sm:$0xff]   ;;  %v1980_v28 = vld [vmem:[%s2645_s0 + $0x48] ss:$28 sps:$4 sm:$0xff]  }
  0x20   :  { %1652 = vmatpush3.bf16.msra.mxu0 %v1901_v30  ;;  %v1977_v25 = vld [vmem:[%s2645_s0 + $0x50] ss:$28 sps:$4 sm:$0xff]   ;;  %v1985_v30 = vld [vmem:[%s2645_s0 + $0xc0] ss:$28 sps:$4 sm:$0xff]   ;;  %v2000_v35 = vld [vmem:[%s2645_s0 + $0x168] ss:$28 sps:$4 sm:$0xff]  }
  0x21   :  { %1716 = vmatpush3.bf16.msra.mxu1 %v1902_v31  ;;  %1765 = vmatprep.subr.bf16.mxu0 %v1909_v36  ;;  %v1992_v31 = vld [vmem:[%s2645_s0 + $0xf8] ss:$28 sps:$4 sm:$0xff]  }
  0x22   :  { %1843 = vmatprep.subr.bf16.mxu1 %v1942_v57  ;;  %v1986_v33 = vld [vmem:[%s2645_s0 + $0xbc] ss:$28 sps:$4 sm:$0xff]  }
  0x23   :  { %852 = vmatmul.mubr.bf16.vlgmr.msra.gmra.mrb[0].mxu0 %v1903_v32  ;;  %v1983_v32 = vld [vmem:[%s2645_s0 + $0x80] ss:$28 sps:$4 sm:$0xff]   ;;  %v1988_v36 = vld [vmem:[%s2645_s0 + $0xb8] ss:$28 sps:$4 sm:$0xff]  }
  0x24   :  { %949 = vmatmul.mubr.bf16.vlgmr.msra.gmra.mrb[0].mxu1 %v1906_v34  ;;  %1766 = vmatpush3.bf16.msra.mxu0 %v1910_v37  ;;  %v1993_v34 = vld [vmem:[%s2645_s0 + $0x130] ss:$28 sps:$4 sm:$0xff]  }
  0x25   :  { %859 = vmatprep.mubr.bf16.mxu0 %v1911_v38  ;;  %956 = vmatprep.mubr.bf16.mxu1 %v1913_v39  ;;  %v1989_v37 = vld [vmem:[%s2645_s0 + $0xf4] ss:$28 sps:$4 sm:$0xff]   ;;  %v2001_v38 = vld [vmem:[%s2645_s0 + $0x1a0] ss:$28 sps:$4 sm:$0xff]  }
  0x26   :  { %1767 = vmatprep.subr.bf16.mxu0 %v1917_v42  ;;  %1844 = vmatpush3.bf16.msra.mxu1 %v1942_v57  ;;  %v1991_v39 = vld [vmem:[%s2645_s0 + $0xf0] ss:$28 sps:$4 sm:$0xff]   ;;  %v1997_v42 = vld [vmem:[%s2645_s0 + $0x164] ss:$28 sps:$4 sm:$0xff]  }
  0x27   :  { %1845 = vmatprep.subr.bf16.mxu1 %v1952_v63 }
  0x28   :  { %1768 = vmatpush3.bf16.msra.mxu0 %v1918_v43  ;;  %v1999_v43 = vld [vmem:[%s2645_s0 + $0x160] ss:$28 sps:$4 sm:$0xff]  }
  0x29   :  { %1769 = vmatprep.subr.bf16.mxu0 %v1925_v46 }
  0x2a   :  { %1846 = vmatpush3.bf16.msra.mxu1 %v1952_v63 }
  0x2b   :  { %860 = vmatmul.mubr.bf16.gmra.mrb[4].mxu0 %v1915_v40  ;;  %1847 = vmatprep.subr.bf16.mxu1 %v1961_v6  ;;  %v1994_v40 = vld [vmem:[%s2645_s0 + $0x12c] ss:$28 sps:$4 sm:$0xff]  }
  0x2c   :  { %957 = vmatmul.mubr.bf16.gmra.mrb[4].mxu1 %v1916_v41  ;;  %867 = vmatprep.mubr.bf16.mxu0 %v1919_v44  ;;  %v1996_v41 = vld [vmem:[%s2645_s0 + $0x128] ss:$28 sps:$4 sm:$0xff]   ;;  %v2002_v44 = vld [vmem:[%s2645_s0 + $0x19c] ss:$28 sps:$4 sm:$0xff]  }
  0x2d   :  { %964 = vmatprep.mubr.bf16.mxu1 %v1921_v45  ;;  %1770 = vmatpush3.bf16.msra.mxu0 %v1926_v47  ;;  %v2004_v45 = vld [vmem:[%s2645_s0 + $0x198] ss:$28 sps:$4 sm:$0xff]  }
  0x2e   :  { %1771 = vmatprep.subr.bf16.mxu0 %v1933_v52  ;;  %1848 = vmatpush3.bf16.msra.mxu1 %v1961_v6 }
  0x2f   :  { %1849 = vmatprep.subr.bf16.mxu1 %v1969_v12 }
  0x31   :  { %1772 = vmatpush3.bf16.msra.mxu0 %v1934_v53 }
  0x32   :  { %1773 = vmatprep.subr.bf16.mxu0 %v1941_v55  ;;  %1850 = vmatpush3.bf16.msra.mxu1 %v1969_v12 }
  0x33   :  { %868 = vmatmul.mubr.bf16.gmra.mrb[8].mxu0 %v1923_v48  ;;  %1851 = vmatprep.subr.bf16.mxu1 %v1971_v14 }
  0x34   :  { %965 = vmatmul.mubr.bf16.gmra.mrb[8].mxu1 %v1924_v49  ;;  %875 = vmatprep.mubr.bf16.mxu0 %v1927_v50 }
  0x35   :  { %972 = vmatprep.mubr.bf16.mxu1 %v1929_v51  ;;  %1774 = vmatpush3.bf16.msra.mxu0 %v1943_v58 }
  0x36   :  { %1775 = vmatprep.subr.bf16.mxu0 %v1950_v61  ;;  %1852 = vmatpush3.bf16.msra.mxu1 %v1971_v14 }
  0x37   :  { %1853 = vmatprep.subr.bf16.mxu1 %v1975_v15 }
  0x39   :  { %1776 = vmatpush3.bf16.msra.mxu0 %v1951_v62 }
  0x3a   :  { %1777 = vmatprep.subr.bf16.mxu0 %v1959_v4  ;;  %1854 = vmatpush3.bf16.msra.mxu1 %v1975_v15 }
  0x3b   :  { %876 = vmatmul.mubr.bf16.gmra.mrb[12].mxu0 %v1931_v54 }
  0x3c   :  { %973 = vmatmul.mubr.bf16.gmra.mrb[12].mxu1 %v1932_v56  ;;  %883 = vmatprep.mubr.bf16.mxu0 %v1935_v59 }
  0x3d   :  { %980 = vmatprep.mubr.bf16.mxu1 %v1937_v60  ;;  %1778 = vmatpush3.bf16.msra.mxu0 %v1960_v5 }
  0x3e   :  { %1779 = vmatprep.subr.bf16.mxu0 %v1968_v10 }
  0x41   :  { %1780 = vmatpush3.bf16.msra.mxu0 %v1970_v13 }
  0x43   :  { %884 = vmatmul.mubr.bf16.gmra.mrb[16].mxu0 %v1939_v0 }
  0x44   :  { %981 = vmatmul.mubr.bf16.gmra.mrb[16].mxu1 %v1940_v1  ;;  %891 = vmatprep.mubr.bf16.mxu0 %v1944_v2 }
  0x45   :  { %988 = vmatprep.mubr.bf16.mxu1 %v1946_v3 }
  0x4b   :  { %892 = vmatmul.mubr.bf16.gmra.mrb[20].mxu0 %v1948_v7 }
  0x4c   :  { %989 = vmatmul.mubr.bf16.gmra.mrb[20].mxu1 %v1949_v8  ;;  %899 = vmatprep.mubr.bf16.mxu0 %v1953_v9 }
  0x4d   :  { %996 = vmatprep.mubr.bf16.mxu1 %v1955_v11 }
  0x53   :  { %900 = vmatmul.mubr.bf16.gmra.mrb[24].mxu0 %v1957_v16 }
  0x54   :  { %997 = vmatmul.mubr.bf16.gmra.mrb[24].mxu1 %v1958_v17  ;;  %907 = vmatprep.mubr.bf16.mxu0 %v1962_v18 }
  0x55   :  { %1004 = vmatprep.mubr.bf16.mxu1 %v1964_v19 }
  0x5b   :  { %908 = vmatmul.mubr.bf16.gmra.mrb[28].mxu0 %v1966_v20 }
  0x5c   :  { %1005 = vmatmul.mubr.bf16.gmra.mrb[28].mxu1 %v1967_v21  ;;  %1045 = vmatprep.mubr.bf16.mxu0 %v1974_v22 }
  0x5d   :  { %1855 = vmatprep.mubr.msk.bf16.mxu1 %vm794_vm0, %v1976_v23 }
  0x63   :  { %1046 = vmatmul.mubr.bf16.vlgmr.msra.gmra.mrb[32].mxu0 %v1972_v24 }
  0x64   :  { %1856 = vmatmul.mubr.msk.bf16.vlgmr.msra.gmra.mrb[32].mxu1 %vm794_vm0, %v1977_v25  ;;  %1053 = vmatprep.mubr.bf16.mxu0 %v1978_v26 }
  0x65   :  { %1859 = vmatprep.mubr.msk.bf16.mxu1 %vm794_vm0, %v1984_v27 }
  0x6b   :  { %1054 = vmatmul.mubr.bf16.gmra.mrb[36].mxu0 %v1980_v28 }
  0x6c   :  { %1061 = vmatprep.mubr.bf16.mxu0 %v1981_v29  ;;  %1860 = vmatmul.mubr.msk.bf16.gmra.mrb[36].mxu1 %vm794_vm0, %v1985_v30 }
  0x6d   :  { %1863 = vmatprep.mubr.msk.bf16.mxu1 %vm794_vm0, %v1992_v31 }
  0x73   :  { %1062 = vmatmul.mubr.bf16.gmra.mrb[40].mxu0 %v1983_v32 }
  0x74   :  { %1069 = vmatprep.mubr.bf16.mxu0 %v1986_v33  ;;  %1864 = vmatmul.mubr.msk.bf16.gmra.mrb[40].mxu1 %vm794_vm0, %v1993_v34 }
  0x75   :  { %1867 = vmatprep.mubr.msk.bf16.mxu1 %vm794_vm0, %v2000_v35 }
  0x7b   :  { %1070 = vmatmul.mubr.bf16.gmra.mrb[44].mxu0 %v1988_v36 }
  0x7c   :  { %1077 = vmatprep.mubr.bf16.mxu0 %v1989_v37  ;;  %1868 = vmatmul.mubr.msk.bf16.gmra.mrb[44].mxu1 %vm794_vm0, %v2001_v38 }
  0x83   :  { %1078 = vmatmul.mubr.bf16.gmra.mrb[48].mxu0 %v1991_v39 }
  0x84   :  { %1085 = vmatprep.mubr.bf16.mxu0 %v1994_v40 }
  0x8b   :  { %1086 = vmatmul.mubr.bf16.gmra.mrb[52].mxu0 %v1996_v41 }
  0x8c   :  { %1093 = vmatprep.mubr.bf16.mxu0 %v1997_v42 }
  0x93   :  { %1094 = vmatmul.mubr.bf16.gmra.mrb[56].mxu0 %v1999_v43 }
  0x94   :  { %1101 = vmatprep.mubr.bf16.mxu0 %v2002_v44 }
  0x9b   :  { %1102 = vmatmul.mubr.bf16.gmra.mrb[60].mxu0 %v2004_v45 }
  0xf6   :  { %v1653_v46 = vpop.f32.mrb[0].mxu0 }
  0xf7   :  { %v1717_v47 = vpop.f32.mrb[0].mxu1  ;;  %v1654_v48 = vpop.f32.mrb[1].mxu0 }
  0xf8   :  { %v1655_v49 = vadd.f32 %v1654_v48, %v1653_v46  ;;  %v1718_v50 = vpop.f32.mrb[1].mxu1  ;;  %v1656_v51 = vpop.f32.mrb[2].mxu0 }
  0xf9   :  { %v1719_v52 = vadd.f32 %v1718_v50, %v1717_v47  ;;  %v1720_v53 = vpop.f32.mrb[2].mxu1  ;;  %v1657_v54 = vpop.f32.mrb[3].mxu0 }
  0xfa   :  { %v1658_v55 = vadd.f32 %v1657_v54, %v1656_v51  ;;  %v1721_v56 = vpop.f32.mrb[3].mxu1 }
  0xfb   :  { %v2370_v57 = vadd.f32 %v1719_v52, %v1655_v49  ;;  %v1722_v58 = vadd.f32 %v1721_v56, %v1720_v53 }
  0xfd   :  { %v2372_v59 = vadd.f32 %v1722_v58, %v1658_v55 }
  0xfe   :  { %v1659_v60 = vpop.f32.mrb[4].mxu0 }
  0xff   :  { %v1723_v61 = vpop.f32.mrb[4].mxu1  ;;  %v1660_v62 = vpop.f32.mrb[5].mxu0 }
 0x100   :  { %v1661_v63 = vadd.f32 %v1660_v62, %v1659_v60  ;;  %v1724_v0 = vpop.f32.mrb[5].mxu1  ;;  %v1662_v1 = vpop.f32.mrb[6].mxu0 }
 0x101   :  { %v1725_v2 = vadd.f32 %v1724_v0, %v1723_v61  ;;  %v1726_v3 = vpop.f32.mrb[6].mxu1  ;;  %v1663_v4 = vpop.f32.mrb[7].mxu0 }
 0x102   :  { %v1664_v5 = vadd.f32 %v1663_v4, %v1662_v1  ;;  %v1727_v6 = vpop.f32.mrb[7].mxu1 }
 0x103   :  { %v2374_v7 = vadd.f32 %v1725_v2, %v1661_v63  ;;  %v1728_v8 = vadd.f32 %v1727_v6, %v1726_v3 }
 0x105   :  { %v2376_v9 = vadd.f32 %v1728_v8, %v1664_v5 }
 0x106   :  { %v1665_v10 = vpop.f32.mrb[8].mxu0 }
 0x107   :  { %v1729_v11 = vpop.f32.mrb[8].mxu1  ;;  %v1666_v12 = vpop.f32.mrb[9].mxu0 }
 0x108   :  { %v1667_v13 = vadd.f32 %v1666_v12, %v1665_v10  ;;  %v1730_v14 = vpop.f32.mrb[9].mxu1  ;;  %v1668_v15 = vpop.f32.mrb[10].mxu0 }
 0x109   :  { %v1731_v16 = vadd.f32 %v1730_v14, %v1729_v11  ;;  %v1732_v17 = vpop.f32.mrb[10].mxu1  ;;  %v1669_v18 = vpop.f32.mrb[11].mxu0 }
 0x10a   :  { %v1670_v19 = vadd.f32 %v1669_v18, %v1668_v15  ;;  %v1733_v20 = vpop.f32.mrb[11].mxu1 }
 0x10b   :  { %v2378_v21 = vadd.f32 %v1731_v16, %v1667_v13  ;;  %v1734_v22 = vadd.f32 %v1733_v20, %v1732_v17 }
 0x10d   :  { %v2380_v23 = vadd.f32 %v1734_v22, %v1670_v19 }
 0x10e   :  { %v1671_v24 = vpop.f32.mrb[12].mxu0 }
 0x10f   :  { %v1735_v25 = vpop.f32.mrb[12].mxu1  ;;  %v1672_v26 = vpop.f32.mrb[13].mxu0 }
 0x110   :  { %v1673_v27 = vadd.f32 %v1672_v26, %v1671_v24  ;;  %v1736_v28 = vpop.f32.mrb[13].mxu1  ;;  %v1674_v29 = vpop.f32.mrb[14].mxu0 }
 0x111   :  { %v1737_v30 = vadd.f32 %v1736_v28, %v1735_v25  ;;  %v1738_v31 = vpop.f32.mrb[14].mxu1  ;;  %v1675_v32 = vpop.f32.mrb[15].mxu0 }
 0x112   :  { %v1676_v33 = vadd.f32 %v1675_v32, %v1674_v29  ;;  %v1739_v34 = vpop.f32.mrb[15].mxu1 }
 0x113   :  { %v2382_v35 = vadd.f32 %v1737_v30, %v1673_v27  ;;  %v1740_v36 = vadd.f32 %v1739_v34, %v1738_v31 }
 0x115   :  { %v2384_v37 = vadd.f32 %v1740_v36, %v1676_v33 }
 0x116   :  { %v1677_v38 = vpop.f32.mrb[16].mxu0 }
 0x117   :  { %v1741_v39 = vpop.f32.mrb[16].mxu1  ;;  %v1678_v40 = vpop.f32.mrb[17].mxu0 }
 0x118   :  { %v1679_v41 = vadd.f32 %v1678_v40, %v1677_v38  ;;  %v1742_v42 = vpop.f32.mrb[17].mxu1  ;;  %v1680_v43 = vpop.f32.mrb[18].mxu0 }
 0x119   :  { %v1743_v44 = vadd.f32 %v1742_v42, %v1741_v39  ;;  %v1744_v45 = vpop.f32.mrb[18].mxu1  ;;  %v1681_v46 = vpop.f32.mrb[19].mxu0 }
 0x11a   :  { %v1682_v47 = vadd.f32 %v1681_v46, %v1680_v43  ;;  %v1745_v48 = vpop.f32.mrb[19].mxu1 }
 0x11b   :  { %v2386_v49 = vadd.f32 %v1743_v44, %v1679_v41  ;;  %v1746_v50 = vadd.f32 %v1745_v48, %v1744_v45 }
 0x11d   :  { %v2388_v51 = vadd.f32 %v1746_v50, %v1682_v47 }
 0x11e   :  { %v1683_v52 = vpop.f32.mrb[20].mxu0 }
 0x11f   :  { %v1747_v53 = vpop.f32.mrb[20].mxu1  ;;  %v1684_v54 = vpop.f32.mrb[21].mxu0 }
 0x120   :  { %v1685_v55 = vadd.f32 %v1684_v54, %v1683_v52  ;;  %v1748_v56 = vpop.f32.mrb[21].mxu1  ;;  %v1686_v58 = vpop.f32.mrb[22].mxu0 }
 0x121   :  { %v1749_v60 = vadd.f32 %v1748_v56, %v1747_v53  ;;  %v1750_v61 = vpop.f32.mrb[22].mxu1  ;;  %v1687_v62 = vpop.f32.mrb[23].mxu0 }
 0x122   :  { %v1688_v63 = vadd.f32 %v1687_v62, %v1686_v58  ;;  %v1751_v0 = vpop.f32.mrb[23].mxu1 }
 0x123   :  { %v2390_v1 = vadd.f32 %v1749_v60, %v1685_v55  ;;  %v1752_v2 = vadd.f32 %v1751_v0, %v1750_v61 }
 0x125   :  { %v2392_v3 = vadd.f32 %v1752_v2, %v1688_v63 }
 0x126   :  { %v1689_v4 = vpop.f32.mrb[24].mxu0 }
 0x127   :  { %v1753_v5 = vpop.f32.mrb[24].mxu1  ;;  %v1690_v6 = vpop.f32.mrb[25].mxu0 }
 0x128   :  { %v1691_v8 = vadd.f32 %v1690_v6, %v1689_v4  ;;  %v1754_v10 = vpop.f32.mrb[25].mxu1  ;;  %v1692_v11 = vpop.f32.mrb[26].mxu0 }
 0x129   :  { %v1755_v12 = vadd.f32 %v1754_v10, %v1753_v5  ;;  %v1756_v13 = vpop.f32.mrb[26].mxu1  ;;  %v1693_v14 = vpop.f32.mrb[27].mxu0 }
 0x12a   :  { %v1694_v15 = vadd.f32 %v1693_v14, %v1692_v11  ;;  %v1757_v16 = vpop.f32.mrb[27].mxu1 }
 0x12b   :  { %v2394_v17 = vadd.f32 %v1755_v12, %v1691_v8  ;;  %v1758_v18 = vadd.f32 %v1757_v16, %v1756_v13 }
 0x12d   :  { %v2396_v19 = vadd.f32 %v1758_v18, %v1694_v15 }
 0x12e   :  { %v1695_v20 = vpop.f32.mrb[28].mxu0 }
 0x12f   :  { %v1759_v22 = vpop.f32.mrb[28].mxu1  ;;  %v1696_v24 = vpop.f32.mrb[29].mxu0 }
 0x130   :  { %v1697_v25 = vadd.f32 %v1696_v24, %v1695_v20  ;;  %v1760_v26 = vpop.f32.mrb[29].mxu1  ;;  %v1698_v27 = vpop.f32.mrb[30].mxu0 }
 0x131   :  { %v1761_v28 = vadd.f32 %v1760_v26, %v1759_v22  ;;  %v1762_v29 = vpop.f32.mrb[30].mxu1  ;;  %v1699_v30 = vpop.f32.mrb[31].mxu0 }
 0x132   :  { %v1700_v31 = vadd.f32 %v1699_v30, %v1698_v27  ;;  %v1763_v32 = vpop.f32.mrb[31].mxu1 }
 0x133   :  { %v2398_v33 = vadd.f32 %v1761_v28, %v1697_v25  ;;  %v1764_v34 = vadd.f32 %v1763_v32, %v1762_v29 }
 0x135   :  { %v2400_v36 = vadd.f32 %v1764_v34, %v1700_v31 }
 0x136   :  { %v1781_v38 = vpop.f32.mrb[32].mxu0 }
 0x137   :  { %v1782_v39 = vpop.f32.mrb[33].mxu0  ;;  %v1857_v40 = vpop.f32.mrb[32].mxu1 }
 0x138   :  { %v1783_v41 = vadd.f32 %v1782_v39, %v1781_v38  ;;  %v1784_v42 = vpop.f32.mrb[34].mxu0  ;;  %v1144_v43 = vpop.f32.mrb[33].mxu1 }
 0x139   :  { %v1785_v44 = vpop.f32.mrb[35].mxu0  ;;  %v1858_v45 = vpop.f32.mrb[34].mxu1 }
 0x13a   :  { %v1786_v46 = vadd.f32 %v1785_v44, %v1784_v42  ;;  %v1048_v47 = vadd.f32 %v1783_v41, %v2370_v57  ;;  %v1147_v48 = vpop.f32.mrb[35].mxu1 }
 0x13c   :  { %v2403_v50 = vadd.f32 %v1144_v43, %v1048_v47  ;;  %v1051_v52 = vadd.f32 %v1786_v46, %v2372_v59 }
 0x13e   :  { %v2406_v53 = vadd.f32 %v1147_v48, %v1051_v52  ;;  %v1787_v54 = vpop.f32.mrb[36].mxu0  ;;  %v1249_v4 = vmul.f32 %v2403_v50, %v2403_v50  ;;  %v1210_v10 = vsel %vm1209_vm1, %v2403_v50, 0.0 }
 0x13f   :  { %v1788_v55 = vpop.f32.mrb[37].mxu0  ;;  %v2408_v56 = vpop.f32.mrb[36].mxu1 }
 0x140   :  { %v1789_v58 = vadd.f32 %v1788_v55, %v1787_v54  ;;  %v1790_v60 = vpop.f32.mrb[38].mxu0  ;;  %v1160_v61 = vpop.f32.mrb[37].mxu1  ;;  %v1250_v57 = vmul.f32 %v2406_v53, %v2406_v53  ;;  %v1211_v5 = vsel %vm1209_vm1, %v2406_v53, 0.0 }
 0x141   :  { %v1791_v62 = vpop.f32.mrb[39].mxu0  ;;  %v2410_v63 = vpop.f32.mrb[38].mxu1  ;;  %v1212_v15 = vadd.f32 %v1211_v5, %v1210_v10 }
 0x142   :  { %v1056_v0 = vadd.f32 %v1789_v58, %v2374_v7  ;;  %v1792_v2 = vadd.f32 %v1791_v62, %v1790_v60  ;;  %v1163_v59 = vpop.f32.mrb[39].mxu1  ;;  %v1266_v11 = vsel %vm1209_vm1, %v1250_v57, 0.0 }
 0x144   :  { %v2419_v6 = vadd.f32 %v1857_v40, %v1056_v0  ;;  %v1059_v8 = vadd.f32 %v1792_v2, %v2376_v9  ;;  %v1265_v9 = vsel %vm1209_vm1, %v1249_v4, 0.0 }
 0x145   :  { %v1267_v27 = vadd.f32 %v1266_v11, %v1265_v9 }
 0x146   :  { %v1213_v7 = vsel %vm1209_vm1, %v2419_v6, 0.0  ;;  %v1251_v12 = vmul.f32 %v2419_v6, %v2419_v6  ;;  %v2429_v13 = vadd.f32 %v1858_v45, %v1059_v8  ;;  %v1793_v14 = vpop.f32.mrb[40].mxu0 }
 0x147   :  { %v1794_v16 = vpop.f32.mrb[41].mxu0  ;;  %v2431_v18 = vpop.f32.mrb[40].mxu1  ;;  %v1214_v29 = vadd.f32 %v1213_v7, %v1212_v15 }
 0x148   :  { %v1268_v20 = vsel %vm1209_vm1, %v1251_v12, 0.0  ;;  %v1252_v22 = vmul.f32 %v2429_v13, %v2429_v13  ;;  %v1795_v24 = vadd.f32 %v1794_v16, %v1793_v14  ;;  %v1796_v25 = vpop.f32.mrb[42].mxu0  ;;  %v1176_v26 = vpop.f32.mrb[41].mxu1  ;;  %v1215_v34 = vsel %vm1209_vm1, %v2429_v13, 0.0 }
 0x149   :  { %v1797_v28 = vpop.f32.mrb[43].mxu0  ;;  %v2437_v30 = vpop.f32.mrb[42].mxu1  ;;  %v1269_v39 = vadd.f32 %v1268_v20, %v1267_v27  ;;  %v1216_v43 = vadd.f32 %v1215_v34, %v1214_v29 }
 0x14a   :  { %v1798_v31 = vadd.f32 %v1797_v28, %v1796_v25  ;;  %v1064_v32 = vadd.f32 %v1795_v24, %v2378_v21  ;;  %v1179_v38 = vpop.f32.mrb[43].mxu1  ;;  %v1270_v41 = vsel %vm1209_vm1, %v1252_v22, 0.0 }
 0x14b   :  { %v1271_v48 = vadd.f32 %v1270_v41, %v1269_v39 }
 0x14c   :  { %v2442_v40 = vadd.f32 %v1160_v61, %v1064_v32  ;;  %v1067_v42 = vadd.f32 %v1798_v31, %v2380_v23 }
 0x14e   :  { %v1217_v44 = vsel %vm1209_vm1, %v2442_v40, 0.0  ;;  %v1253_v45 = vmul.f32 %v2442_v40, %v2442_v40  ;;  %v2450_v46 = vadd.f32 %v1163_v59, %v1067_v42  ;;  %v1799_v21 = vpop.f32.mrb[44].mxu0 }
 0x14f   :  { %v1218_v47 = vadd.f32 %v1217_v44, %v1216_v43  ;;  %v1800_v52 = vpop.f32.mrb[45].mxu0  ;;  %v2452_v54 = vpop.f32.mrb[44].mxu1 }
 0x150   :  { %v1272_v55 = vsel %vm1209_vm1, %v1253_v45, 0.0  ;;  %v1219_v23 = vsel %vm1209_vm1, %v2450_v46, 0.0  ;;  %v1254_v58 = vmul.f32 %v2450_v46, %v2450_v46  ;;  %v1801_v60 = vadd.f32 %v1800_v52, %v1799_v21  ;;  %v1802_v61 = vpop.f32.mrb[46].mxu0  ;;  %v2459_v62 = vpop.f32.mrb[45].mxu1 }
 0x151   :  { %v1273_v57 = vadd.f32 %v1272_v55, %v1271_v48  ;;  %v1220_v0 = vadd.f32 %v1219_v23, %v1218_v47  ;;  %v1803_v2 = vpop.f32.mrb[47].mxu0  ;;  %v2461_v59 = vpop.f32.mrb[46].mxu1 }
 0x152   :  { %v1274_v4 = vsel %vm1209_vm1, %v1254_v58, 0.0  ;;  %v1072_v5 = vadd.f32 %v1801_v60, %v2382_v35  ;;  %v1804_v8 = vadd.f32 %v1803_v2, %v1802_v61  ;;  %v2465_v10 = vpop.f32.mrb[47].mxu1 }
 0x153   :  { %v1275_v11 = vadd.f32 %v1274_v4, %v1273_v57 }
 0x154   :  { %v2468_v7 = vadd.f32 %v2408_v56, %v1072_v5  ;;  %v1075_v12 = vadd.f32 %v1804_v8, %v2384_v37 }
 0x156   :  { %v1221_v14 = vsel %vm1209_vm1, %v2468_v7, 0.0  ;;  %v1255_v15 = vmul.f32 %v2468_v7, %v2468_v7  ;;  %v2476_v16 = vadd.f32 %v2410_v63, %v1075_v12  ;;  %v1805_v9 = vpop.f32.mrb[48].mxu0 }
 0x157   :  { %v1806_v35 = vpop.f32.mrb[49].mxu0  ;;  %v1222_v20 = vadd.f32 %v1221_v14, %v1220_v0 }
 0x158   :  { %v1276_v22 = vsel %vm1209_vm1, %v1255_v15, 0.0  ;;  %v1256_v56 = vmul.f32 %v2476_v16, %v2476_v16  ;;  %v1807_v24 = vadd.f32 %v1806_v35, %v1805_v9  ;;  %v1808_v25 = vpop.f32.mrb[50].mxu0  ;;  %v1223_v37 = vsel %vm1209_vm1, %v2476_v16, 0.0 }
 0x159   :  { %v1809_v27 = vpop.f32.mrb[51].mxu0  ;;  %v1224_v28 = vadd.f32 %v1223_v37, %v1222_v20  ;;  %v1277_v29 = vadd.f32 %v1276_v22, %v1275_v11 }
 0x15a   :  { %v1810_v31 = vadd.f32 %v1809_v27, %v1808_v25  ;;  %v1080_v63 = vadd.f32 %v1807_v24, %v2386_v49  ;;  %v1278_v32 = vsel %vm1209_vm1, %v1256_v56, 0.0 }
 0x15b   :  { %v1279_v34 = vadd.f32 %v1278_v32, %v1277_v29 }
 0x15c   :  { %v2485_v39 = vadd.f32 %v1176_v26, %v1080_v63  ;;  %v1083_v41 = vadd.f32 %v1810_v31, %v2388_v51 }
 0x15e   :  { %v1225_v42 = vsel %vm1209_vm1, %v2485_v39, 0.0  ;;  %v1257_v43 = vmul.f32 %v2485_v39, %v2485_v39  ;;  %v2492_v44 = vadd.f32 %v1179_v38, %v1083_v41  ;;  %v1811_v45 = vpop.f32.mrb[52].mxu0 }
 0x15f   :  { %v1226_v21 = vadd.f32 %v1225_v42, %v1224_v28  ;;  %v1812_v47 = vpop.f32.mrb[53].mxu0 }
 0x160   :  { %v1280_v49 = vsel %vm1209_vm1, %v1257_v43, 0.0  ;;  %v1227_v48 = vsel %vm1209_vm1, %v2492_v44, 0.0  ;;  %v1258_v26 = vmul.f32 %v2492_v44, %v2492_v44  ;;  %v1813_v51 = vadd.f32 %v1812_v47, %v1811_v45  ;;  %v1814_v52 = vpop.f32.mrb[54].mxu0 }
 0x161   :  { %v1281_v55 = vadd.f32 %v1280_v49, %v1279_v34  ;;  %v1228_v23 = vadd.f32 %v1227_v48, %v1226_v21  ;;  %v1815_v58 = vpop.f32.mrb[55].mxu0 }
 0x162   :  { %v1282_v60 = vsel %vm1209_vm1, %v1258_v26, 0.0  ;;  %v1088_v38 = vadd.f32 %v1813_v51, %v2390_v1  ;;  %v1816_v61 = vadd.f32 %v1815_v58, %v1814_v52 }
 0x163   :  { %v1283_v57 = vadd.f32 %v1282_v60, %v1281_v55 }
 0x164   :  { %v2502_v0 = vadd.f32 %v2431_v18, %v1088_v38  ;;  %v1091_v2 = vadd.f32 %v1816_v61, %v2392_v3 }
 0x166   :  { %v1229_v4 = vsel %vm1209_vm1, %v2502_v0, 0.0  ;;  %v1259_v5 = vmul.f32 %v2502_v0, %v2502_v0  ;;  %v2510_v8 = vadd.f32 %v2437_v30, %v1091_v2  ;;  %v1817_v11 = vpop.f32.mrb[56].mxu0 }
 0x167   :  { %v1818_v12 = vpop.f32.mrb[57].mxu0  ;;  %v1230_v14 = vadd.f32 %v1229_v4, %v1228_v23 }
 0x168   :  { %v1284_v1 = vsel %vm1209_vm1, %v1259_v5, 0.0  ;;  %v1260_v18 = vmul.f32 %v2510_v8, %v2510_v8  ;;  %v1819_v15 = vadd.f32 %v1818_v12, %v1817_v11  ;;  %v1820_v9 = vpop.f32.mrb[58].mxu0  ;;  %v1231_v3 = vsel %vm1209_vm1, %v2510_v8, 0.0 }
 0x169   :  { %v1821_v35 = vpop.f32.mrb[59].mxu0  ;;  %v1232_v20 = vadd.f32 %v1231_v3, %v1230_v14  ;;  %v1285_v22 = vadd.f32 %v1284_v1, %v1283_v57 }
 0x16a   :  { %v1822_v56 = vadd.f32 %v1821_v35, %v1820_v9  ;;  %v1096_v30 = vadd.f32 %v1819_v15, %v2394_v17  ;;  %v1286_v24 = vsel %vm1209_vm1, %v1260_v18, 0.0 }
 0x16b   :  { %v1287_v25 = vadd.f32 %v1286_v24, %v1285_v22  ;;  %v1311_v24 = vlaneseq }
 0x16c   :  { %v2520_v37 = vadd.f32 %v2459_v62, %v1096_v30  ;;  %v1099_v27 = vadd.f32 %v1822_v56, %v2396_v19 }
 0x16e   :  { %v1233_v28 = vsel %vm1209_vm1, %v2520_v37, 0.0  ;;  %v1261_v29 = vmul.f32 %v2520_v37, %v2520_v37  ;;  %v2528_v31 = vadd.f32 %v2465_v10, %v1099_v27  ;;  %v1823_v63 = vpop.f32.mrb[60].mxu0  ;;  %v1207_v27 = vld [vmem:[%s2646_s2] sm:$0x1] }
 0x16f   :  { %v1234_v32 = vadd.f32 %v1233_v28, %v1232_v20  ;;  %v1824_v17 = vpop.f32.mrb[61].mxu0 }
 0x170   :  { %v1288_v34 = vsel %vm1209_vm1, %v1261_v29, 0.0  ;;  %v1235_v62 = vsel %vm1209_vm1, %v2528_v31, 0.0  ;;  %v1262_v19 = vmul.f32 %v2528_v31, %v2528_v31  ;;  %v1825_v41 = vadd.f32 %v1824_v17, %v1823_v63  ;;  %v1826_v42 = vpop.f32.mrb[62].mxu0 }
 0x171   :  { %v1289_v43 = vadd.f32 %v1288_v34, %v1287_v25  ;;  %v1236_v45 = vadd.f32 %v1235_v62, %v1234_v32  ;;  %v1827_v21 = vpop.f32.mrb[63].mxu0  ;;  %v1312_v25 = vshrl.u32 %v1311_v24, 7  ;;  %v1208_v32 = vld [vmem:[%s2647_s3] sm:$0x1] }
 0x172   :  { %v1290_v47 = vsel %vm1209_vm1, %v1262_v19, 0.0  ;;  %v1104_v10 = vadd.f32 %v1825_v41, %v2398_v33  ;;  %v1828_v49 = vadd.f32 %v1827_v21, %v1826_v42 }
 0x173   :  { %v1291_v48 = vadd.f32 %v1290_v47, %v1289_v43  ;;  %v1313_v28 = vsub.s32 0, %v1312_v25 }
 0x174   :  { %v1201_v26 = vadd.f32 %v2452_v54, %v1104_v10  ;;  %v1107_v51 = vadd.f32 %v1828_v49, %v2400_v36 }
 0x176   :  { %v1237_v52 = vsel %vm1209_vm1, %v1201_v26, 0.0  ;;  %v1263_v55 = vmul.f32 %v1201_v26, %v1201_v26  ;;  %v1204_v23 = vadd.f32 %v2461_v59, %v1107_v51 }
 0x177   :  { %v1238_v58 = vadd.f32 %v1237_v52, %v1236_v45 }
 0x178   :  { %v1292_v60 = vsel %vm1209_vm1, %v1263_v55, 0.0  ;;  %v1239_v38 = vsel %vm1209_vm1, %v1204_v23, 0.0  ;;  %v1264_v61 = vmul.f32 %v1204_v23, %v1204_v23 }
 0x179   :  { %v1293_v57 = vadd.f32 %v1292_v60, %v1291_v48  ;;  %v1240_v2 = vadd.f32 %v1239_v38, %v1238_v58 }
 0x17a   :  { %v1294_v33 = vsel %vm1209_vm1, %v1264_v61, 0.0 }
 0x17b   :  { %v1241_v4 = vrot.slane %v1240_v2, 4  ;;  %v1295_v5 = vadd.f32 %v1294_v33, %v1293_v57 }
 0x17d   :  { %v1242_v54 = vadd.f32 %v1241_v4, %v1240_v2  ;;  %v1296_v11 = vrot.slane %v1295_v5, 4 }
 0x17f   :  { %v1243_v36 = vrot.slane %v1242_v54, 2  ;;  %v1297_v12 = vadd.f32 %v1296_v11, %v1295_v5 }
 0x181   :  { %v1244_v14 = vadd.f32 %v1243_v36, %v1242_v54  ;;  %v1298_v1 = vrot.slane %v1297_v12, 2 }
 0x183   :  { %v1245_v18 = vrot.slane %v1244_v14, 1  ;;  %v1299_v59 = vadd.f32 %v1298_v1, %v1297_v12 }
 0x185   :  { %v1246_v15 = vadd.f32 %v1245_v18, %v1244_v14  ;;  %v1300_v9 = vrot.slane %v1299_v59, 1 }
 0x187   :  { %v1248_v3 = vmul.f32 0.0078125, %v1246_v15  ;;  %v1301_v35 = vadd.f32 %v1300_v9, %v1299_v59 }
 0x189   :  { %v1302_v20 = vmul.f32 0.0078125, %v1301_v35  ;;  %v1303_v22 = vmul.f32 %v1248_v3, %v1248_v3 }
 0x18b   :  { %v1304_v56 = vsub.f32 %v1302_v20, %v1303_v22 }
 0x18d   :  { %v1305_v30 = vadd.f32 1e-05, %v1304_v56 }
 0x18f   :  { %2005 = vrsqrt.f32 %v1305_v30 }
 0x199   :  { %v2006_v29 = vpop.eup %2005 }
 0x19a   :  { %v1307_v63 = vmul.f32 %v2006_v29, %v1207_v27 }
 0x19c   :  { %v1308_v17 = vmul.f32 %v1307_v63, %v1248_v3  ;;  %v1314_v34 = vrot.slane %v1307_v63, %v1313_v28 }
 0x19e   :  { %v1309_v62 = vsub.f32 %v1208_v32, %v1308_v17  ;;  %v1316_v19 = vmul.f32 %v1314_v34, %v2403_v50  ;;  %v1317_v41 = vmul.f32 %v1314_v34, %v2406_v53  ;;  %v1320_v42 = vmul.f32 %v1314_v34, %v2442_v40 }
 0x19f   :  { %v1321_v43 = vmul.f32 %v1314_v34, %v2450_v46  ;;  %v1322_v45 = vmul.f32 %v1314_v34, %v2468_v7  ;;  %v1323_v21 = vmul.f32 %v1314_v34, %v2476_v16  ;;  %v1324_v47 = vmul.f32 %v1314_v34, %v2485_v39 }
 0x1a0   :  { %v1325_v10 = vmul.f32 %v1314_v34, %v2492_v44  ;;  %v1326_v49 = vmul.f32 %v1314_v34, %v2502_v0  ;;  %v1327_v48 = vmul.f32 %v1314_v34, %v2510_v8  ;;  %v1328_v50 = vmul.f32 %v1314_v34, %v2520_v37 }
 0x1a1   :  { %v1329_v53 = vmul.f32 %v1314_v34, %v2528_v31  ;;  %v1330_v51 = vmul.f32 %v1314_v34, %v1201_v26  ;;  %v1318_v40 = vmul.f32 %v1314_v34, %v2419_v6  ;;  %v1319_v46 = vmul.f32 %v1314_v34, %v2429_v13 }
 0x1a2   :  { %v1331_v7 = vmul.f32 %v1314_v34, %v1204_v23  ;;  %v1336_v52 = vrot.slane %v1309_v62, %v1313_v28 }
 0x1a4   :  { %v1338_v16 = vadd.f32 %v1336_v52, %v1316_v19  ;;  %v1339_v55 = vadd.f32 %v1336_v52, %v1317_v41  ;;  %v1340_v39 = vadd.f32 %v1336_v52, %v1318_v40  ;;  %v1341_v58 = vadd.f32 %v1336_v52, %v1319_v46 }
 0x1a5   :  { %v1342_v44 = vadd.f32 %v1336_v52, %v1320_v42  ;;  %v1343_v60 = vadd.f32 %v1336_v52, %v1321_v43  ;;  %v1344_v0 = vadd.f32 %v1336_v52, %v1322_v45  ;;  %v1345_v38 = vadd.f32 %v1336_v52, %v1323_v21 }
 0x1a6   :  { %v1346_v8 = vadd.f32 %v1336_v52, %v1324_v47  ;;  %v1347_v61 = vadd.f32 %v1336_v52, %v1325_v10  ;;  %v1348_v37 = vadd.f32 %v1336_v52, %v1326_v49  ;;  %v1349_v57 = vadd.f32 %v1336_v52, %v1327_v48 }
 0x1a7   :  { %v1350_v31 = vadd.f32 %v1336_v52, %v1328_v50  ;;  %v1351_v26 = vadd.f32 %v1336_v52, %v1329_v53  ;;  %v1352_v2 = vadd.f32 %v1336_v52, %v1330_v51  ;;  %v1353_v6 = vadd.f32 %v1336_v52, %v1331_v7 }
 0x1a8   :  { %vm1355_vm3 = vcmp.gt.f32.partialorder %v1339_v55, 0.0  ;;  %vm1356_vm4 = vcmp.gt.f32.partialorder %v1340_v39, 0.0  ;;  %vm1357_vm5 = vcmp.gt.f32.partialorder %v1341_v58, 0.0  ;;  %vm1358_vm6 = vcmp.gt.f32.partialorder %v1342_v44, 0.0 }
 0x1a9   :  { %vm1359_vm7 = vcmp.gt.f32.partialorder %v1343_v60, 0.0  ;;  %vm1361_vm9 = vcmp.gt.f32.partialorder %v1345_v38, 0.0  ;;  %vm1362_vm10 = vcmp.gt.f32.partialorder %v1346_v8, 0.0  ;;  %vm1363_vm11 = vcmp.gt.f32.partialorder %v1347_v61, 0.0 }
 0x1aa   :  { %vm1364_vm12 = vcmp.gt.f32.partialorder %v1348_v37, 0.0  ;;  %vm1365_vm13 = vcmp.gt.f32.partialorder %v1349_v57, 0.0  ;;  %vm1366_vm14 = vcmp.gt.f32.partialorder %v1350_v31, 0.0  ;;  %vm1367_vm15 = vcmp.gt.f32.partialorder %v1351_v26, 0.0 }
 0x1ab   :  { %vm1368_vm0 = vcmp.gt.f32.partialorder %v1352_v2, 0.0  ;;  %vm1369_vm1 = vcmp.gt.f32.partialorder %v1353_v6, 0.0  ;;  %v1370_v13 = vmul.f32 0.2, %v1338_v16  ;;  %v1371_v23 = vmul.f32 0.2, %v1339_v55 }
 0x1ac   :  { %v1372_v33 = vmul.f32 0.2, %v1340_v39  ;;  %v1373_v4 = vmul.f32 0.2, %v1341_v58  ;;  %v1374_v5 = vmul.f32 0.2, %v1342_v44 }
 0x1ad   :  { %v1375_v54 = vmul.f32 0.2, %v1343_v60  ;;  %v1376_v11 = vmul.f32 0.2, %v1344_v0  ;;  %v1377_v36 = vmul.f32 0.2, %v1345_v38  ;;  %v1387_v15 = vsel %vm1355_vm3, %v1339_v55, %v1371_v23 }
 0x1ae   :  { %v1378_v12 = vmul.f32 0.2, %v1346_v8  ;;  %vm2649_vm8 = vcmp.gt.f32.partialorder %v1338_v16, 0.0  ;;  %v1379_v1 = vmul.f32 0.2, %v1347_v61  ;;  %v1388_v20 = vsel %vm1356_vm4, %v1340_v39, %v1372_v33 }
 0x1af   :  { %v1386_v14 = vsel %vm2649_vm8, %v1338_v16, %v1370_v13  ;;  %v1380_v18 = vmul.f32 0.2, %v1348_v37  ;;  %v1381_v59 = vmul.f32 0.2, %v1349_v57  ;;  %v1382_v9 = vmul.f32 0.2, %v1350_v31 }
 0x1b0   :  { %v1383_v3 = vmul.f32 0.2, %v1351_v26  ;;  %v1384_v35 = vmul.f32 0.2, %v1352_v2  ;;  %v1385_v22 = vmul.f32 0.2, %v1353_v6  ;;  %v1389_v56 = vsel %vm1357_vm5, %v1341_v58, %v1373_v4 }
 0x1b1   :  { %v1390_v30 = vsel %vm1358_vm6, %v1342_v44, %v1374_v5  ;;  %v1391_v24 = vsel %vm1359_vm7, %v1343_v60, %v1375_v54  ;;  %vm2650_vm2 = vcmp.gt.f32.partialorder %v1344_v0, 0.0  ;;  %v1393_v27 = vsel %vm1361_vm9, %v1345_v38, %v1377_v36 }
 0x1b2   :  { %v1392_v25 = vsel %vm2650_vm2, %v1344_v0, %v1376_v11  ;;  %v1394_v28 = vsel %vm1362_vm10, %v1346_v8, %v1378_v12  ;;  %v1395_v29 = vsel %vm1363_vm11, %v1347_v61, %v1379_v1  ;;  %v1396_v63 = vsel %vm1364_vm12, %v1348_v37, %v1380_v18 }
 0x1b3   :  { %v1397_v32 = vsel %vm1365_vm13, %v1349_v57, %v1381_v59  ;;  %v1398_v17 = vsel %vm1366_vm14, %v1350_v31, %v1382_v9  ;;  %v1399_v34 = vsel %vm1367_vm15, %v1351_v26, %v1383_v3  ;;  %v1400_v62 = vsel %vm1368_vm0, %v1352_v2, %v1384_v35 }
 0x1b4   :  { %v1401_v19 = vsel %vm1369_vm1, %v1353_v6, %v1385_v22  ;;  %v1621_v41 = vpack.c.bf16 %v1386_v14, %v1386_v14  ;;  %v1622_v42 = vpack.c.bf16 %v1387_v15, %v1387_v15  ;;  %v1623_v43 = vpack.c.bf16 %v1388_v20, %v1388_v20 }
 0x1b5   :  { %v1624_v45 = vpack.c.bf16 %v1389_v56, %v1389_v56  ;;  %v1625_v21 = vpack.c.bf16 %v1390_v30, %v1390_v30  ;;  %v1626_v47 = vpack.c.bf16 %v1391_v24, %v1391_v24  ;;  %v1627_v10 = vpack.c.bf16 %v1392_v25, %v1392_v25 }
 0x1b6   :  { %v1628_v49 = vpack.c.bf16 %v1393_v27, %v1393_v27  ;;  %v1629_v48 = vpack.c.bf16 %v1394_v28, %v1394_v28  ;;  %v1630_v50 = vpack.c.bf16 %v1395_v29, %v1395_v29  ;;  %vm2651_vm2 = vcmask 519168  }
 0x1b7   :  { %1467 = vst.msk [vmem:[%s2648_s4] sm:$0xf] %vm2651_vm2, %v1621_v41  ;;  %vm2652_vm3 = vmmov %vm2651_vm2  ;;  %v1631_v53 = vpack.c.bf16 %v1396_v63, %v1396_v63  ;;  %v1632_v51 = vpack.c.bf16 %v1397_v32, %v1397_v32  ;;  %v1633_v40 = vpack.c.bf16 %v1398_v17, %v1398_v17  ;;  %v1634_v46 = vpack.c.bf16 %v1399_v34, %v1399_v34 }
 0x1b8   :  { %1468 = vst.msk [vmem:[%s2648_s4 + $0x4] sm:$0xf] %vm2652_vm3, %v1622_v42  ;;  %vm2653_vm4 = vmmov %vm2651_vm2  ;;  %v1635_v7 = vpack.c.bf16 %v1400_v62, %v1400_v62  ;;  %v1636_v52 = vpack.c.bf16 %v1401_v19, %v1401_v19 }
 0x1b9   :  { %1469 = vst.msk [vmem:[%s2648_s4 + $0x8] sm:$0xf] %vm2653_vm4, %v1623_v43  ;;  %vm2654_vm5 = vmmov %vm2651_vm2 }
 0x1ba   :  { %1470 = vst.msk [vmem:[%s2648_s4 + $0xc] sm:$0xf] %vm2654_vm5, %v1624_v45  ;;  %vm2655_vm6 = vmmov %vm2651_vm2 }
 0x1bb   :  { %1471 = vst.msk [vmem:[%s2648_s4 + $0x10] sm:$0xf] %vm2655_vm6, %v1625_v21  ;;  %vm2656_vm7 = vmmov %vm2651_vm2 }
 0x1bc   :  { %1472 = vst.msk [vmem:[%s2648_s4 + $0x14] sm:$0xf] %vm2656_vm7, %v1626_v47  ;;  %vm2657_vm8 = vmmov %vm2651_vm2 }
 0x1bd   :  { %1473 = vst.msk [vmem:[%s2648_s4 + $0x18] sm:$0xf] %vm2657_vm8, %v1627_v10  ;;  %vm2658_vm9 = vmmov %vm2651_vm2 }
 0x1be   :  { %1474 = vst.msk [vmem:[%s2648_s4 + $0x1c] sm:$0xf] %vm2658_vm9, %v1628_v49  ;;  %vm2659_vm10 = vmmov %vm2651_vm2 }
 0x1bf   :  { %1475 = vst.msk [vmem:[%s2648_s4 + $0x20] sm:$0xf] %vm2659_vm10, %v1629_v48  ;;  %vm2660_vm11 = vmmov %vm2651_vm2 }
 0x1c0   :  { %1476 = vst.msk [vmem:[%s2648_s4 + $0x24] sm:$0xf] %vm2660_vm11, %v1630_v50  ;;  %vm2661_vm12 = vmmov %vm2651_vm2 }
 0x1c1   :  { %1477 = vst.msk [vmem:[%s2648_s4 + $0x28] sm:$0xf] %vm2661_vm12, %v1631_v53  ;;  %vm2662_vm13 = vmmov %vm2651_vm2 }
 0x1c2   :  { %1478 = vst.msk [vmem:[%s2648_s4 + $0x2c] sm:$0xf] %vm2662_vm13, %v1632_v51  ;;  %vm2663_vm14 = vmmov %vm2651_vm2 }
 0x1c3   :  { %1479 = vst.msk [vmem:[%s2648_s4 + $0x30] sm:$0xf] %vm2663_vm14, %v1633_v40  ;;  %vm2664_vm15 = vmmov %vm2651_vm2 }
 0x1c4   :  { %1480 = vst.msk [vmem:[%s2648_s4 + $0x34] sm:$0xf] %vm2664_vm15, %v1634_v46  ;;  %vm2665_vm0 = vmmov %vm2651_vm2 }
 0x1c5   :  { %1481 = vst.msk [vmem:[%s2648_s4 + $0x38] sm:$0xf] %vm2665_vm0, %v1635_v7  ;;  %vm2666_vm1 = vmmov %vm2665_vm0 }
 0x1c6   :  { %1482 = vst.msk [vmem:[%s2648_s4 + $0x3c] sm:$0xf] %vm2666_vm1, %v1636_v52 }

// kernel: discriminator_forward.6
= control target key start
LH: loop header
LB: loop body
LE: loop exit
PB: predicated region body
PF: predicated region fallthrough
CT: control target
= control target key end

     0   :  { %vm965_vm0 = vcmask 523264   ;;  %s2129_s1 = inlined_call_operand.vmem [shape: bf16[1728,128], index: 1, kind: input, shape index: {}]   ;;  %s2130_s0 = inlined_call_operand.vmem [shape: bf16[16,1728], index: 0, kind: input, shape index: {}]   ;;  %s2131_s2 = inlined_call_operand.vmem [shape: f32[1,128], index: 2, kind: input, shape index: {}]   ;;  %s2132_s3 = inlined_call_operand.vmem [shape: f32[1,128], index: 3, kind: input, shape index: {}]   ;;  %s2133_s4 = inlined_call_operand.vmem [shape: bf16[16,128], index: 4, kind: output, shape index: {}]  }
   0x1   :  { %v1585_v0 = vld [vmem:[%s2129_s1 + $0x40] sm:$0xff]   ;;  %v1587_v2 = vld [vmem:[%s2129_s1 + $0x48] sm:$0xff]   ;;  %v1589_v4 = vld [vmem:[%s2129_s1 + $0x50] sm:$0xff]  }
   0x2   :  { %v1586_v1 = vld [vmem:[%s2129_s1] sm:$0xff]   ;;  %1452 = vmatprep.subr.bf16.mxu1 %v1585_v0  ;;  %v1588_v3 = vld [vmem:[%s2129_s1 + $0x8] sm:$0xff]   ;;  %v1590_v5 = vld [vmem:[%s2129_s1 + $0x10] sm:$0xff]  }
   0x3   :  { %1453 = vmatpush3.bf16.msra.mxu1 %v1586_v1  ;;  %v1591_v6 = vld [vmem:[%s2129_s1 + $0x58] sm:$0xff]   ;;  %v1595_v8 = vld [vmem:[%s2129_s1 + $0x140] sm:$0xff]   ;;  %v1599_v12 = vld [vmem:[%s2129_s1 + $0x148] sm:$0xff]  }
   0x4   :  { %1454 = vmatprep.subr.bf16.mxu1 %v1587_v2  ;;  %v1592_v7 = vld [vmem:[%s2129_s1 + $0x18] sm:$0xff]   ;;  %v1596_v9 = vld [vmem:[%s2129_s1 + $0x100] sm:$0xff]   ;;  %1496 = vmatprep.subr.bf16.mxu0 %v1595_v8  ;;  %v1600_v13 = vld [vmem:[%s2129_s1 + $0x108] sm:$0xff]  }
   0x5   :  { %v1593_v10 = vld [vmem:[%s2129_s1 + $0x60] sm:$0xff]   ;;  %1497 = vmatpush3.bf16.msra.mxu0 %v1596_v9  ;;  %v1597_v14 = vld [vmem:[%s2129_s1 + $0x68] sm:$0xff]   ;;  %v1603_v16 = vld [vmem:[%s2129_s1 + $0x150] sm:$0xff]  }
   0x6   :  { %v1594_v11 = vld [vmem:[%s2129_s1 + $0x20] sm:$0xff]   ;;  %1498 = vmatprep.subr.bf16.mxu0 %v1599_v12  ;;  %v1598_v15 = vld [vmem:[%s2129_s1 + $0x28] sm:$0xff]   ;;  %v1604_v17 = vld [vmem:[%s2129_s1 + $0x110] sm:$0xff]  }
   0x7   :  { %1455 = vmatpush3.bf16.msra.mxu1 %v1588_v3  ;;  %v1601_v18 = vld [vmem:[%s2129_s1 + $0x70] sm:$0xff]   ;;  %v1607_v20 = vld [vmem:[%s2129_s1 + $0x158] sm:$0xff]   ;;  %v1612_v25 = vld [vmem:[%s2129_s1 + $0xc0] sm:$0xff]  }
   0x8   :  { %1456 = vmatprep.subr.bf16.mxu1 %v1589_v4  ;;  %v1602_v19 = vld [vmem:[%s2129_s1 + $0x30] sm:$0xff]   ;;  %v1605_v21 = vld [vmem:[%s2129_s1 + $0x78] sm:$0xff]   ;;  %v1614_v27 = vld [vmem:[%s2129_s1 + $0x160] sm:$0xff]  }
   0x9   :  { %1499 = vmatpush3.bf16.msra.mxu0 %v1600_v13  ;;  %v1610_v22 = vld [vmem:[%s2130_s0 + $0x4] ss:$56 sps:$4 sm:$0xff]   ;;  %v1608_v26 = vld [vmem:[%s2130_s0] ss:$56 sps:$4 sm:$0xff]   ;;  %v1616_v30 = vld [vmem:[%s2129_s1 + $0xc8] sm:$0xff]  }
   0xa   :  { %1500 = vmatprep.subr.bf16.mxu0 %v1603_v16  ;;  %v1611_v23 = vld [vmem:[%s2129_s1 + $0x118] sm:$0xff]   ;;  %1001 = vmatprep.mubr.bf16.mxu1 %v1610_v22  ;;  %v1615_v28 = vld [vmem:[%s2129_s1 + $0x120] sm:$0xff]   ;;  %v1618_v31 = vld [vmem:[%s2129_s1 + $0x168] sm:$0xff]  }
   0xb   :  { %1457 = vmatpush3.bf16.msra.mxu1 %v1590_v5  ;;  %v1606_v24 = vld [vmem:[%s2129_s1 + $0x38] sm:$0xff]   ;;  %v1613_v29 = vld [vmem:[%s2129_s1 + $0x80] sm:$0xff]   ;;  %v1619_v32 = vld [vmem:[%s2129_s1 + $0x128] sm:$0xff]  }
   0xc   :  { %1458 = vmatprep.subr.bf16.mxu1 %v1591_v6  ;;  %v1617_v33 = vld [vmem:[%s2129_s1 + $0x88] sm:$0xff]   ;;  %v1620_v34 = vld [vmem:[%s2129_s1 + $0xd0] sm:$0xff]   ;;  %v1624_v38 = vld [vmem:[%s2129_s1 + $0xd8] sm:$0xff]  }
   0xd   :  { %1501 = vmatpush3.bf16.msra.mxu0 %v1604_v17  ;;  %v1622_v35 = vld [vmem:[%s2129_s1 + $0x170] sm:$0xff]   ;;  %v1626_v39 = vld [vmem:[%s2129_s1 + $0x178] sm:$0xff]   ;;  %v1628_v42 = vld [vmem:[%s2129_s1 + $0xe0] sm:$0xff]   ;;  %v1716_v17 = vmov 0  }
   0xe   :  { %1502 = vmatprep.subr.bf16.mxu0 %v1607_v20  ;;  %v1623_v36 = vld [vmem:[%s2129_s1 + $0x130] sm:$0xff]   ;;  %v1627_v40 = vld [vmem:[%s2129_s1 + $0x138] sm:$0xff]   ;;  %v1633_v45 = vld [vmem:[%s2129_s1 + $0x240] sm:$0xff]  }
   0xf   :  { %1459 = vmatpush3.bf16.msra.mxu1 %v1592_v7  ;;  %v1621_v37 = vld [vmem:[%s2129_s1 + $0x90] sm:$0xff]   ;;  %v1625_v41 = vld [vmem:[%s2129_s1 + $0x98] sm:$0xff]   ;;  %v1634_v46 = vld [vmem:[%s2129_s1 + $0x200] sm:$0xff]  }
  0x10   :  { %1460 = vmatprep.subr.bf16.mxu1 %v1593_v10  ;;  %v1630_v43 = vld [vmem:[%s2130_s0 + $0x10] ss:$56 sps:$4 sm:$0xff]   ;;  %v1632_v44 = vld [vmem:[%s2130_s0 + $0x14] ss:$56 sps:$4 sm:$0xff]   ;;  %v1629_v47 = vld [vmem:[%s2129_s1 + $0xa0] sm:$0xff]  }
  0x11   :  { %1503 = vmatpush3.bf16.msra.mxu0 %v1611_v23  ;;  %1083 = vmatprep.mubr.bf16.mxu0 %v1632_v44  ;;  %v1635_v48 = vld [vmem:[%s2129_s1 + $0xe8] sm:$0xff]   ;;  %v1639_v52 = vld [vmem:[%s2129_s1 + $0xf0] sm:$0xff]   ;;  %v1643_v56 = vld [vmem:[%s2129_s1 + $0xf8] sm:$0xff]  }
  0x12   :  { %1504 = vmatprep.subr.bf16.mxu0 %v1614_v27  ;;  %v1637_v49 = vld [vmem:[%s2129_s1 + $0x248] sm:$0xff]   ;;  %v1641_v53 = vld [vmem:[%s2129_s1 + $0x250] sm:$0xff]   ;;  %v1645_v57 = vld [vmem:[%s2129_s1 + $0x258] sm:$0xff]  }
  0x13   :  { %1461 = vmatpush3.bf16.msra.mxu1 %v1594_v11  ;;  %v1638_v50 = vld [vmem:[%s2129_s1 + $0x208] sm:$0xff]   ;;  %v1642_v54 = vld [vmem:[%s2129_s1 + $0x210] sm:$0xff]   ;;  %v1644_v58 = vld [vmem:[%s2129_s1 + $0xb8] sm:$0xff]  }
  0x14   :  { %1462 = vmatprep.subr.bf16.mxu1 %v1597_v14  ;;  %v1636_v51 = vld [vmem:[%s2129_s1 + $0xa8] sm:$0xff]   ;;  %v1640_v55 = vld [vmem:[%s2129_s1 + $0xb0] sm:$0xff]   ;;  %v1649_v60 = vld [vmem:[%s2129_s1 + $0x218] sm:$0xff]  }
  0x15   :  { %1505 = vmatpush3.bf16.msra.mxu0 %v1615_v28  ;;  %v1648_v59 = vld [vmem:[%s2130_s0 + $0xc] ss:$56 sps:$4 sm:$0xff]   ;;  %v1646_v61 = vld [vmem:[%s2130_s0 + $0x8] ss:$56 sps:$4 sm:$0xff]   ;;  %v1658_v6 = vld [vmem:[%s2129_s1 + $0x1d0] sm:$0xff]  }
  0x16   :  { %1506 = vmatprep.subr.bf16.mxu0 %v1618_v31  ;;  %v1650_v62 = vld [vmem:[%s2129_s1 + $0x1c0] sm:$0xff]   ;;  %v1654_v2 = vld [vmem:[%s2129_s1 + $0x1c8] sm:$0xff]   ;;  %v1659_v7 = vld [vmem:[%s2129_s1 + $0x190] sm:$0xff]  }
  0x17   :  { %1463 = vmatpush3.bf16.msra.mxu1 %v1598_v15  ;;  %v1651_v63 = vld [vmem:[%s2129_s1 + $0x180] sm:$0xff]   ;;  %v1655_v3 = vld [vmem:[%s2129_s1 + $0x188] sm:$0xff]   ;;  %v1660_v8 = vld [vmem:[%s2129_s1 + $0x270] sm:$0xff]  }
  0x18   :  { %1464 = vmatprep.subr.bf16.mxu1 %v1601_v18  ;;  %v1652_v0 = vld [vmem:[%s2129_s1 + $0x260] sm:$0xff]   ;;  %v1656_v4 = vld [vmem:[%s2129_s1 + $0x268] sm:$0xff]   ;;  %v1661_v9 = vld [vmem:[%s2129_s1 + $0x230] sm:$0xff]  }
  0x19   :  { %1507 = vmatpush3.bf16.msra.mxu0 %v1619_v32  ;;  %v1653_v1 = vld [vmem:[%s2129_s1 + $0x220] sm:$0xff]   ;;  %v1657_v5 = vld [vmem:[%s2129_s1 + $0x228] sm:$0xff]   ;;  %v1662_v10 = vld [vmem:[%s2129_s1 + $0x1d8] sm:$0xff]  }
  0x1a   :  { %1508 = vmatprep.subr.bf16.mxu0 %v1622_v35  ;;  %v1663_v11 = vld [vmem:[%s2129_s1 + $0x198] sm:$0xff]   ;;  %v1666_v14 = vld [vmem:[%s2129_s1 + $0x1e0] sm:$0xff]   ;;  %v1672_v20 = vld [vmem:[%s2129_s1 + $0x1e8] sm:$0xff]  }
  0x1b   :  { %1465 = vmatpush3.bf16.msra.mxu1 %v1602_v19  ;;  %v1664_v12 = vld [vmem:[%s2129_s1 + $0x278] sm:$0xff]   ;;  %v1667_v15 = vld [vmem:[%s2129_s1 + $0x1a0] sm:$0xff]   ;;  %v1674_v22 = vld [vmem:[%s2129_s1 + $0x308] sm:$0xff]  }
  0x1c   :  { %1466 = vmatprep.subr.bf16.mxu1 %v1605_v21  ;;  %v1665_v13 = vld [vmem:[%s2129_s1 + $0x238] sm:$0xff]   ;;  %v1671_v19 = vld [vmem:[%s2129_s1 + $0x300] sm:$0xff]   ;;  %v1673_v21 = vld [vmem:[%s2129_s1 + $0x1a8] sm:$0xff]  }
  0x1d   :  { %1509 = vmatpush3.bf16.msra.mxu0 %v1623_v36  ;;  %v1668_v16 = vld [vmem:[%s2130_s0 + $0x20] ss:$56 sps:$4 sm:$0xff]   ;;  %v1670_v18 = vld [vmem:[%s2130_s0 + $0x24] ss:$56 sps:$4 sm:$0xff]   ;;  %v1675_v23 = vld [vmem:[%s2129_s1 + $0x1f0] sm:$0xff]  }
  0x1e   :  { %1510 = vmatprep.subr.bf16.mxu0 %v1626_v39  ;;  %v1682_v27 = vld [vmem:[%s2130_s0 + $0x1c] ss:$56 sps:$4 sm:$0xff]   ;;  %v1680_v31 = vld [vmem:[%s2130_s0 + $0x18] ss:$56 sps:$4 sm:$0xff]   ;;  %v1685_v32 = vld [vmem:[%s2129_s1 + $0x280] sm:$0xff]  }
  0x1f   :  { %1467 = vmatpush3.bf16.msra.mxu1 %v1606_v24  ;;  %v1676_v24 = vld [vmem:[%s2129_s1 + $0x1b0] sm:$0xff]   ;;  %v1679_v28 = vld [vmem:[%s2129_s1 + $0x1b8] sm:$0xff]   ;;  %v1688_v35 = vld [vmem:[%s2129_s1 + $0x288] sm:$0xff]  }
  0x20   :  { %1474 = vmatprep.subr.bf16.mxu1 %v1612_v25  ;;  %v1677_v25 = vld [vmem:[%s2129_s1 + $0x310] sm:$0xff]   ;;  %v1689_v36 = vld [vmem:[%s2129_s1 + $0x328] sm:$0xff]   ;;  %v1697_v44 = vld [vmem:[%s2129_s1 + $0x2a0] sm:$0xff]  }
  0x21   :  { %1511 = vmatpush3.bf16.msra.mxu0 %v1627_v40  ;;  %v1692_v39 = vld [vmem:[%s2129_s1 + $0x330] sm:$0xff]   ;;  %v1693_v40 = vld [vmem:[%s2129_s1 + $0x2d8] sm:$0xff]  }
  0x22   :  { %1002 = vmatmul.mubr.bf16.vlgmr.msra.gmra.mrb[0].mxu1 %v1608_v26  ;;  %1540 = vmatprep.subr.bf16.mxu0 %v1633_v45  ;;  %v1678_v26 = vld [vmem:[%s2129_s1 + $0x1f8] sm:$0xff]   ;;  %v1698_v45 = vld [vmem:[%s2129_s1 + $0x340] sm:$0xff]  }
  0x23   :  { %1475 = vmatpush3.bf16.msra.mxu1 %v1613_v29  ;;  %1042 = vmatprep.mubr.bf16.mxu1 %v1648_v59  ;;  %v1683_v29 = vld [vmem:[%s2129_s1 + $0x318] sm:$0xff]  }
  0x24   :  { %1476 = vmatprep.subr.bf16.mxu1 %v1616_v30  ;;  %1084 = vmatmul.mubr.bf16.vlgmr.msra.gmra.mrb[0].mxu0 %v1630_v43  ;;  %v1684_v30 = vld [vmem:[%s2129_s1 + $0x2c0] sm:$0xff]  }
  0x25   :  { %1541 = vmatpush3.bf16.msra.mxu0 %v1634_v46  ;;  %1165 = vmatprep.mubr.bf16.mxu0 %v1670_v18  ;;  %v1696_v43 = vld [vmem:[%s2129_s1 + $0x2e0] sm:$0xff]   ;;  %v1699_v46 = vld [vmem:[%s2129_s1 + $0x2e8] sm:$0xff]  }
  0x26   :  { %1542 = vmatprep.subr.bf16.mxu0 %v1637_v49  ;;  %v1709_v49 = vld [vmem:[%s2130_s0 + $0x2c] ss:$56 sps:$4 sm:$0xff]  }
  0x27   :  { %1477 = vmatpush3.bf16.msra.mxu1 %v1617_v33  ;;  %v1686_v33 = vld [vmem:[%s2129_s1 + $0x320] sm:$0xff]  }
  0x28   :  { %1478 = vmatprep.subr.bf16.mxu1 %v1620_v34  ;;  %v1687_v34 = vld [vmem:[%s2129_s1 + $0x2c8] sm:$0xff]  }
  0x29   :  { %1543 = vmatpush3.bf16.msra.mxu0 %v1638_v50  ;;  %v1702_v50 = vld [vmem:[%s2129_s1 + $0x2f0] sm:$0xff]  }
  0x2a   :  { %1544 = vmatprep.subr.bf16.mxu0 %v1641_v53  ;;  %v1704_v53 = vld [vmem:[%s2129_s1 + $0x350] sm:$0xff]  }
  0x2b   :  { %1479 = vmatpush3.bf16.msra.mxu1 %v1621_v37  ;;  %v1690_v37 = vld [vmem:[%s2129_s1 + $0x2d0] sm:$0xff]  }
  0x2c   :  { %1480 = vmatprep.subr.bf16.mxu1 %v1624_v38  ;;  %v1691_v38 = vld [vmem:[%s2129_s1 + $0x290] sm:$0xff]  }
  0x2d   :  { %1545 = vmatpush3.bf16.msra.mxu0 %v1642_v54  ;;  %v1705_v54 = vld [vmem:[%s2129_s1 + $0x2f8] sm:$0xff]  }
  0x2e   :  { %1546 = vmatprep.subr.bf16.mxu0 %v1645_v57  ;;  %v1707_v57 = vld [vmem:[%s2130_s0 + $0x28] ss:$56 sps:$4 sm:$0xff]  }
  0x2f   :  { %1481 = vmatpush3.bf16.msra.mxu1 %v1625_v41  ;;  %v1694_v41 = vld [vmem:[%s2129_s1 + $0x298] sm:$0xff]  }
  0x30   :  { %1482 = vmatprep.subr.bf16.mxu1 %v1628_v42  ;;  %v1695_v42 = vld [vmem:[%s2129_s1 + $0x338] sm:$0xff]  }
  0x31   :  { %1547 = vmatpush3.bf16.msra.mxu0 %v1649_v60 }
  0x32   :  { %1548 = vmatprep.subr.bf16.mxu0 %v1652_v0 }
  0x33   :  { %1483 = vmatpush3.bf16.msra.mxu1 %v1629_v47  ;;  %v1700_v47 = vld [vmem:[%s2129_s1 + $0x2a8] sm:$0xff]  }
  0x34   :  { %1484 = vmatprep.subr.bf16.mxu1 %v1635_v48  ;;  %v1701_v48 = vld [vmem:[%s2129_s1 + $0x348] sm:$0xff]  }
  0x35   :  { %1549 = vmatpush3.bf16.msra.mxu0 %v1653_v1 }
  0x36   :  { %1550 = vmatprep.subr.bf16.mxu0 %v1656_v4 }
  0x37   :  { %1485 = vmatpush3.bf16.msra.mxu1 %v1636_v51  ;;  %v1711_v51 = vld [vmem:[%s2130_s0 + $0x34] ss:$56 sps:$4 sm:$0xff]  }
  0x38   :  { %1486 = vmatprep.subr.bf16.mxu1 %v1639_v52  ;;  %v1703_v52 = vld [vmem:[%s2129_s1 + $0x2b0] sm:$0xff]  }
  0x39   :  { %1551 = vmatpush3.bf16.msra.mxu0 %v1657_v5 }
  0x3a   :  { %1552 = vmatprep.subr.bf16.mxu0 %v1660_v8 }
  0x3b   :  { %1487 = vmatpush3.bf16.msra.mxu1 %v1640_v55  ;;  %v1706_v55 = vld [vmem:[%s2129_s1 + $0x2b8] sm:$0xff]  }
  0x3c   :  { %1488 = vmatprep.subr.bf16.mxu1 %v1643_v56  ;;  %v1710_v56 = vld [vmem:[%s2129_s1 + $0x358] sm:$0xff]  }
  0x3d   :  { %1553 = vmatpush3.bf16.msra.mxu0 %v1661_v9 }
  0x3e   :  { %1554 = vmatprep.subr.bf16.mxu0 %v1664_v12 }
  0x3f   :  { %1489 = vmatpush3.bf16.msra.mxu1 %v1644_v58  ;;  %v1713_v58 = vld [vmem:[%s2130_s0 + $0x30] ss:$56 sps:$4 sm:$0xff]  }
  0x40   :  { %1518 = vmatprep.subr.bf16.mxu1 %v1650_v62 }
  0x41   :  { %1555 = vmatpush3.bf16.msra.mxu0 %v1665_v13 }
  0x42   :  { %1043 = vmatmul.mubr.bf16.vlgmr.msra.gmra.mrb[4].mxu1 %v1646_v61  ;;  %1215 = vmatprep.subr.bf16.mxu0 %v1716_v17 }
  0x43   :  { %1519 = vmatpush3.bf16.msra.mxu1 %v1651_v63  ;;  %1124 = vmatprep.mubr.bf16.mxu1 %v1682_v27 }
  0x44   :  { %1520 = vmatprep.subr.bf16.mxu1 %v1654_v2  ;;  %1166 = vmatmul.mubr.bf16.vlgmr.msra.gmra.mrb[4].mxu0 %v1668_v16 }
  0x45   :  { %1216 = vmatpush1.bf16.msra.mxu0 %v1671_v19  ;;  %1442 = vmatprep.mubr.msk.bf16.mxu0 %vm965_vm0, %v1711_v51 }
  0x46   :  { %1217 = vmatprep.subr.bf16.mxu0 %v1716_v17 }
  0x47   :  { %1521 = vmatpush3.bf16.msra.mxu1 %v1655_v3 }
  0x48   :  { %1522 = vmatprep.subr.bf16.mxu1 %v1658_v6 }
  0x49   :  { %1218 = vmatpush1.bf16.msra.mxu0 %v1674_v22 }
  0x4a   :  { %1219 = vmatprep.subr.bf16.mxu0 %v1716_v17 }
  0x4b   :  { %1523 = vmatpush3.bf16.msra.mxu1 %v1659_v7 }
  0x4c   :  { %1524 = vmatprep.subr.bf16.mxu1 %v1662_v10 }
  0x4d   :  { %1220 = vmatpush1.bf16.msra.mxu0 %v1677_v25 }
  0x4e   :  { %1221 = vmatprep.subr.bf16.mxu0 %v1716_v17 }
  0x4f   :  { %1525 = vmatpush3.bf16.msra.mxu1 %v1663_v11 }
  0x50   :  { %1526 = vmatprep.subr.bf16.mxu1 %v1666_v14 }
  0x51   :  { %1222 = vmatpush1.bf16.msra.mxu0 %v1683_v29 }
  0x52   :  { %1223 = vmatprep.subr.bf16.mxu0 %v1716_v17 }
  0x53   :  { %1527 = vmatpush3.bf16.msra.mxu1 %v1667_v15 }
  0x54   :  { %1528 = vmatprep.subr.bf16.mxu1 %v1672_v20 }
  0x55   :  { %1224 = vmatpush1.bf16.msra.mxu0 %v1686_v33 }
  0x56   :  { %1225 = vmatprep.subr.bf16.mxu0 %v1716_v17 }
  0x57   :  { %1529 = vmatpush3.bf16.msra.mxu1 %v1673_v21 }
  0x58   :  { %1530 = vmatprep.subr.bf16.mxu1 %v1675_v23 }
  0x59   :  { %1226 = vmatpush1.bf16.msra.mxu0 %v1689_v36 }
  0x5a   :  { %1227 = vmatprep.subr.bf16.mxu0 %v1716_v17 }
  0x5b   :  { %1531 = vmatpush3.bf16.msra.mxu1 %v1676_v24 }
  0x5c   :  { %1532 = vmatprep.subr.bf16.mxu1 %v1678_v26 }
  0x5d   :  { %1228 = vmatpush1.bf16.msra.mxu0 %v1692_v39 }
  0x5e   :  { %1229 = vmatprep.subr.bf16.mxu0 %v1716_v17 }
  0x5f   :  { %1533 = vmatpush3.bf16.msra.mxu1 %v1679_v28 }
  0x60   :  { %1562 = vmatprep.subr.bf16.mxu1 %v1684_v30 }
  0x61   :  { %1230 = vmatpush1.bf16.msra.mxu0 %v1695_v42 }
  0x62   :  { %1125 = vmatmul.mubr.bf16.vlgmr.msra.gmra.mrb[8].mxu1 %v1680_v31  ;;  %1231 = vmatprep.subr.bf16.mxu0 %v1716_v17 }
  0x63   :  { %1563 = vmatpush3.bf16.msra.mxu1 %v1685_v32  ;;  %1206 = vmatprep.mubr.bf16.mxu1 %v1709_v49 }
  0x64   :  { %1564 = vmatprep.subr.bf16.mxu1 %v1687_v34 }
  0x65   :  { %1232 = vmatpush1.bf16.msra.mxu0 %v1698_v45 }
  0x66   :  { %1233 = vmatprep.subr.bf16.mxu0 %v1716_v17 }
  0x67   :  { %1565 = vmatpush3.bf16.msra.mxu1 %v1688_v35 }
  0x68   :  { %1566 = vmatprep.subr.bf16.mxu1 %v1690_v37 }
  0x69   :  { %1234 = vmatpush1.bf16.msra.mxu0 %v1701_v48 }
  0x6a   :  { %1235 = vmatprep.subr.bf16.mxu0 %v1716_v17 }
  0x6b   :  { %1567 = vmatpush3.bf16.msra.mxu1 %v1691_v38 }
  0x6c   :  { %1568 = vmatprep.subr.bf16.mxu1 %v1693_v40 }
  0x6d   :  { %1236 = vmatpush1.bf16.msra.mxu0 %v1704_v53 }
  0x6e   :  { %1237 = vmatprep.subr.bf16.mxu0 %v1716_v17 }
  0x6f   :  { %1569 = vmatpush3.bf16.msra.mxu1 %v1694_v41 }
  0x70   :  { %1570 = vmatprep.subr.bf16.mxu1 %v1696_v43 }
  0x71   :  { %1238 = vmatpush1.bf16.msra.mxu0 %v1710_v56 }
  0x73   :  { %1571 = vmatpush3.bf16.msra.mxu1 %v1697_v44 }
  0x74   :  { %1572 = vmatprep.subr.bf16.mxu1 %v1699_v46  ;;  %1248 = vmatmul.mubr.bf16.vlgmr.msra.gmra.mrb[8].mxu0 %v1713_v58 }
  0x77   :  { %1573 = vmatpush3.bf16.msra.mxu1 %v1700_v47 }
  0x78   :  { %1574 = vmatprep.subr.bf16.mxu1 %v1702_v50 }
  0x7b   :  { %1575 = vmatpush3.bf16.msra.mxu1 %v1703_v52 }
  0x7c   :  { %1576 = vmatprep.subr.bf16.mxu1 %v1705_v54 }
  0x7f   :  { %1577 = vmatpush3.bf16.msra.mxu1 %v1706_v55 }
  0x82   :  { %1207 = vmatmul.mubr.bf16.vlgmr.msra.gmra.mrb[12].mxu1 %v1707_v57 }
  0xf5   :  { %v1468_v59 = vpop.f32.mrb[0].mxu1 }
  0xf6   :  { %v1469_v60 = vpop.f32.mrb[1].mxu1 }
  0xf7   :  { %v1470_v61 = vadd.f32 %v1469_v60, %v1468_v59  ;;  %v1471_v62 = vpop.f32.mrb[2].mxu1  ;;  %v1512_v1 = vpop.f32.mrb[0].mxu0 }
  0xf8   :  { %v1472_v63 = vpop.f32.mrb[3].mxu1  ;;  %v1513_v2 = vpop.f32.mrb[1].mxu0 }
  0xf9   :  { %v1473_v0 = vadd.f32 %v1472_v63, %v1471_v62  ;;  %v1514_v3 = vadd.f32 %v1513_v2, %v1512_v1  ;;  %v1515_v4 = vpop.f32.mrb[2].mxu0 }
  0xfa   :  { %v1516_v5 = vpop.f32.mrb[3].mxu0 }
  0xfb   :  { %v1517_v6 = vadd.f32 %v1516_v5, %v1515_v4  ;;  %v1285_v4 = vlaneseq }
  0xfd   :  { %v1286_v5 = vshrl.u32 %v1285_v4, 7 }
 0x115   :  { %v1490_v7 = vpop.f32.mrb[4].mxu1 }
 0x116   :  { %v1491_v8 = vpop.f32.mrb[5].mxu1 }
 0x117   :  { %v1492_v9 = vadd.f32 %v1491_v8, %v1490_v7  ;;  %v1493_v10 = vpop.f32.mrb[6].mxu1  ;;  %v1556_v17 = vpop.f32.mrb[4].mxu0  ;;  %v1287_v7 = vsub.s32 0, %v1286_v5 }
 0x118   :  { %v1494_v11 = vpop.f32.mrb[7].mxu1  ;;  %v1557_v18 = vpop.f32.mrb[5].mxu0 }
 0x119   :  { %v1045_v12 = vadd.f32 %v1492_v9, %v1470_v61  ;;  %v1495_v13 = vadd.f32 %v1494_v11, %v1493_v10  ;;  %v1558_v19 = vadd.f32 %v1557_v18, %v1556_v17  ;;  %v1559_v20 = vpop.f32.mrb[6].mxu0  ;;  %v1257_v10 = vld [vmem:[%s2132_s3] sm:$0x1] }
 0x11a   :  { %v1560_v21 = vpop.f32.mrb[7].mxu0 }
 0x11b   :  { %v1048_v14 = vadd.f32 %v1495_v13, %v1473_v0  ;;  %v1086_v15 = vadd.f32 %v1514_v3, %v1045_v12  ;;  %v1561_v22 = vadd.f32 %v1560_v21, %v1559_v20 }
 0x11d   :  { %v1089_v16 = vadd.f32 %v1517_v6, %v1048_v14  ;;  %v1256_v6 = vld [vmem:[%s2131_s2] sm:$0x1] }
 0x135   :  { %v1534_v23 = vpop.f32.mrb[8].mxu1 }
 0x136   :  { %v1535_v24 = vpop.f32.mrb[9].mxu1 }
 0x137   :  { %v1536_v25 = vadd.f32 %v1535_v24, %v1534_v23  ;;  %v1537_v26 = vpop.f32.mrb[10].mxu1 }
 0x138   :  { %v1538_v27 = vpop.f32.mrb[11].mxu1 }
 0x139   :  { %v1127_v28 = vadd.f32 %v1536_v25, %v1086_v15  ;;  %v1539_v29 = vadd.f32 %v1538_v27, %v1537_v26 }
 0x13b   :  { %v1130_v30 = vadd.f32 %v1539_v29, %v1089_v16  ;;  %v1168_v31 = vadd.f32 %v1558_v19, %v1127_v28 }
 0x13d   :  { %v1171_v32 = vadd.f32 %v1561_v22, %v1130_v30 }
 0x147   :  { %v1249_v34 = vpop.f32.mrb[8].mxu0 }
 0x148   :  { %v1251_v36 = vpop.f32.mrb[9].mxu0 }
 0x149   :  { %v1252_v39 = vpop.f32.mrb[10].mxu0 }
 0x14a   :  { %v1254_v41 = vpop.f32.mrb[11].mxu0 }
 0x155   :  { %v1578_v33 = vpop.f32.mrb[12].mxu1 }
 0x156   :  { %v1579_v35 = vpop.f32.mrb[13].mxu1 }
 0x157   :  { %v1580_v37 = vadd.f32 %v1579_v35, %v1578_v33  ;;  %v1581_v38 = vpop.f32.mrb[14].mxu1 }
 0x158   :  { %v1582_v40 = vpop.f32.mrb[15].mxu1 }
 0x159   :  { %v1209_v42 = vadd.f32 %v1580_v37, %v1168_v31  ;;  %v1583_v43 = vadd.f32 %v1582_v40, %v1581_v38 }
 0x15b   :  { %v1250_v44 = vadd.f32 %v1249_v34, %v1209_v42  ;;  %v1212_v45 = vadd.f32 %v1583_v43, %v1171_v32 }
 0x15d   :  { %v1253_v46 = vadd.f32 %v1252_v39, %v1212_v45  ;;  %v1267_v47 = vmul.f32 %v1250_v44, %v1250_v44 }
 0x15f   :  { %v1258_v48 = vadd.f32 %v1253_v46, %v1250_v44  ;;  %v1268_v49 = vmul.f32 %v1253_v46, %v1253_v46 }
 0x161   :  { %v1259_v50 = vrot.slane %v1258_v48, 4  ;;  %v1269_v51 = vadd.f32 %v1268_v49, %v1267_v47 }
 0x163   :  { %v1260_v52 = vadd.f32 %v1259_v50, %v1258_v48  ;;  %v1270_v53 = vrot.slane %v1269_v51, 4 }
 0x165   :  { %v1261_v54 = vrot.slane %v1260_v52, 2  ;;  %v1271_v55 = vadd.f32 %v1270_v53, %v1269_v51 }
 0x167   :  { %v1262_v56 = vadd.f32 %v1261_v54, %v1260_v52  ;;  %v1272_v57 = vrot.slane %v1271_v55, 2 }
 0x169   :  { %v1263_v58 = vrot.slane %v1262_v56, 1  ;;  %v1273_v59 = vadd.f32 %v1272_v57, %v1271_v55 }
 0x16b   :  { %v1264_v60 = vadd.f32 %v1263_v58, %v1262_v56  ;;  %v1274_v61 = vrot.slane %v1273_v59, 1 }
 0x16d   :  { %v1266_v62 = vmul.f32 0.0625, %v1264_v60  ;;  %v1275_v63 = vadd.f32 %v1274_v61, %v1273_v59 }
 0x16f   :  { %v1276_v0 = vmul.f32 0.0625, %v1275_v63  ;;  %v1277_v1 = vmul.f32 %v1266_v62, %v1266_v62 }
 0x171   :  { %v1278_v2 = vsub.f32 %v1276_v0, %v1277_v1 }
 0x173   :  { %v1279_v3 = vadd.f32 1e-05, %v1278_v2 }
 0x175   :  { %1714 = vrsqrt.f32 %v1279_v3 }
 0x17f   :  { %v1715_v8 = vpop.eup %1714 }
 0x180   :  { %v1281_v9 = vmul.f32 %v1715_v8, %v1256_v6 }
 0x182   :  { %v1282_v11 = vmul.f32 %v1281_v9, %v1266_v62  ;;  %v1288_v12 = vrot.slane %v1281_v9, %v1287_v7 }
 0x184   :  { %v1283_v13 = vsub.f32 %v1257_v10, %v1282_v11  ;;  %v1290_v14 = vmul.f32 %v1288_v12, %v1250_v44  ;;  %v1291_v15 = vmul.f32 %v1288_v12, %v1253_v46 }
 0x186   :  { %v1296_v16 = vrot.slane %v1283_v13, %v1287_v7 }
 0x188   :  { %v1298_v17 = vadd.f32 %v1296_v16, %v1290_v14  ;;  %v1299_v18 = vadd.f32 %v1296_v16, %v1291_v15 }
 0x18a   :  { %vm1300_vm1 = vcmp.gt.f32.partialorder %v1298_v17, 0.0  ;;  %vm1301_vm2 = vcmp.gt.f32.partialorder %v1299_v18, 0.0  ;;  %v1302_v19 = vmul.f32 0.2, %v1298_v17  ;;  %v1303_v20 = vmul.f32 0.2, %v1299_v18 }
 0x18c   :  { %v1304_v21 = vsel %vm1300_vm1, %v1298_v17, %v1302_v19  ;;  %v1305_v22 = vsel %vm1301_vm2, %v1299_v18, %v1303_v20 }
 0x18d   :  { %v1450_v23 = vpack.c.bf16 %v1305_v22, %v1304_v21 }
 0x18f   :  { %1451 = vst [vmem:[%s2133_s4] sm:$0xff] %v1450_v23  }

// kernel: discriminator_forward.7
= control target key start
LH: loop header
LB: loop body
LE: loop exit
PB: predicated region body
PF: predicated region fallthrough
CT: control target
= control target key end

     0   :  { %v2802_v7 = vmov 1966171168   ;;  %v169_v9 = vlaneseq  ;;  %vm1028_vm0 = vcmask 1041408   ;;  %vm2177_vm7 = vcmask 1024   ;;  %s3658_s1 = inlined_call_operand.vmem [shape: bf16[1024,256], index: 1, kind: input, shape index: {}]   ;;  %s3659_s0 = inlined_call_operand.vmem [shape: bf16[2,1024], index: 0, kind: input, shape index: {}]   ;;  %s3660_s4 = inlined_call_operand.vmem [shape: bf16[256,512], index: 4, kind: input, shape index: {}]   ;;  %s3661_s2 = inlined_call_operand.vmem [shape: f32[1,256], index: 2, kind: input, shape index: {}]   ;;  %s3662_s3 = inlined_call_operand.vmem [shape: f32[1,256], index: 3, kind: input, shape index: {}]   ;;  %s3663_s7 = inlined_call_operand.vmem [shape: bf16[512,1], index: 7, kind: input, shape index: {}]   ;;  %s3664_s5 = inlined_call_operand.vmem [shape: f32[1,512], index: 5, kind: input, shape index: {}]   ;;  %s3665_s6 = inlined_call_operand.vmem [shape: f32[1,512], index: 6, kind: input, shape index: {}]   ;;  %s3666_s8 = inlined_call_operand.<no memory space> [shape: f32[1,1], index: 8, kind: input, shape index: {}]   ;;  %s3667_s9 = inlined_call_operand.vmem [shape: f32[2,1], index: 9, kind: output, shape index: {}]  }
   0x1   :  { %v2465_v0 = vld [vmem:[%s3658_s1 + $0x4] ss:$8 sps:$4 sm:$0xff]   ;;  %v2467_v1 = vld [vmem:[%s3658_s1] ss:$8 sps:$4 sm:$0xff]   ;;  %v2468_v2 = vld [vmem:[%s3658_s1 + $0x14] ss:$8 sps:$4 sm:$0xff]   ;;  %v167_v8 = vunpack.c.l.s4 %v2802_v7 }
   0x2   :  { %862 = vmatprep.subr.bf16.mxu0 %v2465_v0  ;;  %v2470_v3 = vld [vmem:[%s3658_s1 + $0x10] ss:$8 sps:$4 sm:$0xff]   ;;  %v2471_v4 = vld [vmem:[%s3658_s1 + $0x24] ss:$8 sps:$4 sm:$0xff]   ;;  %v2473_v5 = vld [vmem:[%s3658_s1 + $0x20] ss:$8 sps:$4 sm:$0xff]  }
   0x3   :  { %863 = vmatpush1.bf16.msra.mxu0 %v2467_v1  ;;  %v2474_v6 = vld [vmem:[%s3658_s1 + $0x34] ss:$8 sps:$4 sm:$0xff]   ;;  %v2476_v10 = vld [vmem:[%s3658_s1 + $0x30] ss:$8 sps:$4 sm:$0xff]   ;;  %v2477_v11 = vld [vmem:[%s3658_s1 + $0x44] ss:$8 sps:$4 sm:$0xff]   ;;  %v168_v12 = vunpack.c.0.s8 %v167_v8 }
   0x4   :  { %864 = vmatprep.subr.bf16.mxu0 %v2468_v2  ;;  %v2880_v13 = vshrl.u32 %v169_v9, 7  ;;  %v2479_v14 = vld [vmem:[%s3658_s1 + $0x40] ss:$8 sps:$4 sm:$0xff]   ;;  %v2480_v15 = vld [vmem:[%s3658_s1 + $0x54] ss:$8 sps:$4 sm:$0xff]  }
   0x5   :  { %v2482_v17 = vld [vmem:[%s3658_s1 + $0x50] ss:$8 sps:$4 sm:$0xff]   ;;  %v2483_v18 = vld [vmem:[%s3658_s1 + $0x64] ss:$8 sps:$4 sm:$0xff]   ;;  %v2485_v21 = vld [vmem:[%s3658_s1 + $0x60] ss:$8 sps:$4 sm:$0xff]  }
   0x6   :  { %v2889_v16 = vsub.s32 %v168_v12, %v2880_v13  ;;  %v2900_v19 = vld [vmem:[%s3659_s0] sm:$0xff]  ;;  %v2486_v22 = vld [vmem:[%s3658_s1 + $0x74] ss:$8 sps:$4 sm:$0xff]   ;;  %v2488_v25 = vld [vmem:[%s3658_s1 + $0x70] ss:$8 sps:$4 sm:$0xff]  }
   0x7   :  { %865 = vmatpush1.bf16.msra.mxu0 %v2470_v3  ;;  %v2489_v26 = vld [vmem:[%s3658_s1 + $0x84] ss:$8 sps:$4 sm:$0xff]   ;;  %v2491_v27 = vld [vmem:[%s3658_s1 + $0x80] ss:$8 sps:$4 sm:$0xff]   ;;  %v2492_v28 = vld [vmem:[%s3658_s1 + $0x94] ss:$8 sps:$4 sm:$0xff]   ;;  %v165_v7 = vcombine.high %v2900_v19, %v2900_v19 }
   0x8   :  { %866 = vmatprep.subr.bf16.mxu0 %v2471_v4  ;;  %v172_v20 = vrot.slane %v2900_v19, %v2889_v16  ;;  %v2494_v29 = vld [vmem:[%s3658_s1 + $0x90] ss:$8 sps:$4 sm:$0xff]   ;;  %v2495_v30 = vld [vmem:[%s3658_s1 + $0xa4] ss:$8 sps:$4 sm:$0xff]   ;;  %v2497_v31 = vld [vmem:[%s3658_s1 + $0xa0] ss:$8 sps:$4 sm:$0xff]  }
   0x9   :  { %v2498_v32 = vld [vmem:[%s3658_s1 + $0xb4] ss:$8 sps:$4 sm:$0xff]   ;;  %v2500_v33 = vld [vmem:[%s3658_s1 + $0xb0] ss:$8 sps:$4 sm:$0xff]   ;;  %v2501_v34 = vld [vmem:[%s3658_s1 + $0xc4] ss:$8 sps:$4 sm:$0xff]  }
   0xa   :  { %v180_v23 = vcombine.high %v172_v20, %v172_v20  ;;  %v2503_v35 = vld [vmem:[%s3658_s1 + $0xc0] ss:$8 sps:$4 sm:$0xff]   ;;  %v2504_v36 = vld [vmem:[%s3658_s1 + $0xd4] ss:$8 sps:$4 sm:$0xff]   ;;  %v2506_v37 = vld [vmem:[%s3658_s1 + $0xd0] ss:$8 sps:$4 sm:$0xff]   ;;  %v2966_v43 = vrot.slane %v172_v20, %v2889_v16 }
   0xb   :  { %867 = vmatpush1.bf16.msra.mxu0 %v2473_v5  ;;  %v2507_v38 = vld [vmem:[%s3658_s1 + $0xe4] ss:$8 sps:$4 sm:$0xff]   ;;  %v2509_v39 = vld [vmem:[%s3658_s1 + $0xe0] ss:$8 sps:$4 sm:$0xff]   ;;  %v2510_v40 = vld [vmem:[%s3658_s1 + $0xf4] ss:$8 sps:$4 sm:$0xff]  }
   0xc   :  { %868 = vmatprep.subr.bf16.mxu0 %v2474_v6  ;;  %v202_v24 = vrot.slane %v180_v23, %v2889_v16  ;;  %v2512_v41 = vld [vmem:[%s3658_s1 + $0xf0] ss:$8 sps:$4 sm:$0xff]   ;;  %v2516_v42 = vld [vmem:[%s3658_s1 + $0x104] ss:$8 sps:$4 sm:$0xff]   ;;  %v2514_v45 = vld [vmem:[%s3658_s1 + $0x100] ss:$8 sps:$4 sm:$0xff]  }
   0xd   :  { %v2519_v46 = vld [vmem:[%s3658_s1 + $0x114] ss:$8 sps:$4 sm:$0xff]   ;;  %v2517_v47 = vld [vmem:[%s3658_s1 + $0x110] ss:$8 sps:$4 sm:$0xff]   ;;  %v2522_v48 = vld [vmem:[%s3658_s1 + $0x124] ss:$8 sps:$4 sm:$0xff]  }
   0xe   :  { %894 = vmatprep.mubr.bf16.mxu0 %v202_v24  ;;  %v212_v44 = vcombine.high %v202_v24, %v202_v24  ;;  %v2520_v49 = vld [vmem:[%s3658_s1 + $0x120] ss:$8 sps:$4 sm:$0xff]   ;;  %v2525_v50 = vld [vmem:[%s3658_s1 + $0x134] ss:$8 sps:$4 sm:$0xff]   ;;  %v2523_v51 = vld [vmem:[%s3658_s1 + $0x130] ss:$8 sps:$4 sm:$0xff]  }
   0xf   :  { %869 = vmatpush1.bf16.msra.mxu0 %v2476_v10  ;;  %v2528_v52 = vld [vmem:[%s3658_s1 + $0x144] ss:$8 sps:$4 sm:$0xff]   ;;  %v2526_v53 = vld [vmem:[%s3658_s1 + $0x140] ss:$8 sps:$4 sm:$0xff]   ;;  %v2531_v54 = vld [vmem:[%s3658_s1 + $0x154] ss:$8 sps:$4 sm:$0xff]  }
  0x10   :  { %870 = vmatprep.subr.bf16.mxu0 %v2477_v11  ;;  %v2529_v55 = vld [vmem:[%s3658_s1 + $0x150] ss:$8 sps:$4 sm:$0xff]   ;;  %v2534_v56 = vld [vmem:[%s3658_s1 + $0x164] ss:$8 sps:$4 sm:$0xff]   ;;  %v2532_v57 = vld [vmem:[%s3658_s1 + $0x160] ss:$8 sps:$4 sm:$0xff]   ;;  %v3059_v11 = vrot.slane %v165_v7, %v2889_v16 }
  0x11   :  { %v2537_v58 = vld [vmem:[%s3658_s1 + $0x174] ss:$8 sps:$4 sm:$0xff]   ;;  %v2535_v59 = vld [vmem:[%s3658_s1 + $0x170] ss:$8 sps:$4 sm:$0xff]   ;;  %v2540_v60 = vld [vmem:[%s3658_s1 + $0x184] ss:$8 sps:$4 sm:$0xff]  }
  0x12   :  { %v2538_v61 = vld [vmem:[%s3658_s1 + $0x180] ss:$8 sps:$4 sm:$0xff]   ;;  %v2543_v62 = vld [vmem:[%s3658_s1 + $0x194] ss:$8 sps:$4 sm:$0xff]   ;;  %v2541_v63 = vld [vmem:[%s3658_s1 + $0x190] ss:$8 sps:$4 sm:$0xff]  }
  0x13   :  { %871 = vmatpush1.bf16.msra.mxu0 %v2479_v14  ;;  %v2546_v0 = vld [vmem:[%s3658_s1 + $0x1a4] ss:$8 sps:$4 sm:$0xff]   ;;  %v2544_v1 = vld [vmem:[%s3658_s1 + $0x1a0] ss:$8 sps:$4 sm:$0xff]   ;;  %v2549_v2 = vld [vmem:[%s3658_s1 + $0x1b4] ss:$8 sps:$4 sm:$0xff]  }
  0x14   :  { %872 = vmatprep.subr.bf16.mxu0 %v2480_v15  ;;  %v2547_v3 = vld [vmem:[%s3658_s1 + $0x1b0] ss:$8 sps:$4 sm:$0xff]   ;;  %v2552_v4 = vld [vmem:[%s3658_s1 + $0x1c4] ss:$8 sps:$4 sm:$0xff]   ;;  %v2550_v5 = vld [vmem:[%s3658_s1 + $0x1c0] ss:$8 sps:$4 sm:$0xff]   ;;  %v181_v15 = vcombine.high %v3059_v11, %v3059_v11 }
  0x15   :  { %v2555_v6 = vld [vmem:[%s3658_s1 + $0x1d4] ss:$8 sps:$4 sm:$0xff]   ;;  %v2553_v8 = vld [vmem:[%s3658_s1 + $0x1d0] ss:$8 sps:$4 sm:$0xff]   ;;  %v2558_v9 = vld [vmem:[%s3658_s1 + $0x1e4] ss:$8 sps:$4 sm:$0xff]  }
  0x16   :  { %v2556_v10 = vld [vmem:[%s3658_s1 + $0x1e0] ss:$8 sps:$4 sm:$0xff]   ;;  %v2561_v12 = vld [vmem:[%s3658_s1 + $0x1f4] ss:$8 sps:$4 sm:$0xff]   ;;  %v2559_v14 = vld [vmem:[%s3658_s1 + $0x1f0] ss:$8 sps:$4 sm:$0xff]   ;;  %v3078_v20 = vrot.slane %v181_v15, %v2889_v16 }
  0x17   :  { %873 = vmatpush1.bf16.msra.mxu0 %v2482_v17  ;;  %v2564_v17 = vld [vmem:[%s3658_s1 + $0x204] ss:$8 sps:$4 sm:$0xff]   ;;  %v2562_v19 = vld [vmem:[%s3658_s1 + $0x200] ss:$8 sps:$4 sm:$0xff]  }
  0x18   :  { %874 = vmatprep.subr.bf16.mxu0 %v2483_v18  ;;  %v210_v18 = vcombine.high %v2966_v43, %v2966_v43  ;;  %v2570_v23 = vld [vmem:[%s3658_s1 + $0x224] ss:$8 sps:$4 sm:$0xff]   ;;  %v2634_v7 = vld [vmem:[%s3658_s1 + $0x380] ss:$8 sps:$4 sm:$0xff]  }
  0x19   :  { %v2658_v24 = vld [vmem:[%s3660_s4 + $0x4] ss:$16 sps:$4 sm:$0xff]  }
  0x1a   :  { %1530 = vmatprep.subr.bf16.mxu1 %v2658_v24  ;;  %v2648_v15 = vld [vmem:[%s3658_s1 + $0x3c4] ss:$8 sps:$4 sm:$0xff]  }
  0x1b   :  { %875 = vmatpush1.bf16.msra.mxu0 %v2485_v21  ;;  %v2567_v21 = vld [vmem:[%s3658_s1 + $0x214] ss:$8 sps:$4 sm:$0xff]  }
  0x1c   :  { %876 = vmatprep.subr.bf16.mxu0 %v2486_v22  ;;  %v2565_v22 = vld [vmem:[%s3658_s1 + $0x210] ss:$8 sps:$4 sm:$0xff]  }
  0x1f   :  { %877 = vmatpush1.bf16.msra.mxu0 %v2488_v25  ;;  %v2568_v25 = vld [vmem:[%s3658_s1 + $0x220] ss:$8 sps:$4 sm:$0xff]  }
  0x20   :  { %878 = vmatprep.subr.bf16.mxu0 %v2489_v26  ;;  %v2573_v26 = vld [vmem:[%s3658_s1 + $0x234] ss:$8 sps:$4 sm:$0xff]  }
  0x23   :  { %879 = vmatpush1.bf16.msra.mxu0 %v2491_v27  ;;  %v2571_v27 = vld [vmem:[%s3658_s1 + $0x230] ss:$8 sps:$4 sm:$0xff]  }
  0x24   :  { %880 = vmatprep.subr.bf16.mxu0 %v2492_v28  ;;  %v2576_v28 = vld [vmem:[%s3658_s1 + $0x244] ss:$8 sps:$4 sm:$0xff]  }
  0x27   :  { %881 = vmatpush1.bf16.msra.mxu0 %v2494_v29  ;;  %v2574_v29 = vld [vmem:[%s3658_s1 + $0x240] ss:$8 sps:$4 sm:$0xff]  }
  0x28   :  { %882 = vmatprep.subr.bf16.mxu0 %v2495_v30  ;;  %v2579_v30 = vld [vmem:[%s3658_s1 + $0x254] ss:$8 sps:$4 sm:$0xff]  }
  0x2b   :  { %883 = vmatpush1.bf16.msra.mxu0 %v2497_v31  ;;  %v2577_v31 = vld [vmem:[%s3658_s1 + $0x250] ss:$8 sps:$4 sm:$0xff]  }
  0x2c   :  { %884 = vmatprep.subr.bf16.mxu0 %v2498_v32  ;;  %v2582_v32 = vld [vmem:[%s3658_s1 + $0x264] ss:$8 sps:$4 sm:$0xff]  }
  0x2f   :  { %885 = vmatpush1.bf16.msra.mxu0 %v2500_v33  ;;  %v2580_v33 = vld [vmem:[%s3658_s1 + $0x260] ss:$8 sps:$4 sm:$0xff]  }
  0x30   :  { %886 = vmatprep.subr.bf16.mxu0 %v2501_v34  ;;  %v2585_v34 = vld [vmem:[%s3658_s1 + $0x274] ss:$8 sps:$4 sm:$0xff]  }
  0x33   :  { %887 = vmatpush1.bf16.msra.mxu0 %v2503_v35  ;;  %v2583_v35 = vld [vmem:[%s3658_s1 + $0x270] ss:$8 sps:$4 sm:$0xff]  }
  0x34   :  { %888 = vmatprep.subr.bf16.mxu0 %v2504_v36  ;;  %v2588_v36 = vld [vmem:[%s3658_s1 + $0x284] ss:$8 sps:$4 sm:$0xff]  }
  0x37   :  { %889 = vmatpush1.bf16.msra.mxu0 %v2506_v37  ;;  %v2586_v37 = vld [vmem:[%s3658_s1 + $0x280] ss:$8 sps:$4 sm:$0xff]  }
  0x38   :  { %890 = vmatprep.subr.bf16.mxu0 %v2507_v38  ;;  %v2591_v38 = vld [vmem:[%s3658_s1 + $0x294] ss:$8 sps:$4 sm:$0xff]  }
  0x3b   :  { %891 = vmatpush1.bf16.msra.mxu0 %v2509_v39  ;;  %v2589_v39 = vld [vmem:[%s3658_s1 + $0x290] ss:$8 sps:$4 sm:$0xff]  }
  0x3c   :  { %892 = vmatprep.subr.bf16.mxu0 %v2510_v40  ;;  %v2594_v40 = vld [vmem:[%s3658_s1 + $0x2a4] ss:$8 sps:$4 sm:$0xff]  }
  0x3f   :  { %893 = vmatpush1.bf16.msra.mxu0 %v2512_v41  ;;  %v2592_v41 = vld [vmem:[%s3658_s1 + $0x2a0] ss:$8 sps:$4 sm:$0xff]  }
  0x40   :  { %903 = vmatprep.subr.bf16.mxu0 %v2516_v42  ;;  %v2597_v42 = vld [vmem:[%s3658_s1 + $0x2b4] ss:$8 sps:$4 sm:$0xff]  }
  0x42   :  { %895 = vmatmul.mubr.bf16.vlgmr.msra.gmra.mrb[0].mxu0 %v2966_v43  ;;  %v2595_v43 = vld [vmem:[%s3658_s1 + $0x2b0] ss:$8 sps:$4 sm:$0xff]  }
  0x43   :  { %904 = vmatpush1.bf16.msra.mxu0 %v2514_v45  ;;  %935 = vmatprep.mubr.bf16.mxu0 %v212_v44  ;;  %v2600_v44 = vld [vmem:[%s3658_s1 + $0x2c4] ss:$8 sps:$4 sm:$0xff]   ;;  %v2598_v45 = vld [vmem:[%s3658_s1 + $0x2c0] ss:$8 sps:$4 sm:$0xff]  }
  0x44   :  { %905 = vmatprep.subr.bf16.mxu0 %v2519_v46  ;;  %v2603_v46 = vld [vmem:[%s3658_s1 + $0x2d4] ss:$8 sps:$4 sm:$0xff]  }
  0x47   :  { %906 = vmatpush1.bf16.msra.mxu0 %v2517_v47  ;;  %v2601_v47 = vld [vmem:[%s3658_s1 + $0x2d0] ss:$8 sps:$4 sm:$0xff]  }
  0x48   :  { %907 = vmatprep.subr.bf16.mxu0 %v2522_v48  ;;  %v2606_v48 = vld [vmem:[%s3658_s1 + $0x2e4] ss:$8 sps:$4 sm:$0xff]  }
  0x4b   :  { %908 = vmatpush1.bf16.msra.mxu0 %v2520_v49  ;;  %v2604_v49 = vld [vmem:[%s3658_s1 + $0x2e0] ss:$8 sps:$4 sm:$0xff]  }
  0x4c   :  { %909 = vmatprep.subr.bf16.mxu0 %v2525_v50  ;;  %v2609_v50 = vld [vmem:[%s3658_s1 + $0x2f4] ss:$8 sps:$4 sm:$0xff]  }
  0x4f   :  { %910 = vmatpush1.bf16.msra.mxu0 %v2523_v51  ;;  %v2607_v51 = vld [vmem:[%s3658_s1 + $0x2f0] ss:$8 sps:$4 sm:$0xff]  }
  0x50   :  { %911 = vmatprep.subr.bf16.mxu0 %v2528_v52  ;;  %v2612_v52 = vld [vmem:[%s3658_s1 + $0x304] ss:$8 sps:$4 sm:$0xff]  }
  0x53   :  { %912 = vmatpush1.bf16.msra.mxu0 %v2526_v53  ;;  %v3179_v53 = vrot.slane %v3059_v11, %v2889_v16  ;;  %v2640_v11 = vld [vmem:[%s3658_s1 + $0x3a0] ss:$8 sps:$4 sm:$0xff]  }
  0x54   :  { %913 = vmatprep.subr.bf16.mxu0 %v2531_v54  ;;  %v2610_v54 = vld [vmem:[%s3658_s1 + $0x300] ss:$8 sps:$4 sm:$0xff]  }
  0x55   :  { %v211_v24 = vcombine.high %v3179_v53, %v3179_v53 }
  0x57   :  { %914 = vmatpush1.bf16.msra.mxu0 %v2529_v55  ;;  %v213_v55 = vcombine.high %v3078_v20, %v3078_v20 }
  0x58   :  { %915 = vmatprep.subr.bf16.mxu0 %v2534_v56  ;;  %v2615_v56 = vld [vmem:[%s3658_s1 + $0x314] ss:$8 sps:$4 sm:$0xff]  }
  0x5b   :  { %916 = vmatpush1.bf16.msra.mxu0 %v2532_v57  ;;  %v2613_v57 = vld [vmem:[%s3658_s1 + $0x310] ss:$8 sps:$4 sm:$0xff]  }
  0x5c   :  { %917 = vmatprep.subr.bf16.mxu0 %v2537_v58  ;;  %v2618_v58 = vld [vmem:[%s3658_s1 + $0x324] ss:$8 sps:$4 sm:$0xff]  }
  0x5f   :  { %918 = vmatpush1.bf16.msra.mxu0 %v2535_v59  ;;  %v2616_v59 = vld [vmem:[%s3658_s1 + $0x320] ss:$8 sps:$4 sm:$0xff]  }
  0x60   :  { %919 = vmatprep.subr.bf16.mxu0 %v2540_v60  ;;  %v2621_v60 = vld [vmem:[%s3658_s1 + $0x334] ss:$8 sps:$4 sm:$0xff]  }
  0x63   :  { %920 = vmatpush1.bf16.msra.mxu0 %v2538_v61  ;;  %v2619_v61 = vld [vmem:[%s3658_s1 + $0x330] ss:$8 sps:$4 sm:$0xff]  }
  0x64   :  { %921 = vmatprep.subr.bf16.mxu0 %v2543_v62  ;;  %v2624_v62 = vld [vmem:[%s3658_s1 + $0x344] ss:$8 sps:$4 sm:$0xff]  }
  0x67   :  { %922 = vmatpush1.bf16.msra.mxu0 %v2541_v63  ;;  %v2622_v63 = vld [vmem:[%s3658_s1 + $0x340] ss:$8 sps:$4 sm:$0xff]  }
  0x68   :  { %923 = vmatprep.subr.bf16.mxu0 %v2546_v0  ;;  %v2627_v0 = vld [vmem:[%s3658_s1 + $0x354] ss:$8 sps:$4 sm:$0xff]  }
  0x6b   :  { %924 = vmatpush1.bf16.msra.mxu0 %v2544_v1  ;;  %v2625_v1 = vld [vmem:[%s3658_s1 + $0x350] ss:$8 sps:$4 sm:$0xff]  }
  0x6c   :  { %925 = vmatprep.subr.bf16.mxu0 %v2549_v2  ;;  %v2630_v2 = vld [vmem:[%s3658_s1 + $0x364] ss:$8 sps:$4 sm:$0xff]  }
  0x6f   :  { %926 = vmatpush1.bf16.msra.mxu0 %v2547_v3  ;;  %v2628_v3 = vld [vmem:[%s3658_s1 + $0x360] ss:$8 sps:$4 sm:$0xff]  }
  0x70   :  { %927 = vmatprep.subr.bf16.mxu0 %v2552_v4  ;;  %v2633_v4 = vld [vmem:[%s3658_s1 + $0x374] ss:$8 sps:$4 sm:$0xff]  }
  0x73   :  { %928 = vmatpush1.bf16.msra.mxu0 %v2550_v5  ;;  %v2631_v5 = vld [vmem:[%s3658_s1 + $0x370] ss:$8 sps:$4 sm:$0xff]  }
  0x74   :  { %929 = vmatprep.subr.bf16.mxu0 %v2555_v6  ;;  %v2636_v6 = vld [vmem:[%s3658_s1 + $0x384] ss:$8 sps:$4 sm:$0xff]  }
  0x77   :  { %930 = vmatpush1.bf16.msra.mxu0 %v2553_v8  ;;  %v2639_v8 = vld [vmem:[%s3658_s1 + $0x394] ss:$8 sps:$4 sm:$0xff]  }
  0x78   :  { %931 = vmatprep.subr.bf16.mxu0 %v2558_v9  ;;  %v2637_v9 = vld [vmem:[%s3658_s1 + $0x390] ss:$8 sps:$4 sm:$0xff]  }
  0x7b   :  { %932 = vmatpush1.bf16.msra.mxu0 %v2556_v10  ;;  %v2642_v10 = vld [vmem:[%s3658_s1 + $0x3a4] ss:$8 sps:$4 sm:$0xff]  }
  0x7c   :  { %933 = vmatprep.subr.bf16.mxu0 %v2561_v12  ;;  %v2645_v12 = vld [vmem:[%s3658_s1 + $0x3b4] ss:$8 sps:$4 sm:$0xff]  }
  0x7f   :  { %934 = vmatpush1.bf16.msra.mxu0 %v2559_v14  ;;  %v2643_v14 = vld [vmem:[%s3658_s1 + $0x3b0] ss:$8 sps:$4 sm:$0xff]  }
  0x80   :  { %944 = vmatprep.subr.bf16.mxu0 %v2564_v17  ;;  %v2646_v17 = vld [vmem:[%s3658_s1 + $0x3c0] ss:$8 sps:$4 sm:$0xff]  }
  0x82   :  { %936 = vmatmul.mubr.bf16.vlgmr.msra.gmra.mrb[0].mxu0 %v210_v18  ;;  %v2651_v18 = vld [vmem:[%s3658_s1 + $0x3d4] ss:$8 sps:$4 sm:$0xff]  }
  0x83   :  { %945 = vmatpush1.bf16.msra.mxu0 %v2562_v19  ;;  %976 = vmatprep.mubr.bf16.mxu0 %v3078_v20  ;;  %v2649_v19 = vld [vmem:[%s3658_s1 + $0x3d0] ss:$8 sps:$4 sm:$0xff]   ;;  %v2654_v20 = vld [vmem:[%s3658_s1 + $0x3e4] ss:$8 sps:$4 sm:$0xff]  }
  0x84   :  { %946 = vmatprep.subr.bf16.mxu0 %v2567_v21  ;;  %v2652_v21 = vld [vmem:[%s3658_s1 + $0x3e0] ss:$8 sps:$4 sm:$0xff]  }
  0x87   :  { %947 = vmatpush1.bf16.msra.mxu0 %v2565_v22  ;;  %v2657_v22 = vld [vmem:[%s3658_s1 + $0x3f4] ss:$8 sps:$4 sm:$0xff]  }
  0x88   :  { %948 = vmatprep.subr.bf16.mxu0 %v2570_v23  ;;  %v2655_v23 = vld [vmem:[%s3658_s1 + $0x3f0] ss:$8 sps:$4 sm:$0xff]  }
  0x8b   :  { %949 = vmatpush1.bf16.msra.mxu0 %v2568_v25  ;;  %v2660_v25 = vld [vmem:[%s3660_s4] ss:$16 sps:$4 sm:$0xff]  }
  0x8c   :  { %950 = vmatprep.subr.bf16.mxu0 %v2573_v26  ;;  %1531 = vmatpush1.bf16.msra.mxu1 %v2660_v25  ;;  %v2661_v26 = vld [vmem:[%s3660_s4 + $0x24] ss:$16 sps:$4 sm:$0xff]  }
  0x8d   :  { %1532 = vmatprep.subr.bf16.mxu1 %v2661_v26 }
  0x8f   :  { %951 = vmatpush1.bf16.msra.mxu0 %v2571_v27  ;;  %v2663_v27 = vld [vmem:[%s3660_s4 + $0x20] ss:$16 sps:$4 sm:$0xff]  }
  0x90   :  { %952 = vmatprep.subr.bf16.mxu0 %v2576_v28  ;;  %1533 = vmatpush1.bf16.msra.mxu1 %v2663_v27  ;;  %v2664_v28 = vld [vmem:[%s3660_s4 + $0x44] ss:$16 sps:$4 sm:$0xff]  }
  0x91   :  { %1534 = vmatprep.subr.bf16.mxu1 %v2664_v28 }
  0x93   :  { %953 = vmatpush1.bf16.msra.mxu0 %v2574_v29  ;;  %v2666_v29 = vld [vmem:[%s3660_s4 + $0x40] ss:$16 sps:$4 sm:$0xff]  }
  0x94   :  { %954 = vmatprep.subr.bf16.mxu0 %v2579_v30  ;;  %1535 = vmatpush1.bf16.msra.mxu1 %v2666_v29  ;;  %v2667_v30 = vld [vmem:[%s3660_s4 + $0x64] ss:$16 sps:$4 sm:$0xff]  }
  0x95   :  { %1536 = vmatprep.subr.bf16.mxu1 %v2667_v30 }
  0x97   :  { %955 = vmatpush1.bf16.msra.mxu0 %v2577_v31  ;;  %v2669_v31 = vld [vmem:[%s3660_s4 + $0x60] ss:$16 sps:$4 sm:$0xff]  }
  0x98   :  { %956 = vmatprep.subr.bf16.mxu0 %v2582_v32  ;;  %1537 = vmatpush1.bf16.msra.mxu1 %v2669_v31  ;;  %v2670_v32 = vld [vmem:[%s3660_s4 + $0x84] ss:$16 sps:$4 sm:$0xff]  }
  0x99   :  { %1538 = vmatprep.subr.bf16.mxu1 %v2670_v32 }
  0x9b   :  { %957 = vmatpush1.bf16.msra.mxu0 %v2580_v33  ;;  %v2672_v33 = vld [vmem:[%s3660_s4 + $0x80] ss:$16 sps:$4 sm:$0xff]  }
  0x9c   :  { %958 = vmatprep.subr.bf16.mxu0 %v2585_v34  ;;  %1539 = vmatpush1.bf16.msra.mxu1 %v2672_v33  ;;  %v2673_v34 = vld [vmem:[%s3660_s4 + $0xa4] ss:$16 sps:$4 sm:$0xff]  }
  0x9d   :  { %1540 = vmatprep.subr.bf16.mxu1 %v2673_v34 }
  0x9f   :  { %959 = vmatpush1.bf16.msra.mxu0 %v2583_v35  ;;  %v2675_v35 = vld [vmem:[%s3660_s4 + $0xa0] ss:$16 sps:$4 sm:$0xff]  }
  0xa0   :  { %960 = vmatprep.subr.bf16.mxu0 %v2588_v36  ;;  %1541 = vmatpush1.bf16.msra.mxu1 %v2675_v35  ;;  %v2676_v36 = vld [vmem:[%s3660_s4 + $0xc4] ss:$16 sps:$4 sm:$0xff]  }
  0xa1   :  { %1542 = vmatprep.subr.bf16.mxu1 %v2676_v36 }
  0xa3   :  { %961 = vmatpush1.bf16.msra.mxu0 %v2586_v37  ;;  %v2678_v37 = vld [vmem:[%s3660_s4 + $0xc0] ss:$16 sps:$4 sm:$0xff]  }
  0xa4   :  { %962 = vmatprep.subr.bf16.mxu0 %v2591_v38  ;;  %1543 = vmatpush1.bf16.msra.mxu1 %v2678_v37  ;;  %v2679_v38 = vld [vmem:[%s3660_s4 + $0xe4] ss:$16 sps:$4 sm:$0xff]  }
  0xa5   :  { %1544 = vmatprep.subr.bf16.mxu1 %v2679_v38 }
  0xa7   :  { %963 = vmatpush1.bf16.msra.mxu0 %v2589_v39  ;;  %v2681_v39 = vld [vmem:[%s3660_s4 + $0xe0] ss:$16 sps:$4 sm:$0xff]  }
  0xa8   :  { %964 = vmatprep.subr.bf16.mxu0 %v2594_v40  ;;  %1545 = vmatpush1.bf16.msra.mxu1 %v2681_v39  ;;  %v2682_v40 = vld [vmem:[%s3660_s4 + $0x104] ss:$16 sps:$4 sm:$0xff]  }
  0xa9   :  { %1546 = vmatprep.subr.bf16.mxu1 %v2682_v40 }
  0xab   :  { %965 = vmatpush1.bf16.msra.mxu0 %v2592_v41  ;;  %v2684_v41 = vld [vmem:[%s3660_s4 + $0x100] ss:$16 sps:$4 sm:$0xff]  }
  0xac   :  { %966 = vmatprep.subr.bf16.mxu0 %v2597_v42  ;;  %1547 = vmatpush1.bf16.msra.mxu1 %v2684_v41  ;;  %v2685_v42 = vld [vmem:[%s3660_s4 + $0x124] ss:$16 sps:$4 sm:$0xff]  }
  0xad   :  { %1548 = vmatprep.subr.bf16.mxu1 %v2685_v42 }
  0xaf   :  { %967 = vmatpush1.bf16.msra.mxu0 %v2595_v43  ;;  %v2687_v43 = vld [vmem:[%s3660_s4 + $0x120] ss:$16 sps:$4 sm:$0xff]  }
  0xb0   :  { %968 = vmatprep.subr.bf16.mxu0 %v2600_v44  ;;  %1549 = vmatpush1.bf16.msra.mxu1 %v2687_v43  ;;  %v2688_v44 = vld [vmem:[%s3660_s4 + $0x144] ss:$16 sps:$4 sm:$0xff]   ;;  %v1026_v43 = vld [vmem:[%s3661_s2] sm:$0x3] }
  0xb1   :  { %1550 = vmatprep.subr.bf16.mxu1 %v2688_v44 }
  0xb3   :  { %969 = vmatpush1.bf16.msra.mxu0 %v2598_v45  ;;  %v2690_v45 = vld [vmem:[%s3660_s4 + $0x140] ss:$16 sps:$4 sm:$0xff]  }
  0xb4   :  { %970 = vmatprep.subr.bf16.mxu0 %v2603_v46  ;;  %1551 = vmatpush1.bf16.msra.mxu1 %v2690_v45  ;;  %v2691_v46 = vld [vmem:[%s3660_s4 + $0x164] ss:$16 sps:$4 sm:$0xff]   ;;  %v3385_v45 = vsub.s32 0, %v2880_v13 }
  0xb5   :  { %1552 = vmatprep.subr.bf16.mxu1 %v2691_v46  ;;  %v3388_v46 = vsub.s32 1, %v2880_v13 }
  0xb7   :  { %971 = vmatpush1.bf16.msra.mxu0 %v2601_v47  ;;  %v2693_v47 = vld [vmem:[%s3660_s4 + $0x160] ss:$16 sps:$4 sm:$0xff]  }
  0xb8   :  { %972 = vmatprep.subr.bf16.mxu0 %v2606_v48  ;;  %1553 = vmatpush1.bf16.msra.mxu1 %v2693_v47  ;;  %v2694_v48 = vld [vmem:[%s3660_s4 + $0x184] ss:$16 sps:$4 sm:$0xff]  }
  0xb9   :  { %1554 = vmatprep.subr.bf16.mxu1 %v2694_v48 }
  0xbb   :  { %973 = vmatpush1.bf16.msra.mxu0 %v2604_v49  ;;  %v2696_v49 = vld [vmem:[%s3660_s4 + $0x180] ss:$16 sps:$4 sm:$0xff]  }
  0xbc   :  { %974 = vmatprep.subr.bf16.mxu0 %v2609_v50  ;;  %1555 = vmatpush1.bf16.msra.mxu1 %v2696_v49  ;;  %v2697_v50 = vld [vmem:[%s3660_s4 + $0x1a4] ss:$16 sps:$4 sm:$0xff]  }
  0xbd   :  { %1556 = vmatprep.subr.bf16.mxu1 %v2697_v50 }
  0xbf   :  { %975 = vmatpush1.bf16.msra.mxu0 %v2607_v51  ;;  %v2699_v51 = vld [vmem:[%s3660_s4 + $0x1a0] ss:$16 sps:$4 sm:$0xff]  }
  0xc0   :  { %985 = vmatprep.subr.bf16.mxu0 %v2612_v52  ;;  %1557 = vmatpush1.bf16.msra.mxu1 %v2699_v51  ;;  %v2700_v52 = vld [vmem:[%s3660_s4 + $0x1c4] ss:$16 sps:$4 sm:$0xff]  }
  0xc1   :  { %1558 = vmatprep.subr.bf16.mxu1 %v2700_v52 }
  0xc2   :  { %977 = vmatmul.mubr.bf16.vlgmr.msra.gmra.mrb[0].mxu0 %v3179_v53  ;;  %v2702_v53 = vld [vmem:[%s3660_s4 + $0x1c0] ss:$16 sps:$4 sm:$0xff]  }
  0xc3   :  { %986 = vmatpush1.bf16.msra.mxu0 %v2610_v54  ;;  %1017 = vmatprep.mubr.bf16.mxu0 %v213_v55  ;;  %v2703_v54 = vld [vmem:[%s3660_s4 + $0x1e4] ss:$16 sps:$4 sm:$0xff]   ;;  %v2705_v55 = vld [vmem:[%s3660_s4 + $0x1e0] ss:$16 sps:$4 sm:$0xff]  }
  0xc4   :  { %987 = vmatprep.subr.bf16.mxu0 %v2615_v56  ;;  %1559 = vmatpush1.bf16.msra.mxu1 %v2702_v53  ;;  %v2708_v56 = vld [vmem:[%s3660_s4 + $0xc] ss:$16 sps:$4 sm:$0xff]  }
  0xc5   :  { %1560 = vmatprep.subr.bf16.mxu1 %v2703_v54 }
  0xc7   :  { %988 = vmatpush1.bf16.msra.mxu0 %v2613_v57 }
  0xc8   :  { %989 = vmatprep.subr.bf16.mxu0 %v2618_v58  ;;  %1561 = vmatpush1.bf16.msra.mxu1 %v2705_v55 }
  0xc9   :  { %1571 = vmatprep.subr.bf16.mxu1 %v2708_v56  ;;  %v1027_v56 = vld [vmem:[%s3662_s3] sm:$0x3] }
  0xcb   :  { %990 = vmatpush1.bf16.msra.mxu0 %v2616_v59 }
  0xcc   :  { %991 = vmatprep.subr.bf16.mxu0 %v2621_v60 }
  0xcf   :  { %992 = vmatpush1.bf16.msra.mxu0 %v2619_v61 }
  0xd0   :  { %993 = vmatprep.subr.bf16.mxu0 %v2624_v62 }
  0xd3   :  { %994 = vmatpush1.bf16.msra.mxu0 %v2622_v63 }
  0xd4   :  { %995 = vmatprep.subr.bf16.mxu0 %v2627_v0 }
  0xd7   :  { %996 = vmatpush1.bf16.msra.mxu0 %v2625_v1 }
  0xd8   :  { %997 = vmatprep.subr.bf16.mxu0 %v2630_v2 }
  0xdb   :  { %998 = vmatpush1.bf16.msra.mxu0 %v2628_v3 }
  0xdc   :  { %999 = vmatprep.subr.bf16.mxu0 %v2633_v4 }
  0xdf   :  { %1000 = vmatpush1.bf16.msra.mxu0 %v2631_v5 }
  0xe0   :  { %1001 = vmatprep.subr.bf16.mxu0 %v2636_v6 }
  0xe3   :  { %1002 = vmatpush1.bf16.msra.mxu0 %v2634_v7 }
  0xe4   :  { %1003 = vmatprep.subr.bf16.mxu0 %v2639_v8 }
  0xe7   :  { %1004 = vmatpush1.bf16.msra.mxu0 %v2637_v9 }
  0xe8   :  { %1005 = vmatprep.subr.bf16.mxu0 %v2642_v10 }
  0xeb   :  { %1006 = vmatpush1.bf16.msra.mxu0 %v2640_v11 }
  0xec   :  { %1007 = vmatprep.subr.bf16.mxu0 %v2645_v12 }
  0xef   :  { %1008 = vmatpush1.bf16.msra.mxu0 %v2643_v14 }
  0xf0   :  { %1009 = vmatprep.subr.bf16.mxu0 %v2648_v15 }
  0xf3   :  { %1010 = vmatpush1.bf16.msra.mxu0 %v2646_v17 }
  0xf4   :  { %1011 = vmatprep.subr.bf16.mxu0 %v2651_v18 }
  0xf7   :  { %1012 = vmatpush1.bf16.msra.mxu0 %v2649_v19 }
  0xf8   :  { %1013 = vmatprep.subr.bf16.mxu0 %v2654_v20 }
  0xfb   :  { %1014 = vmatpush1.bf16.msra.mxu0 %v2652_v21 }
  0xfc   :  { %1015 = vmatprep.subr.bf16.mxu0 %v2657_v22 }
  0xff   :  { %1016 = vmatpush1.bf16.msra.mxu0 %v2655_v23 }
 0x102   :  { %1018 = vmatmul.mubr.bf16.vlgmr.msra.gmra.mrb[0].mxu0 %v211_v24 }
 0x1d5   :  { %v1019_v57 = vpop.f32.mrb[0].mxu0 }
 0x1d6   :  { %v1029_v58 = vsel %vm1028_vm0, %v1019_v57, 0.0  ;;  %v1046_v59 = vmul.f32 %v1019_v57, %v1019_v57  ;;  %v1021_v60 = vpop.f32.mrb[1].mxu0 }
 0x1d7   :  { %v1030_v61 = vrot.slane %v1029_v58, 4  ;;  %v1036_v62 = vsel %vm1028_vm0, %v1021_v60, 0.0  ;;  %v1047_v63 = vmul.f32 %v1021_v60, %v1021_v60  ;;  %v1023_v0 = vpop.f32.mrb[2].mxu0 }
 0x1d8   :  { %v1048_v1 = vsel %vm1028_vm0, %v1046_v59, 0.0  ;;  %v1037_v2 = vrot.slane %v1036_v62, 4  ;;  %v1024_v3 = vpop.f32.mrb[3].mxu0 }
 0x1d9   :  { %v1031_v4 = vadd.f32 %v1030_v61, %v1029_v58  ;;  %v1049_v5 = vrot.slane %v1048_v1, 4  ;;  %v1055_v6 = vsel %vm1028_vm0, %v1047_v63, 0.0 }
 0x1da   :  { %v1038_v7 = vadd.f32 %v1037_v2, %v1036_v62  ;;  %v1056_v8 = vrot.slane %v1055_v6, 4 }
 0x1db   :  { %v1032_v9 = vrot.slane %v1031_v4, 2  ;;  %v1050_v10 = vadd.f32 %v1049_v5, %v1048_v1 }
 0x1dc   :  { %v1039_v11 = vrot.slane %v1038_v7, 2  ;;  %v1057_v12 = vadd.f32 %v1056_v8, %v1055_v6  ;;  %v2711_v6 = vld [vmem:[%s3660_s4 + $0x2c] ss:$16 sps:$4 sm:$0xff]  }
 0x1dd   :  { %v1033_v14 = vadd.f32 %v1032_v9, %v1031_v4  ;;  %v1051_v15 = vrot.slane %v1050_v10, 2  ;;  %v2706_v4 = vld [vmem:[%s3660_s4 + $0x8] ss:$16 sps:$4 sm:$0xff]   ;;  %v2714_v8 = vld [vmem:[%s3660_s4 + $0x4c] ss:$16 sps:$4 sm:$0xff]  }
 0x1de   :  { %v1040_v17 = vadd.f32 %v1039_v11, %v1038_v7  ;;  %v1058_v18 = vrot.slane %v1057_v12, 2  ;;  %v2709_v7 = vld [vmem:[%s3660_s4 + $0x28] ss:$16 sps:$4 sm:$0xff]  }
 0x1df   :  { %v1034_v19 = vrot.slane %v1033_v14, 1  ;;  %v1052_v20 = vadd.f32 %v1051_v15, %v1050_v10  ;;  %v2712_v9 = vld [vmem:[%s3660_s4 + $0x48] ss:$16 sps:$4 sm:$0xff]   ;;  %v2717_v10 = vld [vmem:[%s3660_s4 + $0x6c] ss:$16 sps:$4 sm:$0xff]  }
 0x1e0   :  { %v1041_v21 = vrot.slane %v1040_v17, 1  ;;  %v1059_v22 = vadd.f32 %v1058_v18, %v1057_v12  ;;  %v2715_v11 = vld [vmem:[%s3660_s4 + $0x68] ss:$16 sps:$4 sm:$0xff]   ;;  %v2720_v12 = vld [vmem:[%s3660_s4 + $0x8c] ss:$16 sps:$4 sm:$0xff]  }
 0x1e1   :  { %v1035_v23 = vadd.f32 %v1034_v19, %v1033_v14  ;;  %v1053_v24 = vrot.slane %v1052_v20, 1  ;;  %v2718_v14 = vld [vmem:[%s3660_s4 + $0x88] ss:$16 sps:$4 sm:$0xff]   ;;  %v2723_v15 = vld [vmem:[%s3660_s4 + $0xac] ss:$16 sps:$4 sm:$0xff]  }
 0x1e2   :  { %v1042_v25 = vadd.f32 %v1041_v21, %v1040_v17  ;;  %v1060_v26 = vrot.slane %v1059_v22, 1  ;;  %v2721_v17 = vld [vmem:[%s3660_s4 + $0xa8] ss:$16 sps:$4 sm:$0xff]   ;;  %v2726_v18 = vld [vmem:[%s3660_s4 + $0xcc] ss:$16 sps:$4 sm:$0xff]  }
 0x1e3   :  { %v1044_v27 = vmul.f32 0.5, %v1035_v23  ;;  %v1054_v28 = vadd.f32 %v1053_v24, %v1052_v20  ;;  %v2724_v19 = vld [vmem:[%s3660_s4 + $0xc8] ss:$16 sps:$4 sm:$0xff]   ;;  %v2729_v20 = vld [vmem:[%s3660_s4 + $0xec] ss:$16 sps:$4 sm:$0xff]  }
 0x1e4   :  { %v1045_v29 = vmul.f32 0.5, %v1042_v25  ;;  %v1061_v30 = vadd.f32 %v1060_v26, %v1059_v22  ;;  %v2727_v21 = vld [vmem:[%s3660_s4 + $0xe8] ss:$16 sps:$4 sm:$0xff]   ;;  %v2732_v22 = vld [vmem:[%s3660_s4 + $0x10c] ss:$16 sps:$4 sm:$0xff]  }
 0x1e5   :  { %v1062_v31 = vmul.f32 0.5, %v1054_v28  ;;  %v1064_v32 = vmul.f32 %v1044_v27, %v1044_v27  ;;  %v2730_v23 = vld [vmem:[%s3660_s4 + $0x108] ss:$16 sps:$4 sm:$0xff]   ;;  %v2735_v24 = vld [vmem:[%s3660_s4 + $0x12c] ss:$16 sps:$4 sm:$0xff]  }
 0x1e6   :  { %v1063_v33 = vmul.f32 0.5, %v1061_v30  ;;  %v1065_v34 = vmul.f32 %v1045_v29, %v1045_v29  ;;  %v2733_v25 = vld [vmem:[%s3660_s4 + $0x128] ss:$16 sps:$4 sm:$0xff]   ;;  %v2738_v26 = vld [vmem:[%s3660_s4 + $0x14c] ss:$16 sps:$4 sm:$0xff]  }
 0x1e7   :  { %v1066_v35 = vsub.f32 %v1062_v31, %v1064_v32  ;;  %v2741_v28 = vld [vmem:[%s3660_s4 + $0x16c] ss:$16 sps:$4 sm:$0xff]   ;;  %v2742_v31 = vld [vmem:[%s3660_s4 + $0x188] ss:$16 sps:$4 sm:$0xff]  }
 0x1e8   :  { %v1067_v36 = vsub.f32 %v1063_v33, %v1065_v34  ;;  %v2744_v30 = vld [vmem:[%s3660_s4 + $0x18c] ss:$16 sps:$4 sm:$0xff]   ;;  %v2745_v33 = vld [vmem:[%s3660_s4 + $0x1a8] ss:$16 sps:$4 sm:$0xff]  }
 0x1e9   :  { %v1068_v37 = vadd.f32 1e-05, %v1066_v35  ;;  %v2747_v32 = vld [vmem:[%s3660_s4 + $0x1ac] ss:$16 sps:$4 sm:$0xff]   ;;  %v2748_v35 = vld [vmem:[%s3660_s4 + $0x1c8] ss:$16 sps:$4 sm:$0xff]  }
 0x1ea   :  { %v1069_v38 = vadd.f32 1e-05, %v1067_v36  ;;  %v2750_v34 = vld [vmem:[%s3660_s4 + $0x1cc] ss:$16 sps:$4 sm:$0xff]  }
 0x1eb   :  { %2786 = vrsqrt.f32 %v1068_v37  ;;  %v2753_v36 = vld [vmem:[%s3660_s4 + $0x1ec] ss:$16 sps:$4 sm:$0xff]   ;;  %v2751_v37 = vld [vmem:[%s3660_s4 + $0x1e8] ss:$16 sps:$4 sm:$0xff]  }
 0x1ec   :  { %2788 = vrsqrt.f32 %v1069_v38  ;;  %v2754_v38 = vld [vmem:[%s3663_s7 + $0x40] sm:$0xff]  }
 0x1f5   :  { %v2787_v39 = vpop.eup %2786 }
 0x1f6   :  { %v2789_v40 = vpop.eup %2788 }
 0x1f7   :  { %v1074_v41 = vcombine.low %v2787_v39, %v2789_v40  ;;  %v2755_v39 = vld [vmem:[%s3663_s7] sm:$0xff]   ;;  %v2756_v40 = vld [vmem:[%s3663_s7 + $0x48] sm:$0xff]  }
 0x1f9   :  { %v1081_v42 = vrot.slane %v1074_v41, %v2889_v16  ;;  %v2757_v41 = vld [vmem:[%s3663_s7 + $0x8] sm:$0xff]  }
 0x1fb   :  { %v1088_v44 = vrot.slane %v1081_v42, %v2889_v16  ;;  %v2758_v42 = vld [vmem:[%s3663_s7 + $0x50] sm:$0xff]  }
 0x1fd   :  { %v1090_v47 = vmul.f32 %v1088_v44, %v1026_v43  ;;  %v2759_v43 = vld [vmem:[%s3663_s7 + $0x10] sm:$0xff]   ;;  %v2760_v44 = vld [vmem:[%s3663_s7 + $0x58] sm:$0xff]  }
 0x1ff   :  { %v1095_v48 = vrot.slane %v1090_v47, %v3385_v45  ;;  %v1099_v49 = vrot.slane %v1090_v47, %v3388_v46  ;;  %v2761_v47 = vld [vmem:[%s3663_s7 + $0x18] sm:$0xff]  }
 0x201   :  { %v1102_v50 = vmul.f32 %v1095_v48, %v1044_v27  ;;  %v1103_v51 = vmul.f32 %v1099_v49, %v1045_v29  ;;  %v1124_v52 = vmul.f32 %v1099_v49, %v1021_v60  ;;  %v1123_v53 = vmul.f32 %v1095_v48, %v1019_v57  ;;  %v2736_v27 = vld [vmem:[%s3660_s4 + $0x148] ss:$16 sps:$4 sm:$0xff]   ;;  %v2762_v48 = vld [vmem:[%s3663_s7 + $0x60] sm:$0xff]  }
 0x202   :  { %v2739_v29 = vld [vmem:[%s3660_s4 + $0x168] ss:$16 sps:$4 sm:$0xff]   ;;  %v2763_v49 = vld [vmem:[%s3663_s7 + $0x20] sm:$0xff]  }
 0x203   :  { %v1106_v54 = vcombine.low %v1102_v50, %v1103_v51  ;;  %v2764_v50 = vld [vmem:[%s3663_s7 + $0x68] sm:$0xff]  }
 0x204   :  { %v2765_v51 = vld [vmem:[%s3663_s7 + $0x28] sm:$0xff]  }
 0x205   :  { %v1113_v55 = vrot.slane %v1106_v54, %v2889_v16  ;;  %v2768_v54 = vld [vmem:[%s3663_s7 + $0x78] sm:$0xff]  }
 0x207   :  { %v1120_v58 = vrot.slane %v1113_v55, %v2889_v16  ;;  %v2769_v55 = vld [vmem:[%s3663_s7 + $0x38] sm:$0xff]  }
 0x209   :  { %v1122_v59 = vsub.f32 %v1027_v56, %v1120_v58 }
 0x20b   :  { %v1133_v61 = vrot.slane %v1122_v59, %v3388_v46  ;;  %v1129_v62 = vrot.slane %v1122_v59, %v3385_v45 }
 0x20d   :  { %v1137_v63 = vadd.f32 %v1133_v61, %v1124_v52  ;;  %v1136_v0 = vadd.f32 %v1129_v62, %v1123_v53  ;;  %v2766_v52 = vld [vmem:[%s3663_s7 + $0x70] sm:$0xff]  }
 0x20e   :  { %v2767_v53 = vld [vmem:[%s3663_s7 + $0x30] sm:$0xff]  }
 0x20f   :  { %vm1139_vm1 = vcmp.gt.f32.partialorder %v1137_v63, 0.0  ;;  %v1141_v1 = vmul.f32 0.2, %v1137_v63  ;;  %vm1138_vm2 = vcmp.gt.f32.partialorder %v1136_v0, 0.0  ;;  %v1140_v57 = vmul.f32 0.2, %v1136_v0 }
 0x211   :  { %v1143_v60 = vsel %vm1139_vm1, %v1137_v63, %v1141_v1  ;;  %v1142_v2 = vsel %vm1138_vm2, %v1136_v0, %v1140_v57  ;;  %v2770_v57 = vld [vmem:[%s3663_s7 + $0xc0] sm:$0xff]  }
 0x212   :  { %v1145_v3 = vpack.c.bf16 %v1143_v60, %v1143_v60  ;;  %v3402_v5 = vpack.c.bf16 %v1142_v2, %v1142_v2 }
 0x214   :  { %1562 = vmatprep.mubr.bf16.mxu1 %v1145_v3 }
 0x215   :  { %1563 = vmatmul.mubr.bf16.vlgmr.msra.gmra.mrb[0].mxu1 %v3402_v5 }
 0x216   :  { %1572 = vmatpush1.bf16.msra.mxu1 %v2706_v4  ;;  %1603 = vmatprep.mubr.bf16.mxu1 %v1145_v3 }
 0x217   :  { %1573 = vmatprep.subr.bf16.mxu1 %v2711_v6 }
 0x21a   :  { %1574 = vmatpush1.bf16.msra.mxu1 %v2709_v7 }
 0x21b   :  { %1575 = vmatprep.subr.bf16.mxu1 %v2714_v8 }
 0x21e   :  { %1576 = vmatpush1.bf16.msra.mxu1 %v2712_v9 }
 0x21f   :  { %1577 = vmatprep.subr.bf16.mxu1 %v2717_v10 }
 0x222   :  { %1578 = vmatpush1.bf16.msra.mxu1 %v2715_v11 }
 0x223   :  { %1579 = vmatprep.subr.bf16.mxu1 %v2720_v12 }
 0x226   :  { %1580 = vmatpush1.bf16.msra.mxu1 %v2718_v14 }
 0x227   :  { %1581 = vmatprep.subr.bf16.mxu1 %v2723_v15 }
 0x22a   :  { %1582 = vmatpush1.bf16.msra.mxu1 %v2721_v17 }
 0x22b   :  { %1583 = vmatprep.subr.bf16.mxu1 %v2726_v18 }
 0x22e   :  { %1584 = vmatpush1.bf16.msra.mxu1 %v2724_v19 }
 0x22f   :  { %1585 = vmatprep.subr.bf16.mxu1 %v2729_v20 }
 0x232   :  { %1586 = vmatpush1.bf16.msra.mxu1 %v2727_v21 }
 0x233   :  { %1587 = vmatprep.subr.bf16.mxu1 %v2732_v22 }
 0x236   :  { %1588 = vmatpush1.bf16.msra.mxu1 %v2730_v23 }
 0x237   :  { %1589 = vmatprep.subr.bf16.mxu1 %v2735_v24 }
 0x23a   :  { %1590 = vmatpush1.bf16.msra.mxu1 %v2733_v25 }
 0x23b   :  { %1591 = vmatprep.subr.bf16.mxu1 %v2738_v26 }
 0x23e   :  { %1592 = vmatpush1.bf16.msra.mxu1 %v2736_v27 }
 0x23f   :  { %1593 = vmatprep.subr.bf16.mxu1 %v2741_v28 }
 0x242   :  { %1594 = vmatpush1.bf16.msra.mxu1 %v2739_v29 }
 0x243   :  { %1595 = vmatprep.subr.bf16.mxu1 %v2744_v30 }
 0x246   :  { %1596 = vmatpush1.bf16.msra.mxu1 %v2742_v31 }
 0x247   :  { %1597 = vmatprep.subr.bf16.mxu1 %v2747_v32 }
 0x24a   :  { %1598 = vmatpush1.bf16.msra.mxu1 %v2745_v33 }
 0x24b   :  { %1599 = vmatprep.subr.bf16.mxu1 %v2750_v34 }
 0x24e   :  { %1600 = vmatpush1.bf16.msra.mxu1 %v2748_v35 }
 0x24f   :  { %1601 = vmatprep.subr.bf16.mxu1 %v2753_v36 }
 0x252   :  { %1602 = vmatpush1.bf16.msra.mxu1 %v2751_v37 }
 0x253   :  { %2408 = vmatprep.subr.bf16.mxu1 %v2754_v38 }
 0x255   :  { %1604 = vmatmul.mubr.bf16.vlgmr.msra.gmra.mrb[4].mxu1 %v3402_v5 }
 0x256   :  { %2409 = vmatpush3.bf16.msra.mxu1 %v2755_v39 }
 0x257   :  { %2410 = vmatprep.subr.bf16.mxu1 %v2756_v40 }
 0x25a   :  { %2411 = vmatpush3.bf16.msra.mxu1 %v2757_v41 }
 0x25b   :  { %2412 = vmatprep.subr.bf16.mxu1 %v2758_v42 }
 0x25e   :  { %2413 = vmatpush3.bf16.msra.mxu1 %v2759_v43 }
 0x25f   :  { %2414 = vmatprep.subr.bf16.mxu1 %v2760_v44 }
 0x262   :  { %2415 = vmatpush3.bf16.msra.mxu1 %v2761_v47 }
 0x263   :  { %2416 = vmatprep.subr.bf16.mxu1 %v2762_v48 }
 0x266   :  { %2417 = vmatpush3.bf16.msra.mxu1 %v2763_v49 }
 0x267   :  { %2418 = vmatprep.subr.bf16.mxu1 %v2764_v50 }
 0x26a   :  { %2419 = vmatpush3.bf16.msra.mxu1 %v2765_v51 }
 0x26b   :  { %2420 = vmatprep.subr.bf16.mxu1 %v2766_v52 }
 0x26e   :  { %2421 = vmatpush3.bf16.msra.mxu1 %v2767_v53 }
 0x26f   :  { %2422 = vmatprep.subr.bf16.mxu1 %v2768_v54 }
 0x272   :  { %2423 = vmatpush3.bf16.msra.mxu1 %v2769_v55 }
 0x273   :  { %2430 = vmatprep.subr.bf16.mxu1 %v2770_v57 }
 0x2e8   :  { %v3544_v56 = vpop.f32.mrb[0].mxu1 }
 0x2e9   :  { %v1614_v58 = vsel %vm1028_vm0, %v3544_v56, 0.0  ;;  %v1646_v59 = vmul.f32 %v3544_v56, %v3544_v56  ;;  %v3550_v61 = vpop.f32.mrb[1].mxu1 }
 0x2ea   :  { %v1615_v62 = vrot.slane %v1614_v58, 4  ;;  %v1621_v63 = vsel %vm1028_vm0, %v3550_v61, 0.0  ;;  %v1647_v0 = vmul.f32 %v3550_v61, %v3550_v61  ;;  %v1568_v1 = vpop.f32.mrb[2].mxu1 }
 0x2eb   :  { %v1650_v60 = vsel %vm1028_vm0, %v1646_v59, 0.0  ;;  %v1622_v2 = vrot.slane %v1621_v63, 4  ;;  %v1569_v3 = vpop.f32.mrb[3].mxu1 }
 0x2ec   :  { %v1616_v4 = vadd.f32 %v1615_v62, %v1614_v58  ;;  %v1651_v5 = vrot.slane %v1650_v60, 4  ;;  %v1657_v6 = vsel %vm1028_vm0, %v1647_v0, 0.0 }
 0x2ed   :  { %v1623_v7 = vadd.f32 %v1622_v2, %v1621_v63  ;;  %v1658_v8 = vrot.slane %v1657_v6, 4 }
 0x2ee   :  { %v1617_v9 = vrot.slane %v1616_v4, 2  ;;  %v1652_v10 = vadd.f32 %v1651_v5, %v1650_v60 }
 0x2ef   :  { %v1624_v11 = vrot.slane %v1623_v7, 2  ;;  %v1659_v12 = vadd.f32 %v1658_v8, %v1657_v6 }
 0x2f0   :  { %v1618_v14 = vadd.f32 %v1617_v9, %v1616_v4  ;;  %v1653_v15 = vrot.slane %v1652_v10, 2 }
 0x2f1   :  { %v1625_v17 = vadd.f32 %v1624_v11, %v1623_v7  ;;  %v1660_v18 = vrot.slane %v1659_v12, 2 }
 0x2f2   :  { %v1619_v19 = vrot.slane %v1618_v14, 1  ;;  %v1654_v20 = vadd.f32 %v1653_v15, %v1652_v10 }
 0x2f3   :  { %v1626_v21 = vrot.slane %v1625_v17, 1  ;;  %v1661_v22 = vadd.f32 %v1660_v18, %v1659_v12 }
 0x2f4   :  { %v1620_v23 = vadd.f32 %v1619_v19, %v1618_v14  ;;  %v1655_v24 = vrot.slane %v1654_v20, 1 }
 0x2f5   :  { %v1627_v25 = vadd.f32 %v1626_v21, %v1625_v17  ;;  %v1662_v26 = vrot.slane %v1661_v22, 1 }
 0x2f6   :  { %v3561_v27 = vmul.f32 0.5, %v1620_v23  ;;  %v1656_v28 = vadd.f32 %v1655_v24, %v1654_v20 }
 0x2f7   :  { %v3563_v29 = vmul.f32 0.5, %v1627_v25  ;;  %v1663_v30 = vadd.f32 %v1662_v26, %v1661_v22 }
 0x2f8   :  { %v1678_v31 = vmul.f32 0.5, %v1656_v28  ;;  %v1682_v32 = vmul.f32 %v3561_v27, %v3561_v27 }
 0x2f9   :  { %v1679_v33 = vmul.f32 0.5, %v1663_v30  ;;  %v1683_v34 = vmul.f32 %v3563_v29, %v3563_v29 }
 0x2fa   :  { %v1686_v35 = vsub.f32 %v1678_v31, %v1682_v32 }
 0x2fb   :  { %v1687_v36 = vsub.f32 %v1679_v33, %v1683_v34 }
 0x2fc   :  { %v1690_v37 = vadd.f32 1e-05, %v1686_v35 }
 0x2fd   :  { %v1691_v38 = vadd.f32 1e-05, %v1687_v36  ;;  %v1612_v36 = vld [vmem:[%s3664_s5] sm:$0xf] }
 0x2fe   :  { %2790 = vrsqrt.f32 %v1690_v37 }
 0x2ff   :  { %2792 = vrsqrt.f32 %v1691_v38  ;;  %v1739_v38 = vsub.s32 2, %v2880_v13 }
 0x308   :  { %v2791_v39 = vpop.eup %2790 }
 0x309   :  { %v2793_v40 = vpop.eup %2792 }
 0x30a   :  { %v1702_v41 = vcombine.low %v2791_v39, %v2793_v40  ;;  %v1743_v39 = vsub.s32 3, %v2880_v13 }
 0x30c   :  { %v1710_v33 = vrot.slane %v1702_v41, %v2889_v16 }
 0x328   :  { %v3569_v42 = vpop.f32.mrb[4].mxu1 }
 0x329   :  { %v1628_v43 = vsel %vm1028_vm0, %v3569_v42, 0.0  ;;  %v1648_v44 = vmul.f32 %v3569_v42, %v3569_v42  ;;  %v3575_v47 = vpop.f32.mrb[5].mxu1 }
 0x32a   :  { %v1629_v48 = vrot.slane %v1628_v43, 4  ;;  %v1635_v49 = vsel %vm1028_vm0, %v3575_v47, 0.0  ;;  %v1649_v50 = vmul.f32 %v3575_v47, %v3575_v47  ;;  %v1609_v51 = vpop.f32.mrb[6].mxu1 }
 0x32b   :  { %v1664_v52 = vsel %vm1028_vm0, %v1648_v44, 0.0  ;;  %v1636_v53 = vrot.slane %v1635_v49, 4  ;;  %v1610_v54 = vpop.f32.mrb[7].mxu1 }
 0x32c   :  { %v1630_v55 = vadd.f32 %v1629_v48, %v1628_v43  ;;  %v1665_v58 = vrot.slane %v1664_v52, 4  ;;  %v1671_v59 = vsel %vm1028_vm0, %v1649_v50, 0.0 }
 0x32d   :  { %v1637_v62 = vadd.f32 %v1636_v53, %v1635_v49  ;;  %v1672_v63 = vrot.slane %v1671_v59, 4 }
 0x32e   :  { %v1631_v0 = vrot.slane %v1630_v55, 2  ;;  %v1666_v1 = vadd.f32 %v1665_v58, %v1664_v52 }
 0x32f   :  { %v1638_v57 = vrot.slane %v1637_v62, 2  ;;  %v1673_v60 = vadd.f32 %v1672_v63, %v1671_v59 }
 0x330   :  { %v1632_v2 = vadd.f32 %v1631_v0, %v1630_v55  ;;  %v1667_v3 = vrot.slane %v1666_v1, 2 }
 0x331   :  { %v1639_v4 = vadd.f32 %v1638_v57, %v1637_v62  ;;  %v1674_v5 = vrot.slane %v1673_v60, 2 }
 0x332   :  { %v1633_v6 = vrot.slane %v1632_v2, 1  ;;  %v1668_v7 = vadd.f32 %v1667_v3, %v1666_v1 }
 0x333   :  { %v1640_v8 = vrot.slane %v1639_v4, 1  ;;  %v1675_v9 = vadd.f32 %v1674_v5, %v1673_v60 }
 0x334   :  { %v1634_v10 = vadd.f32 %v1633_v6, %v1632_v2  ;;  %v1669_v11 = vrot.slane %v1668_v7, 1 }
 0x335   :  { %v1641_v12 = vadd.f32 %v1640_v8, %v1639_v4  ;;  %v1676_v14 = vrot.slane %v1675_v9, 1 }
 0x336   :  { %v1644_v15 = vmul.f32 0.5, %v1634_v10  ;;  %v1670_v17 = vadd.f32 %v1669_v11, %v1668_v7  ;;  %v2772_v10 = vld [vmem:[%s3663_s7 + $0xc8] sm:$0xff]  }
 0x337   :  { %v1645_v18 = vmul.f32 0.5, %v1641_v12  ;;  %v1677_v19 = vadd.f32 %v1676_v14, %v1675_v9  ;;  %v2773_v12 = vld [vmem:[%s3663_s7 + $0x88] sm:$0xff]   ;;  %v2774_v14 = vld [vmem:[%s3663_s7 + $0xd0] sm:$0xff]  }
 0x338   :  { %v1680_v20 = vmul.f32 0.5, %v1670_v17  ;;  %v1684_v21 = vmul.f32 %v1644_v15, %v1644_v15  ;;  %v2776_v17 = vld [vmem:[%s3663_s7 + $0xd8] sm:$0xff]  }
 0x339   :  { %v1681_v22 = vmul.f32 0.5, %v1677_v19  ;;  %v1685_v23 = vmul.f32 %v1645_v18, %v1645_v18  ;;  %v2778_v19 = vld [vmem:[%s3663_s7 + $0xe0] sm:$0xff]  }
 0x33a   :  { %v1688_v24 = vsub.f32 %v1680_v20, %v1684_v21  ;;  %v2779_v20 = vld [vmem:[%s3663_s7 + $0xa0] sm:$0xff]   ;;  %v2780_v21 = vld [vmem:[%s3663_s7 + $0xe8] sm:$0xff]  }
 0x33b   :  { %v1689_v25 = vsub.f32 %v1681_v22, %v1685_v23  ;;  %v2781_v22 = vld [vmem:[%s3663_s7 + $0xa8] sm:$0xff]   ;;  %v2782_v23 = vld [vmem:[%s3663_s7 + $0xf0] sm:$0xff]  }
 0x33c   :  { %v1692_v26 = vadd.f32 1e-05, %v1688_v24  ;;  %v2783_v24 = vld [vmem:[%s3663_s7 + $0xb0] sm:$0xff]  }
 0x33d   :  { %v1693_v28 = vadd.f32 1e-05, %v1689_v25  ;;  %v2784_v25 = vld [vmem:[%s3663_s7 + $0xf8] sm:$0xff]  }
 0x33e   :  { %2794 = vrsqrt.f32 %v1692_v26 }
 0x33f   :  { %2796 = vrsqrt.f32 %v1693_v28  ;;  %v2785_v28 = vld [vmem:[%s3663_s7 + $0xb8] sm:$0xff]  }
 0x348   :  { %v2795_v30 = vpop.eup %2794 }
 0x349   :  { %v2797_v31 = vpop.eup %2796 }
 0x34a   :  { %v1703_v32 = vcombine.low %v2795_v30, %v2797_v31 }
 0x34c   :  { %v1717_v34 = vrot.slane %v1703_v32, %v2889_v16  ;;  %v14_v32 = vstv %s3666_s8 }
 0x34d   :  { %15 = vst [vmem:[#allocation2] sm:$0x1] %v14_v32 }
 0x34e   :  { %v1718_v35 = vcombine.low %v1710_v33, %v1717_v34 }
 0x350   :  { %v1725_v37 = vrot.slane %v1718_v35, %v2889_v16 }
 0x352   :  { %v1727_v40 = vmul.f32 %v1725_v37, %v1612_v36 }
 0x354   :  { %v1732_v43 = vrot.slane %v1727_v40, %v3385_v45  ;;  %v1736_v44 = vrot.slane %v1727_v40, %v3388_v46  ;;  %v1740_v48 = vrot.slane %v1727_v40, %v1739_v38  ;;  %v1744_v41 = vrot.slane %v1727_v40, %v1743_v39 }
 0x356   :  { %v1749_v49 = vmul.f32 %v1732_v43, %v3561_v27  ;;  %v1750_v50 = vmul.f32 %v1736_v44, %v3563_v29  ;;  %v1751_v51 = vmul.f32 %v1740_v48, %v1644_v15  ;;  %v1752_v52 = vmul.f32 %v1744_v41, %v1645_v18  ;;  %v1613_v27 = vld [vmem:[%s3665_s6] sm:$0xf]  ;;  %v2775_v15 = vld [vmem:[%s3663_s7 + $0x90] sm:$0xff]   ;;  %v2777_v18 = vld [vmem:[%s3663_s7 + $0x98] sm:$0xff]  }
 0x357   :  { %v1786_v53 = vmul.f32 %v1744_v41, %v3575_v47  ;;  %v1784_v54 = vmul.f32 %v1736_v44, %v3550_v61  ;;  %v1783_v55 = vmul.f32 %v1732_v43, %v3544_v56  ;;  %v1785_v13 = vmul.f32 %v1740_v48, %v3569_v42 }
 0x358   :  { %v1757_v58 = vcombine.low %v1749_v49, %v1750_v50  ;;  %v1758_v59 = vcombine.low %v1751_v51, %v1752_v52 }
 0x35a   :  { %v1765_v62 = vrot.slane %v1757_v58, %v2889_v16  ;;  %v1772_v63 = vrot.slane %v1758_v59, %v2889_v16 }
 0x35c   :  { %v1773_v0 = vcombine.low %v1765_v62, %v1772_v63 }
 0x35e   :  { %v1780_v29 = vrot.slane %v1773_v0, %v2889_v16 }
 0x360   :  { %v1782_v47 = vsub.f32 %v1613_v27, %v1780_v29 }
 0x362   :  { %v1803_v1 = vrot.slane %v1782_v47, %v1743_v39  ;;  %v1795_v61 = vrot.slane %v1782_v47, %v3388_v46  ;;  %v1791_v56 = vrot.slane %v1782_v47, %v3385_v45  ;;  %v1799_v42 = vrot.slane %v1782_v47, %v1739_v38  ;;  %v2771_v46 = vld [vmem:[%s3663_s7 + $0x80] sm:$0xff]  }
 0x363   :  { %v2375_v38 = vld [vmem:[#allocation2] ss:$0 sm:$0xff] }
 0x364   :  { %v1811_v57 = vadd.f32 %v1803_v1, %v1786_v53  ;;  %v1809_v60 = vadd.f32 %v1795_v61, %v1784_v54  ;;  %v1808_v2 = vadd.f32 %v1791_v56, %v1783_v55  ;;  %v1810_v3 = vadd.f32 %v1799_v42, %v1785_v13 }
 0x366   :  { %vm1813_vm3 = vcmp.gt.f32.partialorder %v1809_v60, 0.0  ;;  %v1817_v4 = vmul.f32 0.2, %v1809_v60  ;;  %vm1812_vm4 = vcmp.gt.f32.partialorder %v1808_v2, 0.0  ;;  %v1816_v5 = vmul.f32 0.2, %v1808_v2 }
 0x367   :  { %vm1815_vm5 = vcmp.gt.f32.partialorder %v1811_v57, 0.0  ;;  %v1819_v6 = vmul.f32 0.2, %v1811_v57  ;;  %v1818_v26 = vmul.f32 0.2, %v1810_v3  ;;  %vm1814_vm6 = vcmp.gt.f32.partialorder %v1810_v3, 0.0 }
 0x368   :  { %v1821_v7 = vsel %vm1813_vm3, %v1809_v60, %v1817_v4  ;;  %v1820_v8 = vsel %vm1812_vm4, %v1808_v2, %v1816_v5 }
 0x369   :  { %v1825_v16 = vpack.c.bf16 %v1821_v7, %v1821_v7  ;;  %v1824_v9 = vpack.c.bf16 %v1820_v8, %v1820_v8  ;;  %v1823_v45 = vsel %vm1815_vm5, %v1811_v57, %v1819_v6  ;;  %v1822_v30 = vsel %vm1814_vm6, %v1810_v3, %v1818_v26 }
 0x36a   :  { %v1827_v11 = vpack.c.bf16 %v1823_v45, %v1823_v45  ;;  %v1826_v31 = vpack.c.bf16 %v1822_v30, %v1822_v30 }
 0x36b   :  { %2123 = vmatprep.mubr.bf16.mxu1 %v1825_v16 }
 0x36c   :  { %2124 = vmatmul.mubr.bf16.vlgmr.msra.gmra.mrb[8].mxu1 %v1824_v9 }
 0x36d   :  { %2431 = vmatpush3.bf16.msra.mxu1 %v2771_v46  ;;  %2163 = vmatprep.mubr.bf16.mxu1 %v1827_v11 }
 0x36e   :  { %2432 = vmatprep.subr.bf16.mxu1 %v2772_v10 }
 0x371   :  { %2433 = vmatpush3.bf16.msra.mxu1 %v2773_v12 }
 0x372   :  { %2434 = vmatprep.subr.bf16.mxu1 %v2774_v14 }
 0x375   :  { %2435 = vmatpush3.bf16.msra.mxu1 %v2775_v15 }
 0x376   :  { %2436 = vmatprep.subr.bf16.mxu1 %v2776_v17 }
 0x379   :  { %2437 = vmatpush3.bf16.msra.mxu1 %v2777_v18 }
 0x37a   :  { %2438 = vmatprep.subr.bf16.mxu1 %v2778_v19 }
 0x37d   :  { %2439 = vmatpush3.bf16.msra.mxu1 %v2779_v20 }
 0x37e   :  { %2440 = vmatprep.subr.bf16.mxu1 %v2780_v21 }
 0x381   :  { %2441 = vmatpush3.bf16.msra.mxu1 %v2781_v22 }
 0x382   :  { %2442 = vmatprep.subr.bf16.mxu1 %v2782_v23 }
 0x385   :  { %2443 = vmatpush3.bf16.msra.mxu1 %v2783_v24 }
 0x386   :  { %2444 = vmatprep.subr.bf16.mxu1 %v2784_v25 }
 0x389   :  { %2445 = vmatpush3.bf16.msra.mxu1 %v2785_v28 }
 0x38c   :  { %2164 = vmatmul.mubr.bf16.vlgmr.msra.gmra.mrb[12].mxu1 %v1826_v31 }
 0x43f   :  { %v2424_v33 = vpop.f32.mrb[8].mxu1 }
 0x440   :  { %v2425_v34 = vpop.f32.mrb[9].mxu1 }
 0x441   :  { %v2426_v35 = vadd.f32 %v2425_v34, %v2424_v33  ;;  %v2427_v36 = vpop.f32.mrb[10].mxu1 }
 0x442   :  { %v2428_v37 = vpop.f32.mrb[11].mxu1 }
 0x443   :  { %v2126_v43 = vadd.f32 %v2426_v35, %v2375_v38 }
 0x45f   :  { %v2446_v39 = vpop.f32.mrb[12].mxu1 }
 0x460   :  { %v2447_v40 = vpop.f32.mrb[13].mxu1 }
 0x461   :  { %v2448_v44 = vadd.f32 %v2447_v40, %v2446_v39  ;;  %v2449_v48 = vpop.f32.mrb[14].mxu1 }
 0x462   :  { %v2450_v41 = vpop.f32.mrb[15].mxu1 }
 0x463   :  { %v2166_v49 = vadd.f32 %v2448_v44, %v2126_v43 }
 0x465   :  { %v2171_v50 = vsub.f32 0.0, %v2166_v49 }
 0x467   :  { %v2172_v51 = vmul.f32 1.442695, %v2171_v50 }
 0x469   :  { %2798 = vpow2.f32 %v2172_v51 }
 0x473   :  { %v2799_v52 = vpop.eup %2798 }
 0x474   :  { %v2174_v53 = vadd.f32 1.0, %v2799_v52 }
 0x476   :  { %2800 = vrcp.f32 %v2174_v53 }
 0x480   :  { %v2801_v54 = vpop.eup %2800 }
 0x481   :  { %2178 = vst.msk [vmem:[%s3667_s9] sm:$0x3] %vm2177_vm7, %v2801_v54 }

</bundles_post_ra>
